<compile_context>
chip_gen: v7x
topology: tpu7x:2x2x1
jax: 0.10.0
libtpu: 0.0.40
codegen_flags: <defaults>
</compile_context>

<pallas_src>
import numpy as np
import jax
import jax.numpy as jnp
from jax.experimental import pallas as pl
from jax.experimental.pallas import tpu as pltpu

BN_EPS = 1e-5
NEG = -1e30          # "never wins a max" marker for invalid row slots
R = 24               # row slots per image (input height), fixed for all stages

# static geometry for 3x24x24 inputs
C0, W0 = 3, 24       # input
C1, W1 = 28, 22      # conv1 output
C2, W2 = 48, 9       # conv2 output
C3, W3 = 64, 3       # conv3 output
L0, L1, L2, L3 = W0 * C0, W1 * C1, W2 * C2, W3 * C3   # 72, 616, 432, 192


def _vmem():
    return pl.BlockSpec(memory_space=pltpu.MemorySpace.VMEM)


def _smem():
    return pl.BlockSpec(memory_space=pltpu.MemorySpace.SMEM)


# ------------------------------ fused kernel ------------------------------- #

def _rnet_kernel(x0_ref, w1_ref, w2_ref, w3_ref,
                 s1_ref, s1t_ref, s2_ref, s2t_ref, s3_ref, s3t_ref,
                 g1_ref, be1_ref, g2_ref, be2_ref, g3_ref, be3_ref,
                 vm_ref, gath_ref, wmlp_ref, bmlp_ref, whead_ref, bhead_ref,
                 alpha_ref,
                 out_ref,
                 f1_ref, p1_ref, f2_ref, p2_ref):
    f32 = jnp.float32
    NR = x0_ref.shape[0]
    N = NR // R

    def conv_bn_prelu(src_ref, w_ref, s_ref, st_ref, gamma_ref, beta_ref,
                      vmask, alpha, kh, row_step, count, fill):
        head = NR - (kh - 1) * row_step
        # conv = kh shifted MXU matmuls against the lane-Toeplitz weights
        z = None
        for i in range(kh):
            lhs = src_ref[i * row_step:i * row_step + head, :].astype(jnp.bfloat16)
            t = jnp.dot(lhs, w_ref[i], preferred_element_type=f32)
            z = t if z is None else z + t
        # BatchNorm2d, training mode: per-channel batch stats over valid rows
        # only (single pass: sum and sum of squares), folded into scale/shift.
        vm = vmask[:head]
        zm = jnp.where(vm > 0, z, 0.0)
        row_sum = jnp.sum(zm, axis=0, keepdims=True)            # (1, lanes)
        row_sq = jnp.sum(zm * zm, axis=0, keepdims=True)
        mean = jnp.dot(row_sum, s_ref[...], preferred_element_type=f32) / count
        ex2 = jnp.dot(row_sq, s_ref[...], preferred_element_type=f32) / count
        var = jnp.maximum(ex2 - mean * mean, 0.0)
        scale_c = gamma_ref[...] * jax.lax.rsqrt(var + BN_EPS)   # (1, C)
        shift_c = beta_ref[...] - mean * scale_c
        scale_l = jnp.dot(scale_c, st_ref[...], preferred_element_type=f32)
        shift_l = jnp.dot(shift_c, st_ref[...], preferred_element_type=f32)
        y = z * scale_l + shift_l
        y = jnp.where(y > 0, y, alpha * y)                       # PReLU (scalar)
        # invalid row slots must never leak into later max-pools / matmuls
        return jnp.where(vm > 0, y, fill), head

    def store_with_tail(dst_ref, y_head, head, lanes):
        dst_ref[0:head, :] = y_head
        dst_ref[head:NR, :] = jnp.full((NR - head, lanes), NEG, f32)

    def maxpool(src_ref, dst_ref, row_deltas, lane_deltas, lanes):
        # separable 3x3 window max; edge handling = "shift does not contribute"
        dst_ref[...] = src_ref[...]
        for d in row_deltas:
            if d > 0:
                dst_ref[0:NR - d, :] = jnp.maximum(dst_ref[0:NR - d, :],
                                                   src_ref[d:NR, :])
            else:
                dst_ref[-d:NR, :] = jnp.maximum(dst_ref[-d:NR, :],
                                                src_ref[0:NR + d, :])
        q = dst_ref[...]          # snapshot of the row-pooled map
        for d in lane_deltas:
            if d > 0:
                dst_ref[:, 0:lanes - d] = jnp.maximum(dst_ref[:, 0:lanes - d],
                                                      q[:, d:lanes])
            else:
                dst_ref[:, -d:lanes] = jnp.maximum(dst_ref[:, -d:lanes],
                                                   q[:, 0:lanes + d])

    a0, a1, a2, a3 = alpha_ref[0], alpha_ref[1], alpha_ref[2], alpha_ref[3]

    # ---- conv1(3x3,3->28)+BN+PReLU, MaxPool(3,2,pad=1) --------------------- #
    y1, h1 = conv_bn_prelu(x0_ref, w1_ref, s1_ref, s1t_ref, g1_ref, be1_ref,
                           vm_ref[0], a0, kh=3, row_step=1,
                           count=float(N * 22 * 22), fill=NEG)
    store_with_tail(f1_ref, y1, h1, L1)
    maxpool(f1_ref, p1_ref, row_deltas=(1, -1), lane_deltas=(C1, -C1), lanes=L1)

    # ---- conv2(3x3,28->48)+BN+PReLU, MaxPool(3,2) -------------------------- #
    y2, h2 = conv_bn_prelu(p1_ref, w2_ref, s2_ref, s2t_ref, g2_ref, be2_ref,
                           vm_ref[1], a1, kh=3, row_step=2,
                           count=float(N * 9 * 9), fill=NEG)
    store_with_tail(f2_ref, y2, h2, L2)
    maxpool(f2_ref, p2_ref, row_deltas=(2, 4), lane_deltas=(C2, 2 * C2), lanes=L2)

    # ---- conv3(2x2,48->64)+BN+PReLU ---------------------------------------- #
    y3, h3 = conv_bn_prelu(p2_ref, w3_ref, s3_ref, s3t_ref, g3_ref, be3_ref,
                           vm_ref[2], a2, kh=2, row_step=4,
                           count=float(N * 3 * 3), fill=0.0)

    # ---- flatten in PyTorch (c, h, w) order + MLP + PReLU ------------------ #
    # The (c,h,w)->lane permutation is folded into wmlp at init; the per-h row
    # gather is a one-hot matmul (no strided row reads needed).
    feat = None
    for h in range(3):
        rows = jnp.dot(gath_ref[h], y3, preferred_element_type=jnp.float32)
        t = jnp.dot(rows, wmlp_ref[h], preferred_element_type=jnp.float32)
        feat = t if feat is None else feat + t
    feat = feat + bmlp_ref[...]
    feat = jnp.where(feat > 0, feat, a3 * feat)

    # ---- merged heads: one lane-dense (128 -> 128) matmul ------------------ #
    raw = jnp.dot(feat, whead_ref[...], preferred_element_type=jnp.float32)
    raw = raw + bhead_ref[...]
    col = jax.lax.broadcasted_iota(jnp.int32, raw.shape, 1)
    out_ref[...] = jnp.where(col == 0, jax.nn.sigmoid(raw), raw)


# --------------------------- weight preprocessing --------------------------- #

def _lane_conv_weight(wc, w_in, c_in, w_out, c_out, in_pos):
    """Fold (kw taps, channel contraction, pool-stride geometry) into one
    (w_in*c_in, w_out*c_out) matrix per kh tap."""
    kh, kw = wc.shape[0], wc.shape[1]
    mat = np.zeros((kh, w_in * c_in, w_out * c_out), np.float32)
    for i in range(kh):
        for wo in range(w_out):
            for j in range(kw):
                wi = in_pos(wo, j)
                mat[i, wi * c_in:(wi + 1) * c_in,
                    wo * c_out:(wo + 1) * c_out] = wc[i, j]
    return mat


def _channel_fold(w_out, c):
    s = np.tile(np.eye(c, dtype=np.float32), (w_out, 1))   # (w_out*c, c)
    return s, np.ascontiguousarray(s.T)


def init_params(key):
    ks = jax.random.split(key, 9)

    def rand(k, shape, scale):
        return scale * jax.random.normal(k, shape, jnp.float32)

    w1 = rand(ks[0], (3, 3, C0, C1), 1.0 / np.sqrt(3 * 3 * C0))
    w2 = rand(ks[1], (3, 3, C1, C2), 1.0 / np.sqrt(3 * 3 * C1))
    w3 = rand(ks[2], (2, 2, C2, C3), 1.0 / np.sqrt(2 * 2 * C2))
    wm = rand(ks[3], (3 * 3 * C3, 128), 1.0 / np.sqrt(3 * 3 * C3))
    wc = rand(ks[4], (128, 1), 1.0 / np.sqrt(128))
    wo = rand(ks[5], (128, 4), 1.0 / np.sqrt(128))
    bm = rand(ks[6], (1, 128), 0.01)
    bc = rand(ks[7], (1, 1), 0.01)
    bo = rand(ks[8], (1, 4), 0.01)
    # NOTE: Conv2d biases are not generated: under training-mode BatchNorm
    # (which subtracts the batch mean) they cancel exactly in the output.

    # conv weights -> lane-Toeplitz matrices; pool stride-2 folded into conv2/3
    w1hat = _lane_conv_weight(np.asarray(w1), W0, C0, W1, C1, lambda o, j: o + j)
    w2hat = _lane_conv_weight(np.asarray(w2), W1, C1, W2, C2, lambda o, j: 2 * (o + j))
    w3hat = _lane_conv_weight(np.asarray(w3), W2, C2, W3, C3, lambda o, j: 2 * (o + j))

    s1, s1t = _channel_fold(W1, C1)
    s2, s2t = _channel_fold(W2, C2)
    s3, s3t = _channel_fold(W3, C3)

    # MLP weight rows re-ordered from PyTorch (c,h,w) flatten order to this
    # kernel's (h, w, c) layout, stacked per h.
    wm_np = np.asarray(wm)
    wmlp = np.zeros((3, L3, 128), np.float32)
    for h in range(3):
        rows = (np.arange(C3)[None, :] * 9 + h * 3 + np.arange(3)[:, None]).reshape(-1)
        wmlp[h] = wm_np[rows, :]

    # heads merged into one lane-dense 128->128 matmul
    whead = np.zeros((128, 128), np.float32)
    whead[:, 0:1] = np.asarray(wc)
    whead[:, 1:5] = np.asarray(wo)
    bhead = np.zeros((1, 128), np.float32)
    bhead[0, 0] = np.asarray(bc)[0, 0]
    bhead[0, 1:5] = np.asarray(bo)[0]

    return {
        "w1hat": jnp.asarray(w1hat, jnp.bfloat16),
        "w2hat": jnp.asarray(w2hat, jnp.bfloat16),
        "w3hat": jnp.asarray(w3hat, jnp.bfloat16),
        "s1": jnp.asarray(s1), "s1t": jnp.asarray(s1t),
        "s2": jnp.asarray(s2), "s2t": jnp.asarray(s2t),
        "s3": jnp.asarray(s3), "s3t": jnp.asarray(s3t),
        "g1": jnp.ones((1, C1), jnp.float32), "be1": jnp.zeros((1, C1), jnp.float32),
        "g2": jnp.ones((1, C2), jnp.float32), "be2": jnp.zeros((1, C2), jnp.float32),
        "g3": jnp.ones((1, C3), jnp.float32), "be3": jnp.zeros((1, C3), jnp.float32),
        "wmlp": jnp.asarray(wmlp), "bmlp": bm,
        "whead": jnp.asarray(whead), "bhead": jnp.asarray(bhead),
        "alphas": jnp.full((4,), 0.25, jnp.float32),   # PReLU (single-alpha) x4
    }


# -------------------------------- forward ----------------------------------- #

@jax.jit
def rnet_forward(x_nchw, p):
    N = x_nchw.shape[0]
    NR = N * R
    head3 = NR - 4

    # NCHW -> (rows = N*H, lanes = W*C) slab (the only wrapper-side relayout)
    x0 = jnp.transpose(x_nchw.astype(jnp.float32), (0, 2, 3, 1)).reshape(NR, L0)

    # row-validity masks for the three conv outputs (valid slots per image)
    hslot = jnp.arange(NR) % R
    vm = jnp.stack([
        (hslot < 22).astype(jnp.float32),
        ((hslot % 2 == 0) & (hslot < 18)).astype(jnp.float32),
        ((hslot % 4 == 0) & (hslot < 12)).astype(jnp.float32),
    ], axis=0)[:, :, None]                                        # (3, NR, 1)

    # one-hot row gather for the MLP: G[h, n, 24*n + 4*h] = 1
    cols = R * jnp.arange(N)[None, :] + 4 * jnp.arange(3)[:, None]
    gath = jax.nn.one_hot(cols, head3, dtype=jnp.float32)          # (3, N, head3)

    out = pl.pallas_call(
        _rnet_kernel,
        out_shape=jax.ShapeDtypeStruct((N, 128), jnp.float32),
        in_specs=[_vmem()] * 22 + [_smem()],
        out_specs=_vmem(),
        scratch_shapes=[
            pltpu.VMEM((NR, L1), jnp.float32),   # conv1 output
            pltpu.VMEM((NR, L1), jnp.float32),   # pool1 output
            pltpu.VMEM((NR, L2), jnp.float32),   # conv2 output
            pltpu.VMEM((NR, L2), jnp.float32),   # pool2 output
        ],
        compiler_params=pltpu.CompilerParams(
            vmem_limit_bytes=48 * 1024 * 1024),
    )(x0,
      p["w1hat"], p["w2hat"], p["w3hat"],
      p["s1"], p["s1t"], p["s2"], p["s2t"], p["s3"], p["s3t"],
      p["g1"], p["be1"], p["g2"], p["be2"], p["g3"], p["be3"],
      vm, gath, p["wmlp"], p["bmlp"], p["whead"], p["bhead"],
      p["alphas"])

    confidence = out[:, 0:1]
    offsets = out[:, 1:5]
    return confidence, offsets


if __name__ == "__main__":
    key = jax.random.PRNGKey(0)
    kx, kp = jax.random.split(key)
    # RNet canonical input: batch=2, 3x24x24 (NCHW) -> 3x3x64 feature map that
    # Linear(3*3*64, 128) expects.
    x = jax.random.normal(kx, (2, 3, 24, 24), jnp.float32)
    params = init_params(kp)

    conf, off = rnet_forward(x, params)
    conf, off = jax.block_until_ready((conf, off))

    assert conf.shape == (2, 1) and off.shape == (2, 4)
    assert bool(jnp.all(jnp.isfinite(conf))) and bool(jnp.all(jnp.isfinite(off)))
    assert bool(jnp.all((conf >= 0.0) & (conf <= 1.0)))
    print("KERNEL_OK")
</pallas_src>

<mosaic_0001>
module attributes {stable_mosaic.version = 11 : i64} {
  func.func @_rnet_kernel(%arg0: memref<48x72xf32, #tpu.memory_space<vmem>>, %arg1: memref<3x72x616xbf16, #tpu.memory_space<vmem>>, %arg2: memref<3x616x432xbf16, #tpu.memory_space<vmem>>, %arg3: memref<2x432x192xbf16, #tpu.memory_space<vmem>>, %arg4: memref<616x28xf32, #tpu.memory_space<vmem>>, %arg5: memref<28x616xf32, #tpu.memory_space<vmem>>, %arg6: memref<432x48xf32, #tpu.memory_space<vmem>>, %arg7: memref<48x432xf32, #tpu.memory_space<vmem>>, %arg8: memref<192x64xf32, #tpu.memory_space<vmem>>, %arg9: memref<64x192xf32, #tpu.memory_space<vmem>>, %arg10: memref<1x28xf32, #tpu.memory_space<vmem>>, %arg11: memref<1x28xf32, #tpu.memory_space<vmem>>, %arg12: memref<1x48xf32, #tpu.memory_space<vmem>>, %arg13: memref<1x48xf32, #tpu.memory_space<vmem>>, %arg14: memref<1x64xf32, #tpu.memory_space<vmem>>, %arg15: memref<1x64xf32, #tpu.memory_space<vmem>>, %arg16: memref<3x48x1xf32, #tpu.memory_space<vmem>>, %arg17: memref<3x2x44xf32, #tpu.memory_space<vmem>>, %arg18: memref<3x192x128xf32, #tpu.memory_space<vmem>>, %arg19: memref<1x128xf32, #tpu.memory_space<vmem>>, %arg20: memref<128x128xf32, #tpu.memory_space<vmem>>, %arg21: memref<1x128xf32, #tpu.memory_space<vmem>>, %arg22: memref<4xf32, #tpu.memory_space<smem>>, %arg23: memref<2x128xf32, #tpu.memory_space<vmem>>, %arg24: memref<48x616xf32, #tpu.memory_space<vmem>>, %arg25: memref<48x616xf32, #tpu.memory_space<vmem>>, %arg26: memref<48x432xf32, #tpu.memory_space<vmem>>, %arg27: memref<48x432xf32, #tpu.memory_space<vmem>>) attributes {dimension_semantics = [], scalar_prefetch = 0 : i64, scratch_operands = 4 : i64, tpu.core_type = #tpu.core_type<tc>} {
    %c0 = arith.constant 0 : index
    %0 = memref.load %arg22[%c0] : memref<4xf32, #tpu.memory_space<smem>>
    %c1 = arith.constant 1 : index
    %1 = memref.load %arg22[%c1] : memref<4xf32, #tpu.memory_space<smem>>
    %c2 = arith.constant 2 : index
    %2 = memref.load %arg22[%c2] : memref<4xf32, #tpu.memory_space<smem>>
    %c3 = arith.constant 3 : index
    %3 = memref.load %arg22[%c3] : memref<4xf32, #tpu.memory_space<smem>>
    %c0_0 = arith.constant 0 : index
    %c0_1 = arith.constant 0 : index
    %c0_2 = arith.constant 0 : index
    %4 = vector.load %arg16[%c0_0, %c0_1, %c0_2] : memref<3x48x1xf32, #tpu.memory_space<vmem>>, vector<1x48x1xf32>
    %5 = vector.shape_cast %4 : vector<1x48x1xf32> to vector<48x1xf32>
    %c0_3 = arith.constant 0 : index
    %c0_4 = arith.constant 0 : index
    %6 = vector.load %arg0[%c0_3, %c0_4] : memref<48x72xf32, #tpu.memory_space<vmem>>, vector<46x72xf32>
    %7 = arith.truncf %6 : vector<46x72xf32> to vector<46x72xbf16>
    %c0_5 = arith.constant 0 : index
    %c0_6 = arith.constant 0 : index
    %c0_7 = arith.constant 0 : index
    %8 = vector.load %arg1[%c0_5, %c0_6, %c0_7] : memref<3x72x616xbf16, #tpu.memory_space<vmem>>, vector<1x72x616xbf16>
    %9 = vector.shape_cast %8 : vector<1x72x616xbf16> to vector<72x616xbf16>
    %cst = arith.constant dense<0.000000e+00> : vector<46x616xf32>
    %10 = tpu.matmul %7, %9, %cst {dimension_numbers = #tpu.dot_dimension_numbers<[1], [0], [0], [1], [0, 0, 1, 1], [], []>} : vector<46x72xbf16>, vector<72x616xbf16>, vector<46x616xf32> -> vector<46x616xf32>
    %c1_8 = arith.constant 1 : index
    %c0_9 = arith.constant 0 : index
    %11 = vector.load %arg0[%c1_8, %c0_9] : memref<48x72xf32, #tpu.memory_space<vmem>>, vector<46x72xf32>
    %12 = arith.truncf %11 : vector<46x72xf32> to vector<46x72xbf16>
    %c1_10 = arith.constant 1 : index
    %c0_11 = arith.constant 0 : index
    %c0_12 = arith.constant 0 : index
    %13 = vector.load %arg1[%c1_10, %c0_11, %c0_12] : memref<3x72x616xbf16, #tpu.memory_space<vmem>>, vector<1x72x616xbf16>
    %14 = vector.shape_cast %13 : vector<1x72x616xbf16> to vector<72x616xbf16>
    %cst_13 = arith.constant dense<0.000000e+00> : vector<46x616xf32>
    %15 = tpu.matmul %12, %14, %cst_13 {dimension_numbers = #tpu.dot_dimension_numbers<[1], [0], [0], [1], [0, 0, 1, 1], [], []>} : vector<46x72xbf16>, vector<72x616xbf16>, vector<46x616xf32> -> vector<46x616xf32>
    %16 = arith.addf %10, %15 : vector<46x616xf32>
    %c2_14 = arith.constant 2 : index
    %c0_15 = arith.constant 0 : index
    %17 = vector.load %arg0[%c2_14, %c0_15] : memref<48x72xf32, #tpu.memory_space<vmem>>, vector<46x72xf32>
    %18 = arith.truncf %17 : vector<46x72xf32> to vector<46x72xbf16>
    %c2_16 = arith.constant 2 : index
    %c0_17 = arith.constant 0 : index
    %c0_18 = arith.constant 0 : index
    %19 = vector.load %arg1[%c2_16, %c0_17, %c0_18] : memref<3x72x616xbf16, #tpu.memory_space<vmem>>, vector<1x72x616xbf16>
    %20 = vector.shape_cast %19 : vector<1x72x616xbf16> to vector<72x616xbf16>
    %cst_19 = arith.constant dense<0.000000e+00> : vector<46x616xf32>
    %21 = tpu.matmul %18, %20, %cst_19 {dimension_numbers = #tpu.dot_dimension_numbers<[1], [0], [0], [1], [0, 0, 1, 1], [], []>} : vector<46x72xbf16>, vector<72x616xbf16>, vector<46x616xf32> -> vector<46x616xf32>
    %22 = arith.addf %16, %21 : vector<46x616xf32>
    %23 = vector.extract_strided_slice %5 {offsets = [0, 0], sizes = [46, 1], strides = [1, 1]} : vector<48x1xf32> to vector<46x1xf32>
    %cst_20 = arith.constant 0.000000e+00 : f32
    %24 = vector.broadcast %cst_20 : f32 to vector<46x1xf32>
    %25 = arith.cmpf ogt, %23, %24 : vector<46x1xf32>
    %cst_21 = arith.constant 0.000000e+00 : f32
    %26 = vector.shape_cast %25 : vector<46x1xi1> to vector<46x1xi1>
    %27 = vector.broadcast %26 : vector<46x1xi1> to vector<46x616xi1>
    %28 = vector.broadcast %cst_21 : f32 to vector<46x616xf32>
    %29 = arith.select %27, %22, %28 : vector<46x616xi1>, vector<46x616xf32>
    %cst_22 = arith.constant dense<0.000000e+00> : vector<616xf32>
    %30 = vector.multi_reduction <add>, %29, %cst_22 [0] : vector<46x616xf32> to vector<616xf32>
    %31 = vector.shape_cast %30 : vector<616xf32> to vector<1x616xf32>
    %32 = arith.mulf %29, %29 : vector<46x616xf32>
    %cst_23 = arith.constant dense<0.000000e+00> : vector<616xf32>
    %33 = vector.multi_reduction <add>, %32, %cst_23 [0] : vector<46x616xf32> to vector<616xf32>
    %34 = vector.shape_cast %33 : vector<616xf32> to vector<1x616xf32>
    %c0_24 = arith.constant 0 : index
    %c0_25 = arith.constant 0 : index
    %35 = vector.load %arg4[%c0_24, %c0_25] : memref<616x28xf32, #tpu.memory_space<vmem>>, vector<616x28xf32>
    %cst_26 = arith.constant dense<0.000000e+00> : vector<1x28xf32>
    %36 = tpu.matmul %31, %35, %cst_26 {dimension_numbers = #tpu.dot_dimension_numbers<[1], [0], [0], [1], [0, 0, 1, 1], [], []>} : vector<1x616xf32>, vector<616x28xf32>, vector<1x28xf32> -> vector<1x28xf32>
    %cst_27 = arith.constant 9.680000e+02 : f32
    %37 = vector.broadcast %cst_27 : f32 to vector<1x28xf32>
    %38 = arith.divf %36, %37 : vector<1x28xf32>
    %c0_28 = arith.constant 0 : index
    %c0_29 = arith.constant 0 : index
    %39 = vector.load %arg4[%c0_28, %c0_29] : memref<616x28xf32, #tpu.memory_space<vmem>>, vector<616x28xf32>
    %cst_30 = arith.constant dense<0.000000e+00> : vector<1x28xf32>
    %40 = tpu.matmul %34, %39, %cst_30 {dimension_numbers = #tpu.dot_dimension_numbers<[1], [0], [0], [1], [0, 0, 1, 1], [], []>} : vector<1x616xf32>, vector<616x28xf32>, vector<1x28xf32> -> vector<1x28xf32>
    %cst_31 = arith.constant 9.680000e+02 : f32
    %41 = vector.broadcast %cst_31 : f32 to vector<1x28xf32>
    %42 = arith.divf %40, %41 : vector<1x28xf32>
    %43 = arith.mulf %38, %38 : vector<1x28xf32>
    %44 = arith.subf %42, %43 : vector<1x28xf32>
    %cst_32 = arith.constant 0.000000e+00 : f32
    %45 = vector.broadcast %cst_32 : f32 to vector<1x28xf32>
    %46 = arith.maximumf %44, %45 : vector<1x28xf32>
    %c0_33 = arith.constant 0 : index
    %c0_34 = arith.constant 0 : index
    %47 = vector.load %arg10[%c0_33, %c0_34] : memref<1x28xf32, #tpu.memory_space<vmem>>, vector<1x28xf32>
    %cst_35 = arith.constant 9.99999974E-6 : f32
    %48 = vector.broadcast %cst_35 : f32 to vector<1x28xf32>
    %49 = arith.addf %46, %48 : vector<1x28xf32>
    %50 = math.rsqrt %49 : vector<1x28xf32>
    %51 = arith.mulf %47, %50 : vector<1x28xf32>
    %c0_36 = arith.constant 0 : index
    %c0_37 = arith.constant 0 : index
    %52 = vector.load %arg11[%c0_36, %c0_37] : memref<1x28xf32, #tpu.memory_space<vmem>>, vector<1x28xf32>
    %53 = arith.mulf %38, %51 : vector<1x28xf32>
    %54 = arith.subf %52, %53 : vector<1x28xf32>
    %c0_38 = arith.constant 0 : index
    %c0_39 = arith.constant 0 : index
    %55 = vector.load %arg5[%c0_38, %c0_39] : memref<28x616xf32, #tpu.memory_space<vmem>>, vector<28x616xf32>
    %cst_40 = arith.constant dense<0.000000e+00> : vector<1x616xf32>
    %56 = tpu.matmul %51, %55, %cst_40 {dimension_numbers = #tpu.dot_dimension_numbers<[1], [0], [0], [1], [0, 0, 1, 1], [], []>} : vector<1x28xf32>, vector<28x616xf32>, vector<1x616xf32> -> vector<1x616xf32>
    %c0_41 = arith.constant 0 : index
    %c0_42 = arith.constant 0 : index
    %57 = vector.load %arg5[%c0_41, %c0_42] : memref<28x616xf32, #tpu.memory_space<vmem>>, vector<28x616xf32>
    %cst_43 = arith.constant dense<0.000000e+00> : vector<1x616xf32>
    %58 = tpu.matmul %54, %57, %cst_43 {dimension_numbers = #tpu.dot_dimension_numbers<[1], [0], [0], [1], [0, 0, 1, 1], [], []>} : vector<1x28xf32>, vector<28x616xf32>, vector<1x616xf32> -> vector<1x616xf32>
    %59 = vector.broadcast %56 : vector<1x616xf32> to vector<46x616xf32>
    %60 = arith.mulf %22, %59 : vector<46x616xf32>
    %61 = vector.broadcast %58 : vector<1x616xf32> to vector<46x616xf32>
    %62 = arith.addf %60, %61 : vector<46x616xf32>
    %cst_44 = arith.constant 0.000000e+00 : f32
    %63 = vector.broadcast %cst_44 : f32 to vector<46x616xf32>
    %64 = arith.cmpf ogt, %62, %63 : vector<46x616xf32>
    %65 = vector.broadcast %0 : f32 to vector<46x616xf32>
    %66 = arith.mulf %65, %62 : vector<46x616xf32>
    %67 = arith.select %64, %62, %66 : vector<46x616xi1>, vector<46x616xf32>
    %cst_45 = arith.constant 0.000000e+00 : f32
    %68 = vector.broadcast %cst_45 : f32 to vector<46x1xf32>
    %69 = arith.cmpf ogt, %23, %68 : vector<46x1xf32>
    %cst_46 = arith.constant -1.000000e+30 : f32
    %70 = vector.shape_cast %69 : vector<46x1xi1> to vector<46x1xi1>
    %71 = vector.broadcast %70 : vector<46x1xi1> to vector<46x616xi1>
    %72 = vector.broadcast %cst_46 : f32 to vector<46x616xf32>
    %73 = arith.select %71, %67, %72 : vector<46x616xi1>, vector<46x616xf32>
    %c0_47 = arith.constant 0 : index
    %c0_48 = arith.constant 0 : index
    %74 = vector.load %arg24[%c0_47, %c0_48] : memref<48x616xf32, #tpu.memory_space<vmem>>, vector<46x616xf32>
    tpu.vector_store %arg24[%c0_47, %c0_48], %73 {strides = array<i32>} : memref<48x616xf32, #tpu.memory_space<vmem>>, vector<46x616xf32>,
    %cst_49 = arith.constant -1.000000e+30 : f32
    %75 = vector.broadcast %cst_49 : f32 to vector<2x616xf32>
    %c46 = arith.constant 46 : index
    %c0_50 = arith.constant 0 : index
    %76 = vector.load %arg24[%c46, %c0_50] : memref<48x616xf32, #tpu.memory_space<vmem>>, vector<2x616xf32>
    tpu.vector_store %arg24[%c46, %c0_50], %75 {strides = array<i32>} : memref<48x616xf32, #tpu.memory_space<vmem>>, vector<2x616xf32>,
    %c0_51 = arith.constant 0 : index
    %c0_52 = arith.constant 0 : index
    %77 = vector.load %arg24[%c0_51, %c0_52] : memref<48x616xf32, #tpu.memory_space<vmem>>, vector<48x616xf32>
    %c0_53 = arith.constant 0 : index
    %c0_54 = arith.constant 0 : index
    %78 = vector.load %arg25[%c0_53, %c0_54] : memref<48x616xf32, #tpu.memory_space<vmem>>, vector<48x616xf32>
    tpu.vector_store %arg25[%c0_53, %c0_54], %77 {strides = array<i32>} : memref<48x616xf32, #tpu.memory_space<vmem>>, vector<48x616xf32>,
    %c0_55 = arith.constant 0 : index
    %c0_56 = arith.constant 0 : index
    %79 = vector.load %arg25[%c0_55, %c0_56] : memref<48x616xf32, #tpu.memory_space<vmem>>, vector<47x616xf32>
    %c1_57 = arith.constant 1 : index
    %c0_58 = arith.constant 0 : index
    %80 = vector.load %arg24[%c1_57, %c0_58] : memref<48x616xf32, #tpu.memory_space<vmem>>, vector<47x616xf32>
    %81 = arith.maximumf %79, %80 : vector<47x616xf32>
    %c0_59 = arith.constant 0 : index
    %c0_60 = arith.constant 0 : index
    %82 = vector.load %arg25[%c0_59, %c0_60] : memref<48x616xf32, #tpu.memory_space<vmem>>, vector<47x616xf32>
    tpu.vector_store %arg25[%c0_59, %c0_60], %81 {strides = array<i32>} : memref<48x616xf32, #tpu.memory_space<vmem>>, vector<47x616xf32>,
    %c1_61 = arith.constant 1 : index
    %c0_62 = arith.constant 0 : index
    %83 = vector.load %arg25[%c1_61, %c0_62] : memref<48x616xf32, #tpu.memory_space<vmem>>, vector<47x616xf32>
    %c0_63 = arith.constant 0 : index
    %c0_64 = arith.constant 0 : index
    %84 = vector.load %arg24[%c0_63, %c0_64] : memref<48x616xf32, #tpu.memory_space<vmem>>, vector<47x616xf32>
    %85 = arith.maximumf %83, %84 : vector<47x616xf32>
    %c1_65 = arith.constant 1 : index
    %c0_66 = arith.constant 0 : index
    %86 = vector.load %arg25[%c1_65, %c0_66] : memref<48x616xf32, #tpu.memory_space<vmem>>, vector<47x616xf32>
    tpu.vector_store %arg25[%c1_65, %c0_66], %85 {strides = array<i32>} : memref<48x616xf32, #tpu.memory_space<vmem>>, vector<47x616xf32>,
    %c0_67 = arith.constant 0 : index
    %c0_68 = arith.constant 0 : index
    %87 = vector.load %arg25[%c0_67, %c0_68] : memref<48x616xf32, #tpu.memory_space<vmem>>, vector<48x616xf32>
    %c0_69 = arith.constant 0 : index
    %c0_70 = arith.constant 0 : index
    %88 = vector.load %arg25[%c0_69, %c0_70] : memref<48x616xf32, #tpu.memory_space<vmem>>, vector<48x588xf32>
    %89 = vector.extract_strided_slice %87 {offsets = [0, 28], sizes = [48, 588], strides = [1, 1]} : vector<48x616xf32> to vector<48x588xf32>
    %90 = arith.maximumf %88, %89 : vector<48x588xf32>
    %c0_71 = arith.constant 0 : index
    %c0_72 = arith.constant 0 : index
    %91 = vector.load %arg25[%c0_71, %c0_72] : memref<48x616xf32, #tpu.memory_space<vmem>>, vector<48x588xf32>
    tpu.vector_store %arg25[%c0_71, %c0_72], %90 {strides = array<i32>} : memref<48x616xf32, #tpu.memory_space<vmem>>, vector<48x588xf32>,
    %c0_73 = arith.constant 0 : index
    %c28 = arith.constant 28 : index
    %92 = vector.load %arg25[%c0_73, %c28] : memref<48x616xf32, #tpu.memory_space<vmem>>, vector<48x588xf32>
    %93 = vector.extract_strided_slice %87 {offsets = [0, 0], sizes = [48, 588], strides = [1, 1]} : vector<48x616xf32> to vector<48x588xf32>
    %94 = arith.maximumf %92, %93 : vector<48x588xf32>
    %c0_74 = arith.constant 0 : index
    %c28_75 = arith.constant 28 : index
    %95 = vector.load %arg25[%c0_74, %c28_75] : memref<48x616xf32, #tpu.memory_space<vmem>>, vector<48x588xf32>
    tpu.vector_store %arg25[%c0_74, %c28_75], %94 {strides = array<i32>} : memref<48x616xf32, #tpu.memory_space<vmem>>, vector<48x588xf32>,
    %c1_76 = arith.constant 1 : index
    %c0_77 = arith.constant 0 : index
    %c0_78 = arith.constant 0 : index
    %96 = vector.load %arg16[%c1_76, %c0_77, %c0_78] : memref<3x48x1xf32, #tpu.memory_space<vmem>>, vector<1x48x1xf32>
    %97 = vector.shape_cast %96 : vector<1x48x1xf32> to vector<48x1xf32>
    %c0_79 = arith.constant 0 : index
    %c0_80 = arith.constant 0 : index
    %98 = vector.load %arg25[%c0_79, %c0_80] : memref<48x616xf32, #tpu.memory_space<vmem>>, vector<44x616xf32>
    %99 = arith.truncf %98 : vector<44x616xf32> to vector<44x616xbf16>
    %c0_81 = arith.constant 0 : index
    %c0_82 = arith.constant 0 : index
    %c0_83 = arith.constant 0 : index
    %100 = vector.load %arg2[%c0_81, %c0_82, %c0_83] : memref<3x616x432xbf16, #tpu.memory_space<vmem>>, vector<1x616x432xbf16>
    %101 = vector.shape_cast %100 : vector<1x616x432xbf16> to vector<616x432xbf16>
    %cst_84 = arith.constant dense<0.000000e+00> : vector<44x432xf32>
    %102 = tpu.matmul %99, %101, %cst_84 {dimension_numbers = #tpu.dot_dimension_numbers<[1], [0], [0], [1], [0, 0, 1, 1], [], []>} : vector<44x616xbf16>, vector<616x432xbf16>, vector<44x432xf32> -> vector<44x432xf32>
    %c2_85 = arith.constant 2 : index
    %c0_86 = arith.constant 0 : index
    %103 = vector.load %arg25[%c2_85, %c0_86] : memref<48x616xf32, #tpu.memory_space<vmem>>, vector<44x616xf32>
    %104 = arith.truncf %103 : vector<44x616xf32> to vector<44x616xbf16>
    %c1_87 = arith.constant 1 : index
    %c0_88 = arith.constant 0 : index
    %c0_89 = arith.constant 0 : index
    %105 = vector.load %arg2[%c1_87, %c0_88, %c0_89] : memref<3x616x432xbf16, #tpu.memory_space<vmem>>, vector<1x616x432xbf16>
    %106 = vector.shape_cast %105 : vector<1x616x432xbf16> to vector<616x432xbf16>
    %cst_90 = arith.constant dense<0.000000e+00> : vector<44x432xf32>
    %107 = tpu.matmul %104, %106, %cst_90 {dimension_numbers = #tpu.dot_dimension_numbers<[1], [0], [0], [1], [0, 0, 1, 1], [], []>} : vector<44x616xbf16>, vector<616x432xbf16>, vector<44x432xf32> -> vector<44x432xf32>
    %108 = arith.addf %102, %107 : vector<44x432xf32>
    %c4 = arith.constant 4 : index
    %c0_91 = arith.constant 0 : index
    %109 = vector.load %arg25[%c4, %c0_91] : memref<48x616xf32, #tpu.memory_space<vmem>>, vector<44x616xf32>
    %110 = arith.truncf %109 : vector<44x616xf32> to vector<44x616xbf16>
    %c2_92 = arith.constant 2 : index
    %c0_93 = arith.constant 0 : index
    %c0_94 = arith.constant 0 : index
    %111 = vector.load %arg2[%c2_92, %c0_93, %c0_94] : memref<3x616x432xbf16, #tpu.memory_space<vmem>>, vector<1x616x432xbf16>
    %112 = vector.shape_cast %111 : vector<1x616x432xbf16> to vector<616x432xbf16>
    %cst_95 = arith.constant dense<0.000000e+00> : vector<44x432xf32>
    %113 = tpu.matmul %110, %112, %cst_95 {dimension_numbers = #tpu.dot_dimension_numbers<[1], [0], [0], [1], [0, 0, 1, 1], [], []>} : vector<44x616xbf16>, vector<616x432xbf16>, vector<44x432xf32> -> vector<44x432xf32>
    %114 = arith.addf %108, %113 : vector<44x432xf32>
    %115 = vector.extract_strided_slice %97 {offsets = [0, 0], sizes = [44, 1], strides = [1, 1]} : vector<48x1xf32> to vector<44x1xf32>
    %cst_96 = arith.constant 0.000000e+00 : f32
    %116 = vector.broadcast %cst_96 : f32 to vector<44x1xf32>
    %117 = arith.cmpf ogt, %115, %116 : vector<44x1xf32>
    %cst_97 = arith.constant 0.000000e+00 : f32
    %118 = vector.shape_cast %117 : vector<44x1xi1> to vector<44x1xi1>
    %119 = vector.broadcast %118 : vector<44x1xi1> to vector<44x432xi1>
    %120 = vector.broadcast %cst_97 : f32 to vector<44x432xf32>
    %121 = arith.select %119, %114, %120 : vector<44x432xi1>, vector<44x432xf32>
    %cst_98 = arith.constant dense<0.000000e+00> : vector<432xf32>
    %122 = vector.multi_reduction <add>, %121, %cst_98 [0] : vector<44x432xf32> to vector<432xf32>
    %123 = vector.shape_cast %122 : vector<432xf32> to vector<1x432xf32>
    %124 = arith.mulf %121, %121 : vector<44x432xf32>
    %cst_99 = arith.constant dense<0.000000e+00> : vector<432xf32>
    %125 = vector.multi_reduction <add>, %124, %cst_99 [0] : vector<44x432xf32> to vector<432xf32>
    %126 = vector.shape_cast %125 : vector<432xf32> to vector<1x432xf32>
    %c0_100 = arith.constant 0 : index
    %c0_101 = arith.constant 0 : index
    %127 = vector.load %arg6[%c0_100, %c0_101] : memref<432x48xf32, #tpu.memory_space<vmem>>, vector<432x48xf32>
    %cst_102 = arith.constant dense<0.000000e+00> : vector<1x48xf32>
    %128 = tpu.matmul %123, %127, %cst_102 {dimension_numbers = #tpu.dot_dimension_numbers<[1], [0], [0], [1], [0, 0, 1, 1], [], []>} : vector<1x432xf32>, vector<432x48xf32>, vector<1x48xf32> -> vector<1x48xf32>
    %cst_103 = arith.constant 1.620000e+02 : f32
    %129 = vector.broadcast %cst_103 : f32 to vector<1x48xf32>
    %130 = arith.divf %128, %129 : vector<1x48xf32>
    %c0_104 = arith.constant 0 : index
    %c0_105 = arith.constant 0 : index
    %131 = vector.load %arg6[%c0_104, %c0_105] : memref<432x48xf32, #tpu.memory_space<vmem>>, vector<432x48xf32>
    %cst_106 = arith.constant dense<0.000000e+00> : vector<1x48xf32>
    %132 = tpu.matmul %126, %131, %cst_106 {dimension_numbers = #tpu.dot_dimension_numbers<[1], [0], [0], [1], [0, 0, 1, 1], [], []>} : vector<1x432xf32>, vector<432x48xf32>, vector<1x48xf32> -> vector<1x48xf32>
    %cst_107 = arith.constant 1.620000e+02 : f32
    %133 = vector.broadcast %cst_107 : f32 to vector<1x48xf32>
    %134 = arith.divf %132, %133 : vector<1x48xf32>
    %135 = arith.mulf %130, %130 : vector<1x48xf32>
    %136 = arith.subf %134, %135 : vector<1x48xf32>
    %cst_108 = arith.constant 0.000000e+00 : f32
    %137 = vector.broadcast %cst_108 : f32 to vector<1x48xf32>
    %138 = arith.maximumf %136, %137 : vector<1x48xf32>
    %c0_109 = arith.constant 0 : index
    %c0_110 = arith.constant 0 : index
    %139 = vector.load %arg12[%c0_109, %c0_110] : memref<1x48xf32, #tpu.memory_space<vmem>>, vector<1x48xf32>
    %cst_111 = arith.constant 9.99999974E-6 : f32
    %140 = vector.broadcast %cst_111 : f32 to vector<1x48xf32>
    %141 = arith.addf %138, %140 : vector<1x48xf32>
    %142 = math.rsqrt %141 : vector<1x48xf32>
    %143 = arith.mulf %139, %142 : vector<1x48xf32>
    %c0_112 = arith.constant 0 : index
    %c0_113 = arith.constant 0 : index
    %144 = vector.load %arg13[%c0_112, %c0_113] : memref<1x48xf32, #tpu.memory_space<vmem>>, vector<1x48xf32>
    %145 = arith.mulf %130, %143 : vector<1x48xf32>
    %146 = arith.subf %144, %145 : vector<1x48xf32>
    %c0_114 = arith.constant 0 : index
    %c0_115 = arith.constant 0 : index
    %147 = vector.load %arg7[%c0_114, %c0_115] : memref<48x432xf32, #tpu.memory_space<vmem>>, vector<48x432xf32>
    %cst_116 = arith.constant dense<0.000000e+00> : vector<1x432xf32>
    %148 = tpu.matmul %143, %147, %cst_116 {dimension_numbers = #tpu.dot_dimension_numbers<[1], [0], [0], [1], [0, 0, 1, 1], [], []>} : vector<1x48xf32>, vector<48x432xf32>, vector<1x432xf32> -> vector<1x432xf32>
    %c0_117 = arith.constant 0 : index
    %c0_118 = arith.constant 0 : index
    %149 = vector.load %arg7[%c0_117, %c0_118] : memref<48x432xf32, #tpu.memory_space<vmem>>, vector<48x432xf32>
    %cst_119 = arith.constant dense<0.000000e+00> : vector<1x432xf32>
    %150 = tpu.matmul %146, %149, %cst_119 {dimension_numbers = #tpu.dot_dimension_numbers<[1], [0], [0], [1], [0, 0, 1, 1], [], []>} : vector<1x48xf32>, vector<48x432xf32>, vector<1x432xf32> -> vector<1x432xf32>
    %151 = vector.broadcast %148 : vector<1x432xf32> to vector<44x432xf32>
    %152 = arith.mulf %114, %151 : vector<44x432xf32>
    %153 = vector.broadcast %150 : vector<1x432xf32> to vector<44x432xf32>
    %154 = arith.addf %152, %153 : vector<44x432xf32>
    %cst_120 = arith.constant 0.000000e+00 : f32
    %155 = vector.broadcast %cst_120 : f32 to vector<44x432xf32>
    %156 = arith.cmpf ogt, %154, %155 : vector<44x432xf32>
    %157 = vector.broadcast %1 : f32 to vector<44x432xf32>
    %158 = arith.mulf %157, %154 : vector<44x432xf32>
    %159 = arith.select %156, %154, %158 : vector<44x432xi1>, vector<44x432xf32>
    %cst_121 = arith.constant 0.000000e+00 : f32
    %160 = vector.broadcast %cst_121 : f32 to vector<44x1xf32>
    %161 = arith.cmpf ogt, %115, %160 : vector<44x1xf32>
    %cst_122 = arith.constant -1.000000e+30 : f32
    %162 = vector.shape_cast %161 : vector<44x1xi1> to vector<44x1xi1>
    %163 = vector.broadcast %162 : vector<44x1xi1> to vector<44x432xi1>
    %164 = vector.broadcast %cst_122 : f32 to vector<44x432xf32>
    %165 = arith.select %163, %159, %164 : vector<44x432xi1>, vector<44x432xf32>
    %c0_123 = arith.constant 0 : index
    %c0_124 = arith.constant 0 : index
    %166 = vector.load %arg26[%c0_123, %c0_124] : memref<48x432xf32, #tpu.memory_space<vmem>>, vector<44x432xf32>
    tpu.vector_store %arg26[%c0_123, %c0_124], %165 {strides = array<i32>} : memref<48x432xf32, #tpu.memory_space<vmem>>, vector<44x432xf32>,
    %cst_125 = arith.constant -1.000000e+30 : f32
    %167 = vector.broadcast %cst_125 : f32 to vector<4x432xf32>
    %c44 = arith.constant 44 : index
    %c0_126 = arith.constant 0 : index
    %168 = vector.load %arg26[%c44, %c0_126] : memref<48x432xf32, #tpu.memory_space<vmem>>, vector<4x432xf32>
    tpu.vector_store %arg26[%c44, %c0_126], %167 {strides = array<i32>} : memref<48x432xf32, #tpu.memory_space<vmem>>, vector<4x432xf32>,
    %c0_127 = arith.constant 0 : index
    %c0_128 = arith.constant 0 : index
    %169 = vector.load %arg26[%c0_127, %c0_128] : memref<48x432xf32, #tpu.memory_space<vmem>>, vector<48x432xf32>
    %c0_129 = arith.constant 0 : index
    %c0_130 = arith.constant 0 : index
    %170 = vector.load %arg27[%c0_129, %c0_130] : memref<48x432xf32, #tpu.memory_space<vmem>>, vector<48x432xf32>
    tpu.vector_store %arg27[%c0_129, %c0_130], %169 {strides = array<i32>} : memref<48x432xf32, #tpu.memory_space<vmem>>, vector<48x432xf32>,
    %c0_131 = arith.constant 0 : index
    %c0_132 = arith.constant 0 : index
    %171 = vector.load %arg27[%c0_131, %c0_132] : memref<48x432xf32, #tpu.memory_space<vmem>>, vector<46x432xf32>
    %c2_133 = arith.constant 2 : index
    %c0_134 = arith.constant 0 : index
    %172 = vector.load %arg26[%c2_133, %c0_134] : memref<48x432xf32, #tpu.memory_space<vmem>>, vector<46x432xf32>
    %173 = arith.maximumf %171, %172 : vector<46x432xf32>
    %c0_135 = arith.constant 0 : index
    %c0_136 = arith.constant 0 : index
    %174 = vector.load %arg27[%c0_135, %c0_136] : memref<48x432xf32, #tpu.memory_space<vmem>>, vector<46x432xf32>
    tpu.vector_store %arg27[%c0_135, %c0_136], %173 {strides = array<i32>} : memref<48x432xf32, #tpu.memory_space<vmem>>, vector<46x432xf32>,
    %c0_137 = arith.constant 0 : index
    %c0_138 = arith.constant 0 : index
    %175 = vector.load %arg27[%c0_137, %c0_138] : memref<48x432xf32, #tpu.memory_space<vmem>>, vector<44x432xf32>
    %c4_139 = arith.constant 4 : index
    %c0_140 = arith.constant 0 : index
    %176 = vector.load %arg26[%c4_139, %c0_140] : memref<48x432xf32, #tpu.memory_space<vmem>>, vector<44x432xf32>
    %177 = arith.maximumf %175, %176 : vector<44x432xf32>
    %c0_141 = arith.constant 0 : index
    %c0_142 = arith.constant 0 : index
    %178 = vector.load %arg27[%c0_141, %c0_142] : memref<48x432xf32, #tpu.memory_space<vmem>>, vector<44x432xf32>
    tpu.vector_store %arg27[%c0_141, %c0_142], %177 {strides = array<i32>} : memref<48x432xf32, #tpu.memory_space<vmem>>, vector<44x432xf32>,
    %c0_143 = arith.constant 0 : index
    %c0_144 = arith.constant 0 : index
    %179 = vector.load %arg27[%c0_143, %c0_144] : memref<48x432xf32, #tpu.memory_space<vmem>>, vector<48x432xf32>
    %c0_145 = arith.constant 0 : index
    %c0_146 = arith.constant 0 : index
    %180 = vector.load %arg27[%c0_145, %c0_146] : memref<48x432xf32, #tpu.memory_space<vmem>>, vector<48x384xf32>
    %181 = vector.extract_strided_slice %179 {offsets = [0, 48], sizes = [48, 384], strides = [1, 1]} : vector<48x432xf32> to vector<48x384xf32>
    %182 = arith.maximumf %180, %181 : vector<48x384xf32>
    %c0_147 = arith.constant 0 : index
    %c0_148 = arith.constant 0 : index
    %183 = vector.load %arg27[%c0_147, %c0_148] : memref<48x432xf32, #tpu.memory_space<vmem>>, vector<48x384xf32>
    tpu.vector_store %arg27[%c0_147, %c0_148], %182 {strides = array<i32>} : memref<48x432xf32, #tpu.memory_space<vmem>>, vector<48x384xf32>,
    %c0_149 = arith.constant 0 : index
    %c0_150 = arith.constant 0 : index
    %184 = vector.load %arg27[%c0_149, %c0_150] : memref<48x432xf32, #tpu.memory_space<vmem>>, vector<48x336xf32>
    %185 = vector.extract_strided_slice %179 {offsets = [0, 96], sizes = [48, 336], strides = [1, 1]} : vector<48x432xf32> to vector<48x336xf32>
    %186 = arith.maximumf %184, %185 : vector<48x336xf32>
    %c0_151 = arith.constant 0 : index
    %c0_152 = arith.constant 0 : index
    %187 = vector.load %arg27[%c0_151, %c0_152] : memref<48x432xf32, #tpu.memory_space<vmem>>, vector<48x336xf32>
    tpu.vector_store %arg27[%c0_151, %c0_152], %186 {strides = array<i32>} : memref<48x432xf32, #tpu.memory_space<vmem>>, vector<48x336xf32>,
    %c2_153 = arith.constant 2 : index
    %c0_154 = arith.constant 0 : index
    %c0_155 = arith.constant 0 : index
    %188 = vector.load %arg16[%c2_153, %c0_154, %c0_155] : memref<3x48x1xf32, #tpu.memory_space<vmem>>, vector<1x48x1xf32>
    %189 = vector.shape_cast %188 : vector<1x48x1xf32> to vector<48x1xf32>
    %c0_156 = arith.constant 0 : index
    %c0_157 = arith.constant 0 : index
    %190 = vector.load %arg27[%c0_156, %c0_157] : memref<48x432xf32, #tpu.memory_space<vmem>>, vector<44x432xf32>
    %191 = arith.truncf %190 : vector<44x432xf32> to vector<44x432xbf16>
    %c0_158 = arith.constant 0 : index
    %c0_159 = arith.constant 0 : index
    %c0_160 = arith.constant 0 : index
    %192 = vector.load %arg3[%c0_158, %c0_159, %c0_160] : memref<2x432x192xbf16, #tpu.memory_space<vmem>>, vector<1x432x192xbf16>
    %193 = vector.shape_cast %192 : vector<1x432x192xbf16> to vector<432x192xbf16>
    %cst_161 = arith.constant dense<0.000000e+00> : vector<44x192xf32>
    %194 = tpu.matmul %191, %193, %cst_161 {dimension_numbers = #tpu.dot_dimension_numbers<[1], [0], [0], [1], [0, 0, 1, 1], [], []>} : vector<44x432xbf16>, vector<432x192xbf16>, vector<44x192xf32> -> vector<44x192xf32>
    %c4_162 = arith.constant 4 : index
    %c0_163 = arith.constant 0 : index
    %195 = vector.load %arg27[%c4_162, %c0_163] : memref<48x432xf32, #tpu.memory_space<vmem>>, vector<44x432xf32>
    %196 = arith.truncf %195 : vector<44x432xf32> to vector<44x432xbf16>
    %c1_164 = arith.constant 1 : index
    %c0_165 = arith.constant 0 : index
    %c0_166 = arith.constant 0 : index
    %197 = vector.load %arg3[%c1_164, %c0_165, %c0_166] : memref<2x432x192xbf16, #tpu.memory_space<vmem>>, vector<1x432x192xbf16>
    %198 = vector.shape_cast %197 : vector<1x432x192xbf16> to vector<432x192xbf16>
    %cst_167 = arith.constant dense<0.000000e+00> : vector<44x192xf32>
    %199 = tpu.matmul %196, %198, %cst_167 {dimension_numbers = #tpu.dot_dimension_numbers<[1], [0], [0], [1], [0, 0, 1, 1], [], []>} : vector<44x432xbf16>, vector<432x192xbf16>, vector<44x192xf32> -> vector<44x192xf32>
    %200 = arith.addf %194, %199 : vector<44x192xf32>
    %201 = vector.extract_strided_slice %189 {offsets = [0, 0], sizes = [44, 1], strides = [1, 1]} : vector<48x1xf32> to vector<44x1xf32>
    %cst_168 = arith.constant 0.000000e+00 : f32
    %202 = vector.broadcast %cst_168 : f32 to vector<44x1xf32>
    %203 = arith.cmpf ogt, %201, %202 : vector<44x1xf32>
    %cst_169 = arith.constant 0.000000e+00 : f32
    %204 = vector.shape_cast %203 : vector<44x1xi1> to vector<44x1xi1>
    %205 = vector.broadcast %204 : vector<44x1xi1> to vector<44x192xi1>
    %206 = vector.broadcast %cst_169 : f32 to vector<44x192xf32>
    %207 = arith.select %205, %200, %206 : vector<44x192xi1>, vector<44x192xf32>
    %cst_170 = arith.constant dense<0.000000e+00> : vector<192xf32>
    %208 = vector.multi_reduction <add>, %207, %cst_170 [0] : vector<44x192xf32> to vector<192xf32>
    %209 = vector.shape_cast %208 : vector<192xf32> to vector<1x192xf32>
    %210 = arith.mulf %207, %207 : vector<44x192xf32>
    %cst_171 = arith.constant dense<0.000000e+00> : vector<192xf32>
    %211 = vector.multi_reduction <add>, %210, %cst_171 [0] : vector<44x192xf32> to vector<192xf32>
    %212 = vector.shape_cast %211 : vector<192xf32> to vector<1x192xf32>
    %c0_172 = arith.constant 0 : index
    %c0_173 = arith.constant 0 : index
    %213 = vector.load %arg8[%c0_172, %c0_173] : memref<192x64xf32, #tpu.memory_space<vmem>>, vector<192x64xf32>
    %cst_174 = arith.constant dense<0.000000e+00> : vector<1x64xf32>
    %214 = tpu.matmul %209, %213, %cst_174 {dimension_numbers = #tpu.dot_dimension_numbers<[1], [0], [0], [1], [0, 0, 1, 1], [], []>} : vector<1x192xf32>, vector<192x64xf32>, vector<1x64xf32> -> vector<1x64xf32>
    %cst_175 = arith.constant 1.800000e+01 : f32
    %215 = vector.broadcast %cst_175 : f32 to vector<1x64xf32>
    %216 = arith.divf %214, %215 : vector<1x64xf32>
    %c0_176 = arith.constant 0 : index
    %c0_177 = arith.constant 0 : index
    %217 = vector.load %arg8[%c0_176, %c0_177] : memref<192x64xf32, #tpu.memory_space<vmem>>, vector<192x64xf32>
    %cst_178 = arith.constant dense<0.000000e+00> : vector<1x64xf32>
    %218 = tpu.matmul %212, %217, %cst_178 {dimension_numbers = #tpu.dot_dimension_numbers<[1], [0], [0], [1], [0, 0, 1, 1], [], []>} : vector<1x192xf32>, vector<192x64xf32>, vector<1x64xf32> -> vector<1x64xf32>
    %cst_179 = arith.constant 1.800000e+01 : f32
    %219 = vector.broadcast %cst_179 : f32 to vector<1x64xf32>
    %220 = arith.divf %218, %219 : vector<1x64xf32>
    %221 = arith.mulf %216, %216 : vector<1x64xf32>
    %222 = arith.subf %220, %221 : vector<1x64xf32>
    %cst_180 = arith.constant 0.000000e+00 : f32
    %223 = vector.broadcast %cst_180 : f32 to vector<1x64xf32>
    %224 = arith.maximumf %222, %223 : vector<1x64xf32>
    %c0_181 = arith.constant 0 : index
    %c0_182 = arith.constant 0 : index
    %225 = vector.load %arg14[%c0_181, %c0_182] : memref<1x64xf32, #tpu.memory_space<vmem>>, vector<1x64xf32>
    %cst_183 = arith.constant 9.99999974E-6 : f32
    %226 = vector.broadcast %cst_183 : f32 to vector<1x64xf32>
    %227 = arith.addf %224, %226 : vector<1x64xf32>
    %228 = math.rsqrt %227 : vector<1x64xf32>
    %229 = arith.mulf %225, %228 : vector<1x64xf32>
    %c0_184 = arith.constant 0 : index
    %c0_185 = arith.constant 0 : index
    %230 = vector.load %arg15[%c0_184, %c0_185] : memref<1x64xf32, #tpu.memory_space<vmem>>, vector<1x64xf32>
    %231 = arith.mulf %216, %229 : vector<1x64xf32>
    %232 = arith.subf %230, %231 : vector<1x64xf32>
    %c0_186 = arith.constant 0 : index
    %c0_187 = arith.constant 0 : index
    %233 = vector.load %arg9[%c0_186, %c0_187] : memref<64x192xf32, #tpu.memory_space<vmem>>, vector<64x192xf32>
    %cst_188 = arith.constant dense<0.000000e+00> : vector<1x192xf32>
    %234 = tpu.matmul %229, %233, %cst_188 {dimension_numbers = #tpu.dot_dimension_numbers<[1], [0], [0], [1], [0, 0, 1, 1], [], []>} : vector<1x64xf32>, vector<64x192xf32>, vector<1x192xf32> -> vector<1x192xf32>
    %c0_189 = arith.constant 0 : index
    %c0_190 = arith.constant 0 : index
    %235 = vector.load %arg9[%c0_189, %c0_190] : memref<64x192xf32, #tpu.memory_space<vmem>>, vector<64x192xf32>
    %cst_191 = arith.constant dense<0.000000e+00> : vector<1x192xf32>
    %236 = tpu.matmul %232, %235, %cst_191 {dimension_numbers = #tpu.dot_dimension_numbers<[1], [0], [0], [1], [0, 0, 1, 1], [], []>} : vector<1x64xf32>, vector<64x192xf32>, vector<1x192xf32> -> vector<1x192xf32>
    %237 = vector.broadcast %234 : vector<1x192xf32> to vector<44x192xf32>
    %238 = arith.mulf %200, %237 : vector<44x192xf32>
    %239 = vector.broadcast %236 : vector<1x192xf32> to vector<44x192xf32>
    %240 = arith.addf %238, %239 : vector<44x192xf32>
    %cst_192 = arith.constant 0.000000e+00 : f32
    %241 = vector.broadcast %cst_192 : f32 to vector<44x192xf32>
    %242 = arith.cmpf ogt, %240, %241 : vector<44x192xf32>
    %243 = vector.broadcast %2 : f32 to vector<44x192xf32>
    %244 = arith.mulf %243, %240 : vector<44x192xf32>
    %245 = arith.select %242, %240, %244 : vector<44x192xi1>, vector<44x192xf32>
    %cst_193 = arith.constant 0.000000e+00 : f32
    %246 = vector.broadcast %cst_193 : f32 to vector<44x1xf32>
    %247 = arith.cmpf ogt, %201, %246 : vector<44x1xf32>
    %cst_194 = arith.constant 0.000000e+00 : f32
    %248 = vector.shape_cast %247 : vector<44x1xi1> to vector<44x1xi1>
    %249 = vector.broadcast %248 : vector<44x1xi1> to vector<44x192xi1>
    %250 = vector.broadcast %cst_194 : f32 to vector<44x192xf32>
    %251 = arith.select %249, %245, %250 : vector<44x192xi1>, vector<44x192xf32>
    %c0_195 = arith.constant 0 : index
    %c0_196 = arith.constant 0 : index
    %c0_197 = arith.constant 0 : index
    %252 = vector.load %arg17[%c0_195, %c0_196, %c0_197] : memref<3x2x44xf32, #tpu.memory_space<vmem>>, vector<1x2x44xf32>
    %253 = vector.shape_cast %252 : vector<1x2x44xf32> to vector<2x44xf32>
    %cst_198 = arith.constant dense<0.000000e+00> : vector<2x192xf32>
    %254 = tpu.matmul %253, %251, %cst_198 {dimension_numbers = #tpu.dot_dimension_numbers<[1], [0], [0], [1], [0, 0, 1, 1], [], []>} : vector<2x44xf32>, vector<44x192xf32>, vector<2x192xf32> -> vector<2x192xf32>
    %c0_199 = arith.constant 0 : index
    %c0_200 = arith.constant 0 : index
    %c0_201 = arith.constant 0 : index
    %255 = vector.load %arg18[%c0_199, %c0_200, %c0_201] : memref<3x192x128xf32, #tpu.memory_space<vmem>>, vector<1x192x128xf32>
    %256 = vector.shape_cast %255 : vector<1x192x128xf32> to vector<192x128xf32>
    %cst_202 = arith.constant dense<0.000000e+00> : vector<2x128xf32>
    %257 = tpu.matmul %254, %256, %cst_202 {dimension_numbers = #tpu.dot_dimension_numbers<[1], [0], [0], [1], [0, 0, 1, 1], [], []>} : vector<2x192xf32>, vector<192x128xf32>, vector<2x128xf32> -> vector<2x128xf32>
    %c1_203 = arith.constant 1 : index
    %c0_204 = arith.constant 0 : index
    %c0_205 = arith.constant 0 : index
    %258 = vector.load %arg17[%c1_203, %c0_204, %c0_205] : memref<3x2x44xf32, #tpu.memory_space<vmem>>, vector<1x2x44xf32>
    %259 = vector.shape_cast %258 : vector<1x2x44xf32> to vector<2x44xf32>
    %cst_206 = arith.constant dense<0.000000e+00> : vector<2x192xf32>
    %260 = tpu.matmul %259, %251, %cst_206 {dimension_numbers = #tpu.dot_dimension_numbers<[1], [0], [0], [1], [0, 0, 1, 1], [], []>} : vector<2x44xf32>, vector<44x192xf32>, vector<2x192xf32> -> vector<2x192xf32>
    %c1_207 = arith.constant 1 : index
    %c0_208 = arith.constant 0 : index
    %c0_209 = arith.constant 0 : index
    %261 = vector.load %arg18[%c1_207, %c0_208, %c0_209] : memref<3x192x128xf32, #tpu.memory_space<vmem>>, vector<1x192x128xf32>
    %262 = vector.shape_cast %261 : vector<1x192x128xf32> to vector<192x128xf32>
    %cst_210 = arith.constant dense<0.000000e+00> : vector<2x128xf32>
    %263 = tpu.matmul %260, %262, %cst_210 {dimension_numbers = #tpu.dot_dimension_numbers<[1], [0], [0], [1], [0, 0, 1, 1], [], []>} : vector<2x192xf32>, vector<192x128xf32>, vector<2x128xf32> -> vector<2x128xf32>
    %264 = arith.addf %257, %263 : vector<2x128xf32>
    %c2_211 = arith.constant 2 : index
    %c0_212 = arith.constant 0 : index
    %c0_213 = arith.constant 0 : index
    %265 = vector.load %arg17[%c2_211, %c0_212, %c0_213] : memref<3x2x44xf32, #tpu.memory_space<vmem>>, vector<1x2x44xf32>
    %266 = vector.shape_cast %265 : vector<1x2x44xf32> to vector<2x44xf32>
    %cst_214 = arith.constant dense<0.000000e+00> : vector<2x192xf32>
    %267 = tpu.matmul %266, %251, %cst_214 {dimension_numbers = #tpu.dot_dimension_numbers<[1], [0], [0], [1], [0, 0, 1, 1], [], []>} : vector<2x44xf32>, vector<44x192xf32>, vector<2x192xf32> -> vector<2x192xf32>
    %c2_215 = arith.constant 2 : index
    %c0_216 = arith.constant 0 : index
    %c0_217 = arith.constant 0 : index
    %268 = vector.load %arg18[%c2_215, %c0_216, %c0_217] : memref<3x192x128xf32, #tpu.memory_space<vmem>>, vector<1x192x128xf32>
    %269 = vector.shape_cast %268 : vector<1x192x128xf32> to vector<192x128xf32>
    %cst_218 = arith.constant dense<0.000000e+00> : vector<2x128xf32>
    %270 = tpu.matmul %267, %269, %cst_218 {dimension_numbers = #tpu.dot_dimension_numbers<[1], [0], [0], [1], [0, 0, 1, 1], [], []>} : vector<2x192xf32>, vector<192x128xf32>, vector<2x128xf32> -> vector<2x128xf32>
    %271 = arith.addf %264, %270 : vector<2x128xf32>
    %c0_219 = arith.constant 0 : index
    %c0_220 = arith.constant 0 : index
    %272 = vector.load %arg19[%c0_219, %c0_220] : memref<1x128xf32, #tpu.memory_space<vmem>>, vector<1x128xf32>
    %273 = vector.broadcast %272 : vector<1x128xf32> to vector<2x128xf32>
    %274 = arith.addf %271, %273 : vector<2x128xf32>
    %cst_221 = arith.constant 0.000000e+00 : f32
    %275 = vector.broadcast %cst_221 : f32 to vector<2x128xf32>
    %276 = arith.cmpf ogt, %274, %275 : vector<2x128xf32>
    %277 = vector.broadcast %3 : f32 to vector<2x128xf32>
    %278 = arith.mulf %277, %274 : vector<2x128xf32>
    %279 = arith.select %276, %274, %278 : vector<2x128xi1>, vector<2x128xf32>
    %c0_222 = arith.constant 0 : index
    %c0_223 = arith.constant 0 : index
    %280 = vector.load %arg20[%c0_222, %c0_223] : memref<128x128xf32, #tpu.memory_space<vmem>>, vector<128x128xf32>
    %cst_224 = arith.constant dense<0.000000e+00> : vector<2x128xf32>
    %281 = tpu.matmul %279, %280, %cst_224 {dimension_numbers = #tpu.dot_dimension_numbers<[1], [0], [0], [1], [0, 0, 1, 1], [], []>} : vector<2x128xf32>, vector<128x128xf32>, vector<2x128xf32> -> vector<2x128xf32>
    %c0_225 = arith.constant 0 : index
    %c0_226 = arith.constant 0 : index
    %282 = vector.load %arg21[%c0_225, %c0_226] : memref<1x128xf32, #tpu.memory_space<vmem>>, vector<1x128xf32>
    %283 = vector.broadcast %282 : vector<1x128xf32> to vector<2x128xf32>
    %284 = arith.addf %281, %283 : vector<2x128xf32>
    %285 = tpu.iota {dimensions = array<i32: 1>} : vector<2x128xi32>
    %c0_i32 = arith.constant 0 : i32
    %286 = vector.broadcast %c0_i32 : i32 to vector<2x128xi32>
    %287 = arith.cmpi eq, %285, %286 : vector<2x128xi32>
    %288 = arith.negf %284 : vector<2x128xf32>
    %289 = math.exp %288 : vector<2x128xf32>
    %cst_227 = arith.constant 1.000000e+00 : f32
    %290 = vector.broadcast %cst_227 : f32 to vector<2x128xf32>
    %291 = arith.addf %290, %289 : vector<2x128xf32>
    %292 = arith.divf %290, %291 : vector<2x128xf32>
    %293 = arith.select %287, %292, %284 : vector<2x128xi1>, vector<2x128xf32>
    %c0_228 = arith.constant 0 : index
    %c0_229 = arith.constant 0 : index
    %294 = vector.load %arg23[%c0_228, %c0_229] : memref<2x128xf32, #tpu.memory_space<vmem>>, vector<2x128xf32>
    tpu.vector_store %arg23[%c0_228, %c0_229], %293 {strides = array<i32>} : memref<2x128xf32, #tpu.memory_space<vmem>>, vector<2x128xf32>,
    return
  }
}

</mosaic_0001>

<bundles_post_ra>
// kernel: rnet_forward.1
= control target key start
LH: loop header
LB: loop body
LE: loop exit
PB: predicated region body
PF: predicated region fallthrough
CT: control target
= control target key end

     0   :  { %s21608_s0 = inlined_call_operand.vmem [shape: f32[48,72], index: 0, kind: input, shape index: {}]   ;;  %s21609_s1 = inlined_call_operand.vmem [shape: bf16[3,72,616], index: 1, kind: input, shape index: {}]   ;;  %s21610_s2 = inlined_call_operand.vmem [shape: bf16[3,616,432], index: 2, kind: input, shape index: {}]   ;;  %s21611_s3 = inlined_call_operand.vmem [shape: bf16[2,432,192], index: 3, kind: input, shape index: {}]   ;;  %s21612_s4 = inlined_call_operand.vmem [shape: f32[616,28], index: 4, kind: input, shape index: {}]   ;;  %s21613_s5 = inlined_call_operand.vmem [shape: f32[28,616], index: 5, kind: input, shape index: {}]   ;;  %s21614_s6 = inlined_call_operand.vmem [shape: f32[432,48], index: 6, kind: input, shape index: {}]   ;;  %s21615_s7 = inlined_call_operand.vmem [shape: f32[48,432], index: 7, kind: input, shape index: {}]   ;;  %s21616_s8 = inlined_call_operand.vmem [shape: f32[192,64], index: 8, kind: input, shape index: {}]   ;;  %s21617_s9 = inlined_call_operand.vmem [shape: f32[64,192], index: 9, kind: input, shape index: {}]   ;;  %s21618_s10 = inlined_call_operand.vmem [shape: f32[1,28], index: 10, kind: input, shape index: {}]   ;;  %s21619_s11 = inlined_call_operand.vmem [shape: f32[1,28], index: 11, kind: input, shape index: {}]   ;;  %s21620_s12 = inlined_call_operand.vmem [shape: f32[1,48], index: 12, kind: input, shape index: {}]   ;;  %s21621_s13 = inlined_call_operand.vmem [shape: f32[1,48], index: 13, kind: input, shape index: {}]   ;;  %s21622_s14 = inlined_call_operand.vmem [shape: f32[1,64], index: 14, kind: input, shape index: {}]   ;;  %s21623_s15 = inlined_call_operand.vmem [shape: f32[1,64], index: 15, kind: input, shape index: {}]   ;;  %s21624_s16 = inlined_call_operand.vmem [shape: f32[3,48,1], index: 16, kind: input, shape index: {}]   ;;  %s21625_s17 = inlined_call_operand.vmem [shape: f32[3,2,44], index: 17, kind: input, shape index: {}]   ;;  %s21626_s18 = inlined_call_operand.vmem [shape: f32[3,192,128], index: 18, kind: input, shape index: {}]   ;;  %s21627_s19 = inlined_call_operand.vmem [shape: f32[1,128], index: 19, kind: input, shape index: {}]   ;;  %s21628_s20 = inlined_call_operand.vmem [shape: f32[128,128], index: 20, kind: input, shape index: {}]   ;;  %s21629_s21 = inlined_call_operand.vmem [shape: f32[1,128], index: 21, kind: input, shape index: {}]   ;;  %s21630_s22 = inlined_call_operand.vmem [shape: f32[4], index: 22, kind: input, shape index: {}]   ;;  %s21631_s23 = inlined_call_operand.vmem [shape: f32[2,128], index: 23, kind: output, shape index: {}]  }
   0x1   :  { %21703 = sst [smem:[#allocation37_spill]] %s21608_s0 }
   0x2   :  { %21704 = sst [smem:[#allocation38_spill]] %s21609_s1 }
   0x3   :  { %21705 = sst [smem:[#allocation39_spill]] %s21610_s2 }
   0x4   :  { %21706 = sst [smem:[#allocation40_spill]] %s21611_s3 }
   0x5   :  { %21707 = sst [smem:[#allocation41_spill]] %s21612_s4 }
   0x6   :  { %21708 = sst [smem:[#allocation42_spill]] %s21613_s5 }
   0x7   :  { %21709 = sst [smem:[#allocation43_spill]] %s21614_s6 }
   0x8   :  { %21710 = sst [smem:[#allocation44_spill]] %s21615_s7 }
   0x9   :  { %28 = vsyncpa [#allocation7], 0  ;;  %s79_s24 = sshll.u32 %s21630_s22, 4  ;;  %s80_s24 = int_to_ptr.vmem [resolvable:$true] %s79_s24 }
   0xa   :  { %s15579_s25 = scalar_lea.vmem %s80_s24, 16  ;;  %p15584_p1 = scmp.lt.s32.totalorder %s80_s24, %s80_s24 }
   0xb   :  { %p15580_p0 = scmp.ne.s32.totalorder %s80_s24, %s15579_s25  ;;  %p15585_p2 = scmp.lt.s32.totalorder %s15579_s25, %s15579_s25 }
   0xd   :  { %p15586_p3 = por %p15585_p2, %p15584_p1 }
   0xf   :  { %p15587_p4 = pnand %p15586_p3, %p15580_p0 }
  0x11   :  { %15590 = shalt.err (!%p15587_p4)
}
  0x12   :  { %s15593_s5 = smov [#allocation6]  }
  0x13   :  { %82 = dma.vmem_to_smem %s80_s24, 16, %s15593_s5, [#allocation7]  }
  0x14   :  { %15591 = dma.done.wait [#allocation7], 16  }
  0x15   :  { %15592 = vsyncadd [#allocation7], 4294967280 }
  0x16   :  { %86 = sfence }
  0x17   :  { %s21711_s2 = sld [smem:[#allocation38_spill]]  ;;  %v21640_v2 = vmov 0   ;;  %vm21664_vm0 = vcmask 1043456   ;;  %s21712_s6 = sld [smem:[#allocation37_spill]]  ;;  %vm288_vm1 = vcmask 588800   ;;  %v21644_v28 = vmov 0.0  }
  0x18   :  { %346 = vmatprep.mubr.bf16.mxu0 %v21640_v2  ;;  %409 = vmatprep.mubr.bf16.mxu1 %v21640_v2  ;;  %vm21662_vm2 = vmmov 0   ;;  %s21713_s26 = sld [smem:[#allocation41_spill]]  ;;  %vm21663_vm15 = vcmask 1045504   ;;  %s21739_s22 = sld [smem:[#allocation39_spill]] }
  0x19   :  { %14600 = vset.pattern.permute.xlu0 %v21640_v2  ;;  %14601 = vset.pattern.permute.xlu1 %v21640_v2  ;;  %s15601_s1 = smov 28   ;;  %s21850_s29 = sld [smem:[#allocation40_spill]] }
  0x1a   :  { %s15603_s4 = smov 32  }
  0x1d   :  { %v14602_v0 = vld [vmem:[%s21711_s2 + $0xb8] ss:$20 sps:$4 sm:$0xff]   ;;  %v14604_v1 = vld [vmem:[%s21711_s2 + $0xb4] ss:$20 sps:$4 sm:$0xff]   ;;  %v14607_v4 = vld [vmem:[%s21711_s2 + $0xdc] ss:$20 sps:$4 sm:$0xff]  }
  0x1e   :  { %314 = vmatprep.subr.bf16.mxu0 %v14602_v0  ;;  %v14605_v3 = vld [vmem:[%s21711_s2 + $0xe0] ss:$20 sps:$4 sm:$0xff]   ;;  %v14608_v5 = vld [vmem:[%s21711_s2 + $0x108] ss:$20 sps:$4 sm:$0xff]   ;;  %v14610_v6 = vld [vmem:[%s21711_s2 + $0x104] ss:$20 sps:$4 sm:$0xff]  }
  0x1f   :  { %315 = vmatpush1.bf16.msra.mxu0 %v14604_v1  ;;  %v14614_v7 = vld [vmem:[%s21711_s2 + $0xc0] ss:$20 sps:$4 sm:$0xff]   ;;  %v14617_v8 = vld [vmem:[%s21711_s2 + $0xbc] ss:$20 sps:$4 sm:$0xff]   ;;  %v14621_v12 = vld [vmem:[%s21711_s2 + $0xe4] ss:$20 sps:$4 sm:$0xff]  }
  0x20   :  { %316 = vmatprep.subr.bf16.mxu0 %v14605_v3  ;;  %v14619_v9 = vld [vmem:[%s21711_s2 + $0xe8] ss:$20 sps:$4 sm:$0xff]   ;;  %v14611_v10 = vld [vmem:[%s21711_s2 + $0x130] ss:$20 sps:$4 sm:$0xff]   ;;  %377 = vmatprep.subr.bf16.mxu1 %v14614_v7  ;;  %v11892_v11 = vld [vmem:[%s21711_s2 + $0x154] sm:$0xff] }
  0x21   :  { %378 = vmatpush1.bf16.msra.mxu1 %v14617_v8  ;;  %v14623_v13 = vld [vmem:[%s21711_s2 + $0x110] ss:$20 sps:$4 sm:$0xff]   ;;  %v14613_v14 = vld [vmem:[%s21711_s2 + $0x12c] ss:$20 sps:$4 sm:$0xff]   ;;  %v11916_v15 = vcombine.high %v11892_v11, %v11892_v11  ;;  %v11915_v16 = vcombine.low %v11892_v11, %v11892_v11  ;;  %v14629_v23 = vld [vmem:[%s21711_s2 + $0x134] ss:$20 sps:$4 sm:$0xff]  }
  0x22   :  { %379 = vmatprep.subr.bf16.mxu1 %v14619_v9  ;;  %v14625_v17 = vld [vmem:[%s21711_s2 + $0x10c] ss:$20 sps:$4 sm:$0xff]   ;;  %v14622_v27 = vld [vmem:[%s21711_s2 + $0xc4] ss:$20 sps:$4 sm:$0xff]   ;;  %v14634_v34 = vld [vmem:[%s21711_s2 + $0x8] ss:$20 sps:$4 sm:$0xff]  }
  0x23   :  { %317 = vmatpush1.bf16.msra.mxu0 %v14607_v4  ;;  %v134_v18 = vld [vmem:[%s21712_s6 + $0x1] sm:$0xff]  ;;  %v14627_v19 = vld [vmem:[%s21711_s2 + $0x138] ss:$20 sps:$4 sm:$0xff]   ;;  %v300_v22 = vsel %vm21664_vm0, %v11915_v16, 0  ;;  %v14646_v39 = vld [vmem:[%s21711_s2 + $0x5c] ss:$20 sps:$4 sm:$0xff]  }
  0x24   :  { %318 = vmatprep.subr.bf16.mxu0 %v14608_v5  ;;  %v135_v20 = vld [vmem:[%s21712_s6 + $0x9] sm:$0xff]  ;;  %v11893_v21 = vld [vmem:[%s21711_s2 + $0x15c] sm:$0xff]  ;;  %v136_v30 = vld [vmem:[%s21712_s6 + $0x11] sm:$0xff] }
  0x25   :  { %380 = vmatpush1.bf16.msra.mxu1 %v14621_v12  ;;  %v15793_v24 = vpack.c.bf16 %v135_v20, %v134_v18  ;;  %v11918_v25 = vcombine.high %v11893_v21, %v11893_v21  ;;  %v11917_v26 = vcombine.low %v11893_v21, %v11893_v21  ;;  %v14626_v29 = vld [vmem:[%s21711_s2 + $0xec] ss:$20 sps:$4 sm:$0xff]   ;;  %v14640_v36 = vld [vmem:[%s21711_s2 + $0x34] ss:$20 sps:$4 sm:$0xff]   ;;  %v14638_v38 = vld [vmem:[%s21711_s2 + $0x30] ss:$20 sps:$4 sm:$0xff]  }
  0x26   :  { %381 = vmatprep.subr.bf16.mxu1 %v14623_v13  ;;  %v14636_v32 = vld [vmem:[%s21711_s2 + $0xc] ss:$20 sps:$4 sm:$0xff]   ;;  %v14631_v37 = vld [vmem:[%s21711_s2 + $0x114] ss:$20 sps:$4 sm:$0xff]   ;;  %v14633_v42 = vld [vmem:[%s21711_s2 + $0x13c] ss:$20 sps:$4 sm:$0xff]  }
  0x27   :  { %319 = vmatpush1.bf16.msra.mxu0 %v14610_v6  ;;  %v306_v31 = vsel %vm21664_vm0, %v11917_v26, 0  ;;  %v137_v33 = vld [vmem:[%s21712_s6 + $0x19] sm:$0xff]  ;;  %v138_v40 = vld [vmem:[%s21712_s6 + $0x21] sm:$0xff]  ;;  %v139_v41 = vld [vmem:[%s21712_s6 + $0x29] sm:$0x3f] }
  0x28   :  { %320 = vmatprep.subr.bf16.mxu0 %v14611_v10  ;;  %v15820_v35 = vpack.c.bf16 %v137_v33, %v136_v30  ;;  %v14637_v43 = vld [vmem:[%s21711_s2 + $0x164] ss:$0 sps:$4 sm:$0xff]   ;;  %v14644_v44 = vld [vmem:[%s21711_s2 + $0x58] ss:$20 sps:$4 sm:$0xff]   ;;  %v15857_v45 = vpack.c.bf16 %v139_v41, %v138_v40  ;;  %v14650_v50 = vld [vmem:[%s21711_s2 + $0x80] ss:$20 sps:$4 sm:$0xff]  }
  0x29   :  { %382 = vmatpush1.bf16.msra.mxu1 %v14625_v17  ;;  %v14652_v46 = vld [vmem:[%s21711_s2 + $0x84] ss:$20 sps:$4 sm:$0xff]   ;;  %v132_v47 = vld [vmem:[%s21711_s2 + $0xa8] sm:$0xff]  ;;  %v312_v48 = vsel %vm21664_vm0, %v14637_v43, 0  ;;  %v14641_v55 = vld [vmem:[%s21711_s2] ss:$20 sps:$4 sm:$0xff]  }
  0x2a   :  { %383 = vmatprep.subr.bf16.mxu1 %v14627_v19  ;;  %v14643_v49 = vld [vmem:[%s21711_s2 + $0x4] ss:$20 sps:$4 sm:$0xff]   ;;  %v11954_v51 = vcombine.high %v132_v47, %v132_v47  ;;  %v11953_v52 = vcombine.low %v132_v47, %v132_v47  ;;  %v14663_v54 = vld [vmem:[%s21711_s2 + $0x174] ss:$20 sps:$4 sm:$0xff]   ;;  %v14649_v56 = vld [vmem:[%s21711_s2 + $0x2c] ss:$20 sps:$4 sm:$0xff]  }
  0x2b   :  { %321 = vmatpush1.bf16.msra.mxu0 %v14613_v14  ;;  %v98_v57 = vld [vmem:[%s21712_s6] sm:$0xff]  ;;  %v99_v58 = vld [vmem:[%s21712_s6 + $0x8] sm:$0xff]  ;;  %v14660_v0 = vld [vmem:[%s21711_s2 + $0x7c] ss:$20 sps:$4 sm:$0xff]  }
  0x2c   :  { %11920 = vmatprep.subr.msk.bf16.mxu0 %vm21664_vm0, %v11916_v15  ;;  %v630_v53 = vsel %vm21664_vm0, %v11953_v52, 0  ;;  %v14647_v59 = vld [vmem:[%s21711_s2 + $0x28] ss:$20 sps:$4 sm:$0xff]   ;;  %v15910_v61 = vpack.c.bf16 %v99_v58, %v98_v57  ;;  %v14653_v62 = vld [vmem:[%s21711_s2 + $0x50] ss:$20 sps:$4 sm:$0xff]  }
  0x2d   :  { %384 = vmatpush1.bf16.msra.mxu1 %v14629_v23  ;;  %v14655_v60 = vld [vmem:[%s21711_s2 + $0x54] ss:$20 sps:$4 sm:$0xff]   ;;  %v14661_v63 = vld [vmem:[%s21711_s2 + $0x170] ss:$20 sps:$4 sm:$0xff]   ;;  %v101_v5 = vld [vmem:[%s21712_s6 + $0x18] sm:$0xff] }
  0x2e   :  { %11924 = vmatprep.subr.msk.bf16.mxu1 %vm21664_vm0, %v11918_v25  ;;  %v14668_v1 = vld [vmem:[%s21711_s2 + $0x19c] ss:$20 sps:$4 sm:$0xff]   ;;  %v131_v3 = vld [vmem:[%s21711_s2 + $0xa0] sm:$0xff]  ;;  %v14666_v7 = vld [vmem:[%s21711_s2 + $0x198] ss:$20 sps:$4 sm:$0xff]  }
  0x2f   :  { %323 = vmatpush1.bf16.msra.mxu0 %v300_v22  ;;  %v100_v4 = vld [vmem:[%s21712_s6 + $0x10] sm:$0xff]  ;;  %v92_v6 = vld [vmem:[%s21624_s16] sm:$0xff]  ;;  %v14658_v8 = vld [vmem:[%s21711_s2 + $0x78] ss:$20 sps:$4 sm:$0xff]   ;;  %v11952_v14 = vcombine.high %v131_v3, %v131_v3  ;;  %v11951_v15 = vcombine.low %v131_v3, %v131_v3 }
  0x30   :  { %13422 = vmatprep.subr.bf16.mxu0 %v21644_v28  ;;  %v14672_v9 = vld [vmem:[%s21711_s2 + $0x1c4] ss:$20 sps:$4 sm:$0xff]   ;;  %vm1212_vm3 = vcmp.gt.f32.partialorder %v92_v6, 0.0  ;;  %v94_v10 = vld [vmem:[%s21624_s16 + $0x10] sm:$0xff]  ;;  %v93_v13 = vld [vmem:[%s21624_s16 + $0x8] sm:$0xff]  ;;  %v15962_v16 = vpack.c.bf16 %v101_v5, %v100_v4 }
  0x31   :  { %386 = vmatpush1.bf16.msra.mxu1 %v306_v31  ;;  %v14670_v11 = vld [vmem:[%s21711_s2 + $0x1c0] ss:$20 sps:$4 sm:$0xff]   ;;  %v1218_v12 = vsel %vm1212_vm3, 1, %v21640_v2  ;;  %vm1214_vm4 = vcmp.gt.f32.partialorder %v94_v10, 0.0  ;;  %v95_v19 = vld [vmem:[%s21624_s16 + $0x18] sm:$0xff]  ;;  %vm1213_vm5 = vcmp.gt.f32.partialorder %v93_v13, 0.0 }
  0x32   :  { %11921 = vmatmul.mubr.msk.bf16.vlgmr.msra.gmra.mrb[0].mxu0 %vm288_vm1, %v15793_v24  ;;  %701 = vmatprep.subr.bf16.mxu1 %v14636_v32  ;;  %v14676_v17 = vld [vmem:[%s21711_s2 + $0x1ec] ss:$20 sps:$4 sm:$0xff]   ;;  %v1220_v18 = vsel %vm1214_vm4, 1, %v21640_v2  ;;  %v11992_v20 = vld [vmem:[%s21711_s2 + $0x210] sm:$0xff]  ;;  %vm1215_vm6 = vcmp.gt.f32.partialorder %v95_v19, 0.0  ;;  %v624_v26 = vsel %vm21664_vm0, %v11951_v15, 0 }
  0x33   :  { %13423 = vmatpush3.bf16.msra.mxu0 %v14622_v27  ;;  %356 = vmatprep.mubr.bf16.mxu0 %v21640_v2  ;;  %v96_v21 = vld [vmem:[%s21624_s16 + $0x20] sm:$0xff]  ;;  %v103_v23 = vld [vmem:[%s21712_s6 + $0x28] sm:$0x3f]  ;;  %v1219_v27 = vsel %vm1213_vm5, 1, %v21640_v2  ;;  %v12016_v30 = vcombine.low %v11992_v20, %v11992_v20  ;;  %v1221_v31 = vsel %vm1215_vm6, 1, %v21640_v2  ;;  %v1460_v13 = vld [vmem:[%s21713_s26 + $0x98] sm:$0xff] }
  0x34   :  { %13424 = vmatprep.subr.bf16.mxu0 %v21644_v28  ;;  %11925 = vmatmul.mubr.msk.bf16.vlgmr.msra.gmra.mrb[0].mxu1 %vm288_vm1, %v15793_v24  ;;  %v102_v22 = vld [vmem:[%s21712_s6 + $0x20] sm:$0xff]  ;;  %v97_v25 = vld [vmem:[%s21624_s16 + $0x28] sm:$0xff]  ;;  %vm1216_vm7 = vcmp.gt.f32.partialorder %v96_v21, 0.0  ;;  %v14700_v4 = vld [vmem:[%s21711_s2 + $0x218] ss:$0 sps:$4 sm:$0xff]   ;;  %vm1337_vm3 = vcmask 848896  }
  0x35   :  { %702 = vmatpush1.bf16.msra.mxu1 %v14634_v34  ;;  %419 = vmatprep.mubr.bf16.mxu1 %v21640_v2  ;;  %v16000_v32 = vpack.c.bf16 %v103_v23, %v102_v22  ;;  %vm1217_vm8 = vcmp.gt.f32.partialorder %v97_v25, 0.0  ;;  %v14669_v33 = vld [vmem:[%s21711_s2 + $0x10] ss:$20 sps:$4 sm:$0xff]   ;;  %v1222_v34 = vsel %vm1216_vm7, 1, %v21640_v2  ;;  %v14677_v41 = vld [vmem:[%s21711_s2 + $0x60] ss:$20 sps:$4 sm:$0xff]  }
  0x36   :  { %703 = vmatprep.subr.bf16.mxu1 %v14640_v36  ;;  %1225 = vperm.xlu0 %14600, %v1218_v12   ;;  %v821_v36 = vld [vmem:[%s21712_s6 + $0x2] sm:$0xff]  ;;  %v824_v43 = vld [vmem:[%s21712_s6 + $0x1a] sm:$0xff]  ;;  %v997_v5 = vsel %vm21664_vm0, %v14700_v4, 0  ;;  %v1459_v12 = vld [vmem:[%s21713_s26 + $0x90] sm:$0xff]  ;;  %vm15598_vm4 = vmmov 1   ;;  %vm21665_vm6 = vcmask 228352  }
  0x37   :  { %13425 = vmatpush3.bf16.msra.mxu0 %v14626_v29  ;;  %1231 = vperm.xlu1 %14601, %v1220_v18   ;;  %v12017_v29 = vcombine.high %v11992_v20, %v11992_v20  ;;  %v14684_v47 = vld [vmem:[%s21711_s2 + $0x16c] ss:$20 sps:$4 sm:$0xff]   ;;  %v14682_v52 = vld [vmem:[%s21711_s2 + $0x168] ss:$20 sps:$4 sm:$0xff]   ;;  %v14693_v57 = vld [vmem:[%s21711_s2 + $0x1e4] ss:$20 sps:$4 sm:$0xff]  }
  0x38   :  { %13426 = vmatprep.subr.bf16.mxu0 %v21644_v28  ;;  %v11991_v58 = vld [vmem:[%s21711_s2 + $0x208] sm:$0xff]  ;;  %v14699_v3 = vld [vmem:[%s21711_s2 + $0x1f0] ss:$20 sps:$4 sm:$0xff]   ;;  %v1464_v25 = vld [vmem:[%s21713_s26 + $0xb8] sm:$0xff]  ;;  %vm2678_vm7 = vcmask 850950  }
  0x39   :  { %704 = vmatpush1.bf16.msra.mxu1 %v14638_v38  ;;  %v1223_v38 = vsel %vm1217_vm8, 1, %v21640_v2  ;;  %v1457_v6 = vld [vmem:[%s21713_s26 + $0x80] sm:$0xff]  ;;  %v1442_v10 = vld [vmem:[%s21713_s26 + $0x8] sm:$0xff]  ;;  %v1443_v15 = vld [vmem:[%s21713_s26 + $0x10] sm:$0xff] }
  0x3a   :  { %11922 = vmatmul.mubr.msk.bf16.gmra.mrb[4].mxu0 %vm288_vm1, %v15820_v35  ;;  %705 = vmatprep.subr.bf16.mxu1 %v14646_v39  ;;  %v14673_v39 = vld [vmem:[%s21711_s2 + $0x38] ss:$20 sps:$4 sm:$0xff]   ;;  %v1461_v18 = vld [vmem:[%s21713_s26 + $0xa0] sm:$0xff]  ;;  %vm16717_vm5 = vmpackc.low %vm21664_vm0, %vm15598_vm4 }
  0x3b   :  { %13427 = vmatpush3.bf16.msra.mxu0 %v14631_v37  ;;  %366 = vmatprep.mubr.bf16.mxu0 %v21640_v2  ;;  %v822_v37 = vld [vmem:[%s21712_s6 + $0xa] sm:$0xff]  ;;  %v1445_v21 = vld [vmem:[%s21713_s26 + $0x20] sm:$0xff] }
  0x3c   :  { %13428 = vmatprep.subr.bf16.mxu0 %v21644_v28  ;;  %11926 = vmatmul.mubr.msk.bf16.gmra.mrb[4].mxu1 %vm288_vm1, %v15820_v35  ;;  %v16025_v40 = vpack.c.bf16 %v822_v37, %v821_v36  ;;  %v1462_v19 = vld [vmem:[%s21713_s26 + $0xa8] sm:$0xff]  ;;  %v1467_v37 = vld [vmem:[%s21713_s26 + $0xd0] sm:$0xff] }
  0x3d   :  { %706 = vmatpush1.bf16.msra.mxu1 %v14644_v44  ;;  %429 = vmatprep.mubr.bf16.mxu1 %v21640_v2  ;;  %v14680_v44 = vld [vmem:[%s21711_s2 + $0x88] ss:$20 sps:$4 sm:$0xff]   ;;  %v13611_v20 = vpack.c.bf16 %v1462_v19, %v1461_v18 }
  0x3e   :  { %707 = vmatprep.subr.bf16.mxu1 %v14652_v46  ;;  %1228 = vperm.xlu0 %14600, %v1219_v27   ;;  %v1446_v22 = vld [vmem:[%s21713_s26 + $0x28] sm:$0xff]  ;;  %v1447_v27 = vld [vmem:[%s21713_s26 + $0x30] sm:$0xff] }
  0x3f   :  { %13429 = vmatpush3.bf16.msra.mxu0 %v14633_v42  ;;  %1234 = vperm.xlu1 %14601, %v1221_v31   ;;  %v823_v42 = vld [vmem:[%s21712_s6 + $0x12] sm:$0xff]  ;;  %v13613_v23 = vpack.c.bf16 %v1446_v22, %v1445_v21  ;;  %v1465_v31 = vld [vmem:[%s21713_s26 + $0xc0] sm:$0xff] }
  0x40   :  { %13430 = vmatprep.subr.bf16.mxu0 %v21644_v28  ;;  %v16050_v46 = vpack.c.bf16 %v824_v43, %v823_v42  ;;  %v1469_v43 = vld [vmem:[%s21713_s26 + $0xe0] sm:$0xff] }
  0x41   :  { %708 = vmatpush1.bf16.msra.mxu1 %v14650_v50 }
  0x42   :  { %11923 = vmatmul.mubr.msk.bf16.gmra.mrb[8].mxu0 %vm288_vm1, %v15857_v45  ;;  %11960 = vmatprep.subr.msk.bf16.mxu1 %vm21664_vm0, %v11954_v51 }
  0x43   :  { %13431 = vmatpush3.bf16.msra.mxu0 %v312_v48  ;;  %13432 = vmatprep.mubr.msk.bf16.mxu0 %vm21662_vm2, %v21644_v28  ;;  %v825_v48 = vld [vmem:[%s21712_s6 + $0x22] sm:$0xff] }
  0x44   :  { %638 = vmatprep.subr.bf16.mxu0 %v14643_v49  ;;  %11927 = vmatmul.mubr.msk.bf16.gmra.mrb[8].mxu1 %vm288_vm1, %v15857_v45  ;;  %v826_v49 = vld [vmem:[%s21712_s6 + $0x2a] sm:$0x3f]  ;;  %s21726_s6 = sld [smem:[#allocation42_spill]] }
  0x45   :  { %710 = vmatpush1.bf16.msra.mxu1 %v630_v53  ;;  %733 = vmatprep.mubr.bf16.mxu1 %v21640_v2  ;;  %v829_v51 = vpack.c.bf16 %v826_v49, %v825_v48  ;;  %v14687_v53 = vld [vmem:[%s21711_s2 + $0x194] ss:$20 sps:$4 sm:$0xff]  }
  0x46   :  { %1062 = vmatprep.subr.bf16.mxu1 %v14663_v54  ;;  %1237 = vperm.xlu0 %14600, %v1222_v34   ;;  %v14685_v54 = vld [vmem:[%s21711_s2 + $0x190] ss:$20 sps:$4 sm:$0xff]  }
  0x47   :  { %1240 = vperm.xlu1 %14601, %v1223_v38   ;;  %v1449_v34 = vld [vmem:[%s21713_s26 + $0x40] sm:$0xff]  ;;  %v1468_v38 = vld [vmem:[%s21713_s26 + $0xd8] sm:$0xff]  ;;  %v1471_v49 = vld [vmem:[%s21713_s26 + $0xf0] sm:$0xff] }
  0x4a   :  { %13433 = vmatmul.mubr.msk.bf16.vlgmr.msra.gmra.mrb[12].mxu0 %vm288_vm1, %v15793_v24  ;;  %v14674_v24 = vld [vmem:[%s21711_s2 + $0x1e8] ss:$20 sps:$4 sm:$0xff]  }
  0x4b   :  { %639 = vmatpush1.bf16.msra.mxu0 %v14641_v55  ;;  %13436 = vmatprep.mubr.msk.bf16.mxu0 %vm21662_vm2, %v21644_v28  ;;  %v14690_v55 = vld [vmem:[%s21711_s2 + $0x1bc] ss:$20 sps:$4 sm:$0xff]  }
  0x4c   :  { %640 = vmatprep.subr.bf16.mxu0 %v14649_v56  ;;  %11961 = vmatmul.mubr.msk.bf16.vlgmr.msra.gmra.mrb[0].mxu1 %vm288_vm1, %v15910_v61  ;;  %v14688_v56 = vld [vmem:[%s21711_s2 + $0x1b8] ss:$20 sps:$4 sm:$0xff]  }
  0x4d   :  { %1063 = vmatpush1.bf16.msra.mxu1 %v14661_v63  ;;  %743 = vmatprep.mubr.bf16.mxu1 %v21640_v2  ;;  %v14696_v63 = vld [vmem:[%s21711_s2 + $0x178] ss:$20 sps:$4 sm:$0xff]  }
  0x4e   :  { %1064 = vmatprep.subr.bf16.mxu1 %v14668_v1  ;;  %v14698_v1 = vld [vmem:[%s21711_s2 + $0x1c8] ss:$20 sps:$4 sm:$0xff]  }
  0x4f   :  { %641 = vmatpush1.bf16.msra.mxu0 %v14647_v59  ;;  %v14691_v59 = vld [vmem:[%s21711_s2 + $0x1e0] ss:$20 sps:$4 sm:$0xff]  }
  0x50   :  { %642 = vmatprep.subr.bf16.mxu0 %v14655_v60  ;;  %v12015_v60 = vcombine.high %v11991_v58, %v11991_v58 }
  0x51   :  { %1065 = vmatpush1.bf16.msra.mxu1 %v14666_v7  ;;  %v1458_v7 = vld [vmem:[%s21713_s26 + $0x88] sm:$0xff] }
  0x52   :  { %13437 = vmatmul.mubr.msk.bf16.gmra.mrb[16].mxu0 %vm288_vm1, %v15820_v35  ;;  %1066 = vmatprep.subr.bf16.mxu1 %v14672_v9  ;;  %v991_v35 = vsel %vm21664_vm0, %v12016_v30, 0  ;;  %v1441_v9 = vld [vmem:[%s21713_s26] sm:$0xff] }
  0x53   :  { %643 = vmatpush1.bf16.msra.mxu0 %v14653_v62  ;;  %13440 = vmatprep.mubr.msk.bf16.mxu0 %vm21662_vm2, %v21644_v28 }
  0x54   :  { %644 = vmatprep.subr.bf16.mxu0 %v14660_v0  ;;  %11962 = vmatmul.mubr.msk.bf16.gmra.mrb[4].mxu1 %vm288_vm1, %v15962_v16  ;;  %v14697_v0 = vld [vmem:[%s21711_s2 + $0x1a0] ss:$20 sps:$4 sm:$0xff]  }
  0x55   :  { %1067 = vmatpush1.bf16.msra.mxu1 %v14670_v11  ;;  %753 = vmatprep.mubr.bf16.mxu1 %v21640_v2  ;;  %v13605_v11 = vpack.c.bf16 %v1442_v10, %v1441_v9 }
  0x56   :  { %1068 = vmatprep.subr.bf16.mxu1 %v14676_v17 }
  0x57   :  { %645 = vmatpush1.bf16.msra.mxu0 %v14658_v8  ;;  %v13603_v8 = vpack.c.bf16 %v1458_v7, %v1457_v6 }
  0x58   :  { %11956 = vmatprep.subr.msk.bf16.mxu0 %vm21664_vm0, %v11952_v14  ;;  %v13607_v14 = vpack.c.bf16 %v1460_v13, %v1459_v12 }
  0x59   :  { %1069 = vmatpush1.bf16.msra.mxu1 %v14674_v24  ;;  %v1463_v24 = vld [vmem:[%s21713_s26 + $0xb0] sm:$0xff] }
  0x5a   :  { %13441 = vmatmul.mubr.msk.bf16.gmra.mrb[20].mxu0 %vm288_vm1, %v15857_v45  ;;  %12023 = vmatprep.subr.msk.bf16.mxu1 %vm21664_vm0, %v12017_v29  ;;  %v14681_v45 = vld [vmem:[%s21711_s2 + $0xb0] ss:$0 sps:$4 sm:$0xff]   ;;  %v1448_v29 = vld [vmem:[%s21713_s26 + $0x38] sm:$0xff] }
  0x5b   :  { %647 = vmatpush1.bf16.msra.mxu0 %v624_v26  ;;  %670 = vmatprep.mubr.bf16.mxu0 %v21640_v2  ;;  %v636_v50 = vsel %vm21664_vm0, %v14681_v45, 0  ;;  %v13615_v26 = vpack.c.bf16 %v1464_v25, %v1463_v24  ;;  %v13617_v30 = vpack.c.bf16 %v1448_v29, %v1447_v27 }
  0x5c   :  { %13444 = vmatprep.subr.bf16.mxu0 %v21644_v28  ;;  %11963 = vmatmul.mubr.msk.bf16.gmra.mrb[8].mxu1 %vm288_vm1, %v16000_v32 }
  0x5d   :  { %1071 = vmatpush1.bf16.msra.mxu1 %v991_v35  ;;  %1094 = vmatprep.mubr.bf16.mxu1 %v21640_v2  ;;  %v1450_v35 = vld [vmem:[%s21713_s26 + $0x48] sm:$0xff] }
  0x5e   :  { %13604 = vmatprep.subr.bf16.mxu1 %v13603_v8  ;;  %v13621_v36 = vpack.c.bf16 %v1450_v35, %v1449_v34 }
  0x62   :  { %11957 = vmatmul.mubr.msk.bf16.vlgmr.msra.gmra.mrb[0].mxu0 %vm288_vm1, %v15910_v61 }
  0x63   :  { %13445 = vmatpush3.bf16.msra.mxu0 %v14669_v33  ;;  %680 = vmatprep.mubr.bf16.mxu0 %v21640_v2 }
  0x64   :  { %13446 = vmatprep.subr.bf16.mxu0 %v21644_v28  ;;  %12024 = vmatmul.mubr.msk.bf16.vlgmr.msra.gmra.mrb[0].mxu1 %vm288_vm1, %v16025_v40 }
  0x65   :  { %1104 = vmatprep.mubr.bf16.mxu1 %v21640_v2  ;;  %13606 = vmatpush3.bf16.msra.mxu1 %v13605_v11 }
  0x66   :  { %13608 = vmatprep.subr.bf16.mxu1 %v13607_v14 }
  0x67   :  { %13447 = vmatpush3.bf16.msra.mxu0 %v14673_v39  ;;  %v13623_v39 = vpack.c.bf16 %v1468_v38, %v1467_v37 }
  0x68   :  { %13448 = vmatprep.subr.bf16.mxu0 %v21644_v28 }
  0x6a   :  { %11958 = vmatmul.mubr.msk.bf16.gmra.mrb[4].mxu0 %vm288_vm1, %v15962_v16 }
  0x6b   :  { %13449 = vmatpush3.bf16.msra.mxu0 %v14677_v41  ;;  %690 = vmatprep.mubr.bf16.mxu0 %v21640_v2  ;;  %v1452_v41 = vld [vmem:[%s21713_s26 + $0x58] sm:$0xff] }
  0x6c   :  { %13450 = vmatprep.subr.bf16.mxu0 %v21644_v28  ;;  %12025 = vmatmul.mubr.msk.bf16.gmra.mrb[4].mxu1 %vm288_vm1, %v16050_v46 }
  0x6d   :  { %1114 = vmatprep.mubr.bf16.mxu1 %v21640_v2 }
  0x6f   :  { %13451 = vmatpush3.bf16.msra.mxu0 %v14680_v44  ;;  %v1470_v44 = vld [vmem:[%s21713_s26 + $0xe8] sm:$0xff] }
  0x70   :  { %13452 = vmatprep.subr.bf16.mxu0 %v21644_v28  ;;  %v13627_v45 = vpack.c.bf16 %v1470_v44, %v1469_v43 }
  0x72   :  { %11959 = vmatmul.mubr.msk.bf16.gmra.mrb[8].mxu0 %vm288_vm1, %v16000_v32 }
  0x73   :  { %13453 = vmatpush3.bf16.msra.mxu0 %v636_v50  ;;  %13454 = vmatprep.mubr.msk.bf16.mxu0 %vm21662_vm2, %v21644_v28  ;;  %v1472_v50 = vld [vmem:[%s21713_s26 + $0xf8] sm:$0xff] }
  0x74   :  { %999 = vmatprep.subr.bf16.mxu0 %v14684_v47  ;;  %12026 = vmatmul.mubr.msk.bf16.gmra.mrb[8].mxu1 %vm288_vm1, %v829_v51  ;;  %v1454_v47 = vld [vmem:[%s21713_s26 + $0x68] sm:$0xff] }
  0x7a   :  { %13455 = vmatmul.mubr.msk.bf16.vlgmr.msra.gmra.mrb[12].mxu0 %vm288_vm1, %v15910_v61  ;;  %v12014_v61 = vcombine.low %v11991_v58, %v11991_v58  ;;  %v21642_v58 = vmov 0.0|0.0  }
  0x7b   :  { %1000 = vmatpush1.bf16.msra.mxu0 %v14682_v52  ;;  %13458 = vmatprep.mubr.msk.bf16.mxu0 %vm21662_vm2, %v21644_v28  ;;  %v1455_v52 = vld [vmem:[%s21713_s26 + $0x70] sm:$0xff] }
  0x7c   :  { %1001 = vmatprep.subr.bf16.mxu0 %v14687_v53  ;;  %v985_v62 = vsel %vm21664_vm0, %v12014_v61, 0  ;;  %v1456_v53 = vld [vmem:[%s21713_s26 + $0x78] sm:$0xff] }
  0x7f   :  { %1002 = vmatpush1.bf16.msra.mxu0 %v14685_v54  ;;  %v13633_v54 = vpack.c.bf16 %v1456_v53, %v1455_v52 }
  0x80   :  { %1003 = vmatprep.subr.bf16.mxu0 %v14690_v55  ;;  %v1489_v55 = vld [vmem:[%s21713_s26 + $0x180] sm:$0xff] }
  0x82   :  { %13459 = vmatmul.mubr.msk.bf16.gmra.mrb[16].mxu0 %vm288_vm1, %v15962_v16  ;;  %v1444_v16 = vld [vmem:[%s21713_s26 + $0x18] sm:$0xff] }
  0x83   :  { %1004 = vmatpush1.bf16.msra.mxu0 %v14688_v56  ;;  %13462 = vmatprep.mubr.msk.bf16.mxu0 %vm21662_vm2, %v21644_v28  ;;  %v13609_v17 = vpack.c.bf16 %v1444_v16, %v1443_v15  ;;  %v1490_v56 = vld [vmem:[%s21713_s26 + $0x188] sm:$0xff] }
  0x84   :  { %1005 = vmatprep.subr.bf16.mxu0 %v14693_v57  ;;  %v16249_v57 = vpack.c.bf16 %v1490_v56, %v1489_v55 }
  0x85   :  { %13610 = vmatpush3.bf16.msra.mxu1 %v13609_v17 }
  0x86   :  { %13612 = vmatprep.subr.bf16.mxu1 %v13611_v20 }
  0x87   :  { %1006 = vmatpush1.bf16.msra.mxu0 %v14691_v59 }
  0x88   :  { %12019 = vmatprep.subr.msk.bf16.mxu0 %vm21664_vm0, %v12015_v60  ;;  %vm2830_vm0 = vcmask 1046528  }
  0x89   :  { %13614 = vmatpush3.bf16.msra.mxu1 %v13613_v23 }
  0x8a   :  { %13463 = vmatmul.mubr.msk.bf16.gmra.mrb[20].mxu0 %vm288_vm1, %v16000_v32  ;;  %13616 = vmatprep.subr.bf16.mxu1 %v13615_v26  ;;  %v1466_v32 = vld [vmem:[%s21713_s26 + $0xc8] sm:$0xff] }
  0x8b   :  { %1008 = vmatpush1.bf16.msra.mxu0 %v985_v62  ;;  %1031 = vmatprep.mubr.bf16.mxu0 %v21640_v2  ;;  %v13619_v33 = vpack.c.bf16 %v1466_v32, %v1465_v31 }
  0x8c   :  { %13466 = vmatprep.subr.bf16.mxu0 %v21644_v28 }
  0x8d   :  { %13618 = vmatpush3.bf16.msra.mxu1 %v13617_v30 }
  0x8e   :  { %13620 = vmatprep.subr.bf16.mxu1 %v13619_v33 }
  0x91   :  { %13622 = vmatpush3.bf16.msra.mxu1 %v13621_v36 }
  0x92   :  { %12020 = vmatmul.mubr.msk.bf16.vlgmr.msra.gmra.mrb[0].mxu0 %vm288_vm1, %v16025_v40  ;;  %13624 = vmatprep.subr.bf16.mxu1 %v13623_v39 }
  0x93   :  { %13467 = vmatpush3.bf16.msra.mxu0 %v14696_v63  ;;  %1041 = vmatprep.mubr.bf16.mxu0 %v21640_v2 }
  0x94   :  { %13468 = vmatprep.subr.bf16.mxu0 %v21644_v28 }
  0x97   :  { %13469 = vmatpush3.bf16.msra.mxu0 %v14697_v0 }
  0x98   :  { %13470 = vmatprep.subr.bf16.mxu0 %v21644_v28 }
  0x9a   :  { %12021 = vmatmul.mubr.msk.bf16.gmra.mrb[4].mxu0 %vm288_vm1, %v16050_v46 }
  0x9b   :  { %13471 = vmatpush3.bf16.msra.mxu0 %v14698_v1  ;;  %1051 = vmatprep.mubr.bf16.mxu0 %v21640_v2 }
  0x9c   :  { %13472 = vmatprep.subr.bf16.mxu0 %v21644_v28 }
  0x9f   :  { %13473 = vmatpush3.bf16.msra.mxu0 %v14699_v3 }
  0xa0   :  { %13474 = vmatprep.subr.bf16.mxu0 %v21644_v28 }
  0xa2   :  { %12022 = vmatmul.mubr.msk.bf16.gmra.mrb[8].mxu0 %vm288_vm1, %v829_v51 }
  0xa3   :  { %13475 = vmatpush3.bf16.msra.mxu0 %v997_v5  ;;  %13476 = vmatprep.mubr.msk.bf16.mxu0 %vm21662_vm2, %v21644_v28 }
  0xa4   :  { %13686 = vmatprep.subr.bf16.mxu0 %v13603_v8 }
  0xaa   :  { %13477 = vmatmul.mubr.msk.bf16.vlgmr.msra.gmra.mrb[12].mxu0 %vm288_vm1, %v16025_v40  ;;  %v1451_v40 = vld [vmem:[%s21713_s26 + $0x50] sm:$0xff] }
  0xab   :  { %13480 = vmatprep.mubr.msk.bf16.mxu0 %vm21662_vm2, %v21644_v28  ;;  %13688 = vmatpush3.bf16.msra.mxu0 %v13605_v11  ;;  %v13625_v42 = vpack.c.bf16 %v1452_v41, %v1451_v40 }
  0xac   :  { %13690 = vmatprep.subr.bf16.mxu0 %v13607_v14 }
  0xad   :  { %13626 = vmatpush3.bf16.msra.mxu1 %v13625_v42 }
  0xae   :  { %13628 = vmatprep.subr.bf16.mxu1 %v13627_v45 }
  0xaf   :  { %13692 = vmatpush3.bf16.msra.mxu0 %v13609_v17 }
  0xb0   :  { %13694 = vmatprep.subr.bf16.mxu0 %v13611_v20 }
  0xb2   :  { %13481 = vmatmul.mubr.msk.bf16.gmra.mrb[16].mxu0 %vm288_vm1, %v16050_v46  ;;  %v1453_v46 = vld [vmem:[%s21713_s26 + $0x60] sm:$0xff] }
  0xb3   :  { %13484 = vmatprep.mubr.msk.bf16.mxu0 %vm21662_vm2, %v21644_v28  ;;  %13696 = vmatpush3.bf16.msra.mxu0 %v13613_v23  ;;  %v13629_v48 = vpack.c.bf16 %v1454_v47, %v1453_v46 }
  0xb4   :  { %13698 = vmatprep.subr.bf16.mxu0 %v13615_v26 }
  0xb5   :  { %13630 = vmatpush3.bf16.msra.mxu1 %v13629_v48  ;;  %v16253_v59 = vpop.permute.xlu0 %1225 }
  0xb6   :  { %21714 = vst [vmem:[#allocation9_spill] sm:$0xff] %v16253_v59  ;;  %vm1242_vm9 = vcmp.eq.s32.totalorder %v16253_v59, 1  ;;  %v16258_v61 = vpop.permute.xlu1 %1231 }
  0xb7   :  { %13700 = vmatpush3.bf16.msra.mxu0 %v13617_v30  ;;  %21716 = vst [vmem:[#allocation11_spill] sm:$0xff] %v16258_v61  ;;  %vm1244_vm11 = vcmp.eq.s32.totalorder %v16258_v61, 1 }
  0xb8   :  { %13702 = vmatprep.subr.bf16.mxu0 %v13619_v33 }
  0xba   :  { %13485 = vmatmul.mubr.msk.bf16.gmra.mrb[20].mxu0 %vm288_vm1, %v829_v51  ;;  %v13631_v51 = vpack.c.bf16 %v1472_v50, %v1471_v49  ;;  %vm1327_vm1 = vcmask 850944  }
  0xbb   :  { %13704 = vmatpush3.bf16.msra.mxu0 %v13621_v36 }
  0xbc   :  { %13706 = vmatprep.subr.bf16.mxu0 %v13623_v39  ;;  %13632 = vmatprep.subr.bf16.mxu1 %v13631_v51 }
  0xbd   :  { %13634 = vmatpush3.bf16.msra.mxu1 %v13633_v54  ;;  %v16255_v60 = vpop.permute.xlu0 %1228 }
  0xbe   :  { %13636 = vmatprep.subr.bf16.mxu1 %v16249_v57  ;;  %21715 = vst [vmem:[#allocation10_spill] sm:$0xff] %v16255_v60  ;;  %vm1243_vm10 = vcmp.eq.s32.totalorder %v16255_v60, 1  ;;  %v16281_v13 = vpop.permute.xlu1 %1234 }
  0xbf   :  { %13708 = vmatpush3.bf16.msra.mxu0 %v13625_v42  ;;  %21717 = vst [vmem:[#allocation12_spill] sm:$0xff] %v16281_v13  ;;  %vm1245_vm12 = vcmp.eq.s32.totalorder %v16281_v13, 1 }
  0xc0   :  { %13710 = vmatprep.subr.bf16.mxu0 %v13627_v45 }
  0xc3   :  { %13712 = vmatpush3.bf16.msra.mxu0 %v13629_v48 }
  0xc4   :  { %13714 = vmatprep.subr.bf16.mxu0 %v13631_v51 }
  0xc5   :  { %v16299_v26 = vpop.permute.xlu0 %1237 }
  0xc6   :  { %21718 = vst [vmem:[#allocation13_spill] sm:$0xff] %v16299_v26  ;;  %v16307_v36 = vpop.permute.xlu1 %1240  ;;  %vm1246_vm13 = vcmp.eq.s32.totalorder %v16299_v26, 1  ;;  %v1511_v26 = vld [vmem:[%s21713_s26 + $0x230] sm:$0xff] }
  0xc7   :  { %13716 = vmatpush3.bf16.msra.mxu0 %v13633_v54  ;;  %21719 = vst [vmem:[#allocation14_spill] sm:$0xff] %v16307_v36  ;;  %vm1247_vm14 = vcmp.eq.s32.totalorder %v16307_v36, 1 }
  0xc8   :  { %13749 = vmatprep.subr.bf16.mxu0 %v21642_v58 }
 0x137   :  { %v16260_v62 = vpop.f32.mrb[0].mxu1 }
 0x138   :  { %v1250_v63 = vsel %vm1242_vm9, %v16260_v62, 0.0  ;;  %v16266_v0 = vpop.f32.mrb[1].mxu1 }
 0x139   :  { %v1348_v1 = vmul.f32 %v1250_v63, %v1250_v63  ;;  %v1251_v3 = vsel %vm1242_vm9, %v16266_v0, 0.0  ;;  %v16271_v4 = vpop.f32.mrb[2].mxu1 }
 0x13a   :  { %v1349_v5 = vmul.f32 %v1251_v3, %v1251_v3  ;;  %v16273_v6 = vpop.f32.mrb[3].mxu1  ;;  %v1255_v7 = vsel %vm1243_vm10, %v16271_v4, 0.0 }
 0x13b   :  { %v1303_v8 = vadd.f32 %v1255_v7, %v1250_v63  ;;  %v1353_v9 = vmul.f32 %v1255_v7, %v1255_v7  ;;  %v1256_v10 = vsel %vm1243_vm10, %v16273_v6, 0.0 }
 0x13c   :  { %v1315_v11 = vadd.f32 %v1256_v10, %v1251_v3  ;;  %v1354_v12 = vmul.f32 %v1256_v10, %v1256_v10 }
 0x13d   :  { %v1400_v14 = vadd.f32 %v1353_v9, %v1348_v1 }
 0x13e   :  { %v1412_v15 = vadd.f32 %v1354_v12, %v1349_v5 }
 0x13f   :  { %v16284_v16 = vpop.f32.mrb[4].mxu1 }
 0x140   :  { %v1260_v17 = vsel %vm1244_vm11, %v16284_v16, 0.0  ;;  %v16290_v18 = vpop.f32.mrb[5].mxu1 }
 0x141   :  { %v1304_v19 = vadd.f32 %v1303_v8, %v1260_v17  ;;  %v1358_v20 = vmul.f32 %v1260_v17, %v1260_v17  ;;  %v1261_v21 = vsel %vm1244_vm11, %v16290_v18, 0.0  ;;  %v16295_v22 = vpop.f32.mrb[6].mxu1 }
 0x142   :  { %v1316_v23 = vadd.f32 %v1315_v11, %v1261_v21  ;;  %v1359_v24 = vmul.f32 %v1261_v21, %v1261_v21  ;;  %v16297_v25 = vpop.f32.mrb[7].mxu1  ;;  %v1265_v27 = vsel %vm1245_vm12, %v16295_v22, 0.0 }
 0x143   :  { %v1401_v29 = vadd.f32 %v1400_v14, %v1358_v20  ;;  %v1266_v30 = vsel %vm1245_vm12, %v16297_v25, 0.0  ;;  %v1305_v31 = vadd.f32 %v1304_v19, %v1265_v27  ;;  %v1363_v32 = vmul.f32 %v1265_v27, %v1265_v27 }
 0x144   :  { %v1413_v33 = vadd.f32 %v1412_v15, %v1359_v24  ;;  %v1317_v34 = vadd.f32 %v1316_v23, %v1266_v30  ;;  %v1364_v35 = vmul.f32 %v1266_v30, %v1266_v30 }
 0x145   :  { %v1402_v37 = vadd.f32 %v1401_v29, %v1363_v32 }
 0x146   :  { %v1414_v38 = vadd.f32 %v1413_v33, %v1364_v35 }
 0x147   :  { %v16310_v39 = vpop.f32.mrb[8].mxu1 }
 0x148   :  { %v16313_v40 = vpop.f32.mrb[9].mxu1  ;;  %v1270_v41 = vsel %vm1246_vm13, %v16310_v39, 0.0 }
 0x149   :  { %v16318_v42 = vpop.f32.mrb[10].mxu1  ;;  %v1271_v43 = vsel %vm1246_vm13, %v16313_v40, 0.0  ;;  %v1306_v44 = vadd.f32 %v1305_v31, %v1270_v41  ;;  %v1368_v45 = vmul.f32 %v1270_v41, %v1270_v41 }
 0x14a   :  { %v16323_v46 = vpop.f32.mrb[11].mxu1  ;;  %v1318_v47 = vadd.f32 %v1317_v34, %v1271_v43  ;;  %v1369_v48 = vmul.f32 %v1271_v43, %v1271_v43  ;;  %v1275_v49 = vsel %vm1247_vm14, %v16318_v42, 0.0 }
 0x14b   :  { %v1276_v50 = vsel %vm1247_vm14, %v16323_v46, 0.0  ;;  %v1307_v51 = vsel %vm21663_vm15, %v1275_v49, 0.0  ;;  %v1373_v52 = vmul.f32 %v1275_v49, %v1275_v49  ;;  %v1403_v53 = vadd.f32 %v1402_v37, %v1368_v45 }
 0x14c   :  { %v1319_v54 = vsel %vm21663_vm15, %v1276_v50, 0.0  ;;  %v1374_v55 = vmul.f32 %v1276_v50, %v1276_v50  ;;  %v1415_v56 = vadd.f32 %v1414_v38, %v1369_v48  ;;  %v16333_v63 = vadd.f32 %v1307_v51, %v1306_v44 }
 0x14d   :  { %v1320_v1 = vadd.f32 %v1319_v54, %v1318_v47  ;;  %v1404_v3 = vsel %vm21663_vm15, %v1373_v52, 0.0 }
 0x14e   :  { %v1416_v5 = vsel %vm21663_vm15, %v1374_v55, 0.0  ;;  %v16337_v7 = vadd.f32 %v1404_v3, %v1403_v53 }
 0x14f   :  { %v16339_v8 = vadd.f32 %v1416_v5, %v1415_v56  ;;  %v1321_v55 = vrot.slane %v1320_v1, 4 }
 0x165   :  { %v16341_v9 = vpop.f32.mrb[0].mxu0 }
 0x166   :  { %v1248_v10 = vsel %vm1242_vm9, %v16341_v9, 0.0  ;;  %v16346_v11 = vpop.f32.mrb[1].mxu0 }
 0x167   :  { %v1249_v12 = vsel %vm1242_vm9, %v16346_v11, 0.0  ;;  %v16351_v14 = vpop.f32.mrb[2].mxu0  ;;  %v1346_v19 = vmul.f32 %v1248_v10, %v1248_v10 }
 0x168   :  { %v1253_v15 = vsel %vm1243_vm10, %v16351_v14, 0.0  ;;  %v16356_v17 = vpop.f32.mrb[3].mxu0  ;;  %v1347_v24 = vmul.f32 %v1249_v12, %v1249_v12 }
 0x169   :  { %v1278_v20 = vadd.f32 %v1253_v15, %v1248_v10  ;;  %v1351_v21 = vmul.f32 %v1253_v15, %v1253_v15  ;;  %v1254_v23 = vsel %vm1243_vm10, %v16356_v17, 0.0  ;;  %v1322_v15 = vadd.f32 %v1321_v55, %v1320_v1 }
 0x16a   :  { %v1291_v27 = vadd.f32 %v1254_v23, %v1249_v12  ;;  %v1352_v29 = vmul.f32 %v1254_v23, %v1254_v23 }
 0x16b   :  { %v1376_v30 = vadd.f32 %v1351_v21, %v1346_v19 }
 0x16c   :  { %v1388_v31 = vadd.f32 %v1352_v29, %v1347_v24 }
 0x16d   :  { %v16361_v32 = vpop.f32.mrb[4].mxu0 }
 0x16e   :  { %v1258_v33 = vsel %vm1244_vm11, %v16361_v32, 0.0  ;;  %v16366_v34 = vpop.f32.mrb[5].mxu0 }
 0x16f   :  { %v1279_v35 = vadd.f32 %v1278_v20, %v1258_v33  ;;  %v1356_v37 = vmul.f32 %v1258_v33, %v1258_v33  ;;  %v1259_v38 = vsel %vm1244_vm11, %v16366_v34, 0.0  ;;  %v16371_v41 = vpop.f32.mrb[6].mxu0 }
 0x170   :  { %v1292_v43 = vadd.f32 %v1291_v27, %v1259_v38  ;;  %v1357_v44 = vmul.f32 %v1259_v38, %v1259_v38  ;;  %v1263_v45 = vsel %vm1245_vm12, %v16371_v41, 0.0  ;;  %v16376_v47 = vpop.f32.mrb[7].mxu0 }
 0x171   :  { %v1377_v48 = vadd.f32 %v1376_v30, %v1356_v37  ;;  %v1280_v49 = vadd.f32 %v1279_v35, %v1263_v45  ;;  %v1361_v50 = vmul.f32 %v1263_v45, %v1263_v45  ;;  %v1264_v51 = vsel %vm1245_vm12, %v16376_v47, 0.0 }
 0x172   :  { %v1389_v52 = vadd.f32 %v1388_v31, %v1357_v44  ;;  %v1293_v53 = vadd.f32 %v1292_v43, %v1264_v51  ;;  %v1362_v54 = vmul.f32 %v1264_v51, %v1264_v51  ;;  %v1323_v45 = vrot.slane %v1322_v15, 2 }
 0x173   :  { %v1378_v56 = vadd.f32 %v1377_v48, %v1361_v50 }
 0x174   :  { %v1390_v3 = vadd.f32 %v1389_v52, %v1362_v54 }
 0x175   :  { %v16381_v5 = vpop.f32.mrb[8].mxu0 }
 0x176   :  { %v1268_v10 = vsel %vm1246_vm13, %v16381_v5, 0.0  ;;  %v16386_v12 = vpop.f32.mrb[9].mxu0 }
 0x177   :  { %v1281_v19 = vadd.f32 %v1280_v49, %v1268_v10  ;;  %v1366_v20 = vmul.f32 %v1268_v10, %v1268_v10  ;;  %v1269_v21 = vsel %vm1246_vm13, %v16386_v12, 0.0  ;;  %v16391_v23 = vpop.f32.mrb[10].mxu0 }
 0x178   :  { %v1294_v24 = vadd.f32 %v1293_v53, %v1269_v21  ;;  %v1367_v27 = vmul.f32 %v1269_v21, %v1269_v21  ;;  %v1273_v29 = vsel %vm1247_vm14, %v16391_v23, 0.0  ;;  %v16396_v30 = vpop.f32.mrb[11].mxu0 }
 0x179   :  { %v1379_v31 = vadd.f32 %v1378_v56, %v1366_v20  ;;  %v1283_v33 = vsel %vm21663_vm15, %v1273_v29, 0.0  ;;  %v1371_v1 = vmul.f32 %v1273_v29, %v1273_v29  ;;  %v1274_v35 = vsel %vm1247_vm14, %v16396_v30, 0.0 }
 0x17a   :  { %v1391_v37 = vadd.f32 %v1390_v3, %v1367_v27  ;;  %v1284_v38 = vadd.f32 %v1283_v33, %v1281_v19  ;;  %v1295_v43 = vsel %vm21663_vm15, %v1274_v35, 0.0  ;;  %v1372_v44 = vmul.f32 %v1274_v35, %v1274_v35 }
 0x17b   :  { %v1380_v48 = vsel %vm21663_vm15, %v1371_v1, 0.0  ;;  %v1296_v49 = vadd.f32 %v1295_v43, %v1294_v24  ;;  %v1324_v24 = vadd.f32 %v1323_v45, %v1322_v15  ;;  %v1473_v15 = vld [vmem:[%s21713_s26 + $0x100] sm:$0xff] }
 0x17c   :  { %v1285_v50 = vrot.slane %v1284_v38, 4  ;;  %v1381_v51 = vadd.f32 %v1380_v48, %v1379_v31  ;;  %v1392_v52 = vsel %vm21663_vm15, %v1372_v44, 0.0 }
 0x17d   :  { %v1297_v53 = vrot.slane %v1296_v49, 4  ;;  %v1393_v54 = vadd.f32 %v1392_v52, %v1391_v37  ;;  %v16405_v55 = vpop.f32.mrb[12].mxu0 }
 0x17e   :  { %v1286_v56 = vadd.f32 %v1285_v50, %v1284_v38  ;;  %v1382_v10 = vrot.slane %v1381_v51, 4  ;;  %v1252_v3 = vsel %vm1242_vm9, %v16405_v55, 0.0  ;;  %v13478_v19 = vpop.f32.mrb[13].mxu0 }
 0x17f   :  { %v1298_v20 = vadd.f32 %v1297_v53, %v1296_v49  ;;  %v1394_v21 = vrot.slane %v1393_v54, 4  ;;  %v16410_v27 = vpop.f32.mrb[14].mxu0  ;;  %v1350_v33 = vmul.f32 %v1252_v3, %v1252_v3  ;;  %v1328_v43 = vsel %vm1327_vm1, %v1252_v3, 0.0 }
 0x180   :  { %v1287_v29 = vrot.slane %v1286_v56, 2  ;;  %v1383_v31 = vadd.f32 %v1382_v10, %v1381_v51  ;;  %v1257_v1 = vsel %vm1243_vm10, %v16410_v27, 0.0  ;;  %v13479_v35 = vpop.f32.mrb[15].mxu0  ;;  %v1474_v51 = vld [vmem:[%s21713_s26 + $0x108] sm:$0xff]  ;;  %v1325_v53 = vrot.slane %v1324_v24, 1 }
 0x181   :  { %v1299_v37 = vrot.slane %v1298_v20, 2  ;;  %v1395_v38 = vadd.f32 %v1394_v21, %v1393_v54  ;;  %v1329_v44 = vsel %vm1327_vm1, %v1257_v1, 0.0  ;;  %v1355_v52 = vmul.f32 %v1257_v1, %v1257_v1  ;;  %v1491_v54 = vld [vmem:[%s21713_s26 + $0x190] sm:$0xff] }
 0x182   :  { %v1288_v48 = vadd.f32 %v1287_v29, %v1286_v56  ;;  %v1384_v49 = vrot.slane %v1383_v31, 2  ;;  %v1330_v50 = vadd.f32 %v1329_v44, %v1328_v43  ;;  %v1492_v56 = vld [vmem:[%s21713_s26 + $0x198] sm:$0xff]  ;;  %v1424_v21 = vsel %vm1327_vm1, %v1350_v33, 0.0 }
 0x183   :  { %v1300_v45 = vadd.f32 %v1299_v37, %v1298_v20  ;;  %v1396_v10 = vrot.slane %v1395_v38, 2  ;;  %v1425_v20 = vsel %vm1327_vm1, %v1355_v52, 0.0  ;;  %v16436_v58 = vpack.c.bf16 %v1474_v51, %v1473_v15 }
 0x184   :  { %v1289_v3 = vrot.slane %v1288_v48, 1  ;;  %v1385_v19 = vadd.f32 %v1384_v49, %v1383_v31  ;;  %v1426_v29 = vadd.f32 %v1425_v20, %v1424_v21  ;;  %v16438_v28 = vpack.c.bf16 %v1492_v56, %v1491_v54  ;;  %v1476_v20 = vld [vmem:[%s21713_s26 + $0x118] sm:$0xff] }
 0x185   :  { %v16431_v1 = vpop.f32.mrb[16].mxu0  ;;  %v1301_v35 = vrot.slane %v1300_v45, 1  ;;  %v1397_v37 = vadd.f32 %v1396_v10, %v1395_v38  ;;  %v1505_v38 = vld [vmem:[%s21713_s26 + $0x200] sm:$0xff]  ;;  %v1506_v10 = vld [vmem:[%s21713_s26 + $0x208] sm:$0xff]  ;;  %v1326_v56 = vadd.f32 %v1325_v53, %v1324_v24 }
 0x186   :  { %21720 = vst [vmem:[#allocation15_spill] sm:$0xff] %v16431_v1  ;;  %v1386_v43 = vrot.slane %v1385_v19, 1  ;;  %v1262_v44 = vsel %vm1244_vm11, %v16431_v1, 0.0  ;;  %v13482_v2 = vpop.f32.mrb[17].mxu0  ;;  %v1494_v24 = vld [vmem:[%s21713_s26 + $0x1a8] sm:$0xff] }
 0x187   :  { %v1331_v31 = vsel %vm1327_vm1, %v1262_v44, 0.0  ;;  %v1360_v33 = vmul.f32 %v1262_v44, %v1262_v44  ;;  %v16441_v49 = vpop.f32.mrb[18].mxu0  ;;  %v1302_v52 = vadd.f32 %v1301_v35, %v1300_v45  ;;  %v1398_v21 = vrot.slane %v1397_v37, 1  ;;  %v1475_v45 = vld [vmem:[%s21713_s26 + $0x110] sm:$0xff] }
 0x188   :  { %21721 = vst [vmem:[#allocation16_spill] sm:$0xff] %v16441_v49  ;;  %v1290_v2 = vadd.f32 %v1289_v3, %v1288_v48  ;;  %v1332_v15 = vadd.f32 %v1331_v31, %v1330_v50  ;;  %v1267_v51 = vsel %vm1245_vm12, %v16441_v49, 0.0  ;;  %v13483_v54 = vpop.f32.mrb[19].mxu0  ;;  %v1493_v3 = vld [vmem:[%s21713_s26 + $0x1a0] sm:$0xff]  ;;  %v1387_v13 = vadd.f32 %v1386_v43, %v1385_v19 }
 0x189   :  { %v1427_v35 = vsel %vm1327_vm1, %v1360_v33, 0.0  ;;  %v1333_v44 = vsel %vm1327_vm1, %v1267_v51, 0.0  ;;  %v1365_v48 = vmul.f32 %v1267_v51, %v1267_v51  ;;  %1585 = vmatprep.mubr.f32.mxu1 %v1302_v52  ;;  %v1399_v50 = vadd.f32 %v1398_v21, %v1397_v37  ;;  %v1507_v52 = vld [vmem:[%s21713_s26 + $0x210] sm:$0xff]  ;;  %v1477_v43 = vld [vmem:[%s21713_s26 + $0x120] sm:$0xff] }
 0x18a   :  { %v1428_v53 = vadd.f32 %v1427_v35, %v1426_v29  ;;  %v1334_v31 = vadd.f32 %v1333_v44, %v1332_v15  ;;  %1586 = vmatmul.mubr.f32.vlgmr.msra.gmra.mrb[12].mxu1 %v1290_v2  ;;  %v16466_v54 = vpack.c.bf16 %v1506_v10, %v1505_v38  ;;  %v16470_v37 = vpack.c.bf16 %v1476_v20, %v1475_v45  ;;  %v1508_v29 = vld [vmem:[%s21713_s26 + $0x218] sm:$0xff]  ;;  %v1478_v38 = vld [vmem:[%s21713_s26 + $0x128] sm:$0xff]  ;;  %v1495_v2 = vld [vmem:[%s21713_s26 + $0x1b0] sm:$0xff] }
 0x18b   :  { %v1429_v33 = vsel %vm1327_vm1, %v1365_v48, 0.0  ;;  %13638 = vmatpush3.bf16.msra.mxu1 %v16436_v58  ;;  %1655 = vmatprep.mubr.f32.mxu1 %v1326_v56  ;;  %v16479_v19 = vpack.c.bf16 %v1494_v24, %v1493_v3  ;;  %v1496_v15 = vld [vmem:[%s21713_s26 + $0x1b8] sm:$0xff]  ;;  %v16499_v45 = vpack.c.bf16 %v1508_v29, %v1507_v52  ;;  %v21725_v48 = vmov 0.0|0.0   ;;  %v1509_v3 = vld [vmem:[%s21713_s26 + $0x220] sm:$0xff]  ;;  %v1510_v24 = vld [vmem:[%s21713_s26 + $0x228] sm:$0xff] }
 0x18c   :  { %v1430_v21 = vadd.f32 %v1429_v33, %v1428_v53  ;;  %1800 = vmatprep.mubr.f32.mxu0 %v1399_v50  ;;  %13640 = vmatprep.subr.bf16.mxu1 %v16438_v28  ;;  %v16508_v50 = vpack.c.bf16 %v1478_v38, %v1477_v43  ;;  %v16520_v29 = vpack.c.bf16 %v1496_v15, %v1495_v2  ;;  %v1479_v43 = vld [vmem:[%s21713_s26 + $0x130] sm:$0xff]  ;;  %v1480_v38 = vld [vmem:[%s21713_s26 + $0x138] sm:$0xff]  ;;  %v1498_v2 = vld [vmem:[%s21713_s26 + $0x1c8] sm:$0xff] }
 0x18d   :  { %1801 = vmatmul.mubr.f32.vlgmr.msra.gmra.mrb[24].mxu0 %v1387_v13  ;;  %v16487_v10 = vpop.f32.mrb[20].mxu0  ;;  %v21723_v13 = vmov 0.0   ;;  %v16539_v36 = vpack.c.bf16 %v1510_v24, %v1509_v3  ;;  %v1481_v24 = vld [vmem:[%s21713_s26 + $0x140] sm:$0xff] }
 0x18e   :  { %21722 = vst [vmem:[#allocation17_spill] sm:$0xff] %v16487_v10  ;;  %13751 = vmatpush3.bf16.msra.mxu0 %v16466_v54  ;;  %v1272_v51 = vsel %vm1246_vm13, %v16487_v10, 0.0  ;;  %v13486_v56 = vpop.f32.mrb[21].mxu0  ;;  %13543 = vmatprep.mubr.msk.f32.mxu0 %vm21662_vm2, %v21723_v13  ;;  %v1504_v10 = vld [vmem:[%s21713_s26 + $0x1f8] sm:$0xff] }
 0x18f   :  { %v1335_v20 = vsel %vm1327_vm1, %v1272_v51, 0.0  ;;  %v1370_v35 = vmul.f32 %v1272_v51, %v1272_v51  ;;  %13642 = vmatpush3.bf16.msra.mxu1 %v16470_v37  ;;  %v16505_v44 = vpop.f32.mrb[22].mxu0  ;;  %13752 = vmatprep.subr.bf16.mxu0 %v21725_v48 }
 0x190   :  { %21724 = vst [vmem:[#allocation18_spill] sm:$0xff] %v16505_v44  ;;  %v1336_v53 = vadd.f32 %v1335_v20, %v1334_v31  ;;  %v1277_v33 = vsel %vm1247_vm14, %v16505_v44, 0.0  ;;  %v13487_v52 = vpop.f32.mrb[23].mxu0  ;;  %13644 = vmatprep.subr.bf16.mxu1 %v16479_v19  ;;  %v1497_v20 = vld [vmem:[%s21713_s26 + $0x1c0] sm:$0xff]  ;;  %v1503_v44 = vld [vmem:[%s21713_s26 + $0x1f0] sm:$0xff] }
 0x191   :  { %v1431_v51 = vsel %vm1327_vm1, %v1370_v35, 0.0  ;;  %v1338_v31 = vsel %vm1337_vm3, %v1277_v33, 0.0  ;;  %v1375_v56 = vmul.f32 %v1277_v33, %v1277_v33  ;;  %v16544_v33 = vpack.c.bf16 %v1480_v38, %v1479_v43  ;;  %v1482_v43 = vld [vmem:[%s21713_s26 + $0x148] sm:$0xff] }
 0x192   :  { %v1432_v15 = vadd.f32 %v1431_v51, %v1430_v21  ;;  %v16536_v52 = vadd.f32 %v1338_v31, %v1336_v53  ;;  %13754 = vmatpush3.bf16.msra.mxu0 %v16499_v45  ;;  %v1512_v21 = vld [vmem:[%s21713_s26 + $0x238] sm:$0xff]  ;;  %v16553_v3 = vpack.c.bf16 %v1498_v2, %v1497_v20  ;;  %v1309_v38 = vrot.slane %v16333_v63, 4  ;;  %v1499_v51 = vld [vmem:[%s21713_s26 + $0x1d0] sm:$0xff] }
 0x193   :  { %v1433_v35 = vsel %vm1337_vm3, %v1375_v56, 0.0  ;;  %13646 = vmatpush3.bf16.msra.mxu1 %v16508_v50  ;;  %13755 = vmatprep.subr.bf16.mxu0 %v21725_v48  ;;  %v1500_v31 = vld [vmem:[%s21713_s26 + $0x1d8] sm:$0xff]  ;;  %v16569_v20 = vpack.c.bf16 %v1512_v21, %v1511_v26  ;;  %v16573_v2 = vpack.c.bf16 %v1482_v43, %v1481_v24  ;;  %v1483_v26 = vld [vmem:[%s21713_s26 + $0x150] sm:$0xff]  ;;  %v1501_v43 = vld [vmem:[%s21713_s26 + $0x1e0] sm:$0xff]  ;;  %v16628_v49 = vpack.c.bf16 %v1504_v10, %v1503_v44 }
 0x194   :  { %v1434_v53 = vadd.f32 %v1433_v35, %v1432_v15  ;;  %13648 = vmatprep.subr.bf16.mxu1 %v16520_v29  ;;  %v1513_v15 = vld [vmem:[%s21713_s26 + $0x240] sm:$0xff]  ;;  %v1514_v35 = vld [vmem:[%s21713_s26 + $0x248] sm:$0xff]  ;;  %v16582_v60 = vpack.c.bf16 %v1500_v31, %v1499_v51  ;;  %v1484_v21 = vld [vmem:[%s21713_s26 + $0x158] sm:$0xff]  ;;  %v1310_v24 = vadd.f32 %v1309_v38, %v16333_v63 }
 0x195   :  { %v13680_v31 = vpack.c.bf16 %v1514_v35, %v1513_v15  ;;  %v1515_v63 = vld [vmem:[%s21713_s26 + $0x250] sm:$0xff]  ;;  %v1516_v38 = vld [vmem:[%s21713_s26 + $0x258] sm:$0xff]  ;;  %v1485_v15 = vld [vmem:[%s21713_s26 + $0x160] sm:$0xff] }
 0x196   :  { %v1435_v56 = vrot.slane %v1434_v53, 4  ;;  %13757 = vmatpush3.bf16.msra.mxu0 %v16539_v36  ;;  %v1486_v35 = vld [vmem:[%s21713_s26 + $0x168] sm:$0xff]  ;;  %v1517_v10 = vld [vmem:[%s21713_s26 + $0x260] sm:$0xff] }
 0x197   :  { %13650 = vmatpush3.bf16.msra.mxu1 %v16544_v33  ;;  %13758 = vmatprep.subr.bf16.mxu0 %v21725_v48 }
 0x198   :  { %v1436_v61 = vadd.f32 %v1435_v56, %v1434_v53  ;;  %13652 = vmatprep.subr.bf16.mxu1 %v16553_v3  ;;  %v1502_v53 = vld [vmem:[%s21713_s26 + $0x1e8] sm:$0xff]  ;;  %v16600_v56 = vpack.c.bf16 %v1484_v21, %v1483_v26  ;;  %v1311_v26 = vrot.slane %v1310_v24, 2 }
 0x199   :  { %v16609_v59 = vpack.c.bf16 %v1502_v53, %v1501_v43  ;;  %v13683_v43 = vpack.c.bf16 %v1516_v38, %v1515_v63  ;;  %v16625_v53 = vpack.c.bf16 %v1486_v35, %v1485_v15  ;;  %v1340_v35 = vrot.slane %v16536_v52, 4 }
 0x19a   :  { %v1437_v51 = vrot.slane %v1436_v61, 2  ;;  %13760 = vmatpush3.bf16.msra.mxu0 %v16569_v20  ;;  %v1312_v1 = vadd.f32 %v1311_v26, %v1310_v24  ;;  %v1418_v26 = vrot.slane %v16339_v8, 4 }
 0x19b   :  { %13654 = vmatpush3.bf16.msra.mxu1 %v16573_v2  ;;  %13761 = vmatprep.subr.bf16.mxu0 %v21725_v48 }
 0x19c   :  { %13656 = vmatprep.subr.bf16.mxu1 %v16582_v60  ;;  %v1438_v21 = vadd.f32 %v1437_v51, %v1436_v61  ;;  %v1487_v61 = vld [vmem:[%s21713_s26 + $0x170] sm:$0xff]  ;;  %v1488_v51 = vld [vmem:[%s21713_s26 + $0x178] sm:$0xff]  ;;  %v1313_v38 = vrot.slane %v1312_v1, 1 }
 0x19d   :  { %v13665_v44 = vpack.c.bf16 %v1488_v51, %v1487_v61 }
 0x19e   :  { %13763 = vmatpush3.bf16.msra.mxu0 %v13680_v31  ;;  %v1439_v63 = vrot.slane %v1438_v21, 1  ;;  %v1314_v24 = vadd.f32 %v1313_v38, %v1312_v1  ;;  %v1341_v1 = vadd.f32 %v1340_v35, %v16536_v52  ;;  %v1970_v38 = vld [vmem:[%s21726_s6 + $0x68] sm:$0xff]  ;;  %v1967_v35 = vld [vmem:[%s21726_s6 + $0x50] sm:$0xff] }
 0x19f   :  { %13658 = vmatpush3.bf16.msra.mxu1 %v16600_v56  ;;  %13764 = vmatprep.subr.bf16.mxu0 %v21725_v48 }
 0x1a0   :  { %13660 = vmatprep.subr.bf16.mxu1 %v16609_v59  ;;  %v1440_v15 = vadd.f32 %v1439_v63, %v1438_v21  ;;  %v1419_v21 = vadd.f32 %v1418_v26, %v16339_v8  ;;  %v1972_v26 = vld [vmem:[%s21726_s6 + $0x78] sm:$0xf] }
 0x1a2   :  { %13766 = vmatpush3.bf16.msra.mxu0 %v13683_v43  ;;  %v1420_v61 = vrot.slane %v1419_v21, 2 }
 0x1a3   :  { %13662 = vmatpush3.bf16.msra.mxu1 %v16625_v53  ;;  %13541 = vmatprep.subr.mxu0 %v21723_v13 }
 0x1a4   :  { %13664 = vmatprep.subr.bf16.mxu1 %v16628_v49  ;;  %v1421_v63 = vadd.f32 %v1420_v61, %v1419_v21  ;;  %v13774_v21 = vpack.c.bf16 %v1972_v26, %v1967_v35  ;;  %v1974_v61 = vld [vmem:[%s21726_s6 + $0x88] sm:$0xf] }
 0x1a6   :  { %13542 = vmatpush3.msra.mxu0 %v1517_v10  ;;  %v1422_v52 = vrot.slane %v1421_v63, 1 }
 0x1a7   :  { %13544 = vmatmul.mubr.msk.f32.vlgmr.msra.gmra.mrb[26].mxu0 %vm1327_vm1, %v1440_v15  ;;  %13666 = vmatpush3.bf16.msra.mxu1 %v13665_v44 }
 0x1a8   :  { %13667 = vmatprep.subr.bf16.mxu1 %v21725_v48  ;;  %2131 = vmatprep.mubr.f32.mxu0 %v21723_v13 }
 0x1aa   :  { %1656 = vmatmul.mubr.f32.vlgmr.msra.gmra.mrb[14].mxu1 %v1314_v24  ;;  %v1975_v24 = vld [vmem:[%s21726_s6 + $0x90] sm:$0xf] }
 0x1ab   :  { %13669 = vmatpush3.bf16.msra.mxu1 %v16466_v54  ;;  %13514 = vmatprep.mubr.msk.f32.mxu1 %vm21662_vm2, %v21723_v13  ;;  %v1342_v54 = vrot.slane %v1341_v1, 2 }
 0x1ac   :  { %13670 = vmatprep.subr.bf16.mxu1 %v21725_v48 }
 0x1ad   :  { %v1343_v51 = vadd.f32 %v1342_v54, %v1341_v1  ;;  %v16736_v1 = vpack.c.bf16 %v1975_v24, %v1970_v38  ;;  %v1969_v54 = vld [vmem:[%s21726_s6 + $0x60] sm:$0xff] }
 0x1af   :  { %13672 = vmatpush3.bf16.msra.mxu1 %v16499_v45  ;;  %v1344_v45 = vrot.slane %v1343_v51, 1 }
 0x1b0   :  { %13673 = vmatprep.subr.bf16.mxu1 %v21725_v48 }
 0x1b1   :  { %v1345_v8 = vadd.f32 %v1344_v45, %v1343_v51  ;;  %v16746_v51 = vpack.c.bf16 %v1974_v61, %v1969_v54  ;;  %v1961_v54 = vld [vmem:[%s21726_s6 + $0x20] sm:$0xff]  ;;  %v1966_v61 = vld [vmem:[%s21726_s6 + $0x48] sm:$0xff] }
 0x1b3   :  { %13675 = vmatpush3.bf16.msra.mxu1 %v16539_v36  ;;  %v1423_v36 = vadd.f32 %v1422_v52, %v1421_v63 }
 0x1b4   :  { %13676 = vmatprep.subr.bf16.mxu1 %v21725_v48 }
 0x1b7   :  { %13678 = vmatpush3.bf16.msra.mxu1 %v16569_v20  ;;  %v1406_v20 = vrot.slane %v16337_v7, 4 }
 0x1b8   :  { %13679 = vmatprep.subr.bf16.mxu1 %v21725_v48 }
 0x1bb   :  { %13681 = vmatpush3.bf16.msra.mxu1 %v13680_v31  ;;  %v1959_v31 = vld [vmem:[%s21726_s6 + $0x10] sm:$0xff] }
 0x1bc   :  { %13682 = vmatprep.subr.bf16.mxu1 %v21725_v48 }
 0x1bf   :  { %13684 = vmatpush3.bf16.msra.mxu1 %v13683_v43  ;;  %v1968_v43 = vld [vmem:[%s21726_s6 + $0x58] sm:$0xff] }
 0x1c0   :  { %13512 = vmatprep.subr.mxu1 %v21723_v13 }
 0x1c3   :  { %13513 = vmatpush3.msra.mxu1 %v1517_v10  ;;  %v1973_v10 = vld [vmem:[%s21726_s6 + $0x80] sm:$0xf] }
 0x1c4   :  { %13515 = vmatmul.mubr.msk.f32.vlgmr.msra.gmra.mrb[16].mxu1 %vm1327_vm1, %v1345_v8  ;;  %13718 = vmatprep.subr.bf16.mxu1 %v16249_v57  ;;  %v1407_v57 = vadd.f32 %v1406_v20, %v16337_v7  ;;  %v1963_v7 = vld [vmem:[%s21726_s6 + $0x30] sm:$0xff]  ;;  %v13771_v15 = vpack.c.bf16 %v1973_v10, %v1968_v43 }
 0x1c5   :  { %13720 = vmatpush3.bf16.msra.mxu1 %v16436_v58  ;;  %1870 = vmatprep.mubr.f32.mxu1 %v1423_v36 }
 0x1c6   :  { %13722 = vmatprep.subr.bf16.mxu1 %v16438_v28  ;;  %v1408_v28 = vrot.slane %v1407_v57, 2 }
 0x1c8   :  { %v1409_v58 = vadd.f32 %v1408_v28, %v1407_v57 }
 0x1c9   :  { %13724 = vmatpush3.bf16.msra.mxu1 %v16470_v37 }
 0x1ca   :  { %13726 = vmatprep.subr.bf16.mxu1 %v16479_v19  ;;  %v1410_v37 = vrot.slane %v1409_v58, 1 }
 0x1cc   :  { %v1411_v19 = vadd.f32 %v1410_v37, %v1409_v58 }
 0x1cd   :  { %13728 = vmatpush3.bf16.msra.mxu1 %v16508_v50 }
 0x1ce   :  { %13730 = vmatprep.subr.bf16.mxu1 %v16520_v29  ;;  %v1957_v29 = vld [vmem:[%s21726_s6] sm:$0xff] }
 0x1d1   :  { %13732 = vmatpush3.bf16.msra.mxu1 %v16544_v33  ;;  %v1962_v33 = vld [vmem:[%s21726_s6 + $0x28] sm:$0xff] }
 0x1d2   :  { %13734 = vmatprep.subr.bf16.mxu1 %v16553_v3 }
 0x1d5   :  { %13736 = vmatpush3.bf16.msra.mxu1 %v16573_v2  ;;  %v16700_v2 = vpack.c.bf16 %v1962_v33, %v1957_v29 }
 0x1d6   :  { %13738 = vmatprep.subr.bf16.mxu1 %v16582_v60  ;;  %v1958_v60 = vld [vmem:[%s21726_s6 + $0x8] sm:$0xff] }
 0x1d7   :  { %v13767_v50 = vpack.c.bf16 %v1963_v7, %v1958_v60 }
 0x1d9   :  { %13740 = vmatpush3.bf16.msra.mxu1 %v16600_v56  ;;  %v1964_v56 = vld [vmem:[%s21726_s6 + $0x38] sm:$0xff] }
 0x1da   :  { %13742 = vmatprep.subr.bf16.mxu1 %v16609_v59  ;;  %v1960_v59 = vld [vmem:[%s21726_s6 + $0x18] sm:$0xff] }
 0x1dd   :  { %13744 = vmatpush3.bf16.msra.mxu1 %v16625_v53  ;;  %v16711_v53 = vpack.c.bf16 %v1964_v56, %v1959_v31 }
 0x1de   :  { %13746 = vmatprep.subr.bf16.mxu1 %v16628_v49  ;;  %v1965_v49 = vld [vmem:[%s21726_s6 + $0x40] sm:$0xff] }
 0x1df   :  { %v16698_v3 = vpack.c.bf16 %v1965_v49, %v1960_v59 }
 0x1e1   :  { %13748 = vmatpush3.bf16.msra.mxu1 %v13665_v44  ;;  %13778 = vmatprep.subr.bf16.mxu0 %v16698_v3 }
 0x1e2   :  { %13768 = vmatprep.subr.bf16.mxu1 %v13767_v50  ;;  %13780 = vmatpush1.bf16.msra.mxu0 %v16711_v53 }
 0x1e3   :  { %13783 = vmatprep.subr.msk.bf16.mxu0 %vm16717_vm5, %v16736_v1 }
 0x1e4   :  { %1871 = vmatmul.mubr.f32.vlgmr.msra.gmra.mrb[18].mxu1 %v1411_v19 }
 0x1e5   :  { %2060 = vmatprep.mubr.f32.mxu1 %v21723_v13  ;;  %13770 = vmatpush1.bf16.msra.mxu1 %v16700_v2 }
 0x1e6   :  { %13773 = vmatprep.subr.msk.bf16.mxu1 %vm16717_vm5, %v13771_v15  ;;  %13786 = vmatpush1.bf16.msk.msra.mxu0 %vm16717_vm5, %v16746_v51 }
 0x1e7   :  { %13795 = vmatprep.subr.bf16.mxu0 %v13767_v50 }
 0x1e9   :  { %13776 = vmatpush1.bf16.msk.msra.mxu1 %vm16717_vm5, %v13774_v21 }
 0x1ea   :  { %13787 = vmatprep.subr.bf16.mxu1 %v21725_v48 }
 0x25d   :  { %v13189_v63 = vpop.f32.mrb[12].mxu1 }
 0x25e   :  { %v13190_v45 = vpop.f32.mrb[13].mxu1 }
 0x25f   :  { %v13191_v52 = vadd.f32 %v13190_v45, %v13189_v63  ;;  %v1950_v63 = vld [vmem:[%s21618_s10] sm:$0x1]  ;;  %s15600_s10 = smov 100  }
 0x260   :  { %v13273_v8 = vpop.f32.mrb[24].mxu0 }
 0x261   :  { %v13274_v36 = vpop.f32.mrb[25].mxu0 }
 0x262   :  { %v13275_v20 = vadd.f32 %v13274_v36, %v13273_v8  ;;  %v1971_v36 = vld [vmem:[%s21726_s6 + $0x70] sm:$0xff] }
 0x27a   :  { %v1942_v57 = vpop.f32.mrb[26].mxu0 }
 0x27b   :  { %v13545_v28 = vpop.f32.mrb[27].mxu0 }
 0x27d   :  { %v13224_v58 = vpop.f32.mrb[14].mxu1 }
 0x27e   :  { %v13225_v37 = vpop.f32.mrb[15].mxu1 }
 0x27f   :  { %v13226_v19 = vadd.f32 %v13225_v37, %v13224_v58  ;;  %v1954_v58 = vld [vmem:[%s21619_s11] sm:$0x1]  ;;  %s16822_s11 = sld [smem:[#allocation6]] }
 0x281   :  { %v1658_v60 = vadd.f32 %v13226_v19, %v13191_v52  ;;  %v13788_v52 = vpack.c.bf16 %v1966_v61, %v1961_v54  ;;  %v21730_v54 = vld [vmem:[#allocation16_spill] sm:$0xff] }
 0x297   :  { %v1727_v7 = vpop.f32.mrb[16].mxu1 }
 0x298   :  { %v1728_v59 = vadd.f32 %v1727_v7, %v1658_v60  ;;  %v13516_v49 = vpop.f32.mrb[17].mxu1 }
 0x29a   :  { %v1732_v56 = vmul.f32 0.0010330578, %v1728_v59 }
 0x29c   :  { %v1947_v10 = vmul.f32 %v1732_v56, %v1732_v56 }
 0x2b7   :  { %v13308_v29 = vpop.f32.mrb[18].mxu1 }
 0x2b8   :  { %v13309_v33 = vpop.f32.mrb[19].mxu1 }
 0x2b9   :  { %v13310_v31 = vadd.f32 %v13309_v33, %v13308_v29 }
 0x2bb   :  { %v1873_v50 = vadd.f32 %v13310_v31, %v13275_v20  ;;  %v1976_v20 = vld [vmem:[%s21726_s6 + $0x98] sm:$0xf] }
 0x2bc   :  { %v13791_v28 = vpack.c.bf16 %v1976_v20, %v1971_v36 }
 0x2bd   :  { %v1943_v43 = vadd.f32 %v1942_v57, %v1873_v50 }
 0x2bf   :  { %v1946_v38 = vmul.f32 0.0010330578, %v1943_v43 }
 0x2c1   :  { %v1948_v24 = vsub.f32 %v1946_v38, %v1947_v10 }
 0x2c3   :  { %v1949_v35 = vmax.f32 %v1948_v24, 0.0 }
 0x2c5   :  { %v1951_v26 = vadd.f32 1e-05, %v1949_v35  ;;  %v16875_v35 = vstv %s16822_s11  ;;  %s21784_s11 = sld [smem:[#allocation43_spill]] }
 0x2c7   :  { %15559 = vrsqrt.f32 %v1951_v26 }
 0x2d1   :  { %v15560_v45 = vpop.eup %15559 }
 0x2d2   :  { %v1953_v8 = vmul.f32 %v15560_v45, %v1950_v63  ;;  %v21731_v63 = vld [vmem:[#allocation17_spill] sm:$0xff] }
 0x2d4   :  { %12034 = vmatmul.mubr.msk.f32.vlgmr.msra.gmra.mrb[20].mxu1 %vm21665_vm6, %v1953_v8  ;;  %12037 = vmatmul.mubr.msk.f32.vlgmr.msra.gmra.mrb[28].mxu0 %vm21665_vm6, %v1953_v8  ;;  %v1955_v57 = vmul.f32 %v1953_v8, %v1732_v56 }
 0x2d5   :  { %13789 = vmatpush3.bf16.msra.mxu1 %v13788_v52  ;;  %13797 = vmatpush1.bf16.msra.mxu0 %v16700_v2 }
 0x2d6   :  { %13790 = vmatprep.subr.bf16.mxu1 %v21725_v48  ;;  %13800 = vmatprep.subr.msk.bf16.mxu0 %vm16717_vm5, %v13771_v15  ;;  %v1956_v2 = vsub.f32 %v1954_v58, %v1955_v57 }
 0x2d7   :  { %13554 = vmatprep.mubr.msk.f32.mxu1 %vm21662_vm2, %v21723_v13  ;;  %2275 = vmatprep.mubr.f32.mxu0 %v21723_v13 }
 0x2d9   :  { %13793 = vmatpush3.bf16.msk.msra.mxu1 %vm16717_vm5, %v13791_v28  ;;  %13803 = vmatpush1.bf16.msk.msra.mxu0 %vm16717_vm5, %v13774_v21 }
 0x2da   :  { %13805 = vmatprep.subr.bf16.mxu1 %v16698_v3  ;;  %13814 = vmatprep.subr.bf16.mxu0 %v21725_v48  ;;  %v21667_v3 = vmov -1e+30  }
 0x2db   :  { %2674 = vst [vmem:[#allocation2 + $0xc8] sm:$0xc0] %v21667_v3  ;;  %2675 = vst [vmem:[#allocation2 + $0xd0] sm:$0xc0] %v21667_v3 }
 0x2dc   :  { %13555 = vmatmul.mubr.msk.f32.vlgmr.msra.gmra.mrb[22].mxu1 %vm21665_vm6, %v1953_v8  ;;  %12042 = vmatmul.mubr.msk.f32.vlgmr.msra.gmra.mrb[30].mxu0 %vm21665_vm6, %v1956_v2  ;;  %2676 = vst [vmem:[#allocation2 + $0xd8] sm:$0xc0] %v21667_v3  ;;  %2677 = vst [vmem:[#allocation2 + $0xe0] sm:$0xc0] %v21667_v3 }
 0x2dd   :  { %13807 = vmatpush1.bf16.msra.mxu1 %v16711_v53  ;;  %13816 = vmatpush3.bf16.msra.mxu0 %v13788_v52  ;;  %8903 = vst [vmem:[#allocation4 + $0xa0] sm:$0xf0] %v21667_v3  ;;  %8904 = vst [vmem:[#allocation4 + $0xa8] sm:$0xf0] %v21667_v3  ;;  %v21666_v53 = vlaneseq  ;;  %v21732_v52 = vld [vmem:[#allocation18_spill] sm:$0xff] }
 0x2de   :  { %13810 = vmatprep.subr.msk.bf16.mxu1 %vm16717_vm5, %v16736_v1  ;;  %13817 = vmatprep.subr.bf16.mxu0 %v21725_v48  ;;  %8905 = vst [vmem:[#allocation4 + $0xb0] sm:$0xf0] %v21667_v3  ;;  %2679 = vst.msk [vmem:[#allocation2 + $0xe8] sm:$0xc0] %vm2678_vm7, %v21667_v3 }
 0x2df   :  { %2346 = vmatprep.mubr.f32.mxu1 %v21723_v13  ;;  %13565 = vmatprep.mubr.msk.f32.mxu0 %vm21662_vm2, %v21723_v13  ;;  %v2424_v44 = vshrl.u32 %v21666_v53, 7 }
 0x2e1   :  { %13813 = vmatpush1.bf16.msk.msra.mxu1 %vm16717_vm5, %v16746_v51  ;;  %13820 = vmatpush3.bf16.msk.msra.mxu0 %vm16717_vm5, %v13791_v28  ;;  %v16816_v15 = vsub.s32 0, %v2424_v44 }
 0x2e4   :  { %12045 = vmatmul.mubr.msk.f32.vlgmr.msra.gmra.mrb[24].mxu1 %vm21665_vm6, %v1956_v2  ;;  %13566 = vmatmul.mubr.msk.f32.vlgmr.msra.gmra.mrb[32].mxu0 %vm21665_vm6, %v1956_v2  ;;  %vm3067_vm6 = vcmask 1040384  }
 0x3a7   :  { %v2062_v1 = vpop.f32.mrb[20].mxu1  ;;  %v2133_v21 = vpop.f32.mrb[28].mxu0 }
 0x3a8   :  { %v2426_v51 = vrot.slane %v2062_v1, %v16816_v15  ;;  %v2434_v37 = vrot.slane %v2133_v21, %v16816_v15  ;;  %v2064_v19 = vpop.f32.mrb[21].mxu1  ;;  %v2135_v60 = vpop.f32.mrb[29].mxu0 }
 0x3a9   :  { %v2430_v7 = vrot.slane %v2064_v19, %v16816_v15  ;;  %v2438_v59 = vrot.slane %v2135_v60, %v16816_v15 }
 0x3aa   :  { %v2443_v49 = vmul.f32 %v2426_v51, %v16341_v9  ;;  %v2448_v29 = vmul.f32 %v2426_v51, %v16351_v14  ;;  %v2453_v33 = vmul.f32 %v2426_v51, %v16361_v32  ;;  %v2458_v31 = vmul.f32 %v2426_v51, %v16371_v41 }
 0x3ab   :  { %v2463_v56 = vmul.f32 %v2426_v51, %v16381_v5  ;;  %v2468_v50 = vmul.f32 %v2426_v51, %v16391_v23  ;;  %v16831_v43 = vmul.f32 %v2434_v37, %v16260_v62  ;;  %v16834_v10 = vmul.f32 %v2434_v37, %v16271_v4 }
 0x3ac   :  { %v16837_v38 = vmul.f32 %v2434_v37, %v16284_v16  ;;  %v16840_v9 = vmul.f32 %v2434_v37, %v16295_v22  ;;  %v16843_v14 = vmul.f32 %v2434_v37, %v16310_v39  ;;  %v16846_v32 = vmul.f32 %v2434_v37, %v16318_v42 }
 0x3ad   :  { %v2444_v41 = vmul.f32 %v2430_v7, %v16346_v11  ;;  %v2449_v62 = vmul.f32 %v2430_v7, %v16356_v17  ;;  %v2454_v5 = vmul.f32 %v2430_v7, %v16366_v34  ;;  %v2459_v4 = vmul.f32 %v2430_v7, %v16376_v47 }
 0x3ae   :  { %v2464_v16 = vmul.f32 %v2430_v7, %v16386_v12  ;;  %v2469_v22 = vmul.f32 %v2430_v7, %v16396_v30  ;;  %v16855_v23 = vmul.f32 %v2438_v59, %v16266_v0  ;;  %v16858_v39 = vmul.f32 %v2438_v59, %v16273_v6 }
 0x3af   :  { %v16861_v42 = vmul.f32 %v2438_v59, %v16290_v18  ;;  %v16864_v11 = vmul.f32 %v2438_v59, %v16297_v25  ;;  %v16867_v17 = vmul.f32 %v2438_v59, %v16313_v40  ;;  %v16870_v34 = vmul.f32 %v2438_v59, %v16323_v46  ;;  %v2204_v47 = vpop.f32.mrb[22].mxu1  ;;  %v2277_v12 = vpop.f32.mrb[30].mxu0  ;;  %v21729_v46 = vld [vmem:[#allocation15_spill] sm:$0xff] }
 0x3b0   :  { %v2442_v0 = vrot.slane %v2204_v47, %v16816_v15  ;;  %v2476_v30 = vrot.slane %v2277_v12, %v16816_v15  ;;  %v13556_v6 = vpop.f32.mrb[23].mxu1  ;;  %v2279_v24 = vpop.f32.mrb[31].mxu0 }
 0x3b1   :  { %v2480_v18 = vrot.slane %v2279_v24, %v16816_v15 }
 0x3b2   :  { %v16879_v25 = vmul.f32 %v2442_v0, %v16405_v55  ;;  %v16882_v40 = vmul.f32 %v2442_v0, %v16410_v27  ;;  %v16885_v26 = vmul.f32 %v2442_v0, %v21729_v46  ;;  %v16888_v61 = vmul.f32 %v2442_v0, %v21730_v54 }
 0x3b3   :  { %v16891_v45 = vmul.f32 %v2442_v0, %v21731_v63  ;;  %v16894_v8 = vmul.f32 %v2442_v0, %v21732_v52  ;;  %v2493_v36 = vadd.f32 %v2476_v30, %v2443_v49  ;;  %v2498_v20 = vadd.f32 %v2476_v30, %v2448_v29 }
 0x3b4   :  { %v2503_v57 = vadd.f32 %v2476_v30, %v2453_v33  ;;  %v2508_v55 = vadd.f32 %v2476_v30, %v2458_v31  ;;  %v2513_v28 = vadd.f32 %v2476_v30, %v2463_v56  ;;  %v2518_v58 = vadd.f32 %v2476_v30, %v2468_v50 }
 0x3b5   :  { %vm2523_vm8 = vcmp.gt.f32.partialorder %v2493_v36, 0.0  ;;  %vm2528_vm4 = vcmp.gt.f32.partialorder %v2498_v20, 0.0  ;;  %v2554_v27 = vmul.f32 %v16875_v35, %v2493_v36  ;;  %v2559_v2 = vmul.f32 %v16875_v35, %v2498_v20 }
 0x3b6   :  { %vm2533_vm5 = vcmp.gt.f32.partialorder %v2503_v57, 0.0  ;;  %vm2538_vm7 = vcmp.gt.f32.partialorder %v2508_v55, 0.0  ;;  %vm2543_vm2 = vcmp.gt.f32.partialorder %v2513_v28, 0.0  ;;  %vm2548_vm15 = vcmp.gt.f32.partialorder %v2518_v58, 0.0 }
 0x3b7   :  { %v2564_v44 = vmul.f32 %v16875_v35, %v2503_v57  ;;  %v2569_v1 = vmul.f32 %v16875_v35, %v2508_v55  ;;  %v2574_v21 = vmul.f32 %v16875_v35, %v2513_v28  ;;  %v2579_v51 = vmul.f32 %v16875_v35, %v2518_v58  ;;  %v2348_v37 = vpop.f32.mrb[24].mxu1  ;;  %v2419_v19 = vpop.f32.mrb[32].mxu0 }
 0x3b8   :  { %v2584_v60 = vsel %vm2523_vm8, %v2493_v36, %v2554_v27  ;;  %v2589_v7 = vsel %vm2528_vm4, %v2498_v20, %v2559_v2  ;;  %v2494_v59 = vadd.f32 %v2480_v18, %v2444_v41  ;;  %v2499_v49 = vadd.f32 %v2480_v18, %v2449_v62  ;;  %v2350_v29 = vpop.f32.mrb[25].mxu1  ;;  %v13567_v33 = vpop.f32.mrb[33].mxu0 }
 0x3b9   :  { %v2594_v31 = vsel %vm2533_vm5, %v2503_v57, %v2564_v44  ;;  %v2599_v56 = vsel %vm2538_vm7, %v2508_v55, %v2569_v1  ;;  %v2604_v50 = vsel %vm2543_vm2, %v2513_v28, %v2574_v21  ;;  %v2609_v47 = vsel %vm2548_vm15, %v2518_v58, %v2579_v51 }
 0x3ba   :  { %v16908_v0 = vsel %vm1242_vm9, %v2584_v60, -1e+30  ;;  %v16912_v6 = vsel %vm1243_vm10, %v2589_v7, -1e+30  ;;  %v16916_v62 = vsel %vm1244_vm11, %v2594_v31, -1e+30  ;;  %v2504_v24 = vadd.f32 %v2480_v18, %v2454_v5 }
 0x3bb   :  { %v16920_v54 = vsel %vm1245_vm12, %v2599_v56, -1e+30  ;;  %v16924_v52 = vsel %vm1246_vm13, %v2604_v50, -1e+30  ;;  %v2639_v20 = vsel %vm1247_vm14, %v2609_v47, -1e+30  ;;  %v2509_v57 = vadd.f32 %v2480_v18, %v2459_v4 }
 0x3bc   :  { %2644 = vst [vmem:[#allocation2] sm:$0xff] %v16908_v0  ;;  %2669 = vst [vmem:[#allocation2 + $0xc8] sm:$0x3f] %v2639_v20  ;;  %v2514_v55 = vadd.f32 %v2480_v18, %v2464_v16  ;;  %v2519_v28 = vadd.f32 %v2480_v18, %v2469_v22  ;;  %vm2524_vm2 = vcmp.gt.f32.partialorder %v2494_v59, 0.0  ;;  %vm2529_vm15 = vcmp.gt.f32.partialorder %v2499_v49, 0.0 }
 0x3bd   :  { %vm2534_vm8 = vcmp.gt.f32.partialorder %v2504_v24, 0.0  ;;  %vm2539_vm4 = vcmp.gt.f32.partialorder %v2509_v57, 0.0  ;;  %v2555_v5 = vmul.f32 %v16875_v35, %v2494_v59  ;;  %v2560_v58 = vmul.f32 %v16875_v35, %v2499_v49 }
 0x3be   :  { %vm2544_vm5 = vcmp.gt.f32.partialorder %v2514_v55, 0.0  ;;  %vm2549_vm7 = vcmp.gt.f32.partialorder %v2519_v28, 0.0  ;;  %v2565_v27 = vmul.f32 %v16875_v35, %v2504_v24  ;;  %v2570_v2 = vmul.f32 %v16875_v35, %v2509_v57 }
 0x3bf   :  { %v2575_v44 = vmul.f32 %v16875_v35, %v2514_v55  ;;  %v2580_v4 = vmul.f32 %v16875_v35, %v2519_v28  ;;  %v2585_v16 = vsel %vm2524_vm2, %v2494_v59, %v2555_v5  ;;  %v2590_v22 = vsel %vm2529_vm15, %v2499_v49, %v2560_v58 }
 0x3c0   :  { %v2595_v18 = vsel %vm2534_vm8, %v2504_v24, %v2565_v27  ;;  %v2600_v1 = vsel %vm2539_vm4, %v2509_v57, %v2570_v2  ;;  %v16937_v21 = vsel %vm1242_vm9, %v2585_v16, -1e+30  ;;  %v16941_v51 = vsel %vm1243_vm10, %v2590_v22, -1e+30 }
 0x3c1   :  { %v2605_v60 = vsel %vm2544_vm5, %v2514_v55, %v2575_v44  ;;  %v2610_v7 = vsel %vm2549_vm7, %v2519_v28, %v2580_v4  ;;  %v16945_v33 = vsel %vm1244_vm11, %v2595_v18, -1e+30  ;;  %v16949_v59 = vsel %vm1245_vm12, %v2600_v1, -1e+30  ;;  %2645 = vst [vmem:[#allocation2 + $0x8] sm:$0xff] %v16937_v21 }
 0x3c2   :  { %v16954_v49 = vsel %vm1246_vm13, %v2605_v60, -1e+30  ;;  %v2640_v31 = vsel %vm1247_vm14, %v2610_v7, -1e+30  ;;  %v2484_v56 = vrot.slane %v2348_v37, %v16816_v15  ;;  %v2492_v50 = vrot.slane %v2419_v19, %v16816_v15 }
 0x3c3   :  { %2670 = vst [vmem:[#allocation2 + $0xd0] sm:$0x3f] %v2640_v31  ;;  %v16961_v47 = vrot.slane %v2350_v29, %v16816_v15  ;;  %v2832_v24 = vrot.slane %v16912_v6, 1  ;;  %v2846_v20 = vrot.slane %v16916_v62, 1  ;;  %v3068_v57 = vrot.slane %v16908_v0, 7  ;;  %v16966_v55 = vld [vmem:[#allocation2 + $0xc8] sm:$0xff] }
 0x3c4   :  { %v2495_v28 = vadd.f32 %v2484_v56, %v16831_v43  ;;  %v2500_v5 = vadd.f32 %v2484_v56, %v16834_v10  ;;  %v2505_v37 = vadd.f32 %v2484_v56, %v16837_v38  ;;  %v2510_v19 = vadd.f32 %v2484_v56, %v16840_v9  ;;  %2735 = vst [vmem:[#allocation3 + $0xc8] sm:$0xff] %v16966_v55 }
 0x3c5   :  { %v2515_v29 = vadd.f32 %v2484_v56, %v16843_v14  ;;  %v2520_v58 = vadd.f32 %v2484_v56, %v16846_v32  ;;  %v2497_v27 = vadd.f32 %v2492_v50, %v16879_v25  ;;  %v2502_v2 = vadd.f32 %v2492_v50, %v16882_v40 }
 0x3c6   :  { %vm2525_vm2 = vcmp.gt.f32.partialorder %v2495_v28, 0.0  ;;  %vm2530_vm15 = vcmp.gt.f32.partialorder %v2500_v5, 0.0  ;;  %vm2535_vm8 = vcmp.gt.f32.partialorder %v2505_v37, 0.0  ;;  %vm2540_vm4 = vcmp.gt.f32.partialorder %v2510_v19, 0.0 }
 0x3c7   :  { %vm2545_vm5 = vcmp.gt.f32.partialorder %v2515_v29, 0.0  ;;  %vm2550_vm7 = vcmp.gt.f32.partialorder %v2520_v58, 0.0  ;;  %v2556_v43 = vmul.f32 %v16875_v35, %v2495_v28  ;;  %v2561_v10 = vmul.f32 %v16875_v35, %v2500_v5 }
 0x3c8   :  { %v2566_v38 = vmul.f32 %v16875_v35, %v2505_v37  ;;  %v2571_v9 = vmul.f32 %v16875_v35, %v2510_v19  ;;  %v2576_v14 = vmul.f32 %v16875_v35, %v2515_v29  ;;  %v2581_v32 = vmul.f32 %v16875_v35, %v2520_v58  ;;  %v2771_v12 = vld [vmem:[#allocation2 + $0x8] sm:$0xfe] }
 0x3c9   :  { %v2586_v25 = vsel %vm2525_vm2, %v2495_v28, %v2556_v43  ;;  %v2591_v40 = vsel %vm2530_vm15, %v2500_v5, %v2561_v10  ;;  %v2507_v44 = vadd.f32 %v2492_v50, %v16885_v26  ;;  %v2512_v4 = vadd.f32 %v2492_v50, %v16888_v61 }
 0x3ca   :  { %v2596_v16 = vsel %vm2535_vm8, %v2505_v37, %v2566_v38  ;;  %v2601_v22 = vsel %vm2540_vm4, %v2510_v19, %v2571_v9  ;;  %v2606_v18 = vsel %vm2545_vm5, %v2515_v29, %v2576_v14  ;;  %v2611_v1 = vsel %vm2550_vm7, %v2520_v58, %v2581_v32  ;;  %v16985_v60 = vld [vmem:[#allocation2 + $0xd0] sm:$0xff] }
 0x3cb   :  { %v16989_v7 = vsel %vm1242_vm9, %v2586_v25, -1e+30  ;;  %v16993_v31 = vsel %vm1243_vm10, %v2591_v40, -1e+30  ;;  %v16997_v56 = vsel %vm1244_vm11, %v2596_v16, -1e+30  ;;  %v2517_v26 = vadd.f32 %v2492_v50, %v16891_v45 }
 0x3cc   :  { %2736 = vst [vmem:[#allocation3 + $0xd0] sm:$0xff] %v16985_v60  ;;  %v17003_v61 = vsel %vm1245_vm12, %v2601_v22, -1e+30  ;;  %v17007_v28 = vsel %vm1246_vm13, %v2606_v18, -1e+30  ;;  %2646 = vst [vmem:[#allocation2 + $0x10] sm:$0xff] %v16989_v7  ;;  %v2522_v37 = vadd.f32 %v2492_v50, %v16894_v8  ;;  %v2558_v45 = vmul.f32 %v16875_v35, %v2497_v27 }
 0x3cd   :  { %v2641_v5 = vsel %vm1247_vm14, %v2611_v1, -1e+30  ;;  %vm2527_vm2 = vcmp.gt.f32.partialorder %v2497_v27, 0.0  ;;  %vm2532_vm15 = vcmp.gt.f32.partialorder %v2502_v2, 0.0  ;;  %vm2537_vm8 = vcmp.gt.f32.partialorder %v2507_v44, 0.0 }
 0x3ce   :  { %2671 = vst [vmem:[#allocation2 + $0xd8] sm:$0x3f] %v2641_v5  ;;  %vm2542_vm4 = vcmp.gt.f32.partialorder %v2512_v4, 0.0  ;;  %vm2547_vm5 = vcmp.gt.f32.partialorder %v2517_v26, 0.0  ;;  %vm2552_vm7 = vcmp.gt.f32.partialorder %v2522_v37, 0.0  ;;  %v2563_v19 = vmul.f32 %v16875_v35, %v2502_v2 }
 0x3cf   :  { %v2568_v29 = vmul.f32 %v16875_v35, %v2507_v44  ;;  %v2573_v58 = vmul.f32 %v16875_v35, %v2512_v4  ;;  %v2578_v43 = vmul.f32 %v16875_v35, %v2517_v26  ;;  %v2583_v10 = vmul.f32 %v16875_v35, %v2522_v37 }
 0x3d0   :  { %v2588_v8 = vsel %vm2527_vm2, %v2497_v27, %v2558_v45  ;;  %v2593_v50 = vsel %vm2532_vm15, %v2502_v2, %v2563_v19  ;;  %v2496_v38 = vadd.f32 %v16961_v47, %v16855_v23  ;;  %v2501_v9 = vadd.f32 %v16961_v47, %v16858_v39 }
 0x3d1   :  { %v2598_v14 = vsel %vm2537_vm8, %v2507_v44, %v2568_v29  ;;  %v2603_v32 = vsel %vm2542_vm4, %v2512_v4, %v2573_v58  ;;  %v2608_v25 = vsel %vm2547_vm5, %v2517_v26, %v2578_v43  ;;  %v2613_v40 = vsel %vm2552_vm7, %v2522_v37, %v2583_v10  ;;  %v14704_v58 = vld [vmem:[%s21739_s22 + $0x4d8] ss:$16 sps:$4 sm:$0xff]   ;;  %v14706_v43 = vld [vmem:[%s21739_s22 + $0x4dc] ss:$16 sps:$4 sm:$0xff]  }
 0x3d2   :  { %v2618_v16 = vsel %vm1242_vm9, %v2588_v8, -1e+30  ;;  %v2623_v22 = vsel %vm1243_vm10, %v2593_v50, -1e+30  ;;  %v2628_v27 = vsel %vm1244_vm11, %v2598_v14, -1e+30  ;;  %v2506_v23 = vadd.f32 %v16961_v47, %v16861_v42  ;;  %5069 = vmatprep.subr.bf16.mxu0 %v14706_v43 }
 0x3d3   :  { %v2633_v39 = vsel %vm1245_vm12, %v2603_v32, -1e+30  ;;  %v2638_v2 = vsel %vm1246_vm13, %v2608_v25, -1e+30  ;;  %v2643_v44 = vsel %vm1247_vm14, %v2613_v40, -1e+30  ;;  %v2511_v4 = vadd.f32 %v16961_v47, %v16864_v11  ;;  %5070 = vmatpush1.bf16.msra.mxu0 %v14704_v58 }
 0x3d4   :  { %2648 = vst.msk [vmem:[#allocation2 + $0x20] sm:$0xff] %vm1327_vm1, %v2618_v16  ;;  %2653 = vst.msk [vmem:[#allocation2 + $0x48] sm:$0xff] %vm1327_vm1, %v2623_v22  ;;  %v2516_v42 = vadd.f32 %v16961_v47, %v16867_v17  ;;  %v2521_v18 = vadd.f32 %v16961_v47, %v16870_v34  ;;  %vm2526_vm2 = vcmp.gt.f32.partialorder %v2496_v38, 0.0  ;;  %vm2531_vm15 = vcmp.gt.f32.partialorder %v2501_v9, 0.0  ;;  %v14701_v17 = vld [vmem:[%s21739_s22 + $0x4d0] ss:$16 sps:$4 sm:$0xff]  }
 0x3d5   :  { %2658 = vst.msk [vmem:[#allocation2 + $0x70] sm:$0xff] %vm1327_vm1, %v2628_v27  ;;  %2663 = vst.msk [vmem:[#allocation2 + $0x98] sm:$0xff] %vm1327_vm1, %v2633_v39  ;;  %vm2536_vm8 = vcmp.gt.f32.partialorder %v2506_v23, 0.0  ;;  %vm2541_vm4 = vcmp.gt.f32.partialorder %v2511_v4, 0.0  ;;  %v2557_v1 = vmul.f32 %v16875_v35, %v2496_v38  ;;  %v2562_v11 = vmul.f32 %v16875_v35, %v2501_v9  ;;  %v17051_v26 = vld [vmem:[#allocation2 + $0xd8] sm:$0xff] }
 0x3d6   :  { %2668 = vst.msk [vmem:[#allocation2 + $0xc0] sm:$0xff] %vm1327_vm1, %v2638_v2  ;;  %vm2546_vm5 = vcmp.gt.f32.partialorder %v2516_v42, 0.0  ;;  %vm2551_vm7 = vcmp.gt.f32.partialorder %v2521_v18, 0.0  ;;  %v2567_v5 = vmul.f32 %v16875_v35, %v2506_v23  ;;  %v2572_v37 = vmul.f32 %v16875_v35, %v2511_v4  ;;  %2737 = vst [vmem:[#allocation3 + $0xd8] sm:$0xff] %v17051_v26  ;;  %v14703_v34 = vld [vmem:[%s21739_s22 + $0x4d4] ss:$16 sps:$4 sm:$0xff]  }
 0x3d7   :  { %2673 = vst.msk [vmem:[#allocation2 + $0xe8] sm:$0x3f] %vm1337_vm3, %v2643_v44  ;;  %v2577_v47 = vmul.f32 %v16875_v35, %v2516_v42  ;;  %v2582_v45 = vmul.f32 %v16875_v35, %v2521_v18  ;;  %v2587_v19 = vsel %vm2526_vm2, %v2496_v38, %v2557_v1  ;;  %v2592_v29 = vsel %vm2531_vm15, %v2501_v9, %v2562_v11  ;;  %v2770_v38 = vld [vmem:[#allocation2] sm:$0xfe]  ;;  %v14710_v58 = vld [vmem:[%s21739_s22 + $0x4f8] ss:$16 sps:$4 sm:$0xff]  }
 0x3d8   :  { %v2597_v10 = vsel %vm2536_vm8, %v2506_v23, %v2567_v5  ;;  %v2602_v8 = vsel %vm2541_vm4, %v2511_v4, %v2572_v37  ;;  %v17076_v50 = vsel %vm1242_vm9, %v2587_v19, -1e+30  ;;  %v17080_v35 = vsel %vm1243_vm10, %v2592_v29, -1e+30  ;;  %4880 = vmatprep.subr.bf16.mxu1 %v14703_v34  ;;  %v2772_v23 = vld [vmem:[#allocation2 + $0x10] sm:$0xfe] }
 0x3d9   :  { %v2607_v9 = vsel %vm2546_vm5, %v2516_v42, %v2577_v47  ;;  %v2612_v14 = vsel %vm2551_vm7, %v2521_v18, %v2582_v45  ;;  %v17086_v32 = vsel %vm1244_vm11, %v2597_v10, -1e+30  ;;  %v17090_v25 = vsel %vm1245_vm12, %v2602_v8, -1e+30  ;;  %2647 = vst [vmem:[#allocation2 + $0x18] sm:$0xff] %v17076_v50  ;;  %4881 = vmatpush1.bf16.msra.mxu1 %v14701_v17 }
 0x3da   :  { %v17095_v30 = vsel %vm1246_vm13, %v2607_v9, -1e+30  ;;  %v2642_v40 = vsel %vm1247_vm14, %v2612_v14, -1e+30  ;;  %v2847_v41 = vsel %vm2830_vm0, %v2832_v24, %v2846_v20  ;;  %v3073_v46 = vrot.slane %v16912_v6, 7 }
 0x3db   :  { %v17105_v16 = vld [vmem:[#allocation2 + $0x20] sm:$0xff]  ;;  %2672 = vst [vmem:[#allocation2 + $0xe0] sm:$0x3f] %v2642_v40  ;;  %v2921_v22 = vmax.f32 %v16912_v6, %v2847_v41  ;;  %v2831_v63 = vrot.slane %v2770_v38, 1  ;;  %v2856_v27 = vrot.slane %v16920_v54, 1  ;;  %v2866_v36 = vrot.slane %v16924_v52, 1 }
 0x3dc   :  { %2714 = vst.msk [vmem:[#allocation3 + $0x20] sm:$0xff] %vm1327_vm1, %v17105_v16  ;;  %v17112_v39 = vld [vmem:[#allocation2 + $0x48] sm:$0xff]  ;;  %v3074_v2 = vsel %vm3067_vm6, %v3068_v57, %v3073_v46  ;;  %v3083_v44 = vrot.slane %v16916_v62, 7  ;;  %v3093_v4 = vrot.slane %v16920_v54, 7  ;;  %v2834_v42 = vrot.slane %v2771_v12, 1  ;;  %v17121_v18 = vld [vmem:[#allocation2 + $0x70] sm:$0xff] }
 0x3dd   :  { %2719 = vst.msk [vmem:[#allocation3 + $0x48] sm:$0xff] %vm1327_vm1, %v17112_v39  ;;  %v17123_v1 = vld [vmem:[#allocation2 + $0x98] sm:$0xff]  ;;  %v17125_v11 = vld [vmem:[#allocation2 + $0xc0] sm:$0xff]  ;;  %v17127_v5 = vmax.f32 %v2921_v22, %v3074_v2  ;;  %v2833_v37 = vsel %vm2830_vm0, %v2831_v63, %v2832_v24  ;;  %v2867_v17 = vsel %vm2830_vm0, %v2856_v27, %v2866_v36  ;;  %v2857_v34 = vsel %vm2830_vm0, %v2846_v20, %v2856_v27 }
 0x3de   :  { %2724 = vst.msk [vmem:[#allocation3 + $0x70] sm:$0xff] %vm1327_vm1, %v17121_v18  ;;  %2729 = vst.msk [vmem:[#allocation3 + $0x98] sm:$0xff] %vm1327_vm1, %v17123_v1  ;;  %v17144_v6 = vld [vmem:[#allocation2 + $0xe8] sm:$0xff]  ;;  %v2916_v24 = vmax.f32 %v16908_v0, %v2833_v37  ;;  %v2931_v47 = vmax.f32 %v16920_v54, %v2867_v17  ;;  %v3094_v45 = vsel %vm3067_vm6, %v3083_v44, %v3093_v4  ;;  %v14707_v19 = vld [vmem:[%s21739_s22 + $0x4f0] ss:$16 sps:$4 sm:$0xff]   ;;  %v2835_v43 = vrot.slane %v16941_v51, 1 }
 0x3df   :  { %2734 = vst.msk [vmem:[#allocation3 + $0xc0] sm:$0xff] %vm1327_vm1, %v17125_v11  ;;  %v2926_v20 = vmax.f32 %v16916_v62, %v2857_v34  ;;  %2739 = vst.msk [vmem:[#allocation3 + $0xe8] sm:$0xff] %vm1327_vm1, %v17144_v6  ;;  %v14709_v29 = vld [vmem:[%s21739_s22 + $0x4f4] ss:$16 sps:$4 sm:$0xff]   ;;  %3284 = vrot.lane.b32.xlu1 %v17127_v5, %s15600_s10  ;;  %v3084_v62 = vsel %vm3067_vm6, %v3073_v46, %v3083_v44  ;;  %v3069_v10 = vrot.slane %v16937_v21, 7  ;;  %v2837_v8 = vrot.slane %v2772_v23, 1 }
 0x3e0   :  { %v14712_v38 = vld [vmem:[%s21739_s22 + $0x4fc] ss:$16 sps:$4 sm:$0xff]   ;;  %2946 = vst [vmem:[#allocation3] sm:$0xff] %v2916_v24  ;;  %v17171_v9 = vmax.f32 %v2931_v47, %v3094_v45  ;;  %v2838_v12 = vrot.slane %v16993_v31, 1  ;;  %v3070_v40 = vrot.slane %v16989_v7, 7  ;;  %4882 = vmatprep.subr.bf16.mxu1 %v14709_v29  ;;  %v2836_v46 = vsel %vm2830_vm0, %v2834_v42, %v2835_v43 }
 0x3e1   :  { %v17173_v14 = vmax.f32 %v2926_v20, %v3084_v62  ;;  %v14713_v41 = vld [vmem:[%s21739_s22 + $0x510] ss:$16 sps:$4 sm:$0xff]   ;;  %v2850_v22 = vrot.slane %v16997_v56, 1  ;;  %v3077_v63 = vrot.slane %v16993_v31, 7  ;;  %v2848_v27 = vrot.slane %v16945_v33, 1  ;;  %5071 = vmatprep.subr.bf16.mxu0 %v14712_v38  ;;  %4883 = vmatpush1.bf16.msra.mxu1 %v14707_v19 }
 0x3e2   :  { %v14715_v23 = vld [vmem:[%s21739_s22 + $0x514] ss:$16 sps:$4 sm:$0xff]   ;;  %v2917_v2 = vmax.f32 %v16937_v21, %v2836_v46  ;;  %v2839_v44 = vsel %vm2830_vm0, %v2837_v8, %v2838_v12  ;;  %v3075_v37 = vrot.slane %v16941_v51, 7  ;;  %v2860_v42 = vrot.slane %v17003_v61, 1  ;;  %5072 = vmatpush1.bf16.msra.mxu0 %v14710_v58  ;;  %v14716_v20 = vld [vmem:[%s21739_s22 + $0x518] ss:$16 sps:$4 sm:$0xff]  }
 0x3e3   :  { %v17191_v17 = vld [vmem:[#allocation2 + $0xe0] sm:$0xff]  ;;  %3304 = vrot.lane.b32.xlu1 %v17171_v9, %s15600_s10  ;;  %v2918_v34 = vmax.f32 %v16989_v7, %v2839_v44  ;;  %v2851_v24 = vsel %vm2830_vm0, %v2838_v12, %v2850_v22  ;;  %v3078_v47 = vsel %vm3067_vm6, %v3070_v40, %v3077_v63  ;;  %v2849_v45 = vsel %vm2830_vm0, %v2835_v43, %v2848_v27  ;;  %v14718_v19 = vld [vmem:[%s21739_s22 + $0x51c] ss:$16 sps:$4 sm:$0xff]  }
 0x3e4   :  { %2738 = vst [vmem:[#allocation3 + $0xe0] sm:$0xff] %v17191_v17  ;;  %2947 = vst [vmem:[#allocation3 + $0x8] sm:$0xff] %v2917_v2  ;;  %v2923_v29 = vmax.f32 %v16993_v31, %v2851_v24  ;;  %v2922_v58 = vmax.f32 %v16941_v51, %v2849_v45  ;;  %v3076_v62 = vsel %vm3067_vm6, %v3069_v10, %v3075_v37  ;;  %4884 = vmatprep.subr.bf16.mxu1 %v14715_v23  ;;  %v14719_v23 = vld [vmem:[%s21739_s22 + $0x530] ss:$16 sps:$4 sm:$0xff]   ;;  %v14722_v45 = vld [vmem:[%s21739_s22 + $0x538] ss:$16 sps:$4 sm:$0xff]  }
 0x3e5   :  { %v2861_v43 = vsel %vm2830_vm0, %v2850_v22, %v2860_v42  ;;  %2948 = vst [vmem:[#allocation3 + $0x10] sm:$0xff] %v2918_v34  ;;  %v3087_v38 = vrot.slane %v16997_v56, 7  ;;  %v2858_v12 = vrot.slane %v16949_v59, 1  ;;  %v3085_v46 = vrot.slane %v16945_v33, 7  ;;  %5073 = vmatprep.subr.bf16.mxu0 %v14718_v19  ;;  %4885 = vmatpush1.bf16.msra.mxu1 %v14713_v41  ;;  %v14731_v21 = vld [vmem:[%s21739_s22 + $0x570] ss:$16 sps:$4 sm:$0xff]  }
 0x3e6   :  { %v2928_v8 = vmax.f32 %v16997_v56, %v2861_v43  ;;  %v17218_v31 = vmax.f32 %v2923_v29, %v3078_v47  ;;  %v17220_v51 = vmax.f32 %v2922_v58, %v3076_v62  ;;  %v2870_v2 = vrot.slane %v17007_v28, 1  ;;  %5074 = vmatpush1.bf16.msra.mxu0 %v14716_v20  ;;  %v14721_v56 = vld [vmem:[%s21739_s22 + $0x534] ss:$16 sps:$4 sm:$0xff]   ;;  %v14725_v62 = vld [vmem:[%s21739_s22 + $0x550] ss:$16 sps:$4 sm:$0xff]  }
 0x3e7   :  { %v3097_v22 = vrot.slane %v17003_v61, 7  ;;  %v2977_v44 = vld [vmem:[#allocation3] sm:$0xfe]  ;;  %v3088_v41 = vsel %vm3067_vm6, %v3077_v63, %v3087_v38  ;;  %v2859_v34 = vsel %vm2830_vm0, %v2848_v27, %v2858_v12  ;;  %v3086_v24 = vsel %vm3067_vm6, %v3075_v37, %v3085_v46  ;;  %v2765_v27 = vld [vmem:[#allocation3 + $0xc8] sm:$0x7f]  ;;  %4886 = vmatprep.subr.bf16.mxu1 %v14721_v56 }
 0x3e8   :  { %v2868_v47 = vrot.slane %v16954_v49, 1  ;;  %v3153_v20 = vmax.f32 %v2977_v44, %v3068_v57  ;;  %v17239_v19 = vmax.f32 %v2928_v8, %v3088_v41  ;;  %v2927_v29 = vmax.f32 %v16945_v33, %v2859_v34  ;;  %v14724_v37 = vld [vmem:[%s21739_s22 + $0x53c] ss:$16 sps:$4 sm:$0xff]   ;;  %v14727_v58 = vld [vmem:[%s21739_s22 + $0x554] ss:$16 sps:$4 sm:$0xff]  }
 0x3e9   :  { %v2871_v63 = vsel %vm2830_vm0, %v2860_v42, %v2870_v2  ;;  %v3098_v33 = vsel %vm3067_vm6, %v3087_v38, %v3097_v22  ;;  %v3095_v42 = vrot.slane %v16949_v59, 7  ;;  %4887 = vmatpush1.bf16.msra.mxu1 %v14719_v23  ;;  %v14730_v43 = vld [vmem:[%s21739_s22 + $0x55c] ss:$16 sps:$4 sm:$0xff]   ;;  %v2876_v38 = vrot.slane %v16966_v55, 1  ;;  %v2766_v44 = vld [vmem:[#allocation3 + $0xd0] sm:$0x7f]  ;;  %5075 = vmatprep.subr.bf16.mxu0 %v14724_v37 }
 0x3ea   :  { %v2933_v0 = vmax.f32 %v17003_v61, %v2871_v63  ;;  %v2869_v57 = vsel %vm2830_vm0, %v2858_v12, %v2868_v47  ;;  %3183 = vst [vmem:[#allocation3] sm:$0xfe] %v3153_v20  ;;  %v17263_v8 = vmax.f32 %v2927_v29, %v3086_v24  ;;  %4888 = vmatprep.subr.bf16.mxu1 %v14727_v58  ;;  %v3103_v34 = vrot.slane %v16924_v52, 7  ;;  %v14728_v24 = vld [vmem:[%s21739_s22 + $0x558] ss:$16 sps:$4 sm:$0xff]  }
 0x3eb   :  { %v2932_v56 = vmax.f32 %v16949_v59, %v2869_v57  ;;  %v2978_v12 = vld [vmem:[#allocation3 + $0x8] sm:$0xfe]  ;;  %v3096_v41 = vsel %vm3067_vm6, %v3085_v46, %v3095_v42  ;;  %v2878_v63 = vrot.slane %v16985_v60, 1  ;;  %5076 = vmatpush1.bf16.msra.mxu0 %v14722_v45  ;;  %v2941_v29 = vmax.f32 %v2765_v27, %v2876_v38 }
 0x3ec   :  { %v17267_v23 = vmax.f32 %v2933_v0, %v3098_v33  ;;  %v3154_v59 = vmax.f32 %v2978_v12, %v3069_v10  ;;  %v2979_v55 = vld [vmem:[#allocation3 + $0x10] sm:$0xfe]  ;;  %v3105_v37 = vrot.slane %v16954_v49, 7  ;;  %v3034_v58 = vld [vmem:[#allocation2 + $0xd8] sm:$0x7f]  ;;  %5077 = vmatprep.subr.bf16.mxu0 %v14730_v43  ;;  %v3107_v43 = vrot.slane %v17007_v28, 7 }
 0x3ed   :  { %v17277_v20 = vmax.f32 %v2932_v56, %v3096_v41  ;;  %v3155_v46 = vmax.f32 %v2979_v55, %v3070_v40  ;;  %v2879_v60 = vsel %vm2830_vm0, %v2868_v47, %v2878_v63  ;;  %v2942_v45 = vmax.f32 %v2766_v44, %v2878_v63  ;;  %v2774_v0 = vld [vmem:[#allocation2 + $0x20] sm:$0xfe]  ;;  %4889 = vmatpush1.bf16.msra.mxu1 %v14725_v62  ;;  %v2767_v47 = vld [vmem:[#allocation3 + $0xd8] sm:$0x7f]  ;;  %v2749_v61 = vld [vmem:[#allocation3 + $0x48] sm:$0xff] }
 0x3ee   :  { %v14733_v10 = vld [vmem:[%s21739_s22 + $0x574] ss:$16 sps:$4 sm:$0xff]   ;;  %3184 = vst [vmem:[#allocation3 + $0x8] sm:$0xfe] %v3154_v59  ;;  %2971 = vst [vmem:[#allocation3 + $0xc8] sm:$0x7f] %v2941_v29  ;;  %v2937_v27 = vmax.f32 %v16954_v49, %v2879_v60  ;;  %v3106_v7 = vsel %vm3067_vm6, %v3095_v42, %v3105_v37  ;;  %v2877_v40 = vsel %vm2830_vm0, %v2866_v36, %v2876_v38 }
 0x3ef   :  { %v14736_v33 = vld [vmem:[%s21739_s22 + $0x57c] ss:$16 sps:$4 sm:$0xff]   ;;  %3185 = vst [vmem:[#allocation3 + $0x10] sm:$0xfe] %v3155_v46  ;;  %2972 = vst [vmem:[#allocation3 + $0xd0] sm:$0x7f] %v2942_v45  ;;  %v2936_v57 = vmax.f32 %v16924_v52, %v2877_v40  ;;  %v3104_v62 = vsel %vm3067_vm6, %v3093_v4, %v3103_v34  ;;  %5078 = vmatpush1.bf16.msra.mxu0 %v14728_v24  ;;  %4890 = vmatprep.subr.bf16.mxu1 %v14733_v10 }
 0x3f0   :  { %v2880_v42 = vrot.slane %v17051_v26, 1  ;;  %v14734_v36 = vld [vmem:[%s21739_s22 + $0x578] ss:$16 sps:$4 sm:$0xff]   ;;  %v17310_v56 = vmax.f32 %v2937_v27, %v3106_v7  ;;  %v3117_v38 = vrot.slane %v3034_v58, 7  ;;  %v2843_v44 = vrot.slane %v2774_v0, 1  ;;  %5079 = vmatprep.subr.bf16.mxu0 %v14736_v33  ;;  %v2744_v59 = vld [vmem:[#allocation3 + $0x20] sm:$0xff] }
 0x3f1   :  { %v17312_v12 = vld [vmem:[#allocation3] sm:$0xff]  ;;  %v17314_v54 = vmax.f32 %v2936_v57, %v3104_v62  ;;  %v3108_v4 = vsel %vm3067_vm6, %v3097_v22, %v3107_v43  ;;  %4891 = vmatpush1.bf16.msra.mxu1 %v14731_v21  ;;  %v2844_v55 = vrot.slane %v17112_v39, 1  ;;  %v2773_v29 = vld [vmem:[#allocation2 + $0x18] sm:$0xfe]  ;;  %v2854_v22 = vrot.slane %v17121_v18, 1  ;;  %v2754_v46 = vld [vmem:[#allocation3 + $0x70] sm:$0xff] }
 0x3f2   :  { %v2881_v26 = vsel %vm2830_vm0, %v2870_v2, %v2880_v42  ;;  %v2943_v41 = vmax.f32 %v2767_v47, %v2880_v42  ;;  %3274 = vrot.lane.b32.xlu0 %v17312_v12, %s15600_s10  ;;  %v17326_v24 = vsel %vm3067_vm6, %v3107_v43, %v3117_v38  ;;  %v3072_v2 = vrot.slane %v17105_v16, 7  ;;  %v14739_v38 = vld [vmem:[%s21739_s22 + $0x594] ss:$16 sps:$4 sm:$0xff]   ;;  %v14802_v49 = vld [vmem:[%s21739_s22 + $0x6dc] ss:$16 sps:$4 sm:$0xff]  }
 0x3f3   :  { %v2938_v63 = vmax.f32 %v17007_v28, %v2881_v26  ;;  %v3081_v58 = vrot.slane %v17112_v39, 7  ;;  %v2864_v60 = vrot.slane %v17123_v1, 1  ;;  %5080 = vmatpush1.bf16.msra.mxu0 %v14734_v36  ;;  %v2845_v45 = vsel %vm2830_vm0, %v2843_v44, %v2844_v55  ;;  %v2759_v39 = vld [vmem:[#allocation3 + $0x98] sm:$0xff]  ;;  %v14737_v36 = vld [vmem:[%s21739_s22 + $0x590] ss:$16 sps:$4 sm:$0xff]   ;;  %4892 = vmatprep.subr.bf16.mxu1 %v14739_v38 }
 0x3f4   :  { %2973 = vst [vmem:[#allocation3 + $0xd8] sm:$0x7f] %v2943_v41  ;;  %v2874_v0 = vrot.slane %v17125_v11, 1  ;;  %v2920_v10 = vmax.f32 %v2744_v59, %v2845_v45  ;;  %v2855_v27 = vsel %vm2830_vm0, %v2844_v55, %v2854_v22  ;;  %v3091_v40 = vrot.slane %v17121_v18, 7  ;;  %v14742_v44 = vld [vmem:[%s21739_s22 + $0x59c] ss:$16 sps:$4 sm:$0xff]  }
 0x3f5   :  { %v17333_v28 = vmax.f32 %v2938_v63, %v3108_v4  ;;  %v17337_v21 = vld [vmem:[#allocation3 + $0x8] sm:$0xff]  ;;  %v2865_v7 = vsel %vm2830_vm0, %v2854_v22, %v2864_v60  ;;  %vm2975_vm9 = vcmask 849920   ;;  %vm3187_vm10 = vcmask 850945   ;;  %v2764_v63 = vld [vmem:[#allocation3 + $0xc0] sm:$0xff]  ;;  %5081 = vmatprep.subr.bf16.mxu0 %v14742_v44  ;;  %4893 = vmatpush1.bf16.msra.mxu1 %v14737_v36 }
 0x3f6   :  { %3294 = vrot.lane.b32.xlu0 %v17173_v14, %s15600_s10  ;;  %3482 = vrot.lane.b32.xlu1 %v17337_v21, %s15601_s1  ;;  %v17346_v47 = vld [vmem:[#allocation3 + $0x10] sm:$0xff]  ;;  %v2925_v33 = vmax.f32 %v2749_v61, %v2855_v27  ;;  %v2930_v57 = vmax.f32 %v2754_v46, %v2865_v7  ;;  %v3101_v62 = vrot.slane %v17123_v1, 7  ;;  %v2840_v42 = vrot.slane %v2773_v29, 1  ;;  %2950 = vst.msk [vmem:[#allocation3 + $0x20] sm:$0xff] %vm1327_vm1, %v2920_v10  ;;  %v14740_v55 = vld [vmem:[%s21739_s22 + $0x598] ss:$16 sps:$4 sm:$0xff]  }
 0x3f7   :  { %v17353_v18 = vsel %vm3067_vm6, %v3072_v2, %v3081_v58  ;;  %v2875_v43 = vsel %vm2830_vm0, %v2864_v60, %v2874_v0  ;;  %v2841_v4 = vrot.slane %v17080_v35, 1  ;;  %v3071_v41 = vrot.slane %v17076_v50, 7  ;;  %v2769_v10 = vld [vmem:[#allocation3 + $0xe8] sm:$0x7f]  ;;  %v14745_v27 = vld [vmem:[%s21739_s22 + $0x5b4] ss:$16 sps:$4 sm:$0xff]   ;;  %5082 = vmatpush1.bf16.msra.mxu0 %v14740_v55 }
 0x3f8   :  { %2955 = vst.msk [vmem:[#allocation3 + $0x48] sm:$0xff] %vm1327_vm1, %v2925_v33  ;;  %2960 = vst.msk [vmem:[#allocation3 + $0x70] sm:$0xff] %vm1327_vm1, %v2930_v57  ;;  %v2935_v26 = vmax.f32 %v2759_v39, %v2875_v43  ;;  %v2884_v59 = vrot.slane %v17144_v6, 1  ;;  %v17374_v29 = vsel %vm3067_vm6, %v3081_v58, %v3091_v40  ;;  %v2852_v61 = vrot.slane %v17086_v32, 1  ;;  %v14746_v36 = vld [vmem:[%s21739_s22 + $0x5b8] ss:$16 sps:$4 sm:$0xff]   ;;  %4894 = vmatprep.subr.bf16.mxu1 %v14745_v27 }
 0x3f9   :  { %v3079_v22 = vrot.slane %v17080_v35, 7  ;;  %v2862_v46 = vrot.slane %v17090_v25, 1  ;;  %v2842_v6 = vsel %vm2830_vm0, %v2840_v42, %v2841_v4  ;;  %v3089_v60 = vrot.slane %v17086_v32, 7  ;;  %v14748_v42 = vld [vmem:[%s21739_s22 + $0x5bc] ss:$16 sps:$4 sm:$0xff]  }
 0x3fa   :  { %3480 = vrot.lane.b32.xlu0 %v17312_v12, %s15601_s1  ;;  %3278 = vrot.lane.b32.xlu1 %v17346_v47, %s15600_s10  ;;  %2965 = vst.msk [vmem:[#allocation3 + $0x98] sm:$0xff] %vm1327_vm1, %v2935_v26  ;;  %v2885_v58 = vsel %vm2830_vm0, %v2874_v0, %v2884_v59  ;;  %v2872_v45 = vrot.slane %v17095_v30, 1  ;;  %v17394_v7 = vsel %vm3067_vm6, %v3091_v40, %v3101_v62  ;;  %v3111_v57 = vrot.slane %v17125_v11, 7  ;;  %v14743_v0 = vld [vmem:[%s21739_s22 + $0x5b0] ss:$16 sps:$4 sm:$0xff]  }
 0x3fb   :  { %v2919_v39 = vmax.f32 %v17076_v50, %v2842_v6  ;;  %v2940_v33 = vmax.f32 %v2764_v63, %v2885_v58  ;;  %v2853_v43 = vsel %vm2830_vm0, %v2841_v4, %v2852_v61  ;;  %v3080_v40 = vsel %vm3067_vm6, %v3071_v41, %v3079_v22  ;;  %v3035_v58 = vld [vmem:[#allocation2 + $0xe0] sm:$0x7f]  ;;  %5083 = vmatprep.subr.bf16.mxu0 %v14748_v42 }
 0x3fc   :  { %v2863_v38 = vsel %vm2830_vm0, %v2852_v61, %v2862_v46  ;;  %v3090_v44 = vsel %vm3067_vm6, %v3079_v22, %v3089_v60  ;;  %v2924_v26 = vmax.f32 %v17080_v35, %v2853_v43  ;;  %v2873_v63 = vsel %vm2830_vm0, %v2862_v46, %v2872_v45  ;;  %v14751_v55 = vld [vmem:[%s21739_s22 + $0x5d4] ss:$16 sps:$4 sm:$0xff]   ;;  %v14754_v61 = vld [vmem:[%s21739_s22 + $0x5dc] ss:$16 sps:$4 sm:$0xff]   ;;  %4895 = vmatpush1.bf16.msra.mxu1 %v14743_v0 }
 0x3fd   :  { %2949 = vst [vmem:[#allocation3 + $0x18] sm:$0xff] %v2919_v39  ;;  %2970 = vst.msk [vmem:[#allocation3 + $0xc0] sm:$0xff] %vm1327_vm1, %v2940_v33  ;;  %v2929_v4 = vmax.f32 %v17086_v32, %v2863_v38  ;;  %v3099_v6 = vrot.slane %v17090_v25, 7  ;;  %v2981_v35 = vld [vmem:[#allocation3 + $0x20] sm:$0xfe]  ;;  %v2934_v32 = vmax.f32 %v17090_v25, %v2873_v63  ;;  %v2882_v22 = vrot.slane %v17191_v17, 1  ;;  %5084 = vmatpush1.bf16.msra.mxu0 %v14746_v36 }
 0x3fe   :  { %3276 = vrot.lane.b32.xlu0 %v17337_v21, %s15600_s10  ;;  %3288 = vrot.lane.b32.xlu1 %v17218_v31, %s15600_s10  ;;  %v3109_v46 = vrot.slane %v17095_v30, 7  ;;  %v2945_v27 = vmax.f32 %v2769_v10, %v2884_v59  ;;  %v2768_v39 = vld [vmem:[#allocation3 + $0xe0] sm:$0x7f]  ;;  %v3157_v33 = vmax.f32 %v2981_v35, %v3072_v2  ;;  %v17433_v38 = vmax.f32 %v2924_v26, %v3080_v40  ;;  %v3036_v2 = vld [vmem:[#allocation2 + $0xe8] sm:$0x7f] }
 0x3ff   :  { %v2986_v42 = vld [vmem:[#allocation3 + $0x48] sm:$0xff]  ;;  %v2991_v43 = vld [vmem:[#allocation3 + $0x70] sm:$0xff]  ;;  %v17435_v53 = vmax.f32 %v2929_v4, %v3090_v44  ;;  %v3100_v3 = vsel %vm3067_vm6, %v3089_v60, %v3099_v6  ;;  %v2883_v16 = vsel %vm2830_vm0, %v2872_v45, %v2882_v22  ;;  %v2944_v45 = vmax.f32 %v2768_v39, %v2882_v22  ;;  %4896 = vmatprep.subr.bf16.mxu1 %v14751_v55  ;;  %v3032_v39 = vld [vmem:[#allocation2 + $0xc8] sm:$0x7f] }
 0x400   :  { %v14749_v25 = vld [vmem:[%s21739_s22 + $0x5d0] ss:$16 sps:$4 sm:$0xff]   ;;  %v3162_v17 = vmax.f32 %v2986_v42, %v17353_v18  ;;  %v3167_v59 = vmax.f32 %v2991_v43, %v17374_v29  ;;  %v17443_v10 = vmax.f32 %v2934_v32, %v3100_v3  ;;  %2976 = vst.msk [vmem:[#allocation3 + $0xe8] sm:$0x7f] %vm2975_vm9, %v2945_v27  ;;  %v14752_v60 = vld [vmem:[%s21739_s22 + $0x5d8] ss:$16 sps:$4 sm:$0xff]   ;;  %v2939_v3 = vmax.f32 %v17095_v30, %v2883_v16 }
 0x401   :  { %v14757_v0 = vld [vmem:[%s21739_s22 + $0x5f4] ss:$16 sps:$4 sm:$0xff]   ;;  %3188 = vst.msk [vmem:[#allocation3 + $0x20] sm:$0xfe] %vm3187_vm10, %v3157_v33  ;;  %v2996_v18 = vld [vmem:[#allocation3 + $0x98] sm:$0xff]  ;;  %v3110_v29 = vsel %vm3067_vm6, %v3099_v6, %v3109_v46  ;;  %5085 = vmatprep.subr.bf16.mxu0 %v14754_v61  ;;  %v3119_v44 = vrot.slane %v3035_v58, 7  ;;  %4897 = vmatpush1.bf16.msra.mxu1 %v14749_v25 }
 0x402   :  { %v14760_v40 = vld [vmem:[%s21739_s22 + $0x5fc] ss:$16 sps:$4 sm:$0xff]   ;;  %3286 = vrot.lane.b32.xlu0 %v17220_v51, %s15600_s10  ;;  %3298 = vrot.lane.b32.xlu1 %v17239_v19, %s15600_s10  ;;  %3193 = vst.msk [vmem:[#allocation3 + $0x48] sm:$0xff] %vm1327_vm1, %v3162_v17  ;;  %3198 = vst.msk [vmem:[#allocation3 + $0x70] sm:$0xff] %vm1327_vm1, %v3167_v59  ;;  %v3172_v30 = vmax.f32 %v2996_v18, %v17394_v7  ;;  %v17466_v36 = vmax.f32 %v2939_v3, %v3110_v29  ;;  %v3121_v26 = vrot.slane %v3036_v2, 7  ;;  %vm3334_vm2 = vcmask 818176  }
 0x403   :  { %2974 = vst [vmem:[#allocation3 + $0xe0] sm:$0x7f] %v2944_v45  ;;  %v14755_v4 = vld [vmem:[%s21739_s22 + $0x5f0] ss:$16 sps:$4 sm:$0xff]   ;;  %v3112_v7 = vsel %vm3067_vm6, %v3101_v62, %v3111_v57  ;;  %v17478_v58 = vsel %vm3067_vm6, %v3109_v46, %v3119_v44  ;;  %5086 = vmatpush1.bf16.msra.mxu0 %v14752_v60  ;;  %4898 = vmatprep.subr.bf16.mxu1 %v14757_v0  ;;  %v14758_v55 = vld [vmem:[%s21739_s22 + $0x5f8] ss:$16 sps:$4 sm:$0xff]  }
 0x404   :  { %3203 = vst.msk [vmem:[#allocation3 + $0x98] sm:$0xff] %vm1327_vm1, %v3172_v30  ;;  %v2980_v63 = vld [vmem:[#allocation3 + $0x18] sm:$0xfe]  ;;  %v3001_v6 = vld [vmem:[#allocation3 + $0xc0] sm:$0xff]  ;;  %5087 = vmatprep.subr.bf16.mxu0 %v14760_v40  ;;  %v3122_v50 = vsel %vm3067_vm6, %v3111_v57, %v3121_v26  ;;  %v3113_v25 = vrot.slane %v3032_v39, 7  ;;  %v3002_v2 = vld [vmem:[#allocation3 + $0xc8] sm:$0xff] }
 0x405   :  { %v3156_v61 = vmax.f32 %v2980_v63, %v3071_v41  ;;  %v3177_v35 = vmax.f32 %v3001_v6, %v3112_v7  ;;  %v14763_v1 = vld [vmem:[%s21739_s22 + $0x614] ss:$16 sps:$4 sm:$0xff]   ;;  %4899 = vmatpush1.bf16.msra.mxu1 %v14755_v4  ;;  %v14761_v41 = vld [vmem:[%s21739_s22 + $0x610] ss:$16 sps:$4 sm:$0xff]   ;;  %v14766_v32 = vld [vmem:[%s21739_s22 + $0x61c] ss:$16 sps:$4 sm:$0xff]  }
 0x406   :  { %3296 = vrot.lane.b32.xlu0 %v17263_v8, %s15600_s10  ;;  %3308 = vrot.lane.b32.xlu1 %v17267_v23, %s15600_s10  ;;  %v14764_v46 = vld [vmem:[%s21739_s22 + $0x618] ss:$16 sps:$4 sm:$0xff]   ;;  %v14769_v11 = vld [vmem:[%s21739_s22 + $0x634] ss:$16 sps:$4 sm:$0xff]   ;;  %v3114_v0 = vsel %vm3067_vm6, %v3103_v34, %v3113_v25  ;;  %vm21741_vm15 = vcmask 228352   ;;  %vm3624_vm8 = vcmask 1047776  }
 0x407   :  { %3186 = vst [vmem:[#allocation3 + $0x18] sm:$0xfe] %v3156_v61  ;;  %3208 = vst.msk [vmem:[#allocation3 + $0xc0] sm:$0xff] %vm1327_vm1, %v3177_v35  ;;  %v3006_v62 = vld [vmem:[#allocation3 + $0xe8] sm:$0xff]  ;;  %5088 = vmatpush1.bf16.msra.mxu0 %v14758_v55  ;;  %4900 = vmatprep.subr.bf16.mxu1 %v14763_v1  ;;  %v14767_v27 = vld [vmem:[%s21739_s22 + $0x630] ss:$16 sps:$4 sm:$0xff]   ;;  %v17554_v3 = vmax.f32 %v3002_v2, %v3114_v0 }
 0x408   :  { %v3182_v22 = vmax.f32 %v3006_v62, %v3122_v50  ;;  %5089 = vmatprep.subr.bf16.mxu0 %v14766_v32  ;;  %v14772_v57 = vld [vmem:[%s21739_s22 + $0x63c] ss:$16 sps:$4 sm:$0xff]   ;;  %v14770_v33 = vld [vmem:[%s21739_s22 + $0x638] ss:$16 sps:$4 sm:$0xff]   ;;  %v14775_v42 = vld [vmem:[%s21739_s22 + $0x654] ss:$16 sps:$4 sm:$0xff]  }
 0x409   :  { %4901 = vmatpush1.bf16.msra.mxu1 %v14761_v41  ;;  %v14778_v43 = vld [vmem:[%s21739_s22 + $0x65c] ss:$16 sps:$4 sm:$0xff]   ;;  %v14773_v17 = vld [vmem:[%s21739_s22 + $0x650] ss:$16 sps:$4 sm:$0xff]   ;;  %v14776_v59 = vld [vmem:[%s21739_s22 + $0x658] ss:$16 sps:$4 sm:$0xff]  }
 0x40a   :  { %3306 = vrot.lane.b32.xlu0 %v17277_v20, %s15600_s10  ;;  %3492 = vrot.lane.b32.xlu1 %v17220_v51, %s15601_s1  ;;  %3213 = vst.msk [vmem:[#allocation3 + $0xe8] sm:$0xff] %vm1327_vm1, %v3182_v22  ;;  %v14781_v16 = vld [vmem:[%s21739_s22 + $0x674] ss:$16 sps:$4 sm:$0xff]   ;;  %v14784_v60 = vld [vmem:[%s21739_s22 + $0x67c] ss:$16 sps:$4 sm:$0xff]   ;;  %vm21742_vm4 = vmmov %vm21741_vm15  ;;  %vm3423_vm10 = vcmask 621568  }
 0x40b   :  { %5090 = vmatpush1.bf16.msra.mxu0 %v14764_v46  ;;  %4902 = vmatprep.subr.bf16.mxu1 %v14769_v11  ;;  %v14779_v18 = vld [vmem:[%s21739_s22 + $0x670] ss:$16 sps:$4 sm:$0xff]   ;;  %v14782_v45 = vld [vmem:[%s21739_s22 + $0x678] ss:$16 sps:$4 sm:$0xff]   ;;  %v14787_v52 = vld [vmem:[%s21739_s22 + $0x694] ss:$16 sps:$4 sm:$0xff]  }
 0x40c   :  { %5091 = vmatprep.subr.bf16.mxu0 %v14772_v57  ;;  %v3033_v29 = vld [vmem:[#allocation2 + $0xd0] sm:$0x7f]  ;;  %v14790_v34 = vld [vmem:[%s21739_s22 + $0x69c] ss:$16 sps:$4 sm:$0xff]   ;;  %v14788_v44 = vld [vmem:[%s21739_s22 + $0x698] ss:$16 sps:$4 sm:$0xff]  }
 0x40d   :  { %4903 = vmatpush1.bf16.msra.mxu1 %v14767_v27  ;;  %v3115_v40 = vrot.slane %v3033_v29, 7  ;;  %v14785_v30 = vld [vmem:[%s21739_s22 + $0x690] ss:$16 sps:$4 sm:$0xff]   ;;  %v14793_v26 = vld [vmem:[%s21739_s22 + $0x6b4] ss:$16 sps:$4 sm:$0xff]   ;;  %v17623_v50 = vld [vmem:[#allocation3 + $0x48] sm:$0xff] }
 0x40e   :  { %3490 = vrot.lane.b32.xlu0 %v17127_v5, %s15601_s1  ;;  %3502 = vrot.lane.b32.xlu1 %v17263_v8, %s15601_s1  ;;  %v3003_v4 = vld [vmem:[#allocation3 + $0xd0] sm:$0xff]  ;;  %v14796_v63 = vld [vmem:[%s21739_s22 + $0x6bc] ss:$16 sps:$4 sm:$0xff]   ;;  %v14794_v61 = vld [vmem:[%s21739_s22 + $0x6b8] ss:$16 sps:$4 sm:$0xff]  }
 0x40f   :  { %5092 = vmatpush1.bf16.msra.mxu0 %v14770_v33  ;;  %4904 = vmatprep.subr.bf16.mxu1 %v14775_v42  ;;  %v3116_v6 = vsel %vm3067_vm6, %v3105_v37, %v3115_v40  ;;  %v14791_v7 = vld [vmem:[%s21739_s22 + $0x6b0] ss:$16 sps:$4 sm:$0xff]   ;;  %v14799_v35 = vld [vmem:[%s21739_s22 + $0x6d4] ss:$16 sps:$4 sm:$0xff]   ;;  %v3004_v37 = vld [vmem:[#allocation3 + $0xd8] sm:$0xff]  ;;  %v21740_v42 = vmov 0  }
 0x410   :  { %5093 = vmatprep.subr.bf16.mxu0 %v14778_v43  ;;  %v17591_v55 = vmax.f32 %v3003_v4, %v3116_v6  ;;  %v17611_v1 = vmax.f32 %v3004_v37, %v17326_v24  ;;  %v17617_v62 = vld [vmem:[#allocation3 + $0x20] sm:$0xff]  ;;  %v17629_v24 = vld [vmem:[#allocation3 + $0x70] sm:$0xff]  ;;  %v17635_v41 = vld [vmem:[#allocation3 + $0x98] sm:$0xff] }
 0x411   :  { %4905 = vmatpush1.bf16.msra.mxu1 %v14773_v17  ;;  %v17641_v32 = vld [vmem:[#allocation3 + $0x18] sm:$0xff]  ;;  %v17643_v22 = vld [vmem:[#allocation3 + $0xc0] sm:$0xff]  ;;  %v17665_v46 = vld [vmem:[#allocation3 + $0xe8] sm:$0xff] }
 0x412   :  { %3500 = vrot.lane.b32.xlu0 %v17173_v14, %s15601_s1  ;;  %3512 = vrot.lane.b32.xlu1 %v17277_v20, %s15601_s1  ;;  %v3005_v11 = vld [vmem:[#allocation3 + $0xe0] sm:$0xff]  ;;  %v12051_v33 = vld [vmem:[%s21624_s16 + $0x48] sm:$0xff]  ;;  %vm21743_vm5 = vmmov %vm21742_vm4 }
 0x413   :  { %5094 = vmatpush1.bf16.msra.mxu0 %v14776_v59  ;;  %4906 = vmatprep.subr.bf16.mxu1 %v14781_v16  ;;  %v17672_v57 = vmax.f32 %v3005_v11, %v17478_v58  ;;  %v12049_v58 = vld [vmem:[%s21624_s16 + $0x38] sm:$0xff]  ;;  %v12048_v39 = vld [vmem:[%s21624_s16 + $0x30] sm:$0xff]  ;;  %vm7846_vm13 = vcmp.gt.f32.partialorder %v12051_v33, 0.0  ;;  %v12050_v59 = vld [vmem:[%s21624_s16 + $0x40] sm:$0xff] }
 0x414   :  { %5095 = vmatprep.subr.bf16.mxu0 %v14784_v60  ;;  %vm7844_vm11 = vcmp.gt.f32.partialorder %v12049_v58, 0.0  ;;  %vm7843_vm12 = vcmp.gt.f32.partialorder %v12048_v39, 0.0  ;;  %v12053_v16 = vld [vmem:[%s21624_s16 + $0x58] sm:$0xff]  ;;  %v7852_v60 = vsel %vm7846_vm13, 1, %v21740_v42  ;;  %vm7845_vm14 = vcmp.gt.f32.partialorder %v12050_v59, 0.0  ;;  %v12052_v29 = vld [vmem:[%s21624_s16 + $0x50] sm:$0xff]  ;;  %vm21744_vm7 = vmmov %vm21742_vm4 }
 0x415   :  { %4907 = vmatpush1.bf16.msra.mxu1 %v14779_v18  ;;  %v7850_v43 = vsel %vm7844_vm11, 1, %v21740_v42  ;;  %v7849_v2 = vsel %vm7843_vm12, 1, %v21740_v42  ;;  %vm7848_vm3 = vcmp.gt.f32.partialorder %v12053_v16, 0.0  ;;  %vm7847_vm6 = vcmp.gt.f32.partialorder %v12052_v29, 0.0  ;;  %vm21745_vm9 = vmmov %vm21742_vm4 }
 0x416   :  { %3510 = vrot.lane.b32.xlu0 %v17171_v9, %s15601_s1  ;;  %3324 = vrot.lane.b32.xlu1 %v17554_v3, %s15600_s10  ;;  %vm21746_vm11 = vmmov %vm21742_vm4 }
 0x417   :  { %5096 = vmatpush1.bf16.msra.mxu0 %v14782_v45  ;;  %4908 = vmatprep.subr.bf16.mxu1 %v14787_v52  ;;  %v7851_v45 = vsel %vm7845_vm14, 1, %v21740_v42  ;;  %v7854_v52 = vsel %vm7848_vm3, 1, %v21740_v42  ;;  %vm21747_vm12 = vmmov %vm21742_vm4 }
 0x418   :  { %5097 = vmatprep.subr.bf16.mxu0 %v14790_v34  ;;  %vm21748_vm13 = vmmov %vm21742_vm4 }
 0x419   :  { %4909 = vmatpush1.bf16.msra.mxu1 %v14785_v30  ;;  %v7853_v30 = vsel %vm7847_vm6, 1, %v21740_v42  ;;  %vm21749_vm14 = vmmov %vm21742_vm4 }
 0x41a   :  { %3316 = vrot.lane.b32.xlu0 %v17310_v56, %s15600_s10  ;;  %3522 = vrot.lane.b32.xlu1 %v17310_v56, %s15601_s1  ;;  %vm21750_vm3 = vmmov %vm21742_vm4 }
 0x41b   :  { %5098 = vmatpush1.bf16.msra.mxu0 %v14788_v44  ;;  %4910 = vmatprep.subr.bf16.mxu1 %v14793_v26  ;;  %vm21751_vm6 = vmmov %vm21750_vm3 }
 0x41c   :  { %5099 = vmatprep.subr.bf16.mxu0 %v14796_v63 }
 0x41d   :  { %4911 = vmatpush1.bf16.msra.mxu1 %v14791_v7 }
 0x41e   :  { %3326 = vrot.lane.b32.xlu0 %v17591_v55, %s15600_s10  ;;  %3532 = vrot.lane.b32.xlu1 %v17591_v55, %s15601_s1 }
 0x41f   :  { %5100 = vmatpush1.bf16.msra.mxu0 %v14794_v61  ;;  %4943 = vmatprep.subr.bf16.mxu1 %v14799_v35 }
 0x420   :  { %5132 = vmatprep.subr.bf16.mxu0 %v14802_v49 }
 0x422   :  { %3314 = vrot.lane.b32.xlu0 %v17314_v54, %s15600_s10  ;;  %3318 = vrot.lane.b32.xlu1 %v17333_v28, %s15600_s10 }
 0x426   :  { %3520 = vrot.lane.b32.xlu0 %v17314_v54, %s15601_s1  ;;  %3328 = vrot.lane.b32.xlu1 %v17611_v1, %s15600_s10 }
 0x42a   :  { %3530 = vrot.lane.b32.xlu0 %v17554_v3, %s15601_s1  ;;  %3282 = vrot.lane.b32.xlu1 %v17617_v62, %s15600_s10 }
 0x42e   :  { %3484 = vrot.lane.b32.xlu0 %v17346_v47, %s15601_s1  ;;  %3292 = vrot.lane.b32.xlu1 %v17623_v50, %s15600_s10 }
 0x432   :  { %3494 = vrot.lane.b32.xlu0 %v17218_v31, %s15601_s1  ;;  %3302 = vrot.lane.b32.xlu1 %v17629_v24, %s15600_s10 }
 0x436   :  { %3504 = vrot.lane.b32.xlu0 %v17239_v19, %s15601_s1  ;;  %3312 = vrot.lane.b32.xlu1 %v17635_v41, %s15600_s10 }
 0x43a   :  { %3280 = vrot.lane.b32.xlu0 %v17641_v32, %s15600_s10  ;;  %3322 = vrot.lane.b32.xlu1 %v17643_v22, %s15600_s10 }
 0x43e   :  { %3290 = vrot.lane.b32.xlu0 %v17433_v38, %s15600_s10  ;;  %3486 = vrot.lane.b32.xlu1 %v17641_v32, %s15601_s1 }
 0x442   :  { %3300 = vrot.lane.b32.xlu0 %v17435_v53, %s15600_s10  ;;  %3496 = vrot.lane.b32.xlu1 %v17433_v38, %s15601_s1 }
 0x446   :  { %3310 = vrot.lane.b32.xlu0 %v17443_v10, %s15600_s10  ;;  %3506 = vrot.lane.b32.xlu1 %v17435_v53, %s15601_s1 }
 0x44a   :  { %3514 = vrot.lane.b32.xlu0 %v17267_v23, %s15601_s1  ;;  %3516 = vrot.lane.b32.xlu1 %v17443_v10, %s15601_s1 }
 0x44e   :  { %3320 = vrot.lane.b32.xlu0 %v17466_v36, %s15600_s10  ;;  %3332 = vrot.lane.b32.xlu1 %v17665_v46, %s15600_s10 }
 0x451   :  { %v3285_v27 = vpop.permute.xlu1 %3284 }
 0x452   :  { %3330 = vrot.lane.b32.xlu0 %v17672_v57, %s15600_s10  ;;  %3526 = vrot.lane.b32.xlu1 %v17466_v36, %s15601_s1  ;;  %s15602_s10 = smov 80  }
 0x455   :  { %v3305_v17 = vpop.permute.xlu1 %3304 }
 0x456   :  { %3524 = vrot.lane.b32.xlu0 %v17333_v28, %s15601_s1  ;;  %3536 = vrot.lane.b32.xlu1 %v17672_v57, %s15601_s1 }
 0x45a   :  { %3534 = vrot.lane.b32.xlu0 %v17611_v1, %s15601_s1  ;;  %3498 = vrot.lane.b32.xlu1 %v17623_v50, %s15601_s1 }
 0x45e   :  { %3488 = vrot.lane.b32.xlu0 %v17617_v62, %s15601_s1  ;;  %3518 = vrot.lane.b32.xlu1 %v17635_v41, %s15601_s1 }
 0x462   :  { %3508 = vrot.lane.b32.xlu0 %v17629_v24, %s15601_s1  ;;  %3538 = vrot.lane.b32.xlu1 %v17665_v46, %s15601_s1 }
 0x464   :  { %v3275_v25 = vpop.permute.xlu0 %3274 }
 0x466   :  { %3528 = vrot.lane.b32.xlu0 %v17643_v22, %s15601_s1  ;;  %7859 = vperm.xlu1 %14601, %v7850_v43   ;;  %s21820_s1 = sld [smem:[#allocation44_spill]] }
 0x468   :  { %v3295_v0 = vpop.permute.xlu0 %3294  ;;  %v17714_v18 = vpop.permute.xlu1 %3482 }
 0x46a   :  { %7856 = vperm.xlu0 %14600, %v7849_v2   ;;  %7865 = vperm.xlu1 %14601, %v7852_v60  }
 0x46c   :  { %v3481_v34 = vpop.permute.xlu0 %3480  ;;  %v17721_v40 = vpop.permute.xlu1 %3278 }
 0x46d   :  { %v3540_v61 = vsel %vm21741_vm15, %v3481_v34, %v17714_v18  ;;  %vm21752_vm15 = vmmov %vm21750_vm3 }
 0x46e   :  { %7862 = vperm.xlu0 %14600, %v7851_v45   ;;  %7871 = vperm.xlu1 %14601, %v7854_v52  }
 0x470   :  { %v3277_v44 = vpop.permute.xlu0 %3276  ;;  %v17724_v26 = vpop.permute.xlu1 %3288 }
 0x471   :  { %v3335_v4 = vsel %vm3334_vm2, %v3275_v25, %v3277_v44  ;;  %v3336_v63 = vsel %vm3334_vm2, %v3277_v44, %v17721_v40 }
 0x472   :  { %v3389_v6 = vmax.f32 %v17312_v12, %v3335_v4  ;;  %v3390_v7 = vmax.f32 %v17337_v21, %v3336_v63  ;;  %7868 = vperm.xlu0 %14600, %v7853_v30  }
 0x474   :  { %3419 = vst [vmem:[#allocation3] sm:$0xff] %v3389_v6  ;;  %v3595_v35 = vmax.f32 %v3390_v7, %v3540_v61  ;;  %v3287_v49 = vpop.permute.xlu0 %3286  ;;  %v17733_v37 = vpop.permute.xlu1 %3298  ;;  %v3594_v11 = vmax.f32 %v3389_v6, %v3481_v34 }
 0x475   :  { %v3339_v58 = vsel %vm3334_vm2, %v3285_v27, %v3287_v49  ;;  %v3340_v27 = vsel %vm3334_vm2, %v3287_v49, %v17724_v26 }
 0x476   :  { %3626 = vst [vmem:[#allocation3 + $0x8] sm:$0xff] %v3595_v35  ;;  %v3394_v39 = vmax.f32 %v17127_v5, %v3339_v58  ;;  %3625 = vst.msk [vmem:[#allocation3] sm:$0xff] %vm3624_vm8, %v3594_v11  ;;  %v3395_v2 = vmax.f32 %v17220_v51, %v3340_v27 }
 0x478   :  { %3425 = vst [vmem:[#allocation3 + $0x28] sm:$0xff] %v3394_v39  ;;  %v3297_v12 = vpop.permute.xlu0 %3296  ;;  %v17738_v21 = vpop.permute.xlu1 %3308 }
 0x479   :  { %v3343_v33 = vsel %vm3334_vm2, %v3295_v0, %v3297_v12 }
 0x47a   :  { %v3399_v43 = vmax.f32 %v17173_v14, %v3343_v33  ;;  %v3344_v14 = vsel %vm3334_vm2, %v3297_v12, %v17733_v37 }
 0x47c   :  { %3430 = vst [vmem:[#allocation3 + $0x50] sm:$0xff] %v3399_v43  ;;  %v3307_v25 = vpop.permute.xlu0 %3306  ;;  %v17742_v59 = vpop.permute.xlu1 %3492 }
 0x47d   :  { %v3347_v16 = vsel %vm3334_vm2, %v3305_v17, %v3307_v25  ;;  %v3400_v17 = vmax.f32 %v17263_v8, %v3344_v14  ;;  %v3348_v34 = vsel %vm3334_vm2, %v3307_v25, %v17738_v21  ;;  %v3862_v35 = vld [vmem:[#allocation3 + $0x8] sm:$0xfc] }
 0x47e   :  { %v3404_v5 = vmax.f32 %v17171_v9, %v3347_v16  ;;  %v3405_v63 = vmax.f32 %v17277_v20, %v3348_v34 }
 0x480   :  { %3435 = vst [vmem:[#allocation3 + $0x78] sm:$0xff] %v3404_v5  ;;  %v3491_v60 = vpop.permute.xlu0 %3490  ;;  %v17749_v29 = vpop.permute.xlu1 %3502 }
 0x481   :  { %v3544_v0 = vsel %vm21742_vm4, %v3491_v60, %v17742_v59  ;;  %v3599_v45 = vmax.f32 %v3394_v39, %v3491_v60  ;;  %vm21754_vm4 = vmmov %vm21750_vm3 }
 0x482   :  { %v17755_v52 = vmax.f32 %v3395_v2, %v3544_v0 }
 0x483   :  { %3630 = vst.msk [vmem:[#allocation3 + $0x28] sm:$0xff] %vm3624_vm8, %v3599_v45 }
 0x484   :  { %3631 = vst [vmem:[#allocation3 + $0x30] sm:$0xff] %v17755_v52  ;;  %v3501_v9 = vpop.permute.xlu0 %3500  ;;  %v17760_v51 = vpop.permute.xlu1 %3512  ;;  %v3872_v11 = vpack.c.bf16 %v17755_v52, %v3862_v35 }
 0x485   :  { %v3548_v30 = vsel %vm21743_vm5, %v3501_v9, %v17749_v29  ;;  %v3604_v44 = vmax.f32 %v3399_v43, %v3501_v9  ;;  %vm21755_vm5 = vmmov %vm21750_vm3 }
 0x486   :  { %v3605_v4 = vmax.f32 %v3400_v17, %v3548_v30  ;;  %v4055_v33 = vrot.slane %v3872_v11, 1 }
 0x487   :  { %3635 = vst.msk [vmem:[#allocation3 + $0x50] sm:$0xff] %vm3624_vm8, %v3604_v44 }
 0x488   :  { %v3511_v6 = vpop.permute.xlu0 %3510  ;;  %v3325_v7 = vpop.permute.xlu1 %3324 }
 0x489   :  { %v3552_v8 = vsel %vm21744_vm7, %v3511_v6, %v17760_v51  ;;  %v3609_v61 = vmax.f32 %v3404_v5, %v3511_v6  ;;  %v3861_v5 = vld [vmem:[#allocation3] sm:$0xfc]  ;;  %vm21756_vm7 = vmmov %vm21750_vm3 }
 0x48a   :  { %v3610_v49 = vmax.f32 %v3405_v63, %v3552_v8  ;;  %v3667_v43 = vld [vmem:[#allocation3 + $0x28] sm:$0xff]  ;;  %v14805_v8 = vld [vmem:[%s21739_s22 + $0x6f4] ss:$16 sps:$4 sm:$0xff]  }
 0x48b   :  { %3640 = vst.msk [vmem:[#allocation3 + $0x78] sm:$0xff] %vm3624_vm8, %v3609_v61  ;;  %v3871_v60 = vpack.c.bf16 %v3667_v43, %v3861_v5  ;;  %v14808_v61 = vld [vmem:[%s21739_s22 + $0x6fc] ss:$16 sps:$4 sm:$0xff]  }
 0x48c   :  { %v3317_v58 = vpop.permute.xlu0 %3316  ;;  %v17772_v39 = vpop.permute.xlu1 %3522  ;;  %v17774_v12 = vpack.c.bf16 %v3610_v49, %v3605_v4  ;;  %v14797_v4 = vld [vmem:[%s21739_s22 + $0x6d0] ss:$16 sps:$4 sm:$0xff]  }
 0x48d   :  { %v4052_v63 = vrot.slane %v3871_v60, 1 }
 0x48e   :  { %v4056_v20 = vrot.slane %v17774_v12, 1  ;;  %v3672_v0 = vld [vmem:[#allocation3 + $0x50] sm:$0xff] }
 0x490   :  { %v3327_v25 = vpop.permute.xlu0 %3326  ;;  %v17777_v27 = vpop.permute.xlu1 %3532  ;;  %v4057_v16 = vsel %vm2830_vm0, %v4055_v33, %v4056_v20 }
 0x491   :  { %v3355_v2 = vsel %vm3334_vm2, %v3325_v7, %v3327_v25  ;;  %4912 = vmatprep.mubr.bf16.mxu1 %v4057_v16  ;;  %5101 = vmatprep.mubr.bf16.mxu0 %v4057_v16  ;;  %v14803_v16 = vld [vmem:[%s21739_s22 + $0x6f0] ss:$16 sps:$4 sm:$0xff]  }
 0x492   :  { %v3414_v14 = vmax.f32 %v17554_v3, %v3355_v2  ;;  %v3677_v45 = vld [vmem:[#allocation3 + $0x78] sm:$0xff]  ;;  %v14811_v2 = vld [vmem:[%s21739_s22 + $0x714] ss:$16 sps:$4 sm:$0xff]  }
 0x493   :  { %v17784_v17 = vpack.c.bf16 %v3677_v45, %v3672_v0  ;;  %v14800_v3 = vld [vmem:[%s21739_s22 + $0x6d8] ss:$16 sps:$4 sm:$0xff]  }
 0x494   :  { %3445 = vst [vmem:[#allocation3 + $0xc8] sm:$0xff] %v3414_v14  ;;  %v3315_v9 = vpop.permute.xlu0 %3314  ;;  %v17786_v34 = vpop.permute.xlu1 %3318 }
 0x495   :  { %v3351_v30 = vsel %vm3334_vm2, %v3315_v9, %v3317_v58  ;;  %v3352_v44 = vsel %vm3334_vm2, %v3317_v58, %v17786_v34  ;;  %v4053_v6 = vrot.slane %v17784_v17, 1 }
 0x496   :  { %v3409_v7 = vmax.f32 %v17314_v54, %v3351_v30  ;;  %v3410_v49 = vmax.f32 %v17310_v56, %v3352_v44  ;;  %v14806_v56 = vld [vmem:[%s21739_s22 + $0x6f8] ss:$16 sps:$4 sm:$0xff]  }
 0x497   :  { %v4054_v35 = vsel %vm2830_vm0, %v4052_v63, %v4053_v6  ;;  %v14820_v63 = vld [vmem:[%s21739_s22 + $0x73c] ss:$16 sps:$4 sm:$0xff]  }
 0x498   :  { %3440 = vst [vmem:[#allocation3 + $0xa0] sm:$0xff] %v3409_v7  ;;  %v3521_v11 = vpop.permute.xlu0 %3520  ;;  %4913 = vmatmul.mubr.bf16.vlgmr.msra.gmra.mrb[28].mxu1 %v4054_v35  ;;  %5102 = vmatmul.mubr.bf16.vlgmr.msra.gmra.mrb[36].mxu0 %v4054_v35  ;;  %v17809_v58 = vpop.permute.xlu1 %3328  ;;  %v14818_v35 = vld [vmem:[%s21739_s22 + $0x738] ss:$16 sps:$4 sm:$0xff]  }
 0x499   :  { %v3556_v54 = vsel %vm21745_vm9, %v3521_v11, %v17772_v39  ;;  %v3614_v33 = vmax.f32 %v3409_v7, %v3521_v11  ;;  %4944 = vmatpush1.bf16.msra.mxu1 %v14797_v4  ;;  %5133 = vmatpush1.bf16.msra.mxu0 %v14800_v3  ;;  %v3356_v43 = vsel %vm3334_vm2, %v3327_v25, %v17809_v58  ;;  %v14814_v25 = vld [vmem:[%s21739_s22 + $0x71c] ss:$16 sps:$4 sm:$0xff]   ;;  %v14809_v4 = vld [vmem:[%s21739_s22 + $0x710] ss:$16 sps:$4 sm:$0xff]  }
 0x49a   :  { %v17821_v5 = vmax.f32 %v3410_v49, %v3556_v54  ;;  %4945 = vmatprep.subr.bf16.mxu1 %v14805_v8  ;;  %5134 = vmatprep.subr.bf16.mxu0 %v14808_v61  ;;  %v3415_v60 = vmax.f32 %v17591_v55, %v3356_v43  ;;  %v14812_v55 = vld [vmem:[%s21739_s22 + $0x718] ss:$16 sps:$4 sm:$0xff]   ;;  %v14815_v61 = vld [vmem:[%s21739_s22 + $0x730] ss:$16 sps:$4 sm:$0xff]   ;;  %v14823_v49 = vld [vmem:[%s21739_s22 + $0x754] ss:$16 sps:$4 sm:$0xff]  }
 0x49b   :  { %3645 = vst.msk [vmem:[#allocation3 + $0xa0] sm:$0xff] %vm3624_vm8, %v3614_v33  ;;  %v14826_v11 = vld [vmem:[%s21739_s22 + $0x75c] ss:$16 sps:$4 sm:$0xff]   ;;  %v14821_v43 = vld [vmem:[%s21739_s22 + $0x750] ss:$16 sps:$4 sm:$0xff]  }
 0x49c   :  { %3646 = vst [vmem:[#allocation3 + $0xa8] sm:$0xff] %v17821_v5  ;;  %v3531_v0 = vpop.permute.xlu0 %3530  ;;  %v17832_v45 = vpop.permute.xlu1 %3282 }
 0x49d   :  { %v3560_v9 = vsel %vm21746_vm11, %v3531_v0, %v17777_v27  ;;  %v3619_v30 = vmax.f32 %v3414_v14, %v3531_v0  ;;  %4946 = vmatpush1.bf16.msra.mxu1 %v14803_v16  ;;  %5135 = vmatpush1.bf16.msra.mxu0 %v14806_v56  ;;  %v3393_v44 = vmax.f32 %v17617_v62, %v17832_v45  ;;  %v14817_v14 = vld [vmem:[%s21739_s22 + $0x734] ss:$16 sps:$4 sm:$0xff]   ;;  %v14824_v16 = vld [vmem:[%s21739_s22 + $0x758] ss:$16 sps:$4 sm:$0xff]  }
 0x49e   :  { %v3620_v3 = vmax.f32 %v3415_v60, %v3560_v9  ;;  %4947 = vmatprep.subr.bf16.mxu1 %v14811_v2  ;;  %5136 = vmatprep.subr.bf16.mxu0 %v14814_v25  ;;  %v14829_v56 = vld [vmem:[%s21739_s22 + $0x774] ss:$16 sps:$4 sm:$0xff]   ;;  %v14832_v2 = vld [vmem:[%s21739_s22 + $0x77c] ss:$16 sps:$4 sm:$0xff]  }
 0x49f   :  { %3650 = vst.msk [vmem:[#allocation3 + $0xc8] sm:$0xff] %vm3624_vm8, %v3619_v30  ;;  %vm21753_vm8 = vmmov %vm21750_vm3 }
 0x4a0   :  { %3424 = vst.msk [vmem:[#allocation3 + $0x20] sm:$0xff] %vm3423_vm10, %v3393_v44  ;;  %3651 = vst [vmem:[#allocation3 + $0xd0] sm:$0xff] %v3620_v3  ;;  %v17852_v62 = vpop.permute.xlu0 %3484  ;;  %v17854_v7 = vpop.permute.xlu1 %3292  ;;  %v14830_v3 = vld [vmem:[%s21739_s22 + $0x778] ss:$16 sps:$4 sm:$0xff]  }
 0x4a1   :  { %4948 = vmatpush1.bf16.msra.mxu1 %v14809_v4  ;;  %5137 = vmatpush1.bf16.msra.mxu0 %v14812_v55  ;;  %v3398_v8 = vmax.f32 %v17623_v50, %v17854_v7  ;;  %v14827_v55 = vld [vmem:[%s21739_s22 + $0x770] ss:$16 sps:$4 sm:$0xff]  }
 0x4a2   :  { %4949 = vmatprep.subr.bf16.mxu1 %v14817_v14  ;;  %5138 = vmatprep.subr.bf16.mxu0 %v14820_v63  ;;  %v3682_v25 = vld [vmem:[#allocation3 + $0xa0] sm:$0xff] }
 0x4a3   :  { %3429 = vst.msk [vmem:[#allocation3 + $0x48] sm:$0xff] %vm3423_vm10, %v3398_v8  ;;  %v14835_v14 = vld [vmem:[%s21739_s22 + $0x794] ss:$16 sps:$4 sm:$0xff]  }
 0x4a4   :  { %v17871_v50 = vpop.permute.xlu0 %3494  ;;  %v17873_v54 = vpop.permute.xlu1 %3302 }
 0x4a5   :  { %4950 = vmatpush1.bf16.msra.mxu1 %v14815_v61  ;;  %5139 = vmatpush1.bf16.msra.mxu0 %v14818_v35  ;;  %v3403_v33 = vmax.f32 %v17629_v24, %v17873_v54 }
 0x4a6   :  { %4951 = vmatprep.subr.bf16.mxu1 %v14823_v49  ;;  %5140 = vmatprep.subr.bf16.mxu0 %v14826_v11  ;;  %v3866_v24 = vld [vmem:[#allocation3 + $0xc8] sm:$0x3f] }
 0x4a7   :  { %3434 = vst.msk [vmem:[#allocation3 + $0x70] sm:$0xff] %vm3423_vm10, %v3403_v33  ;;  %v3867_v60 = vld [vmem:[#allocation3 + $0xd0] sm:$0x3f]  ;;  %v3876_v0 = vpack.c.bf16 %v3866_v24, %v3682_v25 }
 0x4a8   :  { %v17890_v9 = vpop.permute.xlu0 %3504  ;;  %v17892_v30 = vpop.permute.xlu1 %3312  ;;  %v3877_v44 = vpack.c.bf16 %v3867_v60, %v17821_v5  ;;  %v14838_v5 = vld [vmem:[%s21739_s22 + $0x79c] ss:$16 sps:$4 sm:$0xff]  }
 0x4a9   :  { %4952 = vmatpush1.bf16.msra.mxu1 %v14821_v43  ;;  %5141 = vmatpush1.bf16.msra.mxu0 %v14824_v16  ;;  %v3408_v4 = vmax.f32 %v17635_v41, %v17892_v30  ;;  %v17910_v41 = vrot.slane %v3876_v0, 1  ;;  %v14833_v43 = vld [vmem:[%s21739_s22 + $0x790] ss:$16 sps:$4 sm:$0xff]   ;;  %v14836_v16 = vld [vmem:[%s21739_s22 + $0x798] ss:$16 sps:$4 sm:$0xff]  }
 0x4aa   :  { %4953 = vmatprep.subr.bf16.mxu1 %v14829_v56  ;;  %5142 = vmatprep.subr.bf16.mxu0 %v14832_v2  ;;  %v4069_v63 = vrot.slane %v3877_v44, 1  ;;  %v14842_v0 = vld [vmem:[%s21739_s22 + $0x7b8] ss:$16 sps:$4 sm:$0xff]  }
 0x4ab   :  { %3439 = vst.msk [vmem:[#allocation3 + $0x98] sm:$0xff] %vm3423_vm10, %v3408_v4  ;;  %v3545_v4 = vsel %vm21749_vm14, %v17742_v59, %v17871_v50 }
 0x4ac   :  { %v3281_v8 = vpop.permute.xlu0 %3280  ;;  %v17912_v61 = vpop.permute.xlu1 %3322  ;;  %v4070_v35 = vsel %vm2830_vm0, %v4056_v20, %v4069_v63 }
 0x4ad   :  { %v3337_v49 = vsel %vm3334_vm2, %v17721_v40, %v3281_v8  ;;  %v3338_v11 = vsel %vm3334_vm2, %v3281_v8, %v17832_v45  ;;  %4954 = vmatpush1.bf16.msra.mxu1 %v14827_v55  ;;  %5143 = vmatpush1.bf16.msra.mxu0 %v14830_v3  ;;  %v3413_v33 = vmax.f32 %v17643_v22, %v17912_v61  ;;  %v14841_v40 = vld [vmem:[%s21739_s22 + $0x7b4] ss:$16 sps:$4 sm:$0xff]   ;;  %v14844_v22 = vld [vmem:[%s21739_s22 + $0x7bc] ss:$16 sps:$4 sm:$0xff]  }
 0x4ae   :  { %v3391_v20 = vmax.f32 %v17346_v47, %v3337_v49  ;;  %4955 = vmatprep.subr.bf16.mxu1 %v14835_v14  ;;  %5144 = vmatprep.subr.bf16.mxu0 %v14838_v5  ;;  %v3541_v45 = vsel %vm21747_vm12, %v17714_v18, %v17852_v62  ;;  %v4068_v47 = vsel %vm2830_vm0, %v4053_v6, %v17910_v41 }
 0x4af   :  { %3444 = vst.msk [vmem:[#allocation3 + $0xc0] sm:$0xff] %vm3423_vm10, %v3413_v33  ;;  %4922 = vmatprep.mubr.bf16.mxu1 %v4070_v35  ;;  %5111 = vmatprep.mubr.bf16.mxu0 %v4070_v35  ;;  %v3392_v56 = vmax.f32 %v17641_v32, %v3338_v11  ;;  %v14839_v32 = vld [vmem:[%s21739_s22 + $0x7b0] ss:$16 sps:$4 sm:$0xff]   ;;  %v3549_v49 = vsel %vm21751_vm6, %v17749_v29, %v17890_v9  ;;  %vm21765_vm6 = vcmask 1043456  }
 0x4b0   :  { %v3596_v2 = vmax.f32 %v3391_v20, %v3541_v45  ;;  %v3291_v25 = vpop.permute.xlu0 %3290  ;;  %v17945_v24 = vpop.permute.xlu1 %3486  ;;  %4923 = vmatmul.mubr.bf16.gmra.mrb[32].mxu1 %v4068_v47  ;;  %5112 = vmatmul.mubr.bf16.gmra.mrb[40].mxu0 %v4068_v47  ;;  %v14851_v29 = vld [vmem:[%s21739_s22 + $0x7f0] ss:$16 sps:$4 sm:$0xff]  }
 0x4b1   :  { %v3341_v18 = vsel %vm3334_vm2, %v17724_v26, %v3291_v25  ;;  %v3342_v60 = vsel %vm3334_vm2, %v3291_v25, %v17854_v7  ;;  %4956 = vmatpush1.bf16.msra.mxu1 %v14833_v43  ;;  %5145 = vmatpush1.bf16.msra.mxu0 %v14836_v16  ;;  %v3542_v6 = vsel %vm21748_vm13, %v17852_v62, %v17945_v24  ;;  %v14847_v7 = vld [vmem:[%s21739_s22 + $0x7d4] ss:$16 sps:$4 sm:$0xff]   ;;  %v14850_v62 = vld [vmem:[%s21739_s22 + $0x7dc] ss:$16 sps:$4 sm:$0xff]  }
 0x4b2   :  { %3627 = vst [vmem:[#allocation3 + $0x10] sm:$0xff] %v3596_v2  ;;  %v3396_v26 = vmax.f32 %v17218_v31, %v3341_v18  ;;  %v3597_v44 = vmax.f32 %v3392_v56, %v3542_v6  ;;  %4957 = vmatprep.subr.bf16.mxu1 %v14841_v40  ;;  %5146 = vmatprep.subr.bf16.mxu0 %v14844_v22  ;;  %v14857_v18 = vld [vmem:[%s21739_s22 + $0x810] ss:$16 sps:$4 sm:$0xff]   ;;  %v14868_v6 = vld [vmem:[%s21739_s22 + $0x83c] ss:$16 sps:$4 sm:$0xff]  }
 0x4b3   :  { %4932 = vmatprep.mubr.bf16.mxu1 %v4069_v63  ;;  %5121 = vmatprep.mubr.bf16.mxu0 %v4069_v63  ;;  %v3397_v55 = vmax.f32 %v17433_v38, %v3342_v60  ;;  %v14845_v38 = vld [vmem:[%s21739_s22 + $0x7d0] ss:$16 sps:$4 sm:$0xff]   ;;  %v14848_v63 = vld [vmem:[%s21739_s22 + $0x7d8] ss:$16 sps:$4 sm:$0xff]  }
 0x4b4   :  { %v17971_v31 = vmax.f32 %v3396_v26, %v3545_v4  ;;  %3628 = vst [vmem:[#allocation3 + $0x18] sm:$0xff] %v3597_v44  ;;  %v3301_v3 = vpop.permute.xlu0 %3300  ;;  %v17973_v14 = vpop.permute.xlu1 %3496  ;;  %v14866_v4 = vld [vmem:[%s21739_s22 + $0x838] ss:$16 sps:$4 sm:$0xff]  }
 0x4b5   :  { %v3345_v5 = vsel %vm3334_vm2, %v17733_v37, %v3301_v3  ;;  %v3346_v8 = vsel %vm3334_vm2, %v3301_v3, %v17873_v54  ;;  %4958 = vmatpush1.bf16.msra.mxu1 %v14839_v32  ;;  %5147 = vmatpush1.bf16.msra.mxu0 %v14842_v0  ;;  %v3546_v59 = vsel %vm21750_vm3, %v17871_v50, %v17973_v14  ;;  %v14853_v50 = vld [vmem:[%s21739_s22 + $0x7f4] ss:$16 sps:$4 sm:$0xff]   ;;  %v14856_v54 = vld [vmem:[%s21739_s22 + $0x7fc] ss:$16 sps:$4 sm:$0xff]  }
 0x4b6   :  { %3632 = vst [vmem:[#allocation3 + $0x38] sm:$0xff] %v17971_v31  ;;  %v3401_v37 = vmax.f32 %v17239_v19, %v3345_v5  ;;  %v17990_v35 = vmax.f32 %v3397_v55, %v3546_v59  ;;  %4959 = vmatprep.subr.bf16.mxu1 %v14847_v7  ;;  %5148 = vmatprep.subr.bf16.mxu0 %v14850_v62  ;;  %v14863_v62 = vld [vmem:[%s21739_s22 + $0x830] ss:$16 sps:$4 sm:$0xff]   ;;  %v14871_v55 = vld [vmem:[%s21739_s22 + $0x854] ss:$16 sps:$4 sm:$0xff]  }
 0x4b7   :  { %v3402_v11 = vmax.f32 %v17435_v53, %v3346_v8  ;;  %v14874_v3 = vld [vmem:[%s21739_s22 + $0x85c] ss:$16 sps:$4 sm:$0xff]  }
 0x4b8   :  { %v18002_v33 = vmax.f32 %v3401_v37, %v3549_v49  ;;  %3633 = vst [vmem:[#allocation3 + $0x40] sm:$0xff] %v17990_v35  ;;  %v3311_v19 = vpop.permute.xlu0 %3310  ;;  %v18005_v43 = vpop.permute.xlu1 %3506  ;;  %4933 = vmatmul.mubr.bf16.gmra.mrb[36].mxu1 %v17910_v41  ;;  %5122 = vmatmul.mubr.bf16.gmra.mrb[44].mxu0 %v17910_v41  ;;  %v14854_v41 = vld [vmem:[%s21739_s22 + $0x7f8] ss:$16 sps:$4 sm:$0xff]   ;;  %v14877_v49 = vld [vmem:[%s21739_s22 + $0x874] ss:$16 sps:$4 sm:$0xff]  }
 0x4b9   :  { %v3349_v16 = vsel %vm3334_vm2, %v17738_v21, %v3311_v19  ;;  %v3350_v20 = vsel %vm3334_vm2, %v3311_v19, %v17892_v30  ;;  %4960 = vmatpush1.bf16.msra.mxu1 %v14845_v38  ;;  %5149 = vmatpush1.bf16.msra.mxu0 %v14848_v63  ;;  %v3550_v53 = vsel %vm21752_vm15, %v17890_v9, %v18005_v43  ;;  %v14859_v21 = vld [vmem:[%s21739_s22 + $0x814] ss:$16 sps:$4 sm:$0xff]   ;;  %v14862_v30 = vld [vmem:[%s21739_s22 + $0x81c] ss:$16 sps:$4 sm:$0xff]   ;;  %vm21766_vm15 = vmmov %vm21765_vm6 }
 0x4ba   :  { %v3607_v40 = vmax.f32 %v3402_v11, %v3550_v53  ;;  %4961 = vmatprep.subr.bf16.mxu1 %v14853_v50  ;;  %5150 = vmatprep.subr.bf16.mxu0 %v14856_v54  ;;  %v3406_v22 = vmax.f32 %v17267_v23, %v3349_v16  ;;  %v3407_v45 = vmax.f32 %v17443_v10, %v3350_v20  ;;  %v14860_v23 = vld [vmem:[%s21739_s22 + $0x818] ss:$16 sps:$4 sm:$0xff]   ;;  %v14869_v50 = vld [vmem:[%s21739_s22 + $0x850] ss:$16 sps:$4 sm:$0xff]  }
 0x4bb   :  { %v3864_v9 = vld [vmem:[#allocation3 + $0x18] sm:$0xfc] }
 0x4bc   :  { %v3515_v47 = vpop.permute.xlu0 %3514  ;;  %v18030_v56 = vpop.permute.xlu1 %3516  ;;  %v3874_v32 = vpack.c.bf16 %v17990_v35, %v3864_v9  ;;  %v14872_v54 = vld [vmem:[%s21739_s22 + $0x858] ss:$16 sps:$4 sm:$0xff]  }
 0x4bd   :  { %v3553_v2 = vsel %vm21753_vm8, %v17760_v51, %v3515_v47  ;;  %4962 = vmatpush1.bf16.msra.mxu1 %v14851_v29  ;;  %5151 = vmatpush1.bf16.msra.mxu0 %v14854_v41  ;;  %v3554_v25 = vsel %vm21754_vm4, %v3515_v47, %v18030_v56  ;;  %v14865_v51 = vld [vmem:[%s21739_s22 + $0x834] ss:$16 sps:$4 sm:$0xff]   ;;  %vm21767_vm8 = vmmov %vm21765_vm6 }
 0x4be   :  { %v18042_v10 = vmax.f32 %v3406_v22, %v3553_v2  ;;  %v3612_v60 = vmax.f32 %v3407_v45, %v3554_v25  ;;  %4963 = vmatprep.subr.bf16.mxu1 %v14859_v21  ;;  %5152 = vmatprep.subr.bf16.mxu0 %v14862_v30  ;;  %v4061_v5 = vrot.slane %v3874_v32, 1  ;;  %v14886_v21 = vld [vmem:[%s21739_s22 + $0x89c] ss:$16 sps:$4 sm:$0xff]   ;;  %vm21768_vm4 = vmmov %vm21765_vm6 }
 0x4bf   :  { %v3459_v25 = vld [vmem:[#allocation3 + $0x48] sm:$0xff] }
 0x4c0   :  { %v3321_v0 = vpop.permute.xlu0 %3320  ;;  %v3333_v26 = vpop.permute.xlu1 %3332  ;;  %v18051_v44 = vpack.c.bf16 %v3612_v60, %v3607_v40  ;;  %v18140_v32 = vpack.c.bf16 %v18042_v10, %v18002_v33  ;;  %v14890_v10 = vld [vmem:[%s21739_s22 + $0x8b8] ss:$16 sps:$4 sm:$0xff]  }
 0x4c1   :  { %4964 = vmatpush1.bf16.msra.mxu1 %v14857_v18  ;;  %5153 = vmatpush1.bf16.msra.mxu0 %v14860_v23  ;;  %v3418_v7 = vmax.f32 %v17665_v46, %v3333_v26  ;;  %v3353_v63 = vsel %vm3334_vm2, %v17786_v34, %v3321_v0  ;;  %v3354_v37 = vsel %vm3334_vm2, %v3321_v0, %v17912_v61  ;;  %v14880_v34 = vld [vmem:[%s21739_s22 + $0x87c] ss:$16 sps:$4 sm:$0xff]   ;;  %v14884_v18 = vld [vmem:[%s21739_s22 + $0x898] ss:$16 sps:$4 sm:$0xff]  }
 0x4c2   :  { %4965 = vmatprep.subr.bf16.mxu1 %v14865_v51  ;;  %5154 = vmatprep.subr.bf16.mxu0 %v14868_v6  ;;  %v4062_v46 = vrot.slane %v18051_v44, 1  ;;  %v3411_v61 = vmax.f32 %v17333_v28, %v3353_v63  ;;  %v3412_v11 = vmax.f32 %v17466_v36, %v3354_v37  ;;  %v14875_v28 = vld [vmem:[%s21739_s22 + $0x870] ss:$16 sps:$4 sm:$0xff]   ;;  %v14878_v36 = vld [vmem:[%s21739_s22 + $0x878] ss:$16 sps:$4 sm:$0xff]  }
 0x4c3   :  { %3449 = vst.msk [vmem:[#allocation3 + $0xe8] sm:$0xff] %vm3423_vm10, %v3418_v7  ;;  %v14889_v51 = vld [vmem:[%s21739_s22 + $0x8b4] ss:$16 sps:$4 sm:$0xff]   ;;  %v14887_v7 = vld [vmem:[%s21739_s22 + $0x8b0] ss:$16 sps:$4 sm:$0xff]  }
 0x4c4   :  { %v3331_v8 = vpop.permute.xlu0 %3330  ;;  %v18068_v59 = vpop.permute.xlu1 %3526  ;;  %v4063_v38 = vsel %vm2830_vm0, %v4061_v5, %v4062_v46  ;;  %v3863_v6 = vld [vmem:[#allocation3 + $0x10] sm:$0xfc] }
 0x4c5   :  { %4966 = vmatpush1.bf16.msra.mxu1 %v14863_v62  ;;  %5155 = vmatpush1.bf16.msra.mxu0 %v14866_v4  ;;  %v3357_v19 = vsel %vm3334_vm2, %v17809_v58, %v3331_v8  ;;  %v3358_v53 = vsel %vm3334_vm2, %v3331_v8, %v3333_v26  ;;  %vm21757_vm2 = vmmov %vm21750_vm3  ;;  %v3454_v62 = vld [vmem:[#allocation3 + $0x20] sm:$0xff] }
 0x4c6   :  { %4967 = vmatprep.subr.bf16.mxu1 %v14871_v55  ;;  %5156 = vmatprep.subr.bf16.mxu0 %v14874_v3  ;;  %v3416_v30 = vmax.f32 %v17611_v1, %v3357_v19  ;;  %v3417_v9 = vmax.f32 %v17672_v57, %v3358_v53  ;;  %vm21758_vm9 = vmmov %vm21757_vm2  ;;  %v14881_v57 = vld [vmem:[%s21739_s22 + $0x890] ss:$16 sps:$4 sm:$0xff]   ;;  %v3469_v55 = vld [vmem:[#allocation3 + $0x98] sm:$0xff]  ;;  %v3873_v3 = vpack.c.bf16 %v17971_v31, %v3863_v6 }
 0x4c7   :  { %4975 = vmatprep.mubr.bf16.mxu1 %v4063_v38  ;;  %5164 = vmatprep.mubr.bf16.mxu0 %v4063_v38  ;;  %vm21759_vm10 = vmmov %vm21757_vm2  ;;  %v14898_v38 = vld [vmem:[%s21739_s22 + $0x8dc] ss:$16 sps:$4 sm:$0xff]   ;;  %v14893_v37 = vld [vmem:[%s21739_s22 + $0x8d0] ss:$16 sps:$4 sm:$0xff]  }
 0x4c8   :  { %v3525_v16 = vpop.permute.xlu0 %3524  ;;  %v18093_v20 = vpop.permute.xlu1 %3536  ;;  %vm21760_vm11 = vmmov %vm21757_vm2  ;;  %v14901_v53 = vld [vmem:[%s21739_s22 + $0x8f4] ss:$16 sps:$4 sm:$0xff]   ;;  %v14922_v6 = vld [vmem:[%s21739_s22 + $0x95c] ss:$16 sps:$4 sm:$0xff]  }
 0x4c9   :  { %v3557_v29 = vsel %vm21755_vm5, %v17772_v39, %v3525_v16  ;;  %v3558_v41 = vsel %vm21756_vm7, %v3525_v16, %v18068_v59  ;;  %4968 = vmatpush1.bf16.msra.mxu1 %v14869_v50  ;;  %5157 = vmatpush1.bf16.msra.mxu0 %v14872_v54  ;;  %v14883_v39 = vld [vmem:[%s21739_s22 + $0x894] ss:$16 sps:$4 sm:$0xff]   ;;  %vm21761_vm12 = vmmov %vm21757_vm2 }
 0x4ca   :  { %v18106_v58 = vmax.f32 %v3411_v61, %v3557_v29  ;;  %v18108_v40 = vmax.f32 %v3412_v11, %v3558_v41  ;;  %4969 = vmatprep.subr.bf16.mxu1 %v14877_v49  ;;  %5158 = vmatprep.subr.bf16.mxu0 %v14880_v34  ;;  %v3464_v50 = vld [vmem:[#allocation3 + $0x70] sm:$0xff]  ;;  %vm21762_vm13 = vmmov %vm21757_vm2  ;;  %v3479_v49 = vld [vmem:[#allocation3 + $0xe8] sm:$0xff]  ;;  %v4058_v61 = vrot.slane %v3873_v3, 1 }
 0x4cb   :  { %vm21763_vm14 = vmmov %vm21757_vm2  ;;  %v14896_v11 = vld [vmem:[%s21739_s22 + $0x8d8] ss:$16 sps:$4 sm:$0xff]  }
 0x4cc   :  { %3647 = vst [vmem:[#allocation3 + $0xb0] sm:$0xff] %v18106_v58  ;;  %3648 = vst [vmem:[#allocation3 + $0xb8] sm:$0xff] %v18108_v40  ;;  %v3535_v22 = vpop.permute.xlu0 %3534  ;;  %v3499_v45 = vpop.permute.xlu1 %3498  ;;  %v14926_v3 = vld [vmem:[%s21739_s22 + $0x978] ss:$16 sps:$4 sm:$0xff]  }
 0x4cd   :  { %v3561_v47 = vsel %vm21757_vm2, %v17777_v27, %v3535_v22  ;;  %v3562_v2 = vsel %vm21758_vm9, %v3535_v22, %v18093_v20  ;;  %4970 = vmatpush1.bf16.msra.mxu1 %v14875_v28  ;;  %5159 = vmatpush1.bf16.msra.mxu0 %v14878_v36  ;;  %v3547_v1 = vsel %vm21759_vm10, %v17973_v14, %v3499_v45  ;;  %v14892_v14 = vld [vmem:[%s21739_s22 + $0x8bc] ss:$16 sps:$4 sm:$0xff]   ;;  %vm21764_vm3 = vmmov %vm21757_vm2  ;;  %v14902_v22 = vld [vmem:[%s21739_s22 + $0x8f8] ss:$16 sps:$4 sm:$0xff]   ;;  %vm21773_vm9 = vcmask 1045504  }
 0x4ce   :  { %v3621_v23 = vmax.f32 %v3416_v30, %v3561_v47  ;;  %v3622_v60 = vmax.f32 %v3417_v9, %v3562_v2  ;;  %v3603_v27 = vmax.f32 %v3459_v25, %v3547_v1  ;;  %4971 = vmatprep.subr.bf16.mxu1 %v14883_v39  ;;  %5160 = vmatprep.subr.bf16.mxu0 %v14886_v21  ;;  %v3474_v21 = vld [vmem:[#allocation3 + $0xc0] sm:$0xff]  ;;  %vm21774_vm10 = vmmov %vm21773_vm9 }
 0x4cf   :  { %v14899_v9 = vld [vmem:[%s21739_s22 + $0x8f0] ss:$16 sps:$4 sm:$0xff]   ;;  %v14907_v25 = vld [vmem:[%s21739_s22 + $0x914] ss:$16 sps:$4 sm:$0xff]  }
 0x4d0   :  { %3652 = vst [vmem:[#allocation3 + $0xd8] sm:$0xff] %v3621_v23  ;;  %3653 = vst [vmem:[#allocation3 + $0xe0] sm:$0xff] %v3622_v60  ;;  %v3489_v0 = vpop.permute.xlu0 %3488  ;;  %v3519_v26 = vpop.permute.xlu1 %3518  ;;  %v14916_v60 = vld [vmem:[%s21739_s22 + $0x93c] ss:$16 sps:$4 sm:$0xff]  }
 0x4d1   :  { %3634 = vst.msk [vmem:[#allocation3 + $0x48] sm:$0xff] %vm1327_vm1, %v3603_v27  ;;  %v3543_v4 = vsel %vm21760_vm11, %v17945_v24, %v3489_v0  ;;  %4972 = vmatpush1.bf16.msra.mxu1 %v14881_v57  ;;  %5161 = vmatpush1.bf16.msra.mxu0 %v14884_v18  ;;  %v3555_v33 = vsel %vm21761_vm12, %v18030_v56, %v3519_v26  ;;  %v14895_v24 = vld [vmem:[%s21739_s22 + $0x8d4] ss:$16 sps:$4 sm:$0xff]   ;;  %v4059_v56 = vrot.slane %v18140_v32, 1  ;;  %v14905_v57 = vld [vmem:[%s21739_s22 + $0x910] ss:$16 sps:$4 sm:$0xff]   ;;  %vm21775_vm11 = vmmov %vm21773_vm9 }
 0x4d2   :  { %v3598_v5 = vmax.f32 %v3454_v62, %v3543_v4  ;;  %v3613_v8 = vmax.f32 %v3469_v55, %v3555_v33  ;;  %4973 = vmatprep.subr.bf16.mxu1 %v14889_v51  ;;  %5162 = vmatprep.subr.bf16.mxu0 %v14892_v14  ;;  %v14908_v18 = vld [vmem:[%s21739_s22 + $0x918] ss:$16 sps:$4 sm:$0xff]   ;;  %v14911_v27 = vld [vmem:[%s21739_s22 + $0x930] ss:$16 sps:$4 sm:$0xff]   ;;  %v14919_v14 = vld [vmem:[%s21739_s22 + $0x954] ss:$16 sps:$4 sm:$0xff]  }
 0x4d3   :  { %v4060_v29 = vsel %vm2830_vm0, %v4058_v61, %v4059_v56  ;;  %v14914_v51 = vld [vmem:[%s21739_s22 + $0x938] ss:$16 sps:$4 sm:$0xff]   ;;  %v14917_v0 = vld [vmem:[%s21739_s22 + $0x950] ss:$16 sps:$4 sm:$0xff]   ;;  %v14928_v62 = vld [vmem:[%s21739_s22 + $0x97c] ss:$16 sps:$4 sm:$0xff]  }
 0x4d4   :  { %3629 = vst.msk [vmem:[#allocation3 + $0x20] sm:$0xff] %vm1327_vm1, %v3598_v5  ;;  %3644 = vst.msk [vmem:[#allocation3 + $0x98] sm:$0xff] %vm1327_vm1, %v3613_v8  ;;  %v3509_v63 = vpop.permute.xlu0 %3508  ;;  %v3539_v31 = vpop.permute.xlu1 %3538  ;;  %v14920_v26 = vld [vmem:[%s21739_s22 + $0x958] ss:$16 sps:$4 sm:$0xff]   ;;  %v12206_v4 = vld [vmem:[%s21739_s22 + $0x990] sm:$0xff] }
 0x4d5   :  { %v3551_v54 = vsel %vm21762_vm13, %v18005_v43, %v3509_v63  ;;  %4974 = vmatpush1.bf16.msra.mxu1 %v14887_v7  ;;  %5163 = vmatpush1.bf16.msra.mxu0 %v14890_v10  ;;  %v3563_v34 = vsel %vm21763_vm14, %v18093_v20, %v3539_v31  ;;  %v14904_v43 = vld [vmem:[%s21739_s22 + $0x8fc] ss:$16 sps:$4 sm:$0xff]   ;;  %v14925_v7 = vld [vmem:[%s21739_s22 + $0x974] ss:$16 sps:$4 sm:$0xff]   ;;  %v14923_v10 = vld [vmem:[%s21739_s22 + $0x970] ss:$16 sps:$4 sm:$0xff]   ;;  %v12361_v5 = vcombine.high %v12206_v4, %v12206_v4 }
 0x4d6   :  { %v3608_v19 = vmax.f32 %v3464_v50, %v3551_v54  ;;  %v3623_v16 = vmax.f32 %v3479_v49, %v3563_v34  ;;  %5006 = vmatprep.subr.bf16.mxu1 %v14895_v24  ;;  %5195 = vmatprep.subr.bf16.mxu0 %v14898_v38  ;;  %v12207_v55 = vld [vmem:[%s21739_s22 + $0x998] sm:$0xff]  ;;  %v12360_v8 = vcombine.low %v12206_v4, %v12206_v4  ;;  %v14935_v49 = vld [vmem:[%s21739_s22 + $0x4] ss:$16 sps:$4 sm:$0xff]   ;;  %vm21776_vm12 = vmmov %vm21773_vm9 }
 0x4d7   :  { %v3869_v20 = vld [vmem:[#allocation3 + $0xe0] sm:$0x3f]  ;;  %v3868_v41 = vld [vmem:[#allocation3 + $0xd8] sm:$0x3f]  ;;  %v12362_v63 = vcombine.low %v12207_v55, %v12207_v55  ;;  %vm21777_vm13 = vmmov %vm21773_vm9 }
 0x4d8   :  { %3639 = vst.msk [vmem:[#allocation3 + $0x70] sm:$0xff] %vm1327_vm1, %v3608_v19  ;;  %3654 = vst.msk [vmem:[#allocation3 + $0xe8] sm:$0xff] %vm1327_vm1, %v3623_v16  ;;  %v3529_v28 = vpop.permute.xlu0 %3528  ;;  %4976 = vmatmul.mubr.bf16.vlgmr.msra.gmra.mrb[28].mxu1 %v4060_v29  ;;  %5165 = vmatmul.mubr.bf16.vlgmr.msra.gmra.mrb[36].mxu0 %v4060_v29  ;;  %v3879_v36 = vpack.c.bf16 %v3869_v20, %v18108_v40  ;;  %v3878_v39 = vpack.c.bf16 %v3868_v41, %v18106_v58  ;;  %v4869_v54 = vsel %vm21766_vm15, %v12360_v8, 0  ;;  %v14941_v29 = vld [vmem:[%s21739_s22 + $0x24] ss:$16 sps:$4 sm:$0xff]  }
 0x4d9   :  { %v3559_v30 = vsel %vm21764_vm3, %v18068_v59, %v3529_v28  ;;  %5007 = vmatpush1.bf16.msra.mxu1 %v14893_v37  ;;  %5196 = vmatpush1.bf16.msra.mxu0 %v14896_v11  ;;  %v14910_v59 = vld [vmem:[%s21739_s22 + $0x91c] ss:$16 sps:$4 sm:$0xff]   ;;  %v4875_v34 = vsel %vm21768_vm4, %v12362_v63, 0  ;;  %v14972_v4 = vld [vmem:[%s21739_s22 + $0xc8] ss:$16 sps:$4 sm:$0xff]   ;;  %vm21778_vm14 = vmmov %vm21773_vm9 }
 0x4da   :  { %v3618_v45 = vmax.f32 %v3474_v21, %v3559_v30  ;;  %5008 = vmatprep.subr.bf16.mxu1 %v14901_v53  ;;  %5197 = vmatprep.subr.bf16.mxu0 %v14904_v43  ;;  %v4073_v47 = vrot.slane %v3879_v36, 1  ;;  %v4071_v2 = vrot.slane %v3878_v39, 1  ;;  %v18255_v37 = vld [vmem:[#allocation3 + $0x48] sm:$0xff]  ;;  %v14933_v53 = vld [vmem:[%s21739_s22] ss:$16 sps:$4 sm:$0xff]   ;;  %vm21779_vm3 = vmmov %vm21773_vm9 }
 0x4db   :  { %v3681_v24 = vld [vmem:[#allocation3 + $0x98] sm:$0xff]  ;;  %v3865_v38 = vld [vmem:[#allocation3 + $0x20] sm:$0xfc] }
 0x4dc   :  { %3649 = vst.msk [vmem:[#allocation3 + $0xc0] sm:$0xff] %vm1327_vm1, %v3618_v45  ;;  %v4074_v1 = vsel %vm2830_vm0, %v4062_v46, %v4073_v47  ;;  %v4072_v23 = vsel %vm2830_vm0, %v4059_v56, %v4071_v2  ;;  %v14913_v46 = vld [vmem:[%s21739_s22 + $0x934] ss:$16 sps:$4 sm:$0xff]   ;;  %v12363_v56 = vcombine.high %v12207_v55, %v12207_v55  ;;  %v3875_v50 = vpack.c.bf16 %v18255_v37, %v3865_v38  ;;  %v14938_v11 = vld [vmem:[%s21739_s22 + $0xc] ss:$16 sps:$4 sm:$0xff]  }
 0x4dd   :  { %5009 = vmatpush1.bf16.msra.mxu1 %v14899_v9  ;;  %5198 = vmatpush1.bf16.msra.mxu0 %v14902_v22  ;;  %v14936_v43 = vld [vmem:[%s21739_s22 + $0x8] ss:$16 sps:$4 sm:$0xff]   ;;  %v14944_v28 = vld [vmem:[%s21739_s22 + $0x2c] ss:$16 sps:$4 sm:$0xff]   ;;  %v14939_v39 = vld [vmem:[%s21739_s22 + $0x20] ss:$16 sps:$4 sm:$0xff]  }
 0x4de   :  { %4985 = vmatprep.mubr.bf16.mxu1 %v4074_v1  ;;  %5174 = vmatprep.mubr.bf16.mxu0 %v4074_v1  ;;  %v4064_v16 = vrot.slane %v3875_v50, 1  ;;  %v14942_v21 = vld [vmem:[%s21739_s22 + $0x28] ss:$16 sps:$4 sm:$0xff]   ;;  %v14947_v30 = vld [vmem:[%s21739_s22 + $0x44] ss:$16 sps:$4 sm:$0xff]  }
 0x4df   :  { %5010 = vmatprep.subr.bf16.mxu1 %v14907_v25  ;;  %5199 = vmatprep.subr.bf16.mxu0 %v14910_v59  ;;  %v3676_v33 = vld [vmem:[#allocation3 + $0x70] sm:$0xff]  ;;  %v3870_v20 = vld [vmem:[#allocation3 + $0xe8] sm:$0x3f] }
 0x4e0   :  { %4986 = vmatmul.mubr.bf16.gmra.mrb[32].mxu1 %v4072_v23  ;;  %5175 = vmatmul.mubr.bf16.gmra.mrb[40].mxu0 %v4072_v23  ;;  %v18253_v31 = vpack.c.bf16 %v3681_v24, %v3676_v33  ;;  %v14950_v22 = vld [vmem:[%s21739_s22 + $0x4c] ss:$16 sps:$4 sm:$0xff]   ;;  %v14945_v45 = vld [vmem:[%s21739_s22 + $0x40] ss:$16 sps:$4 sm:$0xff]   ;;  %v14977_v55 = vld [vmem:[%s21739_s22 + $0xe4] ss:$16 sps:$4 sm:$0xff]  }
 0x4e1   :  { %4995 = vmatprep.mubr.bf16.mxu1 %v4073_v47  ;;  %5011 = vmatpush1.bf16.msra.mxu1 %v14905_v57  ;;  %v14956_v59 = vld [vmem:[%s21739_s22 + $0x6c] ss:$16 sps:$4 sm:$0xff]   ;;  %v14951_v1 = vld [vmem:[%s21739_s22 + $0x60] ss:$16 sps:$4 sm:$0xff]   ;;  %v14954_v57 = vld [vmem:[%s21739_s22 + $0x68] ss:$16 sps:$4 sm:$0xff]  }
 0x4e2   :  { %5184 = vmatprep.mubr.bf16.mxu0 %v4073_v47  ;;  %5200 = vmatpush1.bf16.msra.mxu0 %v14908_v18  ;;  %v4065_v61 = vrot.slane %v18253_v31, 1  ;;  %v14948_v47 = vld [vmem:[%s21739_s22 + $0x48] ss:$16 sps:$4 sm:$0xff]   ;;  %v14959_v18 = vld [vmem:[%s21739_s22 + $0x84] ss:$16 sps:$4 sm:$0xff]  }
 0x4e3   :  { %5012 = vmatprep.subr.bf16.mxu1 %v14913_v46  ;;  %5201 = vmatprep.subr.bf16.mxu0 %v14916_v60  ;;  %v18269_v19 = vld [vmem:[#allocation3 + $0xc0] sm:$0xff]  ;;  %v14962_v23 = vld [vmem:[%s21739_s22 + $0x8c] ss:$16 sps:$4 sm:$0xff]   ;;  %v14960_v60 = vld [vmem:[%s21739_s22 + $0x88] ss:$16 sps:$4 sm:$0xff]  }
 0x4e4   :  { %v4066_v41 = vsel %vm2830_vm0, %v4064_v16, %v4065_v61  ;;  %v3880_v36 = vpack.c.bf16 %v3870_v20, %v18269_v19  ;;  %v14957_v46 = vld [vmem:[%s21739_s22 + $0x80] ss:$16 sps:$4 sm:$0xff]   ;;  %v14980_v33 = vld [vmem:[%s21739_s22 + $0xec] ss:$16 sps:$4 sm:$0xff]   ;;  %v14984_v38 = vld [vmem:[%s21739_s22 + $0x108] ss:$16 sps:$4 sm:$0xff]  }
 0x4e5   :  { %5013 = vmatpush1.bf16.msra.mxu1 %v14911_v27  ;;  %v3663_v27 = vld [vmem:[#allocation3 + $0x8] sm:$0xff]  ;;  %v14981_v24 = vld [vmem:[%s21739_s22 + $0x100] ss:$16 sps:$4 sm:$0xff]   ;;  %v15001_v16 = vld [vmem:[%s21739_s22 + $0x164] ss:$16 sps:$4 sm:$0xff]  }
 0x4e6   :  { %5202 = vmatpush1.bf16.msra.mxu0 %v14914_v51  ;;  %5014 = vmatprep.subr.bf16.mxu1 %v14919_v14  ;;  %v4075_v9 = vrot.slane %v3880_v36, 1  ;;  %v14965_v51 = vld [vmem:[%s21739_s22 + $0xa4] ss:$16 sps:$4 sm:$0xff]   ;;  %v3693_v14 = vpack.c.bf16 %v17755_v52, %v3663_v27  ;;  %v14986_v8 = vld [vmem:[%s21739_s22 + $0x10c] ss:$16 sps:$4 sm:$0xff]  }
 0x4e7   :  { %5203 = vmatprep.subr.bf16.mxu0 %v14922_v6  ;;  %v14968_v6 = vld [vmem:[%s21739_s22 + $0xac] ss:$16 sps:$4 sm:$0xff]   ;;  %v14971_v52 = vld [vmem:[%s21739_s22 + $0xc4] ss:$16 sps:$4 sm:$0xff]   ;;  %v14987_v50 = vld [vmem:[%s21739_s22 + $0x120] ss:$16 sps:$4 sm:$0xff]  }
 0x4e8   :  { %4996 = vmatmul.mubr.bf16.gmra.mrb[36].mxu1 %v4071_v2  ;;  %5185 = vmatmul.mubr.bf16.gmra.mrb[44].mxu0 %v4071_v2  ;;  %v14953_v2 = vld [vmem:[%s21739_s22 + $0x64] ss:$16 sps:$4 sm:$0xff]   ;;  %v4076_v25 = vsel %vm2830_vm0, %v4065_v61, %v4075_v9  ;;  %v14992_v63 = vld [vmem:[%s21739_s22 + $0x12c] ss:$16 sps:$4 sm:$0xff]   ;;  %v14993_v61 = vld [vmem:[%s21739_s22 + $0x140] ss:$16 sps:$4 sm:$0xff]  }
 0x4e9   :  { %5015 = vmatpush1.bf16.msra.mxu1 %v14917_v0  ;;  %5038 = vmatprep.mubr.bf16.mxu1 %v21740_v42  ;;  %v14963_v0 = vld [vmem:[%s21739_s22 + $0xa0] ss:$16 sps:$4 sm:$0xff]   ;;  %v15007_v20 = vld [vmem:[%s21739_s22 + $0x184] ss:$16 sps:$4 sm:$0xff]   ;;  %v15008_v36 = vld [vmem:[%s21739_s22 + $0x188] ss:$16 sps:$4 sm:$0xff]  }
 0x4ea   :  { %5204 = vmatpush1.bf16.msra.mxu0 %v14920_v26  ;;  %5016 = vmatprep.subr.bf16.mxu1 %v14925_v7  ;;  %v14966_v26 = vld [vmem:[%s21739_s22 + $0xa8] ss:$16 sps:$4 sm:$0xff]   ;;  %v14974_v7 = vld [vmem:[%s21739_s22 + $0xcc] ss:$16 sps:$4 sm:$0xff]   ;;  %vm21769_vm0 = vmmov %vm21768_vm4 }
 0x4eb   :  { %5205 = vmatprep.subr.bf16.mxu0 %v14928_v62  ;;  %5227 = vmatprep.mubr.bf16.mxu0 %v21740_v42  ;;  %v14969_v62 = vld [vmem:[%s21739_s22 + $0xc0] ss:$16 sps:$4 sm:$0xff]   ;;  %vm21770_vm5 = vmmov %vm21769_vm0 }
 0x4ec   :  { %vm21771_vm7 = vmmov %vm21769_vm0 }
 0x4ed   :  { %5017 = vmatpush1.bf16.msra.mxu1 %v14923_v10  ;;  %v14975_v10 = vld [vmem:[%s21739_s22 + $0xe0] ss:$16 sps:$4 sm:$0xff]   ;;  %vm21772_vm2 = vmmov %vm21769_vm0 }
 0x4ee   :  { %5206 = vmatpush1.bf16.msra.mxu0 %v14926_v3  ;;  %12364 = vmatprep.subr.msk.bf16.mxu1 %vm21765_vm6, %v12361_v5  ;;  %v14978_v3 = vld [vmem:[%s21739_s22 + $0xe8] ss:$16 sps:$4 sm:$0xff]   ;;  %v14983_v5 = vld [vmem:[%s21739_s22 + $0x104] ss:$16 sps:$4 sm:$0xff]   ;;  %vm21780_vm6 = vmmov %vm21779_vm3 }
 0x4ef   :  { %12368 = vmatprep.subr.msk.bf16.mxu0 %vm21767_vm8, %v12363_v56  ;;  %v14989_v56 = vld [vmem:[%s21739_s22 + $0x124] ss:$16 sps:$4 sm:$0xff]   ;;  %vm21781_vm15 = vmmov %vm21769_vm0 }
 0x4f0   :  { %vm21782_vm8 = vmmov %vm21769_vm0 }
 0x4f1   :  { %5019 = vmatpush1.bf16.msra.mxu1 %v4869_v54  ;;  %v14990_v54 = vld [vmem:[%s21739_s22 + $0x128] ss:$16 sps:$4 sm:$0xff]   ;;  %vm21783_vm4 = vmmov %vm21769_vm0 }
 0x4f2   :  { %5208 = vmatpush1.bf16.msra.mxu0 %v4875_v34  ;;  %6049 = vmatprep.subr.bf16.mxu1 %v14935_v49  ;;  %v14995_v49 = vld [vmem:[%s21739_s22 + $0x144] ss:$16 sps:$4 sm:$0xff]   ;;  %v14998_v34 = vld [vmem:[%s21739_s22 + $0x14c] ss:$16 sps:$4 sm:$0xff]  }
 0x4f3   :  { %6238 = vmatprep.subr.bf16.mxu0 %v14938_v11  ;;  %v14996_v11 = vld [vmem:[%s21739_s22 + $0x148] ss:$16 sps:$4 sm:$0xff]  }
 0x4f4   :  { %12365 = vmatmul.mubr.msk.bf16.vlgmr.msra.gmra.mrb[28].mxu1 %vm1327_vm1, %v4066_v41 }
 0x4f5   :  { %12369 = vmatmul.mubr.msk.bf16.vlgmr.msra.gmra.mrb[36].mxu0 %vm1327_vm1, %v4066_v41  ;;  %6050 = vmatpush1.bf16.msra.mxu1 %v14933_v53  ;;  %v15004_v53 = vld [vmem:[%s21739_s22 + $0x16c] ss:$16 sps:$4 sm:$0xff]  }
 0x4f6   :  { %6239 = vmatpush1.bf16.msra.mxu0 %v14936_v43  ;;  %6051 = vmatprep.subr.bf16.mxu1 %v14941_v29  ;;  %v14999_v43 = vld [vmem:[%s21739_s22 + $0x160] ss:$16 sps:$4 sm:$0xff]   ;;  %v15002_v29 = vld [vmem:[%s21739_s22 + $0x168] ss:$16 sps:$4 sm:$0xff]   ;;  %v15010_v41 = vld [vmem:[%s21739_s22 + $0x18c] ss:$16 sps:$4 sm:$0xff]  }
 0x4f7   :  { %6240 = vmatprep.subr.bf16.mxu0 %v14944_v28  ;;  %5048 = vmatprep.mubr.bf16.mxu1 %v21740_v42  ;;  %v15005_v28 = vld [vmem:[%s21739_s22 + $0x180] ss:$16 sps:$4 sm:$0xff]  }
 0x4f8   :  { %5237 = vmatprep.mubr.bf16.mxu0 %v21740_v42 }
 0x4f9   :  { %6052 = vmatpush1.bf16.msra.mxu1 %v14939_v39  ;;  %v15013_v39 = vld [vmem:[%s21739_s22 + $0x1a4] ss:$16 sps:$4 sm:$0xff]  }
 0x4fa   :  { %6241 = vmatpush1.bf16.msra.mxu0 %v14942_v21  ;;  %6053 = vmatprep.subr.bf16.mxu1 %v14947_v30  ;;  %v15016_v21 = vld [vmem:[%s21739_s22 + $0x1ac] ss:$16 sps:$4 sm:$0xff]   ;;  %v15011_v30 = vld [vmem:[%s21739_s22 + $0x1a0] ss:$16 sps:$4 sm:$0xff]  }
 0x4fb   :  { %6242 = vmatprep.subr.bf16.mxu0 %v14950_v22  ;;  %v15019_v22 = vld [vmem:[%s21739_s22 + $0x1c4] ss:$16 sps:$4 sm:$0xff]  }
 0x4fc   :  { %12366 = vmatmul.mubr.msk.bf16.gmra.mrb[32].mxu1 %vm1327_vm1, %v4076_v25 }
 0x4fd   :  { %12370 = vmatmul.mubr.msk.bf16.gmra.mrb[40].mxu0 %vm1327_vm1, %v4076_v25  ;;  %6054 = vmatpush1.bf16.msra.mxu1 %v14945_v45  ;;  %v15022_v45 = vld [vmem:[%s21739_s22 + $0x1cc] ss:$16 sps:$4 sm:$0xff]   ;;  %v15025_v25 = vld [vmem:[%s21739_s22 + $0x1e4] ss:$16 sps:$4 sm:$0xff]  }
 0x4fe   :  { %6243 = vmatpush1.bf16.msra.mxu0 %v14948_v47  ;;  %6055 = vmatprep.subr.bf16.mxu1 %v14953_v2  ;;  %v15017_v47 = vld [vmem:[%s21739_s22 + $0x1c0] ss:$16 sps:$4 sm:$0xff]   ;;  %v15020_v2 = vld [vmem:[%s21739_s22 + $0x1c8] ss:$16 sps:$4 sm:$0xff]  }
 0x4ff   :  { %6244 = vmatprep.subr.bf16.mxu0 %v14956_v59  ;;  %5058 = vmatprep.mubr.bf16.mxu1 %v21740_v42  ;;  %v15028_v59 = vld [vmem:[%s21739_s22 + $0x1ec] ss:$16 sps:$4 sm:$0xff]  }
 0x500   :  { %5247 = vmatprep.mubr.bf16.mxu0 %v21740_v42 }
 0x501   :  { %6056 = vmatpush1.bf16.msra.mxu1 %v14951_v1  ;;  %v15023_v1 = vld [vmem:[%s21739_s22 + $0x1e0] ss:$16 sps:$4 sm:$0xff]  }
 0x502   :  { %6245 = vmatpush1.bf16.msra.mxu0 %v14954_v57  ;;  %6057 = vmatprep.subr.bf16.mxu1 %v14959_v18  ;;  %v15026_v57 = vld [vmem:[%s21739_s22 + $0x1e8] ss:$16 sps:$4 sm:$0xff]   ;;  %v15031_v18 = vld [vmem:[%s21739_s22 + $0x204] ss:$16 sps:$4 sm:$0xff]  }
 0x503   :  { %6246 = vmatprep.subr.bf16.mxu0 %v14962_v23  ;;  %v15034_v23 = vld [vmem:[%s21739_s22 + $0x20c] ss:$16 sps:$4 sm:$0xff]  }
 0x504   :  { %12367 = vmatmul.mubr.msk.bf16.gmra.mrb[36].mxu1 %vm1327_vm1, %v4075_v9 }
 0x505   :  { %12371 = vmatmul.mubr.msk.bf16.gmra.mrb[44].mxu0 %vm1327_vm1, %v4075_v9  ;;  %6058 = vmatpush1.bf16.msra.mxu1 %v14957_v46  ;;  %v15014_v9 = vld [vmem:[%s21739_s22 + $0x1a8] ss:$16 sps:$4 sm:$0xff]   ;;  %v3662_v46 = vld [vmem:[#allocation3] sm:$0xff] }
 0x506   :  { %6081 = vmatprep.mubr.bf16.mxu1 %v3693_v14  ;;  %6247 = vmatpush1.bf16.msra.mxu0 %v14960_v60  ;;  %v18477_v60 = vld [vmem:[#allocation3 + $0x28] sm:$0xff] }
 0x507   :  { %6270 = vmatprep.mubr.bf16.mxu0 %v3693_v14  ;;  %6059 = vmatprep.subr.bf16.mxu1 %v14965_v51  ;;  %v3692_v27 = vpack.c.bf16 %v18477_v60, %v3662_v46  ;;  %v15029_v51 = vld [vmem:[%s21739_s22 + $0x200] ss:$16 sps:$4 sm:$0xff]   ;;  %v15032_v14 = vld [vmem:[%s21739_s22 + $0x208] ss:$16 sps:$4 sm:$0xff]  }
 0x508   :  { %6248 = vmatprep.subr.bf16.mxu0 %v14968_v6  ;;  %v15037_v6 = vld [vmem:[%s21739_s22 + $0x224] ss:$16 sps:$4 sm:$0xff]   ;;  %v15089_v46 = vld [vmem:[%s21739_s22 + $0x340] ss:$16 sps:$4 sm:$0xff]  }
 0x509   :  { %6060 = vmatpush1.bf16.msra.mxu1 %v14963_v0  ;;  %v15040_v0 = vld [vmem:[%s21739_s22 + $0x22c] ss:$16 sps:$4 sm:$0xff]  }
 0x50a   :  { %6249 = vmatpush1.bf16.msra.mxu0 %v14966_v26  ;;  %6061 = vmatprep.subr.bf16.mxu1 %v14971_v52  ;;  %v15035_v26 = vld [vmem:[%s21739_s22 + $0x220] ss:$16 sps:$4 sm:$0xff]   ;;  %v15038_v52 = vld [vmem:[%s21739_s22 + $0x228] ss:$16 sps:$4 sm:$0xff]  }
 0x50b   :  { %6250 = vmatprep.subr.bf16.mxu0 %v14974_v7  ;;  %v15043_v7 = vld [vmem:[%s21739_s22 + $0x244] ss:$16 sps:$4 sm:$0xff]  }
 0x50d   :  { %6062 = vmatpush1.bf16.msra.mxu1 %v14969_v62  ;;  %v15046_v62 = vld [vmem:[%s21739_s22 + $0x24c] ss:$16 sps:$4 sm:$0xff]  }
 0x50e   :  { %6251 = vmatpush1.bf16.msra.mxu0 %v14972_v4  ;;  %6063 = vmatprep.subr.bf16.mxu1 %v14977_v55  ;;  %v3688_v4 = vld [vmem:[#allocation3 + $0xd0] sm:$0xf] }
 0x50f   :  { %6252 = vmatprep.subr.bf16.mxu0 %v14980_v33  ;;  %v15041_v55 = vld [vmem:[%s21739_s22 + $0x240] ss:$16 sps:$4 sm:$0xff]   ;;  %v15044_v33 = vld [vmem:[%s21739_s22 + $0x248] ss:$16 sps:$4 sm:$0xff]  }
 0x511   :  { %6064 = vmatpush1.bf16.msra.mxu1 %v14975_v10  ;;  %v18512_v10 = vld [vmem:[#allocation3 + $0xa8] sm:$0xff] }
 0x512   :  { %6253 = vmatpush1.bf16.msra.mxu0 %v14978_v3  ;;  %6065 = vmatprep.subr.bf16.mxu1 %v14983_v5  ;;  %v3703_v3 = vpack.c.bf16 %v3688_v4, %v18512_v10  ;;  %v15049_v5 = vld [vmem:[%s21739_s22 + $0x264] ss:$16 sps:$4 sm:$0xff]  }
 0x513   :  { %6254 = vmatprep.subr.bf16.mxu0 %v14986_v8  ;;  %v15052_v8 = vld [vmem:[%s21739_s22 + $0x26c] ss:$16 sps:$4 sm:$0xff]   ;;  %v15109_v4 = vld [vmem:[%s21739_s22 + $0x3a4] ss:$16 sps:$4 sm:$0xff]  }
 0x515   :  { %6066 = vmatpush1.bf16.msra.mxu1 %v14981_v24  ;;  %v15047_v24 = vld [vmem:[%s21739_s22 + $0x260] ss:$16 sps:$4 sm:$0xff]  }
 0x516   :  { %6255 = vmatpush1.bf16.msra.mxu0 %v14984_v38  ;;  %6067 = vmatprep.subr.bf16.mxu1 %v14989_v56  ;;  %v15050_v38 = vld [vmem:[%s21739_s22 + $0x268] ss:$16 sps:$4 sm:$0xff]  }
 0x517   :  { %6256 = vmatprep.subr.bf16.mxu0 %v14992_v63  ;;  %v3687_v56 = vld [vmem:[#allocation3 + $0xc8] sm:$0xf]  ;;  %v15055_v63 = vld [vmem:[%s21739_s22 + $0x284] ss:$16 sps:$4 sm:$0xff]  }
 0x519   :  { %6068 = vmatpush1.bf16.msra.mxu1 %v14987_v50  ;;  %v15058_v50 = vld [vmem:[%s21739_s22 + $0x28c] ss:$16 sps:$4 sm:$0xff]  }
 0x51a   :  { %6257 = vmatpush1.bf16.msra.mxu0 %v14990_v54  ;;  %6069 = vmatprep.subr.bf16.mxu1 %v14995_v49  ;;  %v3665_v54 = vld [vmem:[#allocation3 + $0x18] sm:$0xff]  ;;  %v18535_v49 = vld [vmem:[#allocation3 + $0xa0] sm:$0xff] }
 0x51b   :  { %6258 = vmatprep.subr.bf16.mxu0 %v14998_v34  ;;  %v3702_v34 = vpack.c.bf16 %v3687_v56, %v18535_v49  ;;  %v15121_v56 = vld [vmem:[%s21739_s22 + $0x3e4] ss:$16 sps:$4 sm:$0xff]  }
 0x51d   :  { %6070 = vmatpush1.bf16.msra.mxu1 %v14993_v61  ;;  %v15053_v61 = vld [vmem:[%s21739_s22 + $0x280] ss:$16 sps:$4 sm:$0xff]  }
 0x51e   :  { %6259 = vmatpush1.bf16.msra.mxu0 %v14996_v11  ;;  %6071 = vmatprep.subr.bf16.mxu1 %v15001_v16  ;;  %v15056_v11 = vld [vmem:[%s21739_s22 + $0x288] ss:$16 sps:$4 sm:$0xff]   ;;  %v3695_v16 = vpack.c.bf16 %v17990_v35, %v3665_v54 }
 0x51f   :  { %6260 = vmatprep.subr.bf16.mxu0 %v15004_v53  ;;  %v15061_v53 = vld [vmem:[%s21739_s22 + $0x2a4] ss:$16 sps:$4 sm:$0xff]   ;;  %v15062_v35 = vld [vmem:[%s21739_s22 + $0x2a8] ss:$16 sps:$4 sm:$0xff]  }
 0x520   :  { %v15122_v54 = vld [vmem:[%s21739_s22 + $0x3e8] ss:$16 sps:$4 sm:$0xff]  }
 0x521   :  { %6072 = vmatpush1.bf16.msra.mxu1 %v14999_v43  ;;  %v15064_v43 = vld [vmem:[%s21739_s22 + $0x2ac] ss:$16 sps:$4 sm:$0xff]  }
 0x522   :  { %6261 = vmatpush1.bf16.msra.mxu0 %v15002_v29  ;;  %6073 = vmatprep.subr.bf16.mxu1 %v15007_v20  ;;  %v15059_v29 = vld [vmem:[%s21739_s22 + $0x2a0] ss:$16 sps:$4 sm:$0xff]   ;;  %v15067_v20 = vld [vmem:[%s21739_s22 + $0x2c4] ss:$16 sps:$4 sm:$0xff]  }
 0x523   :  { %6262 = vmatprep.subr.bf16.mxu0 %v15010_v41  ;;  %v15070_v41 = vld [vmem:[%s21739_s22 + $0x2cc] ss:$16 sps:$4 sm:$0xff]  }
 0x525   :  { %6074 = vmatpush1.bf16.msra.mxu1 %v15005_v28  ;;  %v15065_v28 = vld [vmem:[%s21739_s22 + $0x2c0] ss:$16 sps:$4 sm:$0xff]  }
 0x526   :  { %6263 = vmatpush1.bf16.msra.mxu0 %v15008_v36  ;;  %6075 = vmatprep.subr.bf16.mxu1 %v15013_v39  ;;  %v15068_v36 = vld [vmem:[%s21739_s22 + $0x2c8] ss:$16 sps:$4 sm:$0xff]   ;;  %v15073_v39 = vld [vmem:[%s21739_s22 + $0x2e4] ss:$16 sps:$4 sm:$0xff]  }
 0x527   :  { %6264 = vmatprep.subr.bf16.mxu0 %v15016_v21  ;;  %v15076_v21 = vld [vmem:[%s21739_s22 + $0x2ec] ss:$16 sps:$4 sm:$0xff]  }
 0x529   :  { %6076 = vmatpush1.bf16.msra.mxu1 %v15011_v30  ;;  %v15071_v30 = vld [vmem:[%s21739_s22 + $0x2e0] ss:$16 sps:$4 sm:$0xff]  }
 0x52a   :  { %6265 = vmatpush1.bf16.msra.mxu0 %v15014_v9  ;;  %6077 = vmatprep.subr.bf16.mxu1 %v15019_v22  ;;  %v15074_v9 = vld [vmem:[%s21739_s22 + $0x2e8] ss:$16 sps:$4 sm:$0xff]   ;;  %v15079_v22 = vld [vmem:[%s21739_s22 + $0x304] ss:$16 sps:$4 sm:$0xff]  }
 0x52b   :  { %6266 = vmatprep.subr.bf16.mxu0 %v15022_v45  ;;  %v15082_v45 = vld [vmem:[%s21739_s22 + $0x30c] ss:$16 sps:$4 sm:$0xff]  }
 0x52d   :  { %6078 = vmatpush1.bf16.msra.mxu1 %v15017_v47  ;;  %v15077_v47 = vld [vmem:[%s21739_s22 + $0x300] ss:$16 sps:$4 sm:$0xff]  }
 0x52e   :  { %6267 = vmatpush1.bf16.msra.mxu0 %v15020_v2  ;;  %6079 = vmatprep.subr.bf16.mxu1 %v15025_v25  ;;  %v15080_v2 = vld [vmem:[%s21739_s22 + $0x308] ss:$16 sps:$4 sm:$0xff]   ;;  %v15085_v25 = vld [vmem:[%s21739_s22 + $0x324] ss:$16 sps:$4 sm:$0xff]  }
 0x52f   :  { %6268 = vmatprep.subr.bf16.mxu0 %v15028_v59  ;;  %v15088_v59 = vld [vmem:[%s21739_s22 + $0x32c] ss:$16 sps:$4 sm:$0xff]  }
 0x531   :  { %6080 = vmatpush1.bf16.msra.mxu1 %v15023_v1  ;;  %v15083_v1 = vld [vmem:[%s21739_s22 + $0x320] ss:$16 sps:$4 sm:$0xff]  }
 0x532   :  { %6269 = vmatpush1.bf16.msra.mxu0 %v15026_v57  ;;  %6112 = vmatprep.subr.bf16.mxu1 %v15031_v18  ;;  %v15086_v57 = vld [vmem:[%s21739_s22 + $0x328] ss:$16 sps:$4 sm:$0xff]   ;;  %v15091_v18 = vld [vmem:[%s21739_s22 + $0x344] ss:$16 sps:$4 sm:$0xff]  }
 0x533   :  { %6301 = vmatprep.subr.bf16.mxu0 %v15034_v23  ;;  %v15094_v23 = vld [vmem:[%s21739_s22 + $0x34c] ss:$16 sps:$4 sm:$0xff]  }
 0x534   :  { %6082 = vmatmul.mubr.bf16.vlgmr.msra.gmra.mrb[28].mxu1 %v3692_v27 }
 0x535   :  { %6271 = vmatmul.mubr.bf16.vlgmr.msra.gmra.mrb[36].mxu0 %v3692_v27  ;;  %6091 = vmatprep.mubr.bf16.mxu1 %v17774_v12  ;;  %v15092_v27 = vld [vmem:[%s21739_s22 + $0x348] ss:$16 sps:$4 sm:$0xff]  }
 0x536   :  { %6113 = vmatpush1.bf16.msra.mxu1 %v15029_v51  ;;  %6280 = vmatprep.mubr.bf16.mxu0 %v17774_v12  ;;  %v15097_v51 = vld [vmem:[%s21739_s22 + $0x364] ss:$16 sps:$4 sm:$0xff]  }
 0x537   :  { %6302 = vmatpush1.bf16.msra.mxu0 %v15032_v14  ;;  %6114 = vmatprep.subr.bf16.mxu1 %v15037_v6  ;;  %v15100_v14 = vld [vmem:[%s21739_s22 + $0x36c] ss:$16 sps:$4 sm:$0xff]   ;;  %v15095_v6 = vld [vmem:[%s21739_s22 + $0x360] ss:$16 sps:$4 sm:$0xff]  }
 0x538   :  { %6303 = vmatprep.subr.bf16.mxu0 %v15040_v0  ;;  %v15098_v0 = vld [vmem:[%s21739_s22 + $0x368] ss:$16 sps:$4 sm:$0xff]  }
 0x53a   :  { %6115 = vmatpush1.bf16.msra.mxu1 %v15035_v26  ;;  %v15103_v26 = vld [vmem:[%s21739_s22 + $0x384] ss:$16 sps:$4 sm:$0xff]  }
 0x53b   :  { %6304 = vmatpush1.bf16.msra.mxu0 %v15038_v52  ;;  %6116 = vmatprep.subr.bf16.mxu1 %v15043_v7  ;;  %v15106_v52 = vld [vmem:[%s21739_s22 + $0x38c] ss:$16 sps:$4 sm:$0xff]   ;;  %v15101_v7 = vld [vmem:[%s21739_s22 + $0x380] ss:$16 sps:$4 sm:$0xff]  }
 0x53c   :  { %6092 = vmatmul.mubr.bf16.gmra.mrb[32].mxu1 %v17784_v17  ;;  %6305 = vmatprep.subr.bf16.mxu0 %v15046_v62  ;;  %v15104_v62 = vld [vmem:[%s21739_s22 + $0x388] ss:$16 sps:$4 sm:$0xff]  }
 0x53d   :  { %6281 = vmatmul.mubr.bf16.gmra.mrb[40].mxu0 %v17784_v17  ;;  %6101 = vmatprep.mubr.bf16.mxu1 %v3703_v3 }
 0x53e   :  { %6117 = vmatpush1.bf16.msra.mxu1 %v15041_v55  ;;  %6290 = vmatprep.mubr.bf16.mxu0 %v3703_v3  ;;  %v15112_v55 = vld [vmem:[%s21739_s22 + $0x3ac] ss:$16 sps:$4 sm:$0xff]   ;;  %v15110_v3 = vld [vmem:[%s21739_s22 + $0x3a8] ss:$16 sps:$4 sm:$0xff]  }
 0x53f   :  { %6306 = vmatpush1.bf16.msra.mxu0 %v15044_v33  ;;  %6118 = vmatprep.subr.bf16.mxu1 %v15049_v5  ;;  %v15107_v33 = vld [vmem:[%s21739_s22 + $0x3a0] ss:$16 sps:$4 sm:$0xff]   ;;  %v15115_v5 = vld [vmem:[%s21739_s22 + $0x3c4] ss:$16 sps:$4 sm:$0xff]  }
 0x540   :  { %6307 = vmatprep.subr.bf16.mxu0 %v15052_v8  ;;  %v15118_v8 = vld [vmem:[%s21739_s22 + $0x3cc] ss:$16 sps:$4 sm:$0xff]  }
 0x542   :  { %6119 = vmatpush1.bf16.msra.mxu1 %v15047_v24  ;;  %v15113_v24 = vld [vmem:[%s21739_s22 + $0x3c0] ss:$16 sps:$4 sm:$0xff]  }
 0x543   :  { %6308 = vmatpush1.bf16.msra.mxu0 %v15050_v38  ;;  %6120 = vmatprep.subr.bf16.mxu1 %v15055_v63  ;;  %v15116_v38 = vld [vmem:[%s21739_s22 + $0x3c8] ss:$16 sps:$4 sm:$0xff]   ;;  %v15124_v63 = vld [vmem:[%s21739_s22 + $0x3ec] ss:$16 sps:$4 sm:$0xff]  }
 0x544   :  { %6102 = vmatmul.mubr.bf16.gmra.mrb[36].mxu1 %v3702_v34  ;;  %6309 = vmatprep.subr.bf16.mxu0 %v15058_v50  ;;  %v15119_v50 = vld [vmem:[%s21739_s22 + $0x3e0] ss:$16 sps:$4 sm:$0xff]  }
 0x545   :  { %6291 = vmatmul.mubr.bf16.gmra.mrb[44].mxu0 %v3702_v34  ;;  %6144 = vmatprep.mubr.bf16.mxu1 %v3695_v16  ;;  %v15127_v34 = vld [vmem:[%s21739_s22 + $0x404] ss:$16 sps:$4 sm:$0xff]  }
 0x546   :  { %6121 = vmatpush1.bf16.msra.mxu1 %v15053_v61  ;;  %6333 = vmatprep.mubr.bf16.mxu0 %v3695_v16  ;;  %v3664_v61 = vld [vmem:[#allocation3 + $0x10] sm:$0xff]  ;;  %v18683_v16 = vld [vmem:[#allocation3 + $0x38] sm:$0xff] }
 0x547   :  { %6310 = vmatpush1.bf16.msra.mxu0 %v15056_v11  ;;  %6122 = vmatprep.subr.bf16.mxu1 %v15061_v53  ;;  %v15130_v11 = vld [vmem:[%s21739_s22 + $0x40c] ss:$16 sps:$4 sm:$0xff]   ;;  %v3694_v53 = vpack.c.bf16 %v18683_v16, %v3664_v61  ;;  %v15180_v61 = vld [vmem:[%s21739_s22 + $0x9e8] ss:$16 sps:$4 sm:$0xff]  }
 0x548   :  { %6311 = vmatprep.subr.bf16.mxu0 %v15064_v43  ;;  %v15125_v43 = vld [vmem:[%s21739_s22 + $0x400] ss:$16 sps:$4 sm:$0xff]  }
 0x54a   :  { %6123 = vmatpush1.bf16.msra.mxu1 %v15059_v29  ;;  %v15128_v29 = vld [vmem:[%s21739_s22 + $0x408] ss:$16 sps:$4 sm:$0xff]  }
 0x54b   :  { %6312 = vmatpush1.bf16.msra.mxu0 %v15062_v35  ;;  %6124 = vmatprep.subr.bf16.mxu1 %v15067_v20  ;;  %v15133_v35 = vld [vmem:[%s21739_s22 + $0x424] ss:$16 sps:$4 sm:$0xff]   ;;  %v15136_v20 = vld [vmem:[%s21739_s22 + $0x42c] ss:$16 sps:$4 sm:$0xff]  }
 0x54c   :  { %6313 = vmatprep.subr.bf16.mxu0 %v15070_v41  ;;  %v15131_v41 = vld [vmem:[%s21739_s22 + $0x420] ss:$16 sps:$4 sm:$0xff]  }
 0x54e   :  { %6125 = vmatpush1.bf16.msra.mxu1 %v15065_v28  ;;  %v15134_v28 = vld [vmem:[%s21739_s22 + $0x428] ss:$16 sps:$4 sm:$0xff]  }
 0x54f   :  { %6314 = vmatpush1.bf16.msra.mxu0 %v15068_v36  ;;  %6126 = vmatprep.subr.bf16.mxu1 %v15073_v39  ;;  %v15139_v36 = vld [vmem:[%s21739_s22 + $0x444] ss:$16 sps:$4 sm:$0xff]   ;;  %v15142_v39 = vld [vmem:[%s21739_s22 + $0x44c] ss:$16 sps:$4 sm:$0xff]  }
 0x550   :  { %6315 = vmatprep.subr.bf16.mxu0 %v15076_v21  ;;  %v3690_v21 = vld [vmem:[#allocation3 + $0xe0] sm:$0xf] }
 0x552   :  { %6127 = vmatpush1.bf16.msra.mxu1 %v15071_v30  ;;  %v15137_v30 = vld [vmem:[%s21739_s22 + $0x440] ss:$16 sps:$4 sm:$0xff]  }
 0x553   :  { %6316 = vmatpush1.bf16.msra.mxu0 %v15074_v9  ;;  %6128 = vmatprep.subr.bf16.mxu1 %v15079_v22  ;;  %v15140_v9 = vld [vmem:[%s21739_s22 + $0x448] ss:$16 sps:$4 sm:$0xff]   ;;  %v3705_v22 = vpack.c.bf16 %v3690_v21, %v18108_v40  ;;  %v15143_v40 = vld [vmem:[%s21739_s22 + $0x460] ss:$16 sps:$4 sm:$0xff]  }
 0x554   :  { %6317 = vmatprep.subr.bf16.mxu0 %v15082_v45  ;;  %v15145_v45 = vld [vmem:[%s21739_s22 + $0x464] ss:$16 sps:$4 sm:$0xff]   ;;  %v15189_v21 = vld [vmem:[%s21739_s22 + $0xa20] ss:$16 sps:$4 sm:$0xff]  }
 0x556   :  { %6129 = vmatpush1.bf16.msra.mxu1 %v15077_v47  ;;  %v15148_v47 = vld [vmem:[%s21739_s22 + $0x46c] ss:$16 sps:$4 sm:$0xff]  }
 0x557   :  { %6318 = vmatpush1.bf16.msra.mxu0 %v15080_v2  ;;  %6130 = vmatprep.subr.bf16.mxu1 %v15085_v25  ;;  %v15146_v2 = vld [vmem:[%s21739_s22 + $0x468] ss:$16 sps:$4 sm:$0xff]  }
 0x558   :  { %6319 = vmatprep.subr.bf16.mxu0 %v15088_v59  ;;  %v3689_v25 = vld [vmem:[#allocation3 + $0xd8] sm:$0xf]  ;;  %v15151_v59 = vld [vmem:[%s21739_s22 + $0x484] ss:$16 sps:$4 sm:$0xff]  }
 0x55a   :  { %6131 = vmatpush1.bf16.msra.mxu1 %v15083_v1  ;;  %v15154_v1 = vld [vmem:[%s21739_s22 + $0x48c] ss:$16 sps:$4 sm:$0xff]  }
 0x55b   :  { %6320 = vmatpush1.bf16.msra.mxu0 %v15086_v57  ;;  %6132 = vmatprep.subr.bf16.mxu1 %v15091_v18  ;;  %v3704_v57 = vpack.c.bf16 %v3689_v25, %v18106_v58  ;;  %v15149_v18 = vld [vmem:[%s21739_s22 + $0x480] ss:$16 sps:$4 sm:$0xff]   ;;  %v15160_v58 = vld [vmem:[%s21739_s22 + $0x4ac] ss:$16 sps:$4 sm:$0xff]   ;;  %v15198_v25 = vld [vmem:[%s21739_s22 + $0xa48] ss:$16 sps:$4 sm:$0xff]  }
 0x55c   :  { %6321 = vmatprep.subr.bf16.mxu0 %v15094_v23  ;;  %v15152_v23 = vld [vmem:[%s21739_s22 + $0x488] ss:$16 sps:$4 sm:$0xff]  }
 0x55e   :  { %6133 = vmatpush1.bf16.msra.mxu1 %v15089_v46  ;;  %v15157_v46 = vld [vmem:[%s21739_s22 + $0x4a4] ss:$16 sps:$4 sm:$0xff]  }
 0x55f   :  { %6322 = vmatpush1.bf16.msra.mxu0 %v15092_v27  ;;  %6134 = vmatprep.subr.bf16.mxu1 %v15097_v51  ;;  %v3859_v27 = vld [vmem:[%s21739_s22 + $0x4c0] sm:$0xff]  ;;  %v3860_v51 = vld [vmem:[%s21739_s22 + $0x4c8] sm:$0xff] }
 0x560   :  { %6323 = vmatprep.subr.bf16.mxu0 %v15100_v14  ;;  %v15155_v14 = vld [vmem:[%s21739_s22 + $0x4a0] ss:$16 sps:$4 sm:$0xff]  }
 0x562   :  { %6135 = vmatpush1.bf16.msra.mxu1 %v15095_v6  ;;  %v15158_v6 = vld [vmem:[%s21739_s22 + $0x4a8] ss:$16 sps:$4 sm:$0xff]  }
 0x563   :  { %6324 = vmatpush1.bf16.msra.mxu0 %v15098_v0  ;;  %6136 = vmatprep.subr.bf16.mxu1 %v15103_v26  ;;  %v12525_v0 = vcombine.high %v3859_v27, %v3859_v27  ;;  %v12524_v26 = vcombine.low %v3859_v27, %v3859_v27  ;;  %v15210_v27 = vld [vmem:[%s21739_s22 + $0xa88] ss:$16 sps:$4 sm:$0xff]  }
 0x564   :  { %6325 = vmatprep.subr.bf16.mxu0 %v15106_v52  ;;  %v12527_v52 = vcombine.high %v3860_v51, %v3860_v51 }
 0x566   :  { %6137 = vmatpush1.bf16.msra.mxu1 %v15101_v7  ;;  %v12526_v7 = vcombine.low %v3860_v51, %v3860_v51  ;;  %v15215_v51 = vld [vmem:[%s21739_s22 + $0xaa4] ss:$16 sps:$4 sm:$0xff]  }
 0x567   :  { %6326 = vmatpush1.bf16.msra.mxu0 %v15104_v62  ;;  %6138 = vmatprep.subr.bf16.mxu1 %v15109_v4  ;;  %v6038_v62 = vsel %vm21770_vm5, %v12524_v26, 0  ;;  %v15167_v4 = vld [vmem:[%s21739_s22 + $0x9a4] ss:$16 sps:$4 sm:$0xff]   ;;  %vm21785_vm5 = vmmov %vm21779_vm3 }
 0x568   :  { %6327 = vmatprep.subr.bf16.mxu0 %v15112_v55  ;;  %v6044_v55 = vsel %vm21772_vm2, %v12526_v7, 0  ;;  %v15221_v26 = vld [vmem:[%s21739_s22 + $0xac4] ss:$16 sps:$4 sm:$0xff]   ;;  %v15219_v7 = vld [vmem:[%s21739_s22 + $0xac0] ss:$16 sps:$4 sm:$0xff]  }
 0x56a   :  { %6139 = vmatpush1.bf16.msra.mxu1 %v15107_v33  ;;  %v3666_v33 = vld [vmem:[#allocation3 + $0x20] sm:$0xff] }
 0x56b   :  { %6328 = vmatpush1.bf16.msra.mxu0 %v15110_v3  ;;  %6140 = vmatprep.subr.bf16.mxu1 %v15115_v5  ;;  %v15170_v3 = vld [vmem:[%s21739_s22 + $0x9ac] ss:$16 sps:$4 sm:$0xff]   ;;  %v15165_v5 = vld [vmem:[%s21739_s22 + $0x9a0] ss:$16 sps:$4 sm:$0xff]  }
 0x56c   :  { %6329 = vmatprep.subr.bf16.mxu0 %v15118_v8  ;;  %v3696_v8 = vpack.c.bf16 %v18255_v37, %v3666_v33  ;;  %v15171_v37 = vld [vmem:[%s21739_s22 + $0x9c0] ss:$16 sps:$4 sm:$0xff]  }
 0x56d   :  { %v15225_v33 = vld [vmem:[%s21739_s22 + $0xae0] ss:$16 sps:$4 sm:$0xff]  }
 0x56e   :  { %6141 = vmatpush1.bf16.msra.mxu1 %v15113_v24  ;;  %v15168_v24 = vld [vmem:[%s21739_s22 + $0x9a8] ss:$16 sps:$4 sm:$0xff]  }
 0x56f   :  { %6330 = vmatpush1.bf16.msra.mxu0 %v15116_v38  ;;  %6142 = vmatprep.subr.bf16.mxu1 %v15121_v56  ;;  %v15173_v38 = vld [vmem:[%s21739_s22 + $0x9c4] ss:$16 sps:$4 sm:$0xff]   ;;  %v15176_v56 = vld [vmem:[%s21739_s22 + $0x9cc] ss:$16 sps:$4 sm:$0xff]  }
 0x570   :  { %6331 = vmatprep.subr.bf16.mxu0 %v15124_v63  ;;  %v15174_v63 = vld [vmem:[%s21739_s22 + $0x9c8] ss:$16 sps:$4 sm:$0xff]  }
 0x572   :  { %6143 = vmatpush1.bf16.msra.mxu1 %v15119_v50  ;;  %v15179_v50 = vld [vmem:[%s21739_s22 + $0x9e4] ss:$16 sps:$4 sm:$0xff]  }
 0x573   :  { %6332 = vmatpush1.bf16.msra.mxu0 %v15122_v54  ;;  %6175 = vmatprep.subr.bf16.mxu1 %v15127_v34  ;;  %v15182_v54 = vld [vmem:[%s21739_s22 + $0x9ec] ss:$16 sps:$4 sm:$0xff]   ;;  %v15177_v34 = vld [vmem:[%s21739_s22 + $0x9e0] ss:$16 sps:$4 sm:$0xff]  }
 0x574   :  { %6364 = vmatprep.subr.bf16.mxu0 %v15130_v11  ;;  %v15185_v11 = vld [vmem:[%s21739_s22 + $0xa04] ss:$16 sps:$4 sm:$0xff]  }
 0x575   :  { %6145 = vmatmul.mubr.bf16.vlgmr.msra.gmra.mrb[28].mxu1 %v3694_v53 }
 0x576   :  { %6334 = vmatmul.mubr.bf16.vlgmr.msra.gmra.mrb[36].mxu0 %v3694_v53  ;;  %6154 = vmatprep.mubr.bf16.mxu1 %v18051_v44  ;;  %v15188_v53 = vld [vmem:[%s21739_s22 + $0xa0c] ss:$16 sps:$4 sm:$0xff]  }
 0x577   :  { %6176 = vmatpush1.bf16.msra.mxu1 %v15125_v43  ;;  %6343 = vmatprep.mubr.bf16.mxu0 %v18051_v44  ;;  %v15183_v43 = vld [vmem:[%s21739_s22 + $0xa00] ss:$16 sps:$4 sm:$0xff]  }
 0x578   :  { %6365 = vmatpush1.bf16.msra.mxu0 %v15128_v29  ;;  %6177 = vmatprep.subr.bf16.mxu1 %v15133_v35  ;;  %v15186_v29 = vld [vmem:[%s21739_s22 + $0xa08] ss:$16 sps:$4 sm:$0xff]   ;;  %v15191_v35 = vld [vmem:[%s21739_s22 + $0xa24] ss:$16 sps:$4 sm:$0xff]  }
 0x579   :  { %6366 = vmatprep.subr.bf16.mxu0 %v15136_v20  ;;  %v6428_v20 = vld [vmem:[#allocation3 + $0x8] sm:$0xf0] }
 0x57b   :  { %6178 = vmatpush1.bf16.msra.mxu1 %v15131_v41  ;;  %v15194_v41 = vld [vmem:[%s21739_s22 + $0xa2c] ss:$16 sps:$4 sm:$0xff]  }
 0x57c   :  { %6367 = vmatpush1.bf16.msra.mxu0 %v15134_v28  ;;  %6179 = vmatprep.subr.bf16.mxu1 %v15139_v36  ;;  %v15573_v28 = vld [vmem:[#allocation3 + $0x30] sm:$0xff] }
 0x57d   :  { %6155 = vmatmul.mubr.bf16.gmra.mrb[32].mxu1 %v18140_v32  ;;  %6368 = vmatprep.subr.bf16.mxu0 %v15142_v39  ;;  %v6438_v36 = vpack.c.bf16 %v15573_v28, %v6428_v20  ;;  %v3691_v39 = vld [vmem:[#allocation3 + $0xe8] sm:$0xf]  ;;  %v15260_v28 = vld [vmem:[%s21739_s22 + $0xb8c] ss:$16 sps:$4 sm:$0xff]  }
 0x57e   :  { %6344 = vmatmul.mubr.bf16.gmra.mrb[40].mxu0 %v18140_v32  ;;  %6164 = vmatprep.mubr.bf16.mxu1 %v3705_v22  ;;  %v15252_v20 = vld [vmem:[%s21739_s22 + $0xb68] ss:$16 sps:$4 sm:$0xff]  }
 0x57f   :  { %6180 = vmatpush1.bf16.msra.mxu1 %v15137_v30  ;;  %6353 = vmatprep.mubr.bf16.mxu0 %v3705_v22  ;;  %v6617_v30 = vrot.slane %v17774_v12, 2  ;;  %v15192_v22 = vld [vmem:[%s21739_s22 + $0xa28] ss:$16 sps:$4 sm:$0xff]  }
 0x580   :  { %6369 = vmatpush1.bf16.msra.mxu0 %v15140_v9  ;;  %6181 = vmatprep.subr.bf16.mxu1 %v15145_v45  ;;  %v3706_v9 = vpack.c.bf16 %v3691_v39, %v18269_v19  ;;  %v6616_v45 = vrot.slane %v6438_v36, 2  ;;  %v6427_v36 = vld [vmem:[#allocation3] sm:$0xf0]  ;;  %v15270_v12 = vld [vmem:[%s21739_s22 + $0xbc8] ss:$16 sps:$4 sm:$0xff]  }
 0x581   :  { %6370 = vmatprep.subr.bf16.mxu0 %v15148_v47  ;;  %v15197_v47 = vld [vmem:[%s21739_s22 + $0xa44] ss:$16 sps:$4 sm:$0xff]  }
 0x582   :  { %v6618_v19 = vsel %vm21773_vm9, %v6616_v45, %v6617_v30  ;;  %v15263_v45 = vld [vmem:[%s21739_s22 + $0xba4] ss:$16 sps:$4 sm:$0xff]   ;;  %vm7939_vm9 = vcmask 392192  }
 0x583   :  { %6182 = vmatpush1.bf16.msra.mxu1 %v15143_v40  ;;  %v15200_v40 = vld [vmem:[%s21739_s22 + $0xa4c] ss:$16 sps:$4 sm:$0xff]  }
 0x584   :  { %6371 = vmatpush1.bf16.msra.mxu0 %v15146_v2  ;;  %6183 = vmatprep.subr.bf16.mxu1 %v15151_v59  ;;  %v15195_v2 = vld [vmem:[%s21739_s22 + $0xa40] ss:$16 sps:$4 sm:$0xff]   ;;  %v15203_v59 = vld [vmem:[%s21739_s22 + $0xa64] ss:$16 sps:$4 sm:$0xff]  }
 0x585   :  { %6165 = vmatmul.mubr.bf16.gmra.mrb[36].mxu1 %v3704_v57  ;;  %6372 = vmatprep.subr.bf16.mxu0 %v15154_v1  ;;  %v15206_v1 = vld [vmem:[%s21739_s22 + $0xa6c] ss:$16 sps:$4 sm:$0xff]  }
 0x586   :  { %6354 = vmatmul.mubr.bf16.gmra.mrb[44].mxu0 %v3704_v57  ;;  %6207 = vmatprep.mubr.bf16.mxu1 %v21740_v42  ;;  %v15201_v57 = vld [vmem:[%s21739_s22 + $0xa60] ss:$16 sps:$4 sm:$0xff]  }
 0x587   :  { %6184 = vmatpush1.bf16.msra.mxu1 %v15149_v18  ;;  %6396 = vmatprep.mubr.bf16.mxu0 %v21740_v42  ;;  %v15204_v18 = vld [vmem:[%s21739_s22 + $0xa68] ss:$16 sps:$4 sm:$0xff]  }
 0x588   :  { %6373 = vmatpush1.bf16.msra.mxu0 %v15152_v23  ;;  %6185 = vmatprep.subr.bf16.mxu1 %v15157_v46  ;;  %v15209_v23 = vld [vmem:[%s21739_s22 + $0xa84] ss:$16 sps:$4 sm:$0xff]   ;;  %v15212_v46 = vld [vmem:[%s21739_s22 + $0xa8c] ss:$16 sps:$4 sm:$0xff]  }
 0x589   :  { %6374 = vmatprep.subr.bf16.mxu0 %v15160_v58  ;;  %v15207_v58 = vld [vmem:[%s21739_s22 + $0xa80] ss:$16 sps:$4 sm:$0xff]  }
 0x58b   :  { %6186 = vmatpush1.bf16.msra.mxu1 %v15155_v14  ;;  %v15218_v14 = vld [vmem:[%s21739_s22 + $0xaac] ss:$16 sps:$4 sm:$0xff]  }
 0x58c   :  { %6375 = vmatpush1.bf16.msra.mxu0 %v15158_v6  ;;  %12528 = vmatprep.subr.msk.bf16.mxu1 %vm21769_vm0, %v12525_v0  ;;  %v15213_v6 = vld [vmem:[%s21739_s22 + $0xaa0] ss:$16 sps:$4 sm:$0xff]   ;;  %v15216_v0 = vld [vmem:[%s21739_s22 + $0xaa8] ss:$16 sps:$4 sm:$0xff]  }
 0x58d   :  { %12532 = vmatprep.subr.msk.bf16.mxu0 %vm21771_vm7, %v12527_v52  ;;  %v15224_v52 = vld [vmem:[%s21739_s22 + $0xacc] ss:$16 sps:$4 sm:$0xff]   ;;  %vm21786_vm7 = vmmov %vm21779_vm3 }
 0x58f   :  { %6188 = vmatpush1.bf16.msra.mxu1 %v6038_v62  ;;  %v15222_v62 = vld [vmem:[%s21739_s22 + $0xac8] ss:$16 sps:$4 sm:$0xff]  }
 0x590   :  { %6377 = vmatpush1.bf16.msra.mxu0 %v6044_v55  ;;  %7441 = vmatprep.subr.bf16.mxu1 %v15167_v4  ;;  %v15227_v4 = vld [vmem:[%s21739_s22 + $0xae4] ss:$16 sps:$4 sm:$0xff]   ;;  %v15230_v55 = vld [vmem:[%s21739_s22 + $0xaec] ss:$16 sps:$4 sm:$0xff]  }
 0x591   :  { %7630 = vmatprep.subr.bf16.mxu0 %v15170_v3  ;;  %v15228_v3 = vld [vmem:[%s21739_s22 + $0xae8] ss:$16 sps:$4 sm:$0xff]  }
 0x592   :  { %12529 = vmatmul.mubr.msk.bf16.vlgmr.msra.gmra.mrb[28].mxu1 %vm1327_vm1, %v3696_v8 }
 0x593   :  { %12533 = vmatmul.mubr.msk.bf16.vlgmr.msra.gmra.mrb[36].mxu0 %vm1327_vm1, %v3696_v8  ;;  %7442 = vmatpush1.bf16.msra.mxu1 %v15165_v5  ;;  %v15233_v5 = vld [vmem:[%s21739_s22 + $0xb04] ss:$16 sps:$4 sm:$0xff]   ;;  %v15236_v8 = vld [vmem:[%s21739_s22 + $0xb0c] ss:$16 sps:$4 sm:$0xff]  }
 0x594   :  { %7631 = vmatpush1.bf16.msra.mxu0 %v15168_v24  ;;  %7443 = vmatprep.subr.bf16.mxu1 %v15173_v38  ;;  %v15231_v24 = vld [vmem:[%s21739_s22 + $0xb00] ss:$16 sps:$4 sm:$0xff]   ;;  %v15234_v38 = vld [vmem:[%s21739_s22 + $0xb08] ss:$16 sps:$4 sm:$0xff]  }
 0x595   :  { %7632 = vmatprep.subr.bf16.mxu0 %v15176_v56  ;;  %6217 = vmatprep.mubr.bf16.mxu1 %v21740_v42  ;;  %v15239_v56 = vld [vmem:[%s21739_s22 + $0xb24] ss:$16 sps:$4 sm:$0xff]  }
 0x596   :  { %6406 = vmatprep.mubr.bf16.mxu0 %v21740_v42 }
 0x597   :  { %7444 = vmatpush1.bf16.msra.mxu1 %v15171_v37  ;;  %v15242_v37 = vld [vmem:[%s21739_s22 + $0xb2c] ss:$16 sps:$4 sm:$0xff]  }
 0x598   :  { %7633 = vmatpush1.bf16.msra.mxu0 %v15174_v63  ;;  %7445 = vmatprep.subr.bf16.mxu1 %v15179_v50  ;;  %v15237_v63 = vld [vmem:[%s21739_s22 + $0xb20] ss:$16 sps:$4 sm:$0xff]   ;;  %v15240_v50 = vld [vmem:[%s21739_s22 + $0xb28] ss:$16 sps:$4 sm:$0xff]  }
 0x599   :  { %7634 = vmatprep.subr.bf16.mxu0 %v15182_v54  ;;  %v15245_v54 = vld [vmem:[%s21739_s22 + $0xb44] ss:$16 sps:$4 sm:$0xff]  }
 0x59a   :  { %12530 = vmatmul.mubr.msk.bf16.gmra.mrb[32].mxu1 %vm1327_vm1, %v18253_v31 }
 0x59b   :  { %12534 = vmatmul.mubr.msk.bf16.gmra.mrb[40].mxu0 %vm1327_vm1, %v18253_v31  ;;  %7446 = vmatpush1.bf16.msra.mxu1 %v15177_v34  ;;  %v15248_v34 = vld [vmem:[%s21739_s22 + $0xb4c] ss:$16 sps:$4 sm:$0xff]  }
 0x59c   :  { %7635 = vmatpush1.bf16.msra.mxu0 %v15180_v61  ;;  %7447 = vmatprep.subr.bf16.mxu1 %v15185_v11  ;;  %v15243_v61 = vld [vmem:[%s21739_s22 + $0xb40] ss:$16 sps:$4 sm:$0xff]   ;;  %v15246_v11 = vld [vmem:[%s21739_s22 + $0xb48] ss:$16 sps:$4 sm:$0xff]  }
 0x59d   :  { %7636 = vmatprep.subr.bf16.mxu0 %v15188_v53  ;;  %6227 = vmatprep.mubr.bf16.mxu1 %v21740_v42  ;;  %v15251_v53 = vld [vmem:[%s21739_s22 + $0xb64] ss:$16 sps:$4 sm:$0xff]  }
 0x59e   :  { %6416 = vmatprep.mubr.bf16.mxu0 %v21740_v42 }
 0x59f   :  { %7448 = vmatpush1.bf16.msra.mxu1 %v15183_v43  ;;  %v15254_v43 = vld [vmem:[%s21739_s22 + $0xb6c] ss:$16 sps:$4 sm:$0xff]  }
 0x5a0   :  { %7637 = vmatpush1.bf16.msra.mxu0 %v15186_v29  ;;  %7449 = vmatprep.subr.bf16.mxu1 %v15191_v35  ;;  %v15249_v29 = vld [vmem:[%s21739_s22 + $0xb60] ss:$16 sps:$4 sm:$0xff]  }
 0x5a1   :  { %7638 = vmatprep.subr.bf16.mxu0 %v15194_v41  ;;  %v6433_v35 = vld [vmem:[#allocation3 + $0xd0] sm:$0xff] }
 0x5a2   :  { %12531 = vmatmul.mubr.msk.bf16.gmra.mrb[36].mxu1 %vm1327_vm1, %v3706_v9  ;;  %v15257_v41 = vld [vmem:[%s21739_s22 + $0xb84] ss:$16 sps:$4 sm:$0xff]   ;;  %v6443_v39 = vpack.c.bf16 %v6433_v35, %v18512_v10  ;;  %v6614_v10 = vrot.slane %v17784_v17, 2  ;;  %v15264_v17 = vld [vmem:[%s21739_s22 + $0xba8] ss:$16 sps:$4 sm:$0xff]  }
 0x5a3   :  { %12535 = vmatmul.mubr.msk.bf16.gmra.mrb[44].mxu0 %vm1327_vm1, %v3706_v9  ;;  %7450 = vmatpush1.bf16.msra.mxu1 %v15189_v21  ;;  %v15255_v21 = vld [vmem:[%s21739_s22 + $0xb80] ss:$16 sps:$4 sm:$0xff]   ;;  %v6437_v9 = vpack.c.bf16 %v18477_v60, %v6427_v36  ;;  %v15311_v35 = vld [vmem:[%s21739_s22 + $0xca4] ss:$16 sps:$4 sm:$0xff]  }
 0x5a4   :  { %7473 = vmatprep.mubr.bf16.mxu1 %v6618_v19  ;;  %7639 = vmatpush1.bf16.msra.mxu0 %v15192_v22  ;;  %v15258_v22 = vld [vmem:[%s21739_s22 + $0xb88] ss:$16 sps:$4 sm:$0xff]   ;;  %v15317_v36 = vld [vmem:[%s21739_s22 + $0xcc4] ss:$16 sps:$4 sm:$0xff]  }
 0x5a5   :  { %7662 = vmatprep.mubr.bf16.mxu0 %v6618_v19  ;;  %7451 = vmatprep.subr.bf16.mxu1 %v15197_v47  ;;  %v15266_v47 = vld [vmem:[%s21739_s22 + $0xbac] ss:$16 sps:$4 sm:$0xff]   ;;  %v6613_v60 = vrot.slane %v6437_v9, 2  ;;  %v15318_v9 = vld [vmem:[%s21739_s22 + $0xcc8] ss:$16 sps:$4 sm:$0xff]  }
 0x5a6   :  { %7640 = vmatprep.subr.bf16.mxu0 %v15200_v40  ;;  %v6630_v40 = vrot.slane %v6443_v39, 2  ;;  %v6432_v19 = vld [vmem:[#allocation3 + $0xc8] sm:$0xff] }
 0x5a7   :  { %7452 = vmatpush1.bf16.msra.mxu1 %v15195_v2  ;;  %v15261_v2 = vld [vmem:[%s21739_s22 + $0xba0] ss:$16 sps:$4 sm:$0xff]   ;;  %v15320_v39 = vld [vmem:[%s21739_s22 + $0xccc] ss:$16 sps:$4 sm:$0xff]  }
 0x5a8   :  { %7641 = vmatpush1.bf16.msra.mxu0 %v15198_v25  ;;  %7453 = vmatprep.subr.bf16.mxu1 %v15203_v59  ;;  %v6615_v25 = vsel %vm21774_vm10, %v6613_v60, %v6614_v10  ;;  %v15269_v59 = vld [vmem:[%s21739_s22 + $0xbc4] ss:$16 sps:$4 sm:$0xff]   ;;  %v15327_v60 = vld [vmem:[%s21739_s22 + $0xd00] ss:$16 sps:$4 sm:$0xff]  }
 0x5a9   :  { %7642 = vmatprep.subr.bf16.mxu0 %v15206_v1  ;;  %v6442_v1 = vpack.c.bf16 %v6432_v19, %v18535_v49  ;;  %v15332_v19 = vld [vmem:[%s21739_s22 + $0xd0c] ss:$16 sps:$4 sm:$0xff]  }
 0x5ab   :  { %7454 = vmatpush1.bf16.msra.mxu1 %v15201_v57  ;;  %v6631_v57 = vsel %vm21775_vm11, %v6617_v30, %v6630_v40  ;;  %v6628_v49 = vrot.slane %v6442_v1, 2  ;;  %v15275_v30 = vld [vmem:[%s21739_s22 + $0xbe4] ss:$16 sps:$4 sm:$0xff]   ;;  %v15336_v1 = vld [vmem:[%s21739_s22 + $0xd28] ss:$16 sps:$4 sm:$0xff]  }
 0x5ac   :  { %7643 = vmatpush1.bf16.msra.mxu0 %v15204_v18  ;;  %7455 = vmatprep.subr.bf16.mxu1 %v15209_v23  ;;  %v15272_v18 = vld [vmem:[%s21739_s22 + $0xbcc] ss:$16 sps:$4 sm:$0xff]   ;;  %v15267_v23 = vld [vmem:[%s21739_s22 + $0xbc0] ss:$16 sps:$4 sm:$0xff]  }
 0x5ad   :  { %7644 = vmatprep.subr.bf16.mxu0 %v15212_v46  ;;  %v15278_v46 = vld [vmem:[%s21739_s22 + $0xbec] ss:$16 sps:$4 sm:$0xff]  }
 0x5af   :  { %7456 = vmatpush1.bf16.msra.mxu1 %v15207_v58  ;;  %v15273_v58 = vld [vmem:[%s21739_s22 + $0xbe0] ss:$16 sps:$4 sm:$0xff]  }
 0x5b0   :  { %7645 = vmatpush1.bf16.msra.mxu0 %v15210_v27  ;;  %7457 = vmatprep.subr.bf16.mxu1 %v15215_v51  ;;  %v6629_v27 = vsel %vm21776_vm12, %v6614_v10, %v6628_v49  ;;  %v15276_v51 = vld [vmem:[%s21739_s22 + $0xbe8] ss:$16 sps:$4 sm:$0xff]   ;;  %v15321_v10 = vld [vmem:[%s21739_s22 + $0xce0] ss:$16 sps:$4 sm:$0xff]  }
 0x5b1   :  { %7646 = vmatprep.subr.bf16.mxu0 %v15218_v14  ;;  %v15281_v14 = vld [vmem:[%s21739_s22 + $0xc04] ss:$16 sps:$4 sm:$0xff]  }
 0x5b3   :  { %7458 = vmatpush1.bf16.msra.mxu1 %v15213_v6  ;;  %v6430_v6 = vld [vmem:[#allocation3 + $0x18] sm:$0xf0] }
 0x5b4   :  { %7647 = vmatpush1.bf16.msra.mxu0 %v15216_v0  ;;  %7459 = vmatprep.subr.bf16.mxu1 %v15221_v26  ;;  %v15284_v0 = vld [vmem:[%s21739_s22 + $0xc0c] ss:$16 sps:$4 sm:$0xff]   ;;  %v15279_v26 = vld [vmem:[%s21739_s22 + $0xc00] ss:$16 sps:$4 sm:$0xff]  }
 0x5b5   :  { %7648 = vmatprep.subr.bf16.mxu0 %v15224_v52  ;;  %v15574_v52 = vld [vmem:[#allocation3 + $0x40] sm:$0xff] }
 0x5b7   :  { %7460 = vmatpush1.bf16.msra.mxu1 %v15219_v7  ;;  %v6440_v7 = vpack.c.bf16 %v15574_v52, %v6430_v6  ;;  %v15356_v6 = vld [vmem:[%s21739_s22 + $0xd8c] ss:$16 sps:$4 sm:$0xff]   ;;  %v15351_v52 = vld [vmem:[%s21739_s22 + $0xd80] ss:$16 sps:$4 sm:$0xff]  }
 0x5b8   :  { %7649 = vmatpush1.bf16.msra.mxu0 %v15222_v62  ;;  %7461 = vmatprep.subr.bf16.mxu1 %v15227_v4  ;;  %v15282_v62 = vld [vmem:[%s21739_s22 + $0xc08] ss:$16 sps:$4 sm:$0xff]   ;;  %v15287_v4 = vld [vmem:[%s21739_s22 + $0xc24] ss:$16 sps:$4 sm:$0xff]  }
 0x5b9   :  { %7650 = vmatprep.subr.bf16.mxu0 %v15230_v55  ;;  %v15290_v55 = vld [vmem:[%s21739_s22 + $0xc2c] ss:$16 sps:$4 sm:$0xff]  }
 0x5bb   :  { %7462 = vmatpush1.bf16.msra.mxu1 %v15225_v33  ;;  %v6623_v33 = vrot.slane %v18051_v44, 2  ;;  %v15366_v44 = vld [vmem:[%s21739_s22 + $0xdc8] ss:$16 sps:$4 sm:$0xff]  }
 0x5bc   :  { %7651 = vmatpush1.bf16.msra.mxu0 %v15228_v3  ;;  %7463 = vmatprep.subr.bf16.mxu1 %v15233_v5  ;;  %v15285_v3 = vld [vmem:[%s21739_s22 + $0xc20] ss:$16 sps:$4 sm:$0xff]   ;;  %v6622_v5 = vrot.slane %v6440_v7, 2 }
 0x5bd   :  { %7652 = vmatprep.subr.bf16.mxu0 %v15236_v8  ;;  %v15288_v8 = vld [vmem:[%s21739_s22 + $0xc28] ss:$16 sps:$4 sm:$0xff]  }
 0x5bf   :  { %7464 = vmatpush1.bf16.msra.mxu1 %v15231_v24  ;;  %v15293_v24 = vld [vmem:[%s21739_s22 + $0xc44] ss:$16 sps:$4 sm:$0xff]  }
 0x5c0   :  { %7653 = vmatpush1.bf16.msra.mxu0 %v15234_v38  ;;  %7465 = vmatprep.subr.bf16.mxu1 %v15239_v56  ;;  %v6624_v38 = vsel %vm21777_vm13, %v6622_v5, %v6623_v33  ;;  %v15296_v56 = vld [vmem:[%s21739_s22 + $0xc4c] ss:$16 sps:$4 sm:$0xff]  }
 0x5c1   :  { %7654 = vmatprep.subr.bf16.mxu0 %v15242_v37  ;;  %v15291_v37 = vld [vmem:[%s21739_s22 + $0xc40] ss:$16 sps:$4 sm:$0xff]  }
 0x5c3   :  { %7466 = vmatpush1.bf16.msra.mxu1 %v15237_v63  ;;  %v15294_v63 = vld [vmem:[%s21739_s22 + $0xc48] ss:$16 sps:$4 sm:$0xff]  }
 0x5c4   :  { %7655 = vmatpush1.bf16.msra.mxu0 %v15240_v50  ;;  %7467 = vmatprep.subr.bf16.mxu1 %v15245_v54  ;;  %v15299_v50 = vld [vmem:[%s21739_s22 + $0xc64] ss:$16 sps:$4 sm:$0xff]   ;;  %v15302_v54 = vld [vmem:[%s21739_s22 + $0xc6c] ss:$16 sps:$4 sm:$0xff]  }
 0x5c5   :  { %7656 = vmatprep.subr.bf16.mxu0 %v15248_v34  ;;  %v15297_v34 = vld [vmem:[%s21739_s22 + $0xc60] ss:$16 sps:$4 sm:$0xff]  }
 0x5c7   :  { %7468 = vmatpush1.bf16.msra.mxu1 %v15243_v61  ;;  %v15300_v61 = vld [vmem:[%s21739_s22 + $0xc68] ss:$16 sps:$4 sm:$0xff]  }
 0x5c8   :  { %7657 = vmatpush1.bf16.msra.mxu0 %v15246_v11  ;;  %7469 = vmatprep.subr.bf16.mxu1 %v15251_v53  ;;  %v15305_v11 = vld [vmem:[%s21739_s22 + $0xc84] ss:$16 sps:$4 sm:$0xff]   ;;  %v15308_v53 = vld [vmem:[%s21739_s22 + $0xc8c] ss:$16 sps:$4 sm:$0xff]  }
 0x5c9   :  { %7658 = vmatprep.subr.bf16.mxu0 %v15254_v43  ;;  %v15303_v43 = vld [vmem:[%s21739_s22 + $0xc80] ss:$16 sps:$4 sm:$0xff]  }
 0x5cb   :  { %7470 = vmatpush1.bf16.msra.mxu1 %v15249_v29  ;;  %v15306_v29 = vld [vmem:[%s21739_s22 + $0xc88] ss:$16 sps:$4 sm:$0xff]  }
 0x5cc   :  { %7659 = vmatpush1.bf16.msra.mxu0 %v15252_v20  ;;  %7471 = vmatprep.subr.bf16.mxu1 %v15257_v41  ;;  %v15314_v20 = vld [vmem:[%s21739_s22 + $0xcac] ss:$16 sps:$4 sm:$0xff]   ;;  %v15309_v41 = vld [vmem:[%s21739_s22 + $0xca0] ss:$16 sps:$4 sm:$0xff]  }
 0x5cd   :  { %7660 = vmatprep.subr.bf16.mxu0 %v15260_v28  ;;  %v15312_v28 = vld [vmem:[%s21739_s22 + $0xca8] ss:$16 sps:$4 sm:$0xff]  }
 0x5cf   :  { %7472 = vmatpush1.bf16.msra.mxu1 %v15255_v21  ;;  %v15315_v21 = vld [vmem:[%s21739_s22 + $0xcc0] ss:$16 sps:$4 sm:$0xff]  }
 0x5d0   :  { %7661 = vmatpush1.bf16.msra.mxu0 %v15258_v22  ;;  %7504 = vmatprep.subr.bf16.mxu1 %v15263_v45  ;;  %v15323_v22 = vld [vmem:[%s21739_s22 + $0xce4] ss:$16 sps:$4 sm:$0xff]   ;;  %v15326_v45 = vld [vmem:[%s21739_s22 + $0xcec] ss:$16 sps:$4 sm:$0xff]  }
 0x5d1   :  { %7693 = vmatprep.subr.bf16.mxu0 %v15266_v47  ;;  %v15324_v47 = vld [vmem:[%s21739_s22 + $0xce8] ss:$16 sps:$4 sm:$0xff]  }
 0x5d2   :  { %7474 = vmatmul.mubr.bf16.vlgmr.msra.gmra.mrb[28].mxu1 %v6615_v25 }
 0x5d3   :  { %7663 = vmatmul.mubr.bf16.vlgmr.msra.gmra.mrb[36].mxu0 %v6615_v25  ;;  %7483 = vmatprep.mubr.bf16.mxu1 %v6631_v57  ;;  %v15335_v25 = vld [vmem:[%s21739_s22 + $0xd24] ss:$16 sps:$4 sm:$0xff]  }
 0x5d4   :  { %7505 = vmatpush1.bf16.msra.mxu1 %v15261_v2  ;;  %7672 = vmatprep.mubr.bf16.mxu0 %v6631_v57  ;;  %v15330_v2 = vld [vmem:[%s21739_s22 + $0xd08] ss:$16 sps:$4 sm:$0xff]   ;;  %v15341_v57 = vld [vmem:[%s21739_s22 + $0xd44] ss:$16 sps:$4 sm:$0xff]  }
 0x5d5   :  { %7694 = vmatpush1.bf16.msra.mxu0 %v15264_v17  ;;  %7506 = vmatprep.subr.bf16.mxu1 %v15269_v59  ;;  %v15338_v17 = vld [vmem:[%s21739_s22 + $0xd2c] ss:$16 sps:$4 sm:$0xff]   ;;  %v15333_v59 = vld [vmem:[%s21739_s22 + $0xd20] ss:$16 sps:$4 sm:$0xff]  }
 0x5d6   :  { %7695 = vmatprep.subr.bf16.mxu0 %v15272_v18  ;;  %v15344_v18 = vld [vmem:[%s21739_s22 + $0xd4c] ss:$16 sps:$4 sm:$0xff]  }
 0x5d8   :  { %7507 = vmatpush1.bf16.msra.mxu1 %v15267_v23  ;;  %v15339_v23 = vld [vmem:[%s21739_s22 + $0xd40] ss:$16 sps:$4 sm:$0xff]  }
 0x5d9   :  { %7696 = vmatpush1.bf16.msra.mxu0 %v15270_v12  ;;  %7508 = vmatprep.subr.bf16.mxu1 %v15275_v30  ;;  %v15342_v12 = vld [vmem:[%s21739_s22 + $0xd48] ss:$16 sps:$4 sm:$0xff]   ;;  %v15350_v30 = vld [vmem:[%s21739_s22 + $0xd6c] ss:$16 sps:$4 sm:$0xff]  }
 0x5da   :  { %7484 = vmatmul.mubr.bf16.gmra.mrb[32].mxu1 %v6629_v27  ;;  %7697 = vmatprep.subr.bf16.mxu0 %v15278_v46  ;;  %v15345_v46 = vld [vmem:[%s21739_s22 + $0xd60] ss:$16 sps:$4 sm:$0xff]  }
 0x5db   :  { %7673 = vmatmul.mubr.bf16.gmra.mrb[40].mxu0 %v6629_v27  ;;  %7493 = vmatprep.mubr.bf16.mxu1 %v6630_v40  ;;  %v15348_v27 = vld [vmem:[%s21739_s22 + $0xd68] ss:$16 sps:$4 sm:$0xff]  }
 0x5dc   :  { %7509 = vmatpush1.bf16.msra.mxu1 %v15273_v58  ;;  %7682 = vmatprep.mubr.bf16.mxu0 %v6630_v40  ;;  %v15329_v40 = vld [vmem:[%s21739_s22 + $0xd04] ss:$16 sps:$4 sm:$0xff]  }
 0x5dd   :  { %7698 = vmatpush1.bf16.msra.mxu0 %v15276_v51  ;;  %7510 = vmatprep.subr.bf16.mxu1 %v15281_v14  ;;  %v6435_v58 = vld [vmem:[#allocation3 + $0xe0] sm:$0xff]  ;;  %v6429_v14 = vld [vmem:[#allocation3 + $0x10] sm:$0xf0] }
 0x5de   :  { %7699 = vmatprep.subr.bf16.mxu0 %v15284_v0  ;;  %v15353_v51 = vld [vmem:[%s21739_s22 + $0xd84] ss:$16 sps:$4 sm:$0xff]   ;;  %v15575_v0 = vld [vmem:[#allocation3 + $0xb8] sm:$0xff]  ;;  %v6439_v7 = vpack.c.bf16 %v18683_v16, %v6429_v14 }
 0x5df   :  { %v15578_v14 = vld [vmem:[#allocation3 + $0xc0] sm:$0xff] }
 0x5e0   :  { %7511 = vmatpush1.bf16.msra.mxu1 %v15279_v26  ;;  %v6445_v26 = vpack.c.bf16 %v6435_v58, %v15575_v0  ;;  %v6619_v16 = vrot.slane %v6439_v7, 2  ;;  %v6436_v58 = vld [vmem:[#allocation3 + $0xe8] sm:$0xff] }
 0x5e1   :  { %7700 = vmatpush1.bf16.msra.mxu0 %v15282_v62  ;;  %7512 = vmatprep.subr.bf16.mxu1 %v15287_v4  ;;  %v15354_v62 = vld [vmem:[%s21739_s22 + $0xd88] ss:$16 sps:$4 sm:$0xff]   ;;  %v15359_v4 = vld [vmem:[%s21739_s22 + $0xda4] ss:$16 sps:$4 sm:$0xff]  }
 0x5e2   :  { %7494 = vmatmul.mubr.bf16.gmra.mrb[36].mxu1 %v6628_v49  ;;  %7701 = vmatprep.subr.bf16.mxu0 %v15290_v55  ;;  %v6620_v55 = vrot.slane %v18140_v32, 2  ;;  %v6634_v5 = vrot.slane %v6445_v26, 2  ;;  %v15360_v32 = vld [vmem:[%s21739_s22 + $0xda8] ss:$16 sps:$4 sm:$0xff]  }
 0x5e3   :  { %7683 = vmatmul.mubr.bf16.gmra.mrb[44].mxu0 %v6628_v49  ;;  %7536 = vmatprep.mubr.bf16.mxu1 %v6624_v38  ;;  %v15347_v49 = vld [vmem:[%s21739_s22 + $0xd64] ss:$16 sps:$4 sm:$0xff]   ;;  %v8070_v0 = vld [vmem:[%s21784_s11 + $0x118] sm:$0xff] }
 0x5e4   :  { %7513 = vmatpush1.bf16.msra.mxu1 %v15285_v3  ;;  %7725 = vmatprep.mubr.bf16.mxu0 %v6624_v38  ;;  %v15362_v3 = vld [vmem:[%s21739_s22 + $0xdac] ss:$16 sps:$4 sm:$0xff]   ;;  %v6621_v38 = vsel %vm21778_vm14, %v6619_v16, %v6620_v55  ;;  %vm7949_vm14 = vcmask 388096  }
 0x5e5   :  { %7702 = vmatpush1.bf16.msra.mxu0 %v15288_v8  ;;  %7514 = vmatprep.subr.bf16.mxu1 %v15293_v24  ;;  %v6434_v8 = vld [vmem:[#allocation3 + $0xd8] sm:$0xff]  ;;  %v15357_v24 = vld [vmem:[%s21739_s22 + $0xda0] ss:$16 sps:$4 sm:$0xff]  }
 0x5e6   :  { %7703 = vmatprep.subr.bf16.mxu0 %v15296_v56  ;;  %v15365_v56 = vld [vmem:[%s21739_s22 + $0xdc4] ss:$16 sps:$4 sm:$0xff]  }
 0x5e8   :  { %7515 = vmatpush1.bf16.msra.mxu1 %v15291_v37  ;;  %v15576_v37 = vld [vmem:[#allocation3 + $0xb0] sm:$0xff] }
 0x5e9   :  { %7704 = vmatpush1.bf16.msra.mxu0 %v15294_v63  ;;  %7516 = vmatprep.subr.bf16.mxu1 %v15299_v50  ;;  %v6444_v63 = vpack.c.bf16 %v6434_v8, %v15576_v37  ;;  %v6635_v50 = vsel %vm21779_vm3, %v6623_v33, %v6634_v5  ;;  %v15371_v33 = vld [vmem:[%s21739_s22 + $0xde4] ss:$16 sps:$4 sm:$0xff]   ;;  %vm21815_vm3 = vmmov %vm21769_vm0 }
 0x5ea   :  { %7705 = vmatprep.subr.bf16.mxu0 %v15302_v54  ;;  %v15368_v54 = vld [vmem:[%s21739_s22 + $0xdcc] ss:$16 sps:$4 sm:$0xff]   ;;  %v8035_v8 = vld [vmem:[%s21784_s11] sm:$0xff] }
 0x5ec   :  { %7517 = vmatpush1.bf16.msra.mxu1 %v15297_v34  ;;  %v15363_v34 = vld [vmem:[%s21739_s22 + $0xdc0] ss:$16 sps:$4 sm:$0xff]  }
 0x5ed   :  { %7706 = vmatpush1.bf16.msra.mxu0 %v15300_v61  ;;  %7518 = vmatprep.subr.bf16.mxu1 %v15305_v11  ;;  %v6632_v61 = vrot.slane %v6444_v63, 2  ;;  %v15374_v11 = vld [vmem:[%s21739_s22 + $0xdec] ss:$16 sps:$4 sm:$0xff]   ;;  %v8053_v63 = vld [vmem:[%s21784_s11 + $0x90] sm:$0xff] }
 0x5ee   :  { %7707 = vmatprep.subr.bf16.mxu0 %v15308_v53  ;;  %v15369_v53 = vld [vmem:[%s21739_s22 + $0xde0] ss:$16 sps:$4 sm:$0xff]  }
 0x5f0   :  { %7519 = vmatpush1.bf16.msra.mxu1 %v15303_v43  ;;  %v6633_v43 = vsel %vm21780_vm6, %v6620_v55, %v6632_v61  ;;  %vm21816_vm6 = vmmov %vm21769_vm0 }
 0x5f1   :  { %7708 = vmatpush1.bf16.msra.mxu0 %v15306_v29  ;;  %7520 = vmatprep.subr.bf16.mxu1 %v15311_v35  ;;  %v15372_v29 = vld [vmem:[%s21739_s22 + $0xde8] ss:$16 sps:$4 sm:$0xff]   ;;  %v15377_v35 = vld [vmem:[%s21739_s22 + $0xe04] ss:$16 sps:$4 sm:$0xff]  }
 0x5f2   :  { %7709 = vmatprep.subr.bf16.mxu0 %v15314_v20  ;;  %v15380_v20 = vld [vmem:[%s21739_s22 + $0xe0c] ss:$16 sps:$4 sm:$0xff]  }
 0x5f4   :  { %7521 = vmatpush1.bf16.msra.mxu1 %v15309_v41  ;;  %v15375_v41 = vld [vmem:[%s21739_s22 + $0xe00] ss:$16 sps:$4 sm:$0xff]  }
 0x5f5   :  { %7710 = vmatpush1.bf16.msra.mxu0 %v15312_v28  ;;  %7522 = vmatprep.subr.bf16.mxu1 %v15317_v36  ;;  %v15378_v28 = vld [vmem:[%s21739_s22 + $0xe08] ss:$16 sps:$4 sm:$0xff]   ;;  %v15383_v36 = vld [vmem:[%s21739_s22 + $0xe24] ss:$16 sps:$4 sm:$0xff]  }
 0x5f6   :  { %7711 = vmatprep.subr.bf16.mxu0 %v15320_v39  ;;  %v15386_v39 = vld [vmem:[%s21739_s22 + $0xe2c] ss:$16 sps:$4 sm:$0xff]  }
 0x5f8   :  { %7523 = vmatpush1.bf16.msra.mxu1 %v15315_v21  ;;  %v15381_v21 = vld [vmem:[%s21739_s22 + $0xe20] ss:$16 sps:$4 sm:$0xff]  }
 0x5f9   :  { %7712 = vmatpush1.bf16.msra.mxu0 %v15318_v9  ;;  %7524 = vmatprep.subr.bf16.mxu1 %v15323_v22  ;;  %v15384_v9 = vld [vmem:[%s21739_s22 + $0xe28] ss:$16 sps:$4 sm:$0xff]   ;;  %v15389_v22 = vld [vmem:[%s21739_s22 + $0xe44] ss:$16 sps:$4 sm:$0xff]  }
 0x5fa   :  { %7713 = vmatprep.subr.bf16.mxu0 %v15326_v45  ;;  %v15392_v45 = vld [vmem:[%s21739_s22 + $0xe4c] ss:$16 sps:$4 sm:$0xff]  }
 0x5fc   :  { %7525 = vmatpush1.bf16.msra.mxu1 %v15321_v10  ;;  %v12688_v10 = vld [vmem:[%s21739_s22 + $0xe60] sm:$0xff] }
 0x5fd   :  { %7714 = vmatpush1.bf16.msra.mxu0 %v15324_v47  ;;  %7526 = vmatprep.subr.bf16.mxu1 %v15329_v40  ;;  %v12689_v47 = vld [vmem:[%s21739_s22 + $0xe68] sm:$0xff]  ;;  %v15387_v40 = vld [vmem:[%s21739_s22 + $0xe40] ss:$16 sps:$4 sm:$0xff]  }
 0x5fe   :  { %7715 = vmatprep.subr.bf16.mxu0 %v15332_v19  ;;  %v15390_v19 = vld [vmem:[%s21739_s22 + $0xe48] ss:$16 sps:$4 sm:$0xff]  }
 0x600   :  { %7527 = vmatpush1.bf16.msra.mxu1 %v15327_v60  ;;  %v12843_v60 = vcombine.high %v12688_v10, %v12688_v10 }
 0x601   :  { %7716 = vmatpush1.bf16.msra.mxu0 %v15330_v2  ;;  %7528 = vmatprep.subr.bf16.mxu1 %v15335_v25  ;;  %v12842_v2 = vcombine.low %v12688_v10, %v12688_v10  ;;  %v6431_v25 = vld [vmem:[#allocation3 + $0x20] sm:$0xf0] }
 0x602   :  { %7717 = vmatprep.subr.bf16.mxu0 %v15338_v17  ;;  %v12845_v17 = vcombine.high %v12689_v47, %v12689_v47  ;;  %v8041_v10 = vld [vmem:[%s21784_s11 + $0x30] sm:$0xff] }
 0x604   :  { %7529 = vmatpush1.bf16.msra.mxu1 %v15333_v59  ;;  %v12844_v59 = vcombine.low %v12689_v47, %v12689_v47  ;;  %v8042_v47 = vld [vmem:[%s21784_s11 + $0x38] sm:$0xff] }
 0x605   :  { %7718 = vmatpush1.bf16.msra.mxu0 %v15336_v1  ;;  %7530 = vmatprep.subr.bf16.mxu1 %v15341_v57  ;;  %v15577_v1 = vld [vmem:[#allocation3 + $0x48] sm:$0xff] }
 0x606   :  { %7719 = vmatprep.subr.bf16.mxu0 %v15344_v18  ;;  %v6441_v57 = vpack.c.bf16 %v15577_v1, %v6431_v25  ;;  %v7430_v18 = vsel %vm21782_vm8, %v12842_v2, 0  ;;  %v8059_v25 = vld [vmem:[%s21784_s11 + $0xc0] sm:$0xff]  ;;  %vm21818_vm8 = vmmov %vm21769_vm0 }
 0x608   :  { %7531 = vmatpush1.bf16.msra.mxu1 %v15339_v23  ;;  %v7436_v23 = vsel %vm21769_vm0, %v12844_v59, 0  ;;  %v8043_v59 = vld [vmem:[%s21784_s11 + $0x40] sm:$0xff] }
 0x609   :  { %7720 = vmatpush1.bf16.msra.mxu0 %v15342_v12  ;;  %7532 = vmatprep.subr.bf16.mxu1 %v15347_v49  ;;  %v6626_v12 = vrot.slane %v18253_v31, 2  ;;  %v8067_v49 = vld [vmem:[%s21784_s11 + $0x100] sm:$0xff]  ;;  %v8069_v31 = vld [vmem:[%s21784_s11 + $0x110] sm:$0xff] }
 0x60a   :  { %7721 = vmatprep.subr.bf16.mxu0 %v15350_v30  ;;  %v8068_v30 = vld [vmem:[%s21784_s11 + $0x108] sm:$0xff]  ;;  %v19298_v26 = vpack.c.bf16 %v8070_v0, %v8069_v31 }
 0x60b   :  { %v8084_v31 = vld [vmem:[%s21784_s11 + $0x188] sm:$0xff] }
 0x60c   :  { %7533 = vmatpush1.bf16.msra.mxu1 %v15345_v46  ;;  %v6625_v46 = vrot.slane %v6441_v57, 2  ;;  %v8044_v57 = vld [vmem:[%s21784_s11 + $0x48] sm:$0xff] }
 0x60d   :  { %7722 = vmatpush1.bf16.msra.mxu0 %v15348_v27  ;;  %7534 = vmatprep.subr.bf16.mxu1 %v15353_v51  ;;  %v19283_v27 = vpack.c.bf16 %v8068_v30, %v8067_v49  ;;  %v8061_v30 = vld [vmem:[%s21784_s11 + $0xd0] sm:$0xff] }
 0x60e   :  { %7723 = vmatprep.subr.bf16.mxu0 %v15356_v6  ;;  %v6627_v51 = vsel %vm21785_vm5, %v6625_v46, %v6626_v12  ;;  %v6446_v6 = vpack.c.bf16 %v6436_v58, %v15578_v14  ;;  %v8062_v46 = vld [vmem:[%s21784_s11 + $0xd8] sm:$0xff]  ;;  %v8045_v58 = vld [vmem:[%s21784_s11 + $0x50] sm:$0xff]  ;;  %vm8906_vm5 = vcmask 392196  }
 0x60f   :  { %v8046_v14 = vld [vmem:[%s21784_s11 + $0x58] sm:$0xff] }
 0x610   :  { %7535 = vmatpush1.bf16.msra.mxu1 %v15351_v52  ;;  %v6636_v52 = vrot.slane %v6446_v6, 2  ;;  %v8083_v6 = vld [vmem:[%s21784_s11 + $0x180] sm:$0xff]  ;;  %v19479_v0 = vpack.c.bf16 %v8046_v14, %v8045_v58 }
 0x611   :  { %7724 = vmatpush1.bf16.msra.mxu0 %v15354_v62  ;;  %7567 = vmatprep.subr.bf16.mxu1 %v15359_v4  ;;  %v8071_v62 = vld [vmem:[%s21784_s11 + $0x120] sm:$0xff]  ;;  %v8072_v4 = vld [vmem:[%s21784_s11 + $0x128] sm:$0xff] }
 0x612   :  { %7756 = vmatprep.subr.bf16.mxu0 %v15362_v3  ;;  %v6637_v7 = vsel %vm21786_vm7, %v6626_v12, %v6636_v52  ;;  %v19316_v55 = vpack.c.bf16 %v8072_v4, %v8071_v62  ;;  %v8051_v3 = vld [vmem:[%s21784_s11 + $0x80] sm:$0xff]  ;;  %v19452_v12 = vpack.c.bf16 %v8044_v57, %v8043_v59  ;;  %v8064_v62 = vld [vmem:[%s21784_s11 + $0xe8] sm:$0xff] }
 0x613   :  { %7537 = vmatmul.mubr.bf16.vlgmr.msra.gmra.mrb[28].mxu1 %v6621_v38  ;;  %v8047_v4 = vld [vmem:[%s21784_s11 + $0x60] sm:$0xff] }
 0x614   :  { %7726 = vmatmul.mubr.bf16.vlgmr.msra.gmra.mrb[36].mxu0 %v6621_v38  ;;  %7546 = vmatprep.mubr.bf16.mxu1 %v6635_v50  ;;  %v8073_v38 = vld [vmem:[%s21784_s11 + $0x130] sm:$0xff] }
 0x615   :  { %7568 = vmatpush1.bf16.msra.mxu1 %v15357_v24  ;;  %7735 = vmatprep.mubr.bf16.mxu0 %v6635_v50  ;;  %v8036_v24 = vld [vmem:[%s21784_s11 + $0x8] sm:$0xff]  ;;  %v8054_v50 = vld [vmem:[%s21784_s11 + $0x98] sm:$0xff] }
 0x616   :  { %7757 = vmatpush1.bf16.msra.mxu0 %v15360_v32  ;;  %7569 = vmatprep.subr.bf16.mxu1 %v15365_v56  ;;  %v8074_v32 = vld [vmem:[%s21784_s11 + $0x138] sm:$0xff]  ;;  %v19340_v56 = vpack.c.bf16 %v8036_v24, %v8035_v8  ;;  %v8085_v8 = vld [vmem:[%s21784_s11 + $0x190] sm:$0xff] }
 0x617   :  { %7758 = vmatprep.subr.bf16.mxu0 %v15368_v54  ;;  %v19342_v37 = vpack.c.bf16 %v8074_v32, %v8073_v38  ;;  %v19353_v54 = vpack.c.bf16 %v8054_v50, %v8053_v63  ;;  %v8086_v24 = vld [vmem:[%s21784_s11 + $0x198] sm:$0xff]  ;;  %v8065_v38 = vld [vmem:[%s21784_s11 + $0xf0] sm:$0xff] }
 0x618   :  { %v8066_v32 = vld [vmem:[%s21784_s11 + $0xf8] sm:$0xff]  ;;  %v19515_v50 = vpack.c.bf16 %v8086_v24, %v8085_v8 }
 0x619   :  { %7570 = vmatpush1.bf16.msra.mxu1 %v15363_v34  ;;  %v8037_v34 = vld [vmem:[%s21784_s11 + $0x10] sm:$0xff] }
 0x61a   :  { %7759 = vmatpush1.bf16.msra.mxu0 %v15366_v44  ;;  %7571 = vmatprep.subr.bf16.mxu1 %v15371_v33  ;;  %v8038_v44 = vld [vmem:[%s21784_s11 + $0x18] sm:$0xff] }
 0x61b   :  { %7547 = vmatmul.mubr.bf16.gmra.mrb[32].mxu1 %v6633_v43  ;;  %7760 = vmatprep.subr.bf16.mxu0 %v15374_v11  ;;  %v19366_v33 = vpack.c.bf16 %v8038_v44, %v8037_v34  ;;  %v8076_v11 = vld [vmem:[%s21784_s11 + $0x148] sm:$0xff]  ;;  %v8049_v34 = vld [vmem:[%s21784_s11 + $0x70] sm:$0xff]  ;;  %v19522_v44 = vpack.c.bf16 %v8066_v32, %v8065_v38 }
 0x61c   :  { %7736 = vmatmul.mubr.bf16.gmra.mrb[40].mxu0 %v6633_v43  ;;  %7556 = vmatprep.mubr.bf16.mxu1 %v6634_v5  ;;  %v8055_v43 = vld [vmem:[%s21784_s11 + $0xa0] sm:$0xff] }
 0x61d   :  { %7572 = vmatpush1.bf16.msra.mxu1 %v15369_v53  ;;  %7745 = vmatprep.mubr.bf16.mxu0 %v6634_v5  ;;  %v8052_v5 = vld [vmem:[%s21784_s11 + $0x88] sm:$0xff] }
 0x61e   :  { %7761 = vmatpush1.bf16.msra.mxu0 %v15372_v29  ;;  %7573 = vmatprep.subr.bf16.mxu1 %v15377_v35  ;;  %v19329_v16 = vpack.c.bf16 %v8052_v5, %v8051_v3  ;;  %v8056_v29 = vld [vmem:[%s21784_s11 + $0xa8] sm:$0xff]  ;;  %v8039_v35 = vld [vmem:[%s21784_s11 + $0x20] sm:$0xff] }
 0x61f   :  { %7762 = vmatprep.subr.bf16.mxu0 %v15380_v20  ;;  %v19385_v20 = vpack.c.bf16 %v8056_v29, %v8055_v43  ;;  %v8048_v5 = vld [vmem:[%s21784_s11 + $0x68] sm:$0xff] }
 0x620   :  { %v19513_v63 = vpack.c.bf16 %v8048_v5, %v8047_v4  ;;  %v8088_v43 = vld [vmem:[%s21784_s11 + $0x1a8] sm:$0xff] }
 0x621   :  { %7574 = vmatpush1.bf16.msra.mxu1 %v15375_v41  ;;  %v8040_v41 = vld [vmem:[%s21784_s11 + $0x28] sm:$0xff] }
 0x622   :  { %7763 = vmatpush1.bf16.msra.mxu0 %v15378_v28  ;;  %7575 = vmatprep.subr.bf16.mxu1 %v15383_v36  ;;  %v8077_v28 = vld [vmem:[%s21784_s11 + $0x150] sm:$0xff]  ;;  %v8078_v36 = vld [vmem:[%s21784_s11 + $0x158] sm:$0xff] }
 0x623   :  { %7557 = vmatmul.mubr.bf16.gmra.mrb[36].mxu1 %v6632_v61  ;;  %7764 = vmatprep.subr.bf16.mxu0 %v15386_v39  ;;  %v19396_v39 = vpack.c.bf16 %v8040_v41, %v8039_v35  ;;  %v19545_v41 = vpop.permute.xlu0 %7856 }
 0x624   :  { %7746 = vmatmul.mubr.bf16.gmra.mrb[44].mxu0 %v6632_v61  ;;  %7599 = vmatprep.mubr.bf16.mxu1 %v21740_v42  ;;  %v8075_v61 = vld [vmem:[%s21784_s11 + $0x140] sm:$0xff]  ;;  %21787 = vst [vmem:[#allocation15_spill] sm:$0xff] %v19545_v41 }
 0x625   :  { %7576 = vmatpush1.bf16.msra.mxu1 %v15381_v21  ;;  %7788 = vmatprep.mubr.bf16.mxu0 %v21740_v42  ;;  %v19371_v53 = vpack.c.bf16 %v8076_v11, %v8075_v61  ;;  %v19398_v21 = vpack.c.bf16 %v8078_v36, %v8077_v28  ;;  %v8050_v61 = vld [vmem:[%s21784_s11 + $0x78] sm:$0xff]  ;;  %v8087_v11 = vld [vmem:[%s21784_s11 + $0x1a0] sm:$0xff]  ;;  %v19547_v28 = vpop.permute.xlu1 %7859 }
 0x626   :  { %7765 = vmatpush1.bf16.msra.mxu0 %v15384_v9  ;;  %7577 = vmatprep.subr.bf16.mxu1 %v15389_v22  ;;  %v8057_v9 = vld [vmem:[%s21784_s11 + $0xb0] sm:$0xff]  ;;  %v8058_v22 = vld [vmem:[%s21784_s11 + $0xb8] sm:$0xff]  ;;  %v19535_v29 = vpack.c.bf16 %v8050_v61, %v8049_v34  ;;  %v19537_v35 = vpack.c.bf16 %v8088_v43, %v8087_v11  ;;  %21788 = vst [vmem:[#allocation16_spill] sm:$0xff] %v19547_v28  ;;  %vm7874_vm2 = vcmp.eq.s32.totalorder %v19547_v28, 1 }
 0x627   :  { %7766 = vmatprep.subr.bf16.mxu0 %v15392_v45  ;;  %v19407_v45 = vpack.c.bf16 %v8058_v22, %v8057_v9  ;;  %v19549_v36 = vpop.permute.xlu0 %7862 }
 0x628   :  { %21789 = vst [vmem:[#allocation17_spill] sm:$0xff] %v19549_v36  ;;  %vm7875_vm11 = vcmp.eq.s32.totalorder %v19549_v36, 1 }
 0x629   :  { %7578 = vmatpush1.bf16.msra.mxu1 %v15387_v40  ;;  %v8079_v40 = vld [vmem:[%s21784_s11 + $0x160] sm:$0xff]  ;;  %v19552_v9 = vpop.permute.xlu1 %7865 }
 0x62a   :  { %7767 = vmatpush1.bf16.msra.mxu0 %v15390_v19  ;;  %12846 = vmatprep.subr.msk.bf16.mxu1 %vm21781_vm15, %v12843_v60  ;;  %v19422_v19 = vpack.c.bf16 %v8042_v47, %v8041_v10  ;;  %v8080_v60 = vld [vmem:[%s21784_s11 + $0x168] sm:$0xff]  ;;  %21790 = vst [vmem:[#allocation18_spill] sm:$0xff] %v19552_v9  ;;  %vm7876_vm10 = vcmp.eq.s32.totalorder %v19552_v9, 1  ;;  %vm21817_vm15 = vmmov %vm21769_vm0 }
 0x62b   :  { %12850 = vmatprep.subr.msk.bf16.mxu0 %vm21783_vm4, %v12845_v17  ;;  %v19427_v2 = vpack.c.bf16 %v8080_v60, %v8079_v40  ;;  %v8060_v17 = vld [vmem:[%s21784_s11 + $0xc8] sm:$0xff]  ;;  %vm21819_vm4 = vmmov %vm21769_vm0 }
 0x62c   :  { %v19441_v1 = vpack.c.bf16 %v8060_v17, %v8059_v25 }
 0x62d   :  { %7580 = vmatpush1.bf16.msra.mxu1 %v7430_v18  ;;  %v8081_v18 = vld [vmem:[%s21784_s11 + $0x170] sm:$0xff]  ;;  %v19636_v36 = vpop.permute.xlu1 %7871 }
 0x62e   :  { %7769 = vmatpush1.bf16.msra.mxu0 %v7436_v23  ;;  %13822 = vmatprep.subr.bf16.mxu1 %v19329_v16  ;;  %v8082_v23 = vld [vmem:[%s21784_s11 + $0x178] sm:$0xff]  ;;  %21806 = vst [vmem:[#allocation28_spill] sm:$0xff] %v19636_v36  ;;  %vm7878_vm13 = vcmp.eq.s32.totalorder %v19636_v36, 1 }
 0x62f   :  { %13853 = vmatprep.subr.bf16.mxu0 %v21725_v48  ;;  %v19454_v49 = vpack.c.bf16 %v8082_v23, %v8081_v18 }
 0x630   :  { %12847 = vmatmul.mubr.msk.bf16.vlgmr.msra.gmra.mrb[28].mxu1 %vm1327_vm1, %v6627_v51 }
 0x631   :  { %12851 = vmatmul.mubr.msk.bf16.vlgmr.msra.gmra.mrb[36].mxu0 %vm1327_vm1, %v6627_v51  ;;  %7609 = vmatprep.mubr.bf16.mxu1 %v21740_v42  ;;  %v19466_v51 = vpack.c.bf16 %v8062_v46, %v8061_v30 }
 0x632   :  { %7798 = vmatprep.mubr.bf16.mxu0 %v21740_v42  ;;  %13855 = vmatpush1.bf16.msra.mxu0 %v19283_v27 }
 0x633   :  { %13856 = vmatprep.subr.bf16.mxu0 %v21725_v48  ;;  %13824 = vmatpush3.bf16.msra.mxu1 %v19340_v56 }
 0x634   :  { %13826 = vmatprep.subr.bf16.mxu1 %v19353_v54 }
 0x636   :  { %13858 = vmatpush1.bf16.msra.mxu0 %v19298_v26 }
 0x637   :  { %13859 = vmatprep.subr.bf16.mxu0 %v21725_v48  ;;  %13828 = vmatpush3.bf16.msra.mxu1 %v19366_v33 }
 0x638   :  { %12848 = vmatmul.mubr.msk.bf16.gmra.mrb[32].mxu1 %vm1327_vm1, %v6637_v7  ;;  %13830 = vmatprep.subr.bf16.mxu1 %v19385_v20 }
 0x639   :  { %12852 = vmatmul.mubr.msk.bf16.gmra.mrb[40].mxu0 %vm1327_vm1, %v6637_v7  ;;  %7619 = vmatprep.mubr.bf16.mxu1 %v21740_v42  ;;  %v8063_v7 = vld [vmem:[%s21784_s11 + $0xe0] sm:$0xff] }
 0x63a   :  { %7808 = vmatprep.mubr.bf16.mxu0 %v21740_v42  ;;  %13861 = vmatpush1.bf16.msra.mxu0 %v19316_v55  ;;  %v19494_v3 = vpack.c.bf16 %v8064_v62, %v8063_v7  ;;  %v19587_v7 = vpop.permute.xlu0 %7868 }
 0x63b   :  { %13862 = vmatprep.subr.bf16.mxu0 %v21725_v48  ;;  %13832 = vmatpush3.bf16.msra.mxu1 %v19396_v39  ;;  %21797 = vst [vmem:[#allocation19_spill] sm:$0xff] %v19587_v7  ;;  %vm7877_vm12 = vcmp.eq.s32.totalorder %v19587_v7, 1 }
 0x63c   :  { %13834 = vmatprep.subr.bf16.mxu1 %v19407_v45 }
 0x63e   :  { %13864 = vmatpush1.bf16.msra.mxu0 %v19342_v37 }
 0x63f   :  { %13865 = vmatprep.subr.bf16.mxu0 %v21725_v48  ;;  %13836 = vmatpush3.bf16.msra.mxu1 %v19422_v19 }
 0x640   :  { %12849 = vmatmul.mubr.msk.bf16.gmra.mrb[36].mxu1 %vm1327_vm1, %v6636_v52  ;;  %13838 = vmatprep.subr.bf16.mxu1 %v19441_v1 }
 0x641   :  { %12853 = vmatmul.mubr.msk.bf16.gmra.mrb[44].mxu0 %vm1327_vm1, %v6636_v52  ;;  %v19481_v52 = vpack.c.bf16 %v8084_v31, %v8083_v6  ;;  %vm7873_vm1 = vcmp.eq.s32.totalorder %v19545_v41, 1 }
 0x642   :  { %13867 = vmatpush1.bf16.msra.mxu0 %v19371_v53 }
 0x643   :  { %13868 = vmatprep.subr.bf16.mxu0 %v21725_v48  ;;  %13840 = vmatpush3.bf16.msra.mxu1 %v19452_v12 }
 0x644   :  { %13842 = vmatprep.subr.bf16.mxu1 %v19466_v51 }
 0x646   :  { %13870 = vmatpush1.bf16.msra.mxu0 %v19398_v21 }
 0x647   :  { %13871 = vmatprep.subr.bf16.mxu0 %v21725_v48  ;;  %13844 = vmatpush3.bf16.msra.mxu1 %v19479_v0 }
 0x648   :  { %13846 = vmatprep.subr.bf16.mxu1 %v19494_v3 }
 0x64a   :  { %13873 = vmatpush1.bf16.msra.mxu0 %v19427_v2 }
 0x64b   :  { %13874 = vmatprep.subr.bf16.mxu0 %v21725_v48  ;;  %13848 = vmatpush3.bf16.msra.mxu1 %v19513_v63 }
 0x64c   :  { %13850 = vmatprep.subr.bf16.mxu1 %v19522_v44 }
 0x64e   :  { %13876 = vmatpush1.bf16.msra.mxu0 %v19454_v49 }
 0x64f   :  { %13877 = vmatprep.subr.bf16.mxu0 %v21725_v48  ;;  %13852 = vmatpush3.bf16.msra.mxu1 %v19535_v29 }
 0x650   :  { %13887 = vmatprep.subr.bf16.mxu1 %v19329_v16 }
 0x652   :  { %13879 = vmatpush1.bf16.msra.mxu0 %v19481_v52 }
 0x653   :  { %13880 = vmatprep.subr.bf16.mxu0 %v21725_v48 }
 0x656   :  { %13882 = vmatpush1.bf16.msra.mxu0 %v19515_v50 }
 0x657   :  { %13883 = vmatprep.subr.bf16.mxu0 %v21725_v48 }
 0x65a   :  { %13885 = vmatpush1.bf16.msra.mxu0 %v19537_v35 }
 0x65b   :  { %13918 = vmatprep.subr.bf16.mxu0 %v21725_v48 }
 0x703   :  { %v19554_v22 = vpop.f32.mrb[28].mxu1 }
 0x704   :  { %v7879_v10 = vsel %vm7873_vm1, %v19554_v22, 0.0  ;;  %v19559_v47 = vpop.f32.mrb[36].mxu0  ;;  %v19561_v16 = vpop.f32.mrb[29].mxu1 }
 0x705   :  { %21791 = vst [vmem:[#allocation9_spill] sm:$0xff] %v19559_v47  ;;  %21792 = vst [vmem:[#allocation10_spill] sm:$0xff] %v19561_v16  ;;  %v7881_v40 = vsel %vm7873_vm1, %v19559_v47, 0.0  ;;  %v7880_v60 = vsel %vm7873_vm1, %v19561_v16, 0.0  ;;  %v19570_v25 = vpop.f32.mrb[37].mxu0  ;;  %v19572_v17 = vpop.f32.mrb[30].mxu1  ;;  %v7958_v59 = vmul.f32 %v7879_v10, %v7879_v10 }
 0x706   :  { %21793 = vst [vmem:[#allocation11_spill] sm:$0xff] %v19570_v25  ;;  %v7882_v57 = vsel %vm7873_vm1, %v19570_v25, 0.0  ;;  %v7883_v18 = vsel %vm7874_vm2, %v19572_v17, 0.0  ;;  %v19580_v23 = vpop.f32.mrb[38].mxu0  ;;  %v19582_v30 = vpop.f32.mrb[31].mxu1  ;;  %v7960_v46 = vmul.f32 %v7881_v40, %v7881_v40  ;;  %v7959_v58 = vmul.f32 %v7880_v60, %v7880_v60 }
 0x707   :  { %21794 = vst [vmem:[#allocation12_spill] sm:$0xff] %v19580_v23  ;;  %21795 = vst [vmem:[#allocation13_spill] sm:$0xff] %v19582_v30  ;;  %v7903_v14 = vadd.f32 %v7883_v18, %v7879_v10  ;;  %v7962_v6 = vmul.f32 %v7883_v18, %v7883_v18  ;;  %v19585_v31 = vpop.f32.mrb[39].mxu0  ;;  %v7961_v62 = vmul.f32 %v7882_v57, %v7882_v57  ;;  %v7885_v4 = vsel %vm7874_vm2, %v19580_v23, 0.0 }
 0x708   :  { %21796 = vst [vmem:[#allocation14_spill] sm:$0xff] %v19585_v31  ;;  %v7884_v5 = vsel %vm7874_vm2, %v19582_v30, 0.0  ;;  %v7886_v8 = vsel %vm7874_vm2, %v19585_v31, 0.0  ;;  %v7940_v24 = vsel %vm7939_vm9, %v7882_v57, 0.0  ;;  %v7927_v32 = vadd.f32 %v7885_v4, %v7881_v40 }
 0x709   :  { %v7982_v38 = vadd.f32 %v7962_v6, %v7958_v59  ;;  %v7964_v34 = vmul.f32 %v7885_v4, %v7885_v4  ;;  %v7915_v61 = vadd.f32 %v7884_v5, %v7880_v60  ;;  %v7963_v11 = vmul.f32 %v7884_v5, %v7884_v5 }
 0x70a   :  { %v7941_v43 = vsel %vm7939_vm9, %v7886_v8, 0.0  ;;  %v7965_v10 = vmul.f32 %v7886_v8, %v7886_v8  ;;  %v8018_v28 = vsel %vm7939_vm9, %v7961_v62, 0.0 }
 0x70b   :  { %v8006_v18 = vadd.f32 %v7964_v34, %v7960_v46  ;;  %v7942_v42 = vadd.f32 %v7941_v43, %v7940_v24  ;;  %v19602_v41 = vpop.f32.mrb[32].mxu1  ;;  %v7994_v31 = vadd.f32 %v7963_v11, %v7959_v58 }
 0x70c   :  { %21798 = vst [vmem:[#allocation20_spill] sm:$0xff] %v19602_v41  ;;  %v8019_v59 = vsel %vm7939_vm9, %v7965_v10, 0.0  ;;  %v7887_v40 = vsel %vm7875_vm11, %v19602_v41, 0.0  ;;  %v19609_v60 = vpop.f32.mrb[40].mxu0  ;;  %v19611_v57 = vpop.f32.mrb[33].mxu1 }
 0x70d   :  { %21799 = vst [vmem:[#allocation21_spill] sm:$0xff] %v19609_v60  ;;  %21800 = vst [vmem:[#allocation22_spill] sm:$0xff] %v19611_v57  ;;  %v8020_v6 = vadd.f32 %v8019_v59, %v8018_v28  ;;  %v7904_v4 = vadd.f32 %v7903_v14, %v7887_v40  ;;  %v7966_v5 = vmul.f32 %v7887_v40, %v7887_v40  ;;  %v7889_v46 = vsel %vm7875_vm11, %v19609_v60, 0.0  ;;  %v19616_v8 = vpop.f32.mrb[41].mxu0  ;;  %v19618_v58 = vpop.f32.mrb[34].mxu1 }
 0x70e   :  { %21801 = vst [vmem:[#allocation23_spill] sm:$0xff] %v19616_v8  ;;  %21802 = vst [vmem:[#allocation24_spill] sm:$0xff] %v19618_v58  ;;  %v7928_v62 = vadd.f32 %v7927_v32, %v7889_v46  ;;  %v7968_v24 = vmul.f32 %v7889_v46, %v7889_v46  ;;  %v7888_v34 = vsel %vm7875_vm11, %v19611_v57, 0.0  ;;  %v7890_v28 = vsel %vm7875_vm11, %v19616_v8, 0.0  ;;  %v19626_v14 = vpop.f32.mrb[42].mxu0  ;;  %v19628_v11 = vpop.f32.mrb[35].mxu1 }
 0x70f   :  { %21803 = vst [vmem:[#allocation25_spill] sm:$0xff] %v19626_v14  ;;  %21804 = vst [vmem:[#allocation26_spill] sm:$0xff] %v19628_v11  ;;  %v7983_v43 = vadd.f32 %v7982_v38, %v7966_v5  ;;  %v7916_v10 = vadd.f32 %v7915_v61, %v7888_v34  ;;  %v7967_v59 = vmul.f32 %v7888_v34, %v7888_v34  ;;  %v7943_v40 = vsel %vm7939_vm9, %v7890_v28, 0.0  ;;  %v19631_v25 = vpop.f32.mrb[43].mxu0 }
 0x710   :  { %21805 = vst [vmem:[#allocation27_spill] sm:$0xff] %v19631_v25  ;;  %v8007_v32 = vadd.f32 %v8006_v18, %v7968_v24  ;;  %v7944_v46 = vadd.f32 %v7943_v40, %v7942_v42  ;;  %v7969_v60 = vmul.f32 %v7890_v28, %v7890_v28  ;;  %v7891_v23 = vsel %vm7876_vm10, %v19618_v58, 0.0 }
 0x711   :  { %v7995_v8 = vadd.f32 %v7994_v31, %v7967_v59  ;;  %v7905_v47 = vadd.f32 %v7904_v4, %v7891_v23  ;;  %v7970_v57 = vmul.f32 %v7891_v23, %v7891_v23  ;;  %v7893_v38 = vsel %vm7876_vm10, %v19626_v14, 0.0 }
 0x712   :  { %v8021_v61 = vsel %vm7939_vm9, %v7969_v60, 0.0  ;;  %v7929_v5 = vadd.f32 %v7928_v62, %v7893_v38  ;;  %v7972_v34 = vmul.f32 %v7893_v38, %v7893_v38  ;;  %v7892_v42 = vsel %vm7876_vm10, %v19628_v11, 0.0 }
 0x713   :  { %v8022_v18 = vadd.f32 %v8021_v61, %v8020_v6  ;;  %v7984_v24 = vadd.f32 %v7983_v43, %v7970_v57  ;;  %v7917_v28 = vadd.f32 %v7916_v10, %v7892_v42  ;;  %v7971_v40 = vmul.f32 %v7892_v42, %v7892_v42  ;;  %v19645_v30 = vpop.f32.mrb[36].mxu1 }
 0x714   :  { %21807 = vst [vmem:[#allocation29_spill] sm:$0xff] %v19645_v30  ;;  %v8008_v23 = vadd.f32 %v8007_v32, %v7972_v34  ;;  %v7894_v31 = vsel %vm7876_vm10, %v19631_v25, 0.0  ;;  %v7895_v60 = vsel %vm7877_vm12, %v19645_v30, 0.0  ;;  %v19654_v4 = vpop.f32.mrb[44].mxu0  ;;  %v19656_v62 = vpop.f32.mrb[37].mxu1 }
 0x715   :  { %21808 = vst [vmem:[#allocation30_spill] sm:$0xff] %v19654_v4  ;;  %21809 = vst [vmem:[#allocation31_spill] sm:$0xff] %v19656_v62  ;;  %v7996_v57 = vadd.f32 %v7995_v8, %v7971_v40  ;;  %v7945_v6 = vsel %vm7939_vm9, %v7894_v31, 0.0  ;;  %v7973_v43 = vmul.f32 %v7894_v31, %v7894_v31  ;;  %v7906_v10 = vadd.f32 %v7905_v47, %v7895_v60  ;;  %v19659_v59 = vpop.f32.mrb[45].mxu0  ;;  %v19661_v32 = vpop.f32.mrb[38].mxu1 }
 0x716   :  { %21810 = vst [vmem:[#allocation32_spill] sm:$0xff] %v19659_v59  ;;  %21811 = vst [vmem:[#allocation33_spill] sm:$0xff] %v19661_v32  ;;  %v7946_v38 = vadd.f32 %v7945_v6, %v7944_v46  ;;  %v7974_v61 = vmul.f32 %v7895_v60, %v7895_v60  ;;  %v7897_v34 = vsel %vm7877_vm12, %v19654_v4, 0.0  ;;  %v7896_v42 = vsel %vm7877_vm12, %v19656_v62, 0.0  ;;  %v19669_v8 = vpop.f32.mrb[46].mxu0  ;;  %v19671_v40 = vpop.f32.mrb[39].mxu1 }
 0x717   :  { %21812 = vst [vmem:[#allocation34_spill] sm:$0xff] %v19669_v8  ;;  %21813 = vst [vmem:[#allocation35_spill] sm:$0xff] %v19671_v40  ;;  %v8023_v47 = vsel %vm7939_vm9, %v7973_v43, 0.0  ;;  %v7930_v31 = vadd.f32 %v7929_v5, %v7897_v34  ;;  %v7976_v9 = vmul.f32 %v7897_v34, %v7897_v34  ;;  %v7918_v25 = vadd.f32 %v7917_v28, %v7896_v42  ;;  %v19674_v14 = vpop.f32.mrb[47].mxu0 }
 0x718   :  { %21814 = vst [vmem:[#allocation36_spill] sm:$0xff] %v19674_v14  ;;  %v8024_v46 = vadd.f32 %v8023_v47, %v8022_v18  ;;  %v7985_v60 = vadd.f32 %v7984_v24, %v7974_v61  ;;  %v7975_v6 = vmul.f32 %v7896_v42, %v7896_v42  ;;  %v7898_v4 = vsel %vm7877_vm12, %v19659_v59, 0.0 }
 0x719   :  { %v8009_v11 = vadd.f32 %v8008_v23, %v7976_v9  ;;  %v7947_v62 = vsel %vm7939_vm9, %v7898_v4, 0.0  ;;  %v7977_v16 = vmul.f32 %v7898_v4, %v7898_v4  ;;  %v7899_v43 = vsel %vm7878_vm13, %v19661_v32, 0.0 }
 0x71a   :  { %v7997_v5 = vadd.f32 %v7996_v57, %v7975_v6  ;;  %v7948_v34 = vadd.f32 %v7947_v62, %v7946_v38  ;;  %v7907_v28 = vsel %vm21815_vm3, %v7899_v43, 0.0  ;;  %v7978_v30 = vmul.f32 %v7899_v43, %v7899_v43 }
 0x71b   :  { %v8025_v18 = vsel %vm7939_vm9, %v7977_v16, 0.0  ;;  %v7908_v24 = vadd.f32 %v7907_v28, %v7906_v10  ;;  %v7901_v61 = vsel %vm7878_vm13, %v19669_v8, 0.0  ;;  %v7900_v9 = vsel %vm7878_vm13, %v19671_v40, 0.0 }
 0x71c   :  { %v8026_v23 = vadd.f32 %v8025_v18, %v8024_v46  ;;  %v7986_v4 = vsel %vm21816_vm6, %v7978_v30, 0.0  ;;  %v7931_v57 = vsel %vm21817_vm15, %v7901_v61, 0.0  ;;  %v7980_v62 = vmul.f32 %v7901_v61, %v7901_v61 }
 0x71d   :  { %v7909_v38 = vrot.slane %v7908_v24, 4  ;;  %v19693_v42 = vadd.f32 %v7986_v4, %v7985_v60  ;;  %v7932_v47 = vadd.f32 %v7931_v57, %v7930_v31  ;;  %v7919_v16 = vsel %vm21818_vm8, %v7900_v9, 0.0 }
 0x71e   :  { %v8010_v10 = vsel %vm21819_vm4, %v7980_v62, 0.0  ;;  %v7920_v6 = vadd.f32 %v7919_v16, %v7918_v25  ;;  %v7979_v43 = vmul.f32 %v7900_v9, %v7900_v9  ;;  %v7902_v28 = vsel %vm7878_vm13, %v19674_v14, 0.0 }
 0x71f   :  { %v7910_v46 = vadd.f32 %v7909_v38, %v7908_v24  ;;  %v7933_v18 = vrot.slane %v7932_v47, 4  ;;  %v19700_v30 = vadd.f32 %v8010_v10, %v8009_v11  ;;  %v7950_v60 = vsel %vm7949_vm14, %v7902_v28, 0.0 }
 0x720   :  { %v7921_v7 = vrot.slane %v7920_v6, 4  ;;  %v7998_v61 = vsel %vm21769_vm0, %v7979_v43, 0.0  ;;  %v7981_v31 = vmul.f32 %v7902_v28, %v7902_v28  ;;  %v7951_v25 = vadd.f32 %v7950_v60, %v7948_v34 }
 0x721   :  { %v7911_v4 = vrot.slane %v7910_v46, 2  ;;  %v7934_v57 = vadd.f32 %v7933_v18, %v7932_v47  ;;  %v7999_v62 = vadd.f32 %v7998_v61, %v7997_v5 }
 0x722   :  { %v7922_v59 = vadd.f32 %v7921_v7, %v7920_v6  ;;  %v8027_v9 = vsel %vm7949_vm14, %v7981_v31, 0.0  ;;  %v7952_v38 = vrot.slane %v7951_v25, 4 }
 0x723   :  { %v7912_v16 = vadd.f32 %v7911_v4, %v7910_v46  ;;  %v7935_v36 = vrot.slane %v7934_v57, 2  ;;  %v8000_v24 = vrot.slane %v7999_v62, 4  ;;  %v8028_v11 = vadd.f32 %v8027_v9, %v8026_v23  ;;  %v8399_v9 = vld [vmem:[%s21820_s1 + $0x58] sm:$0xff] }
 0x724   :  { %v7923_v14 = vrot.slane %v7922_v59, 2  ;;  %v7953_v8 = vadd.f32 %v7952_v38, %v7951_v25  ;;  %v8408_v25 = vld [vmem:[%s21820_s1 + $0xa0] sm:$0xff]  ;;  %v8398_v38 = vld [vmem:[%s21820_s1 + $0x50] sm:$0xff] }
 0x725   :  { %v8001_v10 = vadd.f32 %v8000_v24, %v7999_v62  ;;  %v8029_v40 = vrot.slane %v8028_v11, 4  ;;  %v7913_v32 = vrot.slane %v7912_v16, 1  ;;  %v7936_v58 = vadd.f32 %v7935_v36, %v7934_v57  ;;  %v8404_v57 = vld [vmem:[%s21820_s1 + $0x80] sm:$0xff] }
 0x726   :  { %v7924_v43 = vadd.f32 %v7923_v14, %v7922_v59  ;;  %v7954_v28 = vrot.slane %v7953_v8, 2 }
 0x727   :  { %v8030_v41 = vadd.f32 %v8029_v40, %v8028_v11  ;;  %v8002_v7 = vrot.slane %v8001_v10, 2  ;;  %v7914_v46 = vadd.f32 %v7913_v32, %v7912_v16  ;;  %v7937_v61 = vrot.slane %v7936_v58, 1  ;;  %v8403_v16 = vld [vmem:[%s21820_s1 + $0x78] sm:$0xff]  ;;  %v8402_v11 = vld [vmem:[%s21820_s1 + $0x70] sm:$0xff] }
 0x728   :  { %v7925_v47 = vrot.slane %v7924_v43, 1  ;;  %v7955_v5 = vadd.f32 %v7954_v28, %v7953_v8  ;;  %v13967_v24 = vpack.c.bf16 %v8403_v16, %v8399_v9  ;;  %v8407_v28 = vld [vmem:[%s21820_s1 + $0x98] sm:$0xff]  ;;  %v21830_v9 = vld [vmem:[#allocation31_spill] sm:$0xff] }
 0x729   :  { %v8031_v34 = vrot.slane %v8030_v41, 2  ;;  %v8003_v18 = vadd.f32 %v8002_v7, %v8001_v10  ;;  %v7938_v59 = vadd.f32 %v7937_v61, %v7936_v58  ;;  %v13969_v10 = vpack.c.bf16 %v8402_v11, %v8398_v38  ;;  %v8406_v7 = vld [vmem:[%s21820_s1 + $0x90] sm:$0xff] }
 0x72a   :  { %v7926_v6 = vadd.f32 %v7925_v47, %v7924_v43  ;;  %v7956_v60 = vrot.slane %v7955_v5, 1  ;;  %v13961_v43 = vpack.c.bf16 %v8408_v25, %v8404_v57  ;;  %v8411_v47 = vld [vmem:[%s21820_s1 + $0xb8] sm:$0xff] }
 0x72b   :  { %v8004_v31 = vrot.slane %v8003_v18, 1  ;;  %v8032_v23 = vadd.f32 %v8031_v34, %v8030_v41  ;;  %v8394_v41 = vld [vmem:[%s21820_s1 + $0x30] sm:$0xff] }
 0x72c   :  { %8156 = vmatprep.mubr.f32.mxu1 %v7926_v6  ;;  %v7957_v4 = vadd.f32 %v7956_v60, %v7955_v5  ;;  %v13971_v5 = vpack.c.bf16 %v8411_v47, %v8407_v28  ;;  %v8410_v34 = vld [vmem:[%s21820_s1 + $0xb0] sm:$0xff] }
 0x72d   :  { %8157 = vmatmul.mubr.f32.vlgmr.msra.gmra.mrb[26].mxu1 %v7914_v46  ;;  %v8005_v14 = vadd.f32 %v8004_v31, %v8003_v18  ;;  %v8033_v36 = vrot.slane %v8032_v23, 1  ;;  %v13973_v6 = vpack.c.bf16 %v8410_v34, %v8406_v7 }
 0x72e   :  { %13889 = vmatpush3.bf16.msra.mxu1 %v19340_v56  ;;  %12854 = vmatprep.mubr.msk.f32.mxu0 %vm7939_vm9, %v7957_v4  ;;  %v7988_v56 = vrot.slane %v19693_v42, 4 }
 0x72f   :  { %13891 = vmatprep.subr.bf16.mxu1 %v19353_v54  ;;  %8301 = vmatprep.mubr.f32.mxu1 %v8005_v14  ;;  %v8034_v8 = vadd.f32 %v8033_v36, %v8032_v23 }
 0x730   :  { %8227 = vmatmul.mubr.f32.vlgmr.msra.gmra.mrb[34].mxu0 %v7938_v59 }
 0x731   :  { %13920 = vmatpush1.bf16.msra.mxu0 %v19283_v27  ;;  %12855 = vmatprep.mubr.msk.f32.mxu0 %vm7939_vm9, %v8034_v8  ;;  %v7989_v27 = vadd.f32 %v7988_v56, %v19693_v42  ;;  %v8405_v42 = vld [vmem:[%s21820_s1 + $0x88] sm:$0xff] }
 0x732   :  { %13921 = vmatprep.subr.bf16.mxu0 %v21725_v48  ;;  %13893 = vmatpush3.bf16.msra.mxu1 %v19366_v33 }
 0x733   :  { %13895 = vmatprep.subr.bf16.mxu1 %v19385_v20 }
 0x735   :  { %13923 = vmatpush1.bf16.msra.mxu0 %v19298_v26  ;;  %v7990_v26 = vrot.slane %v7989_v27, 2 }
 0x736   :  { %13924 = vmatprep.subr.bf16.mxu0 %v21725_v48  ;;  %13897 = vmatpush3.bf16.msra.mxu1 %v19396_v39 }
 0x737   :  { %13899 = vmatprep.subr.bf16.mxu1 %v19407_v45 }
 0x739   :  { %13926 = vmatpush1.bf16.msra.mxu0 %v19316_v55  ;;  %v7991_v55 = vadd.f32 %v7990_v26, %v7989_v27 }
 0x73a   :  { %13927 = vmatprep.subr.bf16.mxu0 %v21725_v48  ;;  %13901 = vmatpush3.bf16.msra.mxu1 %v19422_v19  ;;  %v8389_v19 = vld [vmem:[%s21820_s1 + $0x8] sm:$0xff] }
 0x73b   :  { %13903 = vmatprep.subr.bf16.mxu1 %v19441_v1  ;;  %v7992_v54 = vrot.slane %v7991_v55, 1  ;;  %v8388_v1 = vld [vmem:[%s21820_s1] sm:$0xff] }
 0x73d   :  { %13929 = vmatpush1.bf16.msra.mxu0 %v19342_v37  ;;  %v8012_v37 = vrot.slane %v19700_v30, 4 }
 0x73e   :  { %13930 = vmatprep.subr.bf16.mxu0 %v21725_v48  ;;  %13905 = vmatpush3.bf16.msra.mxu1 %v19452_v12 }
 0x73f   :  { %13907 = vmatprep.subr.bf16.mxu1 %v19466_v51  ;;  %v8013_v33 = vadd.f32 %v8012_v37, %v19700_v30  ;;  %v8397_v51 = vld [vmem:[%s21820_s1 + $0x48] sm:$0xff] }
 0x740   :  { %v8409_v30 = vld [vmem:[%s21820_s1 + $0xa8] sm:$0xff] }
 0x741   :  { %13932 = vmatpush1.bf16.msra.mxu0 %v19371_v53  ;;  %v7993_v53 = vadd.f32 %v7992_v54, %v7991_v55  ;;  %v8014_v20 = vrot.slane %v8013_v33, 2  ;;  %v19805_v62 = vpack.c.bf16 %v8409_v30, %v8405_v42  ;;  %v21828_v30 = vld [vmem:[#allocation22_spill] sm:$0xff] }
 0x742   :  { %13933 = vmatprep.subr.bf16.mxu0 %v21725_v48  ;;  %13909 = vmatpush3.bf16.msra.mxu1 %v19479_v0  ;;  %v8401_v0 = vld [vmem:[%s21820_s1 + $0x68] sm:$0xff] }
 0x743   :  { %13911 = vmatprep.subr.bf16.mxu1 %v19494_v3  ;;  %v8015_v39 = vadd.f32 %v8014_v20, %v8013_v33  ;;  %v19771_v3 = vpack.c.bf16 %v8401_v0, %v8397_v51 }
 0x745   :  { %13935 = vmatpush1.bf16.msra.mxu0 %v19398_v21  ;;  %v8016_v21 = vrot.slane %v8015_v39, 1 }
 0x746   :  { %13936 = vmatprep.subr.bf16.mxu0 %v21725_v48  ;;  %13913 = vmatpush3.bf16.msra.mxu1 %v19513_v63  ;;  %v8396_v63 = vld [vmem:[%s21820_s1 + $0x40] sm:$0xff] }
 0x747   :  { %13915 = vmatprep.subr.bf16.mxu1 %v19522_v44  ;;  %v8017_v45 = vadd.f32 %v8016_v21, %v8015_v39  ;;  %v8391_v44 = vld [vmem:[%s21820_s1 + $0x18] sm:$0xff]  ;;  %v8385_v21 = vld [vmem:[%s21621_s13] sm:$0x1] }
 0x749   :  { %13938 = vmatpush1.bf16.msra.mxu0 %v19427_v2  ;;  %v8393_v2 = vld [vmem:[%s21820_s1 + $0x28] sm:$0xff] }
 0x74a   :  { %13939 = vmatprep.subr.bf16.mxu0 %v21725_v48  ;;  %13917 = vmatpush3.bf16.msra.mxu1 %v19535_v29  ;;  %v19758_v12 = vpack.c.bf16 %v8393_v2, %v8389_v19  ;;  %v8395_v29 = vld [vmem:[%s21820_s1 + $0x38] sm:$0xff]  ;;  %v21821_v2 = vmov -1e+30  }
 0x74b   :  { %v13963_v32 = vpack.c.bf16 %v8395_v29, %v8391_v44  ;;  %8907 = vst.msk [vmem:[#allocation4 + $0xb8] sm:$0xf0] %vm8906_vm5, %v21821_v2  ;;  %v21824_v29 = vld [vmem:[#allocation29_spill] sm:$0xff] }
 0x74c   :  { %13952 = vmatprep.subr.bf16.mxu1 %v19758_v12 }
 0x74d   :  { %13941 = vmatpush1.bf16.msra.mxu0 %v19454_v49  ;;  %8302 = vmatmul.mubr.f32.vlgmr.msra.gmra.mrb[40].mxu1 %v7993_v53  ;;  %v8392_v49 = vld [vmem:[%s21820_s1 + $0x20] sm:$0xff] }
 0x74e   :  { %13942 = vmatprep.subr.bf16.mxu0 %v21725_v48  ;;  %8479 = vmatprep.mubr.f32.mxu1 %v21723_v13  ;;  %v8381_v53 = vld [vmem:[%s21620_s12] sm:$0x1]  ;;  %s11865_s12 = sld [smem:[#allocation6 + $0x1]] }
 0x751   :  { %13944 = vmatpush1.bf16.msra.mxu0 %v19481_v52  ;;  %v19769_v52 = vpack.c.bf16 %v8392_v49, %v8388_v1 }
 0x752   :  { %13945 = vmatprep.subr.bf16.mxu0 %v21725_v48 }
 0x753   :  { %13954 = vmatpush1.bf16.msra.mxu1 %v19769_v52 }
 0x754   :  { %13956 = vmatprep.subr.bf16.mxu1 %v19771_v3 }
 0x755   :  { %13947 = vmatpush1.bf16.msra.mxu0 %v19515_v50  ;;  %v8400_v50 = vld [vmem:[%s21820_s1 + $0x60] sm:$0xff] }
 0x756   :  { %13948 = vmatprep.subr.bf16.mxu0 %v21725_v48  ;;  %v19793_v58 = vpack.c.bf16 %v8400_v50, %v8396_v63  ;;  %v21823_v50 = vld [vmem:[#allocation24_spill] sm:$0xff] }
 0x758   :  { %13958 = vmatpush1.bf16.msra.mxu1 %v19793_v58 }
 0x759   :  { %13950 = vmatpush1.bf16.msra.mxu0 %v19537_v35  ;;  %v8390_v35 = vld [vmem:[%s21820_s1 + $0x10] sm:$0xff]  ;;  %13960 = vmatprep.subr.bf16.mxu1 %v19805_v62  ;;  %s11867_s1 = sld [smem:[#allocation6 + $0x3]] }
 0x75a   :  { %v13965_v40 = vpack.c.bf16 %v8394_v41, %v8390_v35  ;;  %13988 = vmatprep.subr.bf16.mxu0 %v13963_v32  ;;  %v21825_v41 = vld [vmem:[#allocation33_spill] sm:$0xff] }
 0x75c   :  { %8372 = vmatmul.mubr.f32.vlgmr.msra.gmra.mrb[48].mxu0 %v8017_v45  ;;  %13962 = vmatpush1.bf16.msra.mxu1 %v13961_v43 }
 0x75d   :  { %8695 = vmatprep.mubr.f32.mxu0 %v21723_v13  ;;  %13990 = vmatpush1.bf16.msra.mxu0 %v13965_v40 }
 0x75e   :  { %13992 = vmatprep.subr.bf16.mxu0 %v13967_v24  ;;  %13964 = vmatprep.subr.bf16.mxu1 %v13963_v32  ;;  %v21826_v32 = vld [vmem:[#allocation10_spill] sm:$0xff] }
 0x761   :  { %13994 = vmatpush1.bf16.msra.mxu0 %v13969_v10 }
 0x762   :  { %13996 = vmatprep.subr.bf16.mxu0 %v13971_v5 }
 0x765   :  { %13998 = vmatpush1.bf16.msra.mxu0 %v13973_v6 }
 0x766   :  { %13999 = vmatprep.subr.bf16.mxu0 %v21725_v48 }
 0x800   :  { %v13367_v18 = vpop.f32.mrb[26].mxu1 }
 0x801   :  { %v13368_v46 = vpop.f32.mrb[27].mxu1 }
 0x802   :  { %v13369_v61 = vadd.f32 %v13368_v46, %v13367_v18  ;;  %v21833_v46 = vld [vmem:[#allocation12_spill] sm:$0xff] }
 0x803   :  { %v8228_v60 = vpop.f32.mrb[34].mxu0 }
 0x804   :  { %v8229_v31 = vadd.f32 %v13369_v61, %v8228_v60  ;;  %v8230_v23 = vpop.f32.mrb[35].mxu0  ;;  %v21834_v60 = vld [vmem:[#allocation21_spill] sm:$0xff] }
 0x805   :  { %v21835_v23 = vld [vmem:[#allocation25_spill] sm:$0xff] }
 0x806   :  { %v8233_v59 = vmul.f32 0.0061728396, %v8229_v31 }
 0x808   :  { %v8378_v55 = vmul.f32 %v8233_v59, %v8233_v59 }
 0x820   :  { %v13402_v4 = vpop.f32.mrb[40].mxu1 }
 0x821   :  { %v13403_v14 = vpop.f32.mrb[41].mxu1 }
 0x822   :  { %v13404_v36 = vadd.f32 %v13403_v14, %v13402_v4  ;;  %v21836_v14 = vld [vmem:[#allocation30_spill] sm:$0xff] }
 0x82f   :  { %v8373_v8 = vpop.f32.mrb[48].mxu0 }
 0x830   :  { %v8374_v56 = vadd.f32 %v13404_v36, %v8373_v8  ;;  %v8375_v27 = vpop.f32.mrb[49].mxu0 }
 0x832   :  { %v8377_v26 = vmul.f32 0.0061728396, %v8374_v56  ;;  %v21838_v56 = vld [vmem:[#allocation11_spill] sm:$0xff] }
 0x834   :  { %v8379_v37 = vsub.f32 %v8377_v26, %v8378_v55  ;;  %v21839_v26 = vld [vmem:[#allocation14_spill] sm:$0xff] }
 0x836   :  { %v8380_v54 = vmax.f32 %v8379_v37, 0.0 }
 0x838   :  { %v8382_v33 = vadd.f32 1e-05, %v8380_v54 }
 0x83a   :  { %15561 = vrsqrt.f32 %v8382_v33 }
 0x844   :  { %v15562_v20 = vpop.eup %15561 }
 0x845   :  { %v8384_v39 = vmul.f32 %v15562_v20, %v8381_v53 }
 0x847   :  { %12856 = vmatmul.mubr.msk.f32.vlgmr.msra.gmra.mrb[42].mxu1 %vm7939_vm9, %v8384_v39  ;;  %v8386_v45 = vmul.f32 %v8384_v39, %v8233_v59  ;;  %v21837_v59 = vld [vmem:[#allocation34_spill] sm:$0xff] }
 0x848   :  { %13966 = vmatpush1.bf16.msra.mxu1 %v13965_v40  ;;  %8550 = vmatprep.mubr.f32.mxu1 %v21723_v13 }
 0x849   :  { %13968 = vmatprep.subr.bf16.mxu1 %v13967_v24  ;;  %v8387_v19 = vsub.f32 %v8385_v21, %v8386_v45  ;;  %v21831_v24 = vld [vmem:[#allocation35_spill] sm:$0xff] }
 0x84a   :  { %v21840_v21 = vld [vmem:[#allocation23_spill] sm:$0xff] }
 0x84b   :  { %12859 = vmatmul.mubr.msk.f32.vlgmr.msra.gmra.mrb[50].mxu0 %vm7939_vm9, %v8387_v19 }
 0x84c   :  { %13970 = vmatpush1.bf16.msra.mxu1 %v13969_v10 }
 0x84d   :  { %13972 = vmatprep.subr.bf16.mxu1 %v13971_v5  ;;  %v19896_v5 = vstv %s11865_s12 }
 0x850   :  { %13974 = vmatpush1.bf16.msra.mxu1 %v13973_v6  ;;  %v21832_v6 = vld [vmem:[#allocation9_spill] sm:$0xff] }
 0x851   :  { %13976 = vmatprep.subr.bf16.mxu1 %v19758_v12 }
 0x853   :  { %12857 = vmatmul.mubr.msk.f32.vlgmr.msra.gmra.mrb[44].mxu1 %vm7939_vm9, %v8384_v39 }
 0x854   :  { %13978 = vmatpush1.bf16.msra.mxu1 %v19769_v52  ;;  %8624 = vmatprep.mubr.f32.mxu1 %v21723_v13 }
 0x855   :  { %13980 = vmatprep.subr.bf16.mxu1 %v19771_v3  ;;  %v21822_v3 = vld [vmem:[#allocation20_spill] sm:$0xff] }
 0x858   :  { %13982 = vmatpush1.bf16.msra.mxu1 %v19793_v58 }
 0x859   :  { %13984 = vmatprep.subr.bf16.mxu1 %v19805_v62  ;;  %v21829_v62 = vld [vmem:[#allocation26_spill] sm:$0xff] }
 0x85c   :  { %13986 = vmatpush1.bf16.msra.mxu1 %v13961_v43 }
 0x85f   :  { %12858 = vmatmul.mubr.msk.f32.vlgmr.msra.gmra.mrb[46].mxu1 %vm7939_vm9, %v8387_v19  ;;  %v21841_v19 = vld [vmem:[#allocation27_spill] sm:$0xff] }
 0x91a   :  { %v8481_v1 = vpop.f32.mrb[42].mxu1 }
 0x91b   :  { %v8705_v12 = vrot.slane %v8481_v1, %v16816_v15  ;;  %v8483_v49 = vpop.f32.mrb[43].mxu1 }
 0x91c   :  { %v8709_v51 = vrot.slane %v8483_v49, %v16816_v15 }
 0x91d   :  { %v19858_v0 = vmul.f32 %v8705_v12, %v19554_v22  ;;  %v19861_v52 = vmul.f32 %v8705_v12, %v19572_v17  ;;  %v19864_v63 = vmul.f32 %v8705_v12, %v21822_v3  ;;  %v19867_v44 = vmul.f32 %v8705_v12, %v21823_v50  ;;  %v21827_v22 = vld [vmem:[#allocation13_spill] sm:$0xff] }
 0x91e   :  { %v19870_v35 = vmul.f32 %v8705_v12, %v21824_v29  ;;  %v19873_v58 = vmul.f32 %v8705_v12, %v21825_v41  ;;  %v19876_v40 = vmul.f32 %v8709_v51, %v21826_v32  ;;  %v19879_v42 = vmul.f32 %v8709_v51, %v21827_v22  ;;  %v8697_v17 = vpop.f32.mrb[50].mxu0  ;;  %v21842_v32 = vld [vmem:[#allocation32_spill] sm:$0xff] }
 0x91f   :  { %v19882_v57 = vmul.f32 %v8709_v51, %v21828_v30  ;;  %v19885_v25 = vmul.f32 %v8709_v51, %v21829_v62  ;;  %v19888_v16 = vmul.f32 %v8709_v51, %v21830_v9  ;;  %v19891_v38 = vmul.f32 %v8709_v51, %v21831_v24  ;;  %v8699_v11 = vpop.f32.mrb[51].mxu0 }
 0x920   :  { %v8753_v47 = vrot.slane %v8697_v17, %v16816_v15  ;;  %v8757_v7 = vrot.slane %v8699_v11, %v16816_v15  ;;  %v21843_v17 = vld [vmem:[#allocation36_spill] sm:$0xff] }
 0x926   :  { %v8552_v10 = vpop.f32.mrb[44].mxu1 }
 0x927   :  { %v8713_v43 = vrot.slane %v8552_v10, %v16816_v15  ;;  %v8554_v28 = vpop.f32.mrb[45].mxu1 }
 0x928   :  { %v8717_v34 = vrot.slane %v8554_v28, %v16816_v15 }
 0x929   :  { %v8720_v18 = vmul.f32 %v8713_v43, %v21832_v6  ;;  %v8724_v61 = vmul.f32 %v8713_v43, %v21833_v46  ;;  %v8728_v31 = vmul.f32 %v8713_v43, %v21834_v60  ;;  %v8732_v4 = vmul.f32 %v8713_v43, %v21835_v23 }
 0x92a   :  { %v8736_v36 = vmul.f32 %v8713_v43, %v21836_v14  ;;  %v8740_v8 = vmul.f32 %v8713_v43, %v21837_v59  ;;  %v8721_v27 = vmul.f32 %v8717_v34, %v21838_v56  ;;  %v8725_v55 = vmul.f32 %v8717_v34, %v21839_v26 }
 0x92b   :  { %v8760_v37 = vadd.f32 %v8753_v47, %v8720_v18  ;;  %v8764_v54 = vadd.f32 %v8753_v47, %v8724_v61  ;;  %v8768_v33 = vadd.f32 %v8753_v47, %v8728_v31  ;;  %v8772_v53 = vadd.f32 %v8753_v47, %v8732_v4 }
 0x92c   :  { %v8776_v20 = vadd.f32 %v8753_v47, %v8736_v36  ;;  %v8780_v39 = vadd.f32 %v8753_v47, %v8740_v8  ;;  %v8729_v45 = vmul.f32 %v8717_v34, %v21840_v21  ;;  %v8733_v2 = vmul.f32 %v8717_v34, %v21841_v19 }
 0x92d   :  { %vm8784_vm7 = vcmp.gt.f32.partialorder %v8760_v37, 0.0  ;;  %vm8788_vm3 = vcmp.gt.f32.partialorder %v8764_v54, 0.0  ;;  %vm8792_vm6 = vcmp.gt.f32.partialorder %v8768_v33, 0.0  ;;  %vm8796_vm15 = vcmp.gt.f32.partialorder %v8772_v53, 0.0 }
 0x92e   :  { %vm8800_vm8 = vcmp.gt.f32.partialorder %v8776_v20, 0.0  ;;  %vm8804_vm4 = vcmp.gt.f32.partialorder %v8780_v39, 0.0  ;;  %v8809_v1 = vmul.f32 %v19896_v5, %v8760_v37  ;;  %v8813_v12 = vmul.f32 %v19896_v5, %v8764_v54 }
 0x92f   :  { %v8817_v49 = vmul.f32 %v19896_v5, %v8768_v33  ;;  %v8821_v51 = vmul.f32 %v19896_v5, %v8772_v53  ;;  %v8825_v3 = vmul.f32 %v19896_v5, %v8776_v20  ;;  %v8829_v50 = vmul.f32 %v19896_v5, %v8780_v39 }
 0x930   :  { %v8833_v29 = vsel %vm8784_vm7, %v8760_v37, %v8809_v1  ;;  %v8837_v41 = vsel %vm8788_vm3, %v8764_v54, %v8813_v12  ;;  %v8737_v22 = vmul.f32 %v8717_v34, %v21842_v32  ;;  %v8741_v30 = vmul.f32 %v8717_v34, %v21843_v17 }
 0x931   :  { %v8841_v62 = vsel %vm8792_vm6, %v8768_v33, %v8817_v49  ;;  %v8845_v9 = vsel %vm8796_vm15, %v8772_v53, %v8821_v51  ;;  %v8849_v24 = vsel %vm8800_vm8, %v8776_v20, %v8825_v3  ;;  %v8853_v11 = vsel %vm8804_vm4, %v8780_v39, %v8829_v50 }
 0x932   :  { %v19919_v43 = vsel %vm7873_vm1, %v8833_v29, -1e+30  ;;  %v19923_v47 = vsel %vm7874_vm2, %v8837_v41, -1e+30  ;;  %v19927_v18 = vsel %vm7875_vm11, %v8841_v62, -1e+30  ;;  %v8761_v46 = vadd.f32 %v8757_v7, %v8721_v27 }
 0x933   :  { %v19931_v34 = vsel %vm7876_vm10, %v8845_v9, -1e+30  ;;  %v19935_v31 = vsel %vm7877_vm12, %v8849_v24, -1e+30  ;;  %v8877_v4 = vsel %vm7878_vm13, %v8853_v11, -1e+30  ;;  %v8765_v14 = vadd.f32 %v8757_v7, %v8725_v55 }
 0x934   :  { %8881 = vst [vmem:[#allocation4 + $0x10] sm:$0xff] %v19919_v43  ;;  %8901 = vst [vmem:[#allocation4 + $0xb0] sm:$0xf] %v8877_v4  ;;  %v8769_v36 = vadd.f32 %v8757_v7, %v8729_v45  ;;  %v8773_v59 = vadd.f32 %v8757_v7, %v8733_v2  ;;  %v8777_v8 = vadd.f32 %v8757_v7, %v8737_v22  ;;  %v8626_v27 = vpop.f32.mrb[46].mxu1  ;;  %vm8785_vm0 = vcmp.gt.f32.partialorder %v8761_v46, 0.0 }
 0x935   :  { %v8781_v56 = vadd.f32 %v8757_v7, %v8741_v30  ;;  %vm8789_vm5 = vcmp.gt.f32.partialorder %v8765_v14, 0.0  ;;  %v8810_v26 = vmul.f32 %v19896_v5, %v8761_v46  ;;  %v8814_v37 = vmul.f32 %v19896_v5, %v8765_v14  ;;  %v8628_v54 = vpop.f32.mrb[47].mxu1 }
 0x936   :  { %vm8793_vm7 = vcmp.gt.f32.partialorder %v8769_v36, 0.0  ;;  %vm8797_vm3 = vcmp.gt.f32.partialorder %v8773_v59, 0.0  ;;  %vm8801_vm6 = vcmp.gt.f32.partialorder %v8777_v8, 0.0  ;;  %v8818_v33 = vmul.f32 %v19896_v5, %v8769_v36 }
 0x937   :  { %vm8805_vm15 = vcmp.gt.f32.partialorder %v8781_v56, 0.0  ;;  %v8822_v55 = vmul.f32 %v19896_v5, %v8773_v59  ;;  %v8826_v53 = vmul.f32 %v19896_v5, %v8777_v8  ;;  %v8830_v7 = vmul.f32 %v19896_v5, %v8781_v56 }
 0x938   :  { %v8834_v20 = vsel %vm8785_vm0, %v8761_v46, %v8810_v26  ;;  %v8838_v39 = vsel %vm8789_vm5, %v8765_v14, %v8814_v37  ;;  %v8745_v21 = vrot.slane %v8626_v27, %v16816_v15  ;;  %v8749_v45 = vrot.slane %v8628_v54, %v16816_v15 }
 0x939   :  { %v8842_v19 = vsel %vm8793_vm7, %v8769_v36, %v8818_v33  ;;  %v8846_v2 = vsel %vm8797_vm3, %v8773_v59, %v8822_v55  ;;  %v8850_v1 = vsel %vm8801_vm6, %v8777_v8, %v8826_v53  ;;  %v8854_v12 = vsel %vm8805_vm15, %v8781_v56, %v8830_v7 }
 0x93a   :  { %v8858_v49 = vsel %vm7873_vm1, %v8834_v20, -1e+30  ;;  %v8862_v51 = vsel %vm7874_vm2, %v8838_v39, -1e+30  ;;  %v8866_v3 = vsel %vm7875_vm11, %v8842_v19, -1e+30  ;;  %v8758_v50 = vadd.f32 %v8745_v21, %v19858_v0 }
 0x93b   :  { %v8870_v29 = vsel %vm7876_vm10, %v8846_v2, -1e+30  ;;  %v8874_v41 = vsel %vm7877_vm12, %v8850_v1, -1e+30  ;;  %v8878_v32 = vsel %vm7878_vm13, %v8854_v12, -1e+30  ;;  %v8762_v22 = vadd.f32 %v8745_v21, %v19861_v52 }
 0x93c   :  { %8882 = vst.msk [vmem:[#allocation4 + $0x18] sm:$0xff] %vm7939_vm9, %v8858_v49  ;;  %8886 = vst.msk [vmem:[#allocation4 + $0x38] sm:$0xff] %vm7939_vm9, %v8862_v51  ;;  %v8766_v0 = vadd.f32 %v8745_v21, %v19864_v63  ;;  %v8770_v17 = vadd.f32 %v8745_v21, %v19867_v44  ;;  %v8774_v30 = vadd.f32 %v8745_v21, %v19870_v35  ;;  %v19972_v9 = vld [vmem:[#allocation4 + $0xb0] sm:$0xff]  ;;  %vm8782_vm8 = vcmp.gt.f32.partialorder %v8758_v50, 0.0 }
 0x93d   :  { %8890 = vst.msk [vmem:[#allocation4 + $0x58] sm:$0xff] %vm7939_vm9, %v8866_v3  ;;  %8894 = vst.msk [vmem:[#allocation4 + $0x78] sm:$0xff] %vm7939_vm9, %v8870_v29  ;;  %v8778_v62 = vadd.f32 %v8745_v21, %v19873_v58  ;;  %vm8786_vm4 = vcmp.gt.f32.partialorder %v8762_v22, 0.0  ;;  %v8807_v52 = vmul.f32 %v19896_v5, %v8758_v50  ;;  %v8811_v24 = vmul.f32 %v19896_v5, %v8762_v22  ;;  %v8982_v2 = vld [vmem:[#allocation4 + $0x10] sm:$0xfc] }
 0x93e   :  { %8898 = vst.msk [vmem:[#allocation4 + $0x98] sm:$0xff] %vm7939_vm9, %v8874_v41  ;;  %8954 = vst [vmem:[#allocation5 + $0xb0] sm:$0xff] %v19972_v9  ;;  %vm8790_vm0 = vcmp.gt.f32.partialorder %v8766_v0, 0.0  ;;  %vm8794_vm5 = vcmp.gt.f32.partialorder %v8770_v17, 0.0  ;;  %vm8798_vm7 = vcmp.gt.f32.partialorder %v8774_v30, 0.0  ;;  %v8815_v63 = vmul.f32 %v19896_v5, %v8766_v0 }
 0x93f   :  { %8902 = vst.msk [vmem:[#allocation4 + $0xb8] sm:$0xf] %vm7949_vm14, %v8878_v32  ;;  %vm8802_vm3 = vcmp.gt.f32.partialorder %v8778_v62, 0.0  ;;  %v8819_v44 = vmul.f32 %v19896_v5, %v8770_v17  ;;  %v8823_v35 = vmul.f32 %v19896_v5, %v8774_v30  ;;  %v8827_v58 = vmul.f32 %v19896_v5, %v8778_v62  ;;  %v9171_v3 = vld [vmem:[#allocation4 + $0x10] sm:$0xf0] }
 0x940   :  { %v8831_v11 = vsel %vm8782_vm8, %v8758_v50, %v8807_v52  ;;  %v8835_v46 = vsel %vm8786_vm4, %v8762_v22, %v8811_v24  ;;  %v8759_v4 = vadd.f32 %v8749_v45, %v19876_v40  ;;  %v8763_v14 = vadd.f32 %v8749_v45, %v19879_v42  ;;  %v15397_v29 = vld [vmem:[%s21850_s29 + $0x1b0] ss:$8 sps:$4 sm:$0xff]  }
 0x941   :  { %v8839_v36 = vsel %vm8790_vm0, %v8766_v0, %v8815_v63  ;;  %v8843_v59 = vsel %vm8794_vm5, %v8770_v17, %v8819_v44  ;;  %v8847_v8 = vsel %vm8798_vm7, %v8774_v30, %v8823_v35  ;;  %v8851_v56 = vsel %vm8802_vm3, %v8778_v62, %v8827_v58  ;;  %v15399_v0 = vld [vmem:[%s21850_s29 + $0x1b4] ss:$8 sps:$4 sm:$0xff]  }
 0x942   :  { %v19985_v27 = vsel %vm7873_vm1, %v8831_v11, -1e+30  ;;  %v19989_v26 = vsel %vm7874_vm2, %v8835_v46, -1e+30  ;;  %v19993_v37 = vsel %vm7875_vm11, %v8839_v36, -1e+30  ;;  %v8767_v40 = vadd.f32 %v8749_v45, %v19882_v57  ;;  %10129 = vmatprep.subr.bf16.mxu1 %v15399_v0 }
 0x943   :  { %v19998_v42 = vsel %vm7876_vm10, %v8843_v59, -1e+30  ;;  %v20002_v54 = vsel %vm7877_vm12, %v8847_v8, -1e+30  ;;  %v8875_v33 = vsel %vm7878_vm13, %v8851_v56, -1e+30  ;;  %v8771_v55 = vadd.f32 %v8749_v45, %v19885_v25  ;;  %10130 = vmatpush1.bf16.msra.mxu1 %v15397_v29 }
 0x944   :  { %8879 = vst [vmem:[#allocation4] sm:$0xff] %v19985_v27  ;;  %8899 = vst [vmem:[#allocation4 + $0xa0] sm:$0xf] %v8875_v33  ;;  %v8775_v53 = vadd.f32 %v8749_v45, %v19888_v16  ;;  %v8779_v57 = vadd.f32 %v8749_v45, %v19891_v38  ;;  %vm8783_vm6 = vcmp.gt.f32.partialorder %v8759_v4, 0.0  ;;  %vm8787_vm15 = vcmp.gt.f32.partialorder %v8763_v14, 0.0  ;;  %v20010_v7 = vld [vmem:[#allocation4 + $0x38] sm:$0xff] }
 0x945   :  { %v20012_v20 = vld [vmem:[#allocation4 + $0x58] sm:$0xff]  ;;  %vm8791_vm8 = vcmp.gt.f32.partialorder %v8767_v40, 0.0  ;;  %vm8795_vm4 = vcmp.gt.f32.partialorder %v8771_v55, 0.0  ;;  %v8808_v39 = vmul.f32 %v19896_v5, %v8759_v4  ;;  %v8812_v21 = vmul.f32 %v19896_v5, %v8763_v14  ;;  %8939 = vst.msk [vmem:[#allocation5 + $0x38] sm:$0xff] %vm7939_vm9, %v20010_v7 }
 0x946   :  { %v20018_v25 = vld [vmem:[#allocation4 + $0x78] sm:$0xff]  ;;  %8943 = vst.msk [vmem:[#allocation5 + $0x58] sm:$0xff] %vm7939_vm9, %v20012_v20  ;;  %vm8799_vm0 = vcmp.gt.f32.partialorder %v8775_v53, 0.0  ;;  %vm8803_vm5 = vcmp.gt.f32.partialorder %v8779_v57, 0.0  ;;  %v8816_v45 = vmul.f32 %v19896_v5, %v8767_v40  ;;  %v8820_v19 = vmul.f32 %v19896_v5, %v8771_v55 }
 0x947   :  { %v20020_v16 = vld [vmem:[#allocation4 + $0x98] sm:$0xff]  ;;  %8947 = vst.msk [vmem:[#allocation5 + $0x78] sm:$0xff] %vm7939_vm9, %v20018_v25  ;;  %v8824_v1 = vmul.f32 %v19896_v5, %v8775_v53  ;;  %v8828_v12 = vmul.f32 %v19896_v5, %v8779_v57  ;;  %v8832_v49 = vsel %vm8783_vm6, %v8759_v4, %v8808_v39  ;;  %v8836_v51 = vsel %vm8787_vm15, %v8763_v14, %v8812_v21 }
 0x948   :  { %v8911_v38 = vld [vmem:[#allocation4 + $0x18] sm:$0xff]  ;;  %8951 = vst.msk [vmem:[#allocation5 + $0x98] sm:$0xff] %vm7939_vm9, %v20020_v16  ;;  %v8840_v41 = vsel %vm8791_vm8, %v8767_v40, %v8816_v45  ;;  %v8844_v32 = vsel %vm8795_vm4, %v8771_v55, %v8820_v19  ;;  %v20044_v22 = vsel %vm7873_vm1, %v8832_v49, -1e+30  ;;  %v20048_v5 = vsel %vm7874_vm2, %v8836_v51, -1e+30 }
 0x949   :  { %8935 = vst.msk [vmem:[#allocation5 + $0x18] sm:$0xff] %vm7939_vm9, %v8911_v38  ;;  %v20035_v50 = vld [vmem:[#allocation4 + $0xb8] sm:$0xff]  ;;  %v8848_v17 = vsel %vm8799_vm0, %v8775_v53, %v8824_v1  ;;  %v8852_v30 = vsel %vm8803_vm5, %v8779_v57, %v8828_v12  ;;  %v20059_v10 = vsel %vm7875_vm11, %v8840_v41, -1e+30  ;;  %v20063_v28 = vsel %vm7876_vm10, %v8844_v32, -1e+30 }
 0x94a   :  { %8955 = vst.msk [vmem:[#allocation5 + $0xb8] sm:$0xff] %vm7939_vm9, %v20035_v50  ;;  %8880 = vst [vmem:[#allocation4 + $0x8] sm:$0xff] %v20044_v22  ;;  %v20068_v62 = vsel %vm7877_vm12, %v8848_v17, -1e+30  ;;  %v8876_v52 = vsel %vm7878_vm13, %v8852_v30, -1e+30 }
 0x94b   :  { %v9034_v24 = vrot.slane %v8982_v2, 2  ;;  %v9035_v63 = vrot.slane %v19923_v47, 2  ;;  %8900 = vst [vmem:[#allocation4 + $0xa8] sm:$0xf] %v8876_v52  ;;  %v9223_v6 = vrot.slane %v9171_v3, 4  ;;  %v9224_v44 = vrot.slane %v19923_v47, 4 }
 0x94c   :  { %v9044_v61 = vrot.slane %v19927_v18, 2  ;;  %v9233_v35 = vrot.slane %v19927_v18, 4  ;;  %v8980_v58 = vld [vmem:[#allocation4] sm:$0xfc]  ;;  %vm21851_vm1 = vcmask 1045504   ;;  %v9052_v11 = vrot.slane %v19931_v34, 2 }
 0x94d   :  { %v9036_v60 = vsel %vm21851_vm1, %v9034_v24, %v9035_v63  ;;  %v9241_v23 = vrot.slane %v19931_v34, 4  ;;  %v9028_v46 = vrot.slane %v8980_v58, 2  ;;  %v9169_v4 = vld [vmem:[#allocation4] sm:$0xf0]  ;;  %vm21852_vm2 = vcmask 1043456   ;;  %vm21853_vm10 = vmmov %vm21851_vm1 }
 0x94e   :  { %v20079_v14 = vld [vmem:[#allocation4 + $0xa0] sm:$0xff]  ;;  %v9098_v36 = vmax.f32 %v19919_v43, %v9036_v60  ;;  %v9225_v59 = vsel %vm21852_vm2, %v9223_v6, %v9224_v44  ;;  %v9045_v8 = vsel %vm21853_vm10, %v9035_v63, %v9044_v61  ;;  %vm21854_vm11 = vmmov %vm21852_vm2  ;;  %v9029_v53 = vrot.slane %v19989_v26, 2  ;;  %v15405_v41 = vld [vmem:[%s21850_s29 + $0x1d4] ss:$8 sps:$4 sm:$0xff]  }
 0x94f   :  { %v9234_v56 = vsel %vm21854_vm11, %v9224_v44, %v9233_v35  ;;  %8952 = vst [vmem:[#allocation5 + $0xa0] sm:$0xff] %v20079_v14  ;;  %v9102_v40 = vmax.f32 %v19923_v47, %v9045_v8  ;;  %vm21855_vm12 = vmmov %vm21851_vm1  ;;  %v15400_v43 = vld [vmem:[%s21850_s29 + $0x1c0] ss:$8 sps:$4 sm:$0xff]   ;;  %v9217_v21 = vrot.slane %v9169_v4, 4  ;;  %v9218_v38 = vrot.slane %v19989_v26, 4 }
 0x950   :  { %v9053_v33 = vsel %vm21855_vm12, %v9044_v61, %v9052_v11  ;;  %vm21856_vm13 = vmmov %vm21852_vm2  ;;  %v20093_v57 = vmax.f32 %v9098_v36, %v9225_v59  ;;  %v15402_v47 = vld [vmem:[%s21850_s29 + $0x1c4] ss:$8 sps:$4 sm:$0xff]   ;;  %v9060_v2 = vrot.slane %v19935_v31, 2  ;;  %v9249_v1 = vrot.slane %v19935_v31, 4  ;;  %v15403_v52 = vld [vmem:[%s21850_s29 + $0x1d0] ss:$8 sps:$4 sm:$0xff]  }
 0x951   :  { %v9242_v55 = vsel %vm21856_vm13, %v9233_v35, %v9241_v23  ;;  %v9106_v39 = vmax.f32 %v19927_v18, %v9053_v33  ;;  %v20100_v45 = vmax.f32 %v9102_v40, %v9234_v56  ;;  %vm21857_vm7 = vmmov %vm21851_vm1  ;;  %v8981_v12 = vld [vmem:[#allocation4 + $0x8] sm:$0xfc]  ;;  %v9040_v3 = vrot.slane %v19993_v37, 2  ;;  %10131 = vmatprep.subr.bf16.mxu1 %v15402_v47 }
 0x952   :  { %v9030_v19 = vsel %vm21857_vm7, %v9028_v46, %v9029_v53  ;;  %9385 = vrot.lane.b32.xlu1 %v20093_v57, %s15602_s10  ;;  %vm21858_vm3 = vmmov %vm21852_vm2  ;;  %v9170_v29 = vld [vmem:[#allocation4 + $0x8] sm:$0xf0]  ;;  %v9229_v17 = vrot.slane %v19993_v37, 4  ;;  %10132 = vmatpush1.bf16.msra.mxu1 %v15400_v43  ;;  %v9237_v6 = vrot.slane %v19998_v42, 4  ;;  %v9031_v44 = vrot.slane %v8981_v12, 2 }
 0x953   :  { %v20107_v18 = vmax.f32 %v9106_v39, %v9242_v55  ;;  %v9096_v49 = vmax.f32 %v19985_v27, %v9030_v19  ;;  %v9219_v51 = vsel %vm21858_vm3, %v9217_v21, %v9218_v38  ;;  %vm21859_vm6 = vmmov %vm21851_vm1  ;;  %v9048_v27 = vrot.slane %v19998_v42, 2  ;;  %v20123_v30 = vld [vmem:[#allocation4 + $0xa8] sm:$0xff]  ;;  %10133 = vmatprep.subr.bf16.mxu1 %v15405_v41  ;;  %v15411_v39 = vld [vmem:[%s21850_s29 + $0x1f4] ss:$8 sps:$4 sm:$0xff]  }
 0x954   :  { %v9061_v32 = vsel %vm21859_vm6, %v9052_v11, %v9060_v2  ;;  %vm21860_vm15 = vmmov %vm21852_vm2  ;;  %8953 = vst [vmem:[#allocation5 + $0xa8] sm:$0xff] %v20123_v30  ;;  %v15408_v61 = vld [vmem:[%s21850_s29 + $0x1e4] ss:$8 sps:$4 sm:$0xff]   ;;  %v9032_v58 = vrot.slane %v20048_v5, 2  ;;  %v9220_v60 = vrot.slane %v9170_v29, 4  ;;  %v9221_v11 = vrot.slane %v20048_v5, 4 }
 0x955   :  { %v9250_v0 = vsel %vm21860_vm15, %v9241_v23, %v9249_v1  ;;  %v20128_v24 = vmax.f32 %v9096_v49, %v9219_v51  ;;  %v9110_v63 = vmax.f32 %v19931_v34, %v9061_v32  ;;  %vm21861_vm8 = vmmov %vm21851_vm1  ;;  %v9042_v4 = vrot.slane %v20059_v10, 2  ;;  %v15406_v40 = vld [vmem:[%s21850_s29 + $0x1e0] ss:$8 sps:$4 sm:$0xff]   ;;  %v15409_v29 = vld [vmem:[%s21850_s29 + $0x1f0] ss:$8 sps:$4 sm:$0xff]  }
 0x956   :  { %v9049_v35 = vsel %vm21861_vm8, %v9040_v3, %v9048_v27  ;;  %9393 = vrot.lane.b32.xlu1 %v20100_v45, %s15602_s10  ;;  %vm21862_vm4 = vmmov %vm21852_vm2  ;;  %v9231_v8 = vrot.slane %v20059_v10, 4  ;;  %10134 = vmatpush1.bf16.msra.mxu1 %v15403_v52  ;;  %v9050_v19 = vrot.slane %v20063_v28, 2  ;;  %v9239_v12 = vrot.slane %v20063_v28, 4  ;;  %v8978_v52 = vld [vmem:[#allocation5 + $0xb0] sm:$0x3f] }
 0x957   :  { %9381 = vrot.lane.b32.xlu0 %v20128_v24, %s15602_s10  ;;  %v20143_v34 = vmax.f32 %v9110_v63, %v9250_v0  ;;  %v9104_v23 = vmax.f32 %v19993_v37, %v9049_v35  ;;  %v9238_v46 = vsel %vm21862_vm4, %v9229_v17, %v9237_v6  ;;  %vm21863_vm0 = vmmov %vm21851_vm1  ;;  %10135 = vmatprep.subr.bf16.mxu1 %v15408_v61  ;;  %v9245_v51 = vrot.slane %v20002_v54, 4  ;;  %v15414_v63 = vld [vmem:[%s21850_s29 + $0x204] ss:$8 sps:$4 sm:$0xff]  }
 0x958   :  { %v9033_v36 = vsel %vm21863_vm0, %v9031_v44, %v9032_v58  ;;  %vm21864_vm5 = vmmov %vm21852_vm2 }
 0x959   :  { %v9222_v59 = vsel %vm21864_vm5, %v9220_v60, %v9221_v11  ;;  %vm21865_vm1 = vmmov %vm21863_vm0  ;;  %v20155_v33 = vmax.f32 %v9104_v23, %v9238_v46  ;;  %v9097_v37 = vmax.f32 %v20044_v22, %v9033_v36  ;;  %v8976_v60 = vld [vmem:[#allocation5 + $0xa0] sm:$0x3f] }
 0x95a   :  { %v9041_v56 = vsel %vm21865_vm1, %v9029_v53, %v9040_v3  ;;  %vm21866_vm2 = vmmov %vm21863_vm0  ;;  %9401 = vrot.lane.b32.xlu1 %v20107_v18, %s15602_s10  ;;  %v9058_v3 = vrot.slane %v20068_v62, 2  ;;  %10136 = vmatpush1.bf16.msra.mxu1 %v15406_v40 }
 0x95b   :  { %v9043_v55 = vsel %vm21866_vm2, %v9032_v58, %v9042_v4  ;;  %v9100_v43 = vmax.f32 %v19989_v26, %v9041_v56  ;;  %vm21867_vm10 = vmmov %vm21858_vm3  ;;  %9397 = vrot.lane.b32.xlu0 %v20155_v33, %s15602_s10  ;;  %v20171_v26 = vmax.f32 %v9097_v37, %v9222_v59  ;;  %10137 = vmatprep.subr.bf16.mxu1 %v15411_v39  ;;  %v9257_v58 = vrot.slane %v19972_v9, 4  ;;  %v15415_v39 = vld [vmem:[%s21850_s29 + $0x210] ss:$8 sps:$4 sm:$0xff]  }
 0x95c   :  { %v9101_v53 = vmax.f32 %v20048_v5, %v9043_v55  ;;  %v9232_v21 = vsel %vm21867_vm10, %v9221_v11, %v9231_v8  ;;  %vm21868_vm11 = vmmov %vm21858_vm3  ;;  %v9056_v5 = vrot.slane %v20002_v54, 2  ;;  %v9066_v56 = vrot.slane %v20123_v30, 2  ;;  %v8963_v55 = vld [vmem:[#allocation5 + $0x38] sm:$0xff] }
 0x95d   :  { %v9230_v47 = vsel %vm21868_vm11, %v9218_v38, %v9229_v17  ;;  %vm21869_vm12 = vmmov %vm21863_vm0  ;;  %v9247_v17 = vrot.slane %v20068_v62, 4  ;;  %v9038_v37 = vrot.slane %v20010_v7, 2  ;;  %vm9143_vm10 = vcmask 390144  }
 0x95e   :  { %v20173_v22 = vmax.f32 %v9100_v43, %v9230_v47  ;;  %v20177_v49 = vmax.f32 %v9101_v53, %v9232_v21  ;;  %v9051_v38 = vsel %vm21869_vm12, %v9042_v4, %v9050_v19  ;;  %vm21870_vm13 = vmmov %vm21858_vm3  ;;  %9409 = vrot.lane.b32.xlu1 %v20143_v34, %s15602_s10  ;;  %v9064_v4 = vrot.slane %v20079_v14, 2  ;;  %10138 = vmatpush1.bf16.msra.mxu1 %v15409_v29  ;;  %v8983_v53 = vld [vmem:[#allocation4 + $0x18] sm:$0xfc]  ;;  %v15420_v21 = vld [vmem:[%s21850_s29 + $0x224] ss:$8 sps:$4 sm:$0xff]  }
 0x95f   :  { %v9105_v41 = vmax.f32 %v20059_v10, %v9051_v38  ;;  %v9240_v32 = vsel %vm21870_vm13, %v9231_v8, %v9239_v12  ;;  %vm21871_vm7 = vmmov %vm21863_vm0  ;;  %v9246_v10 = vsel %vm21858_vm3, %v9237_v6, %v9245_v51  ;;  %9520 = vrot.lane.b32.xlu0 %v20128_v24, %s15603_s4  ;;  %10139 = vmatprep.subr.bf16.mxu1 %v15414_v63  ;;  %v9046_v43 = vrot.slane %v20012_v20, 2  ;;  %v8967_v29 = vld [vmem:[#allocation5 + $0x58] sm:$0xff] }
 0x960   :  { %v9057_v0 = vsel %vm21871_vm7, %v9048_v27, %v9056_v5  ;;  %vm21872_vm6 = vmmov %vm21863_vm0  ;;  %v9068_v27 = vrot.slane %v19972_v9, 2  ;;  %v8977_v9 = vld [vmem:[#allocation5 + $0xa8] sm:$0x3f]  ;;  %v9062_v38 = vrot.slane %v20020_v16, 2 }
 0x961   :  { %v9108_v44 = vmax.f32 %v19998_v42, %v9057_v0  ;;  %v9059_v61 = vsel %vm21872_vm6, %v9050_v19, %v9058_v3  ;;  %v20206_v35 = vmax.f32 %v9105_v41, %v9240_v32  ;;  %vm21873_vm15 = vmmov %vm21858_vm3  ;;  %v9047_v47 = vsel %vm21863_vm0, %v9038_v37, %v9046_v43  ;;  %v8971_v19 = vld [vmem:[#allocation5 + $0x78] sm:$0xff] }
 0x962   :  { %v9109_v42 = vmax.f32 %v20063_v28, %v9059_v61  ;;  %v9248_v6 = vsel %vm21873_vm15, %v9239_v12, %v9247_v17  ;;  %vm21874_vm8 = vmmov %vm21863_vm0  ;;  %v9118_v46 = vmax.f32 %v8978_v52, %v9068_v27  ;;  %v15412_v28 = vld [vmem:[%s21850_s29 + $0x200] ss:$8 sps:$4 sm:$0xff]   ;;  %9524 = vrot.lane.b32.xlu1 %v20093_v57, %s15603_s4  ;;  %v9054_v12 = vrot.slane %v20018_v25, 2  ;;  %v8959_v0 = vld [vmem:[#allocation5 + $0x18] sm:$0xff] }
 0x963   :  { %v20213_v11 = vmax.f32 %v9108_v44, %v9246_v10  ;;  %v9069_v23 = vsel %vm21874_vm8, %v9060_v2, %v9068_v27  ;;  %vm21875_vm4 = vmmov %vm21858_vm3  ;;  %v9116_v2 = vmax.f32 %v8976_v60, %v9064_v4  ;;  %9383 = vrot.lane.b32.xlu0 %v20171_v26, %s15602_s10  ;;  %10140 = vmatpush1.bf16.msra.mxu1 %v15412_v28  ;;  %v9037_v52 = vrot.slane %v8983_v53, 2  ;;  %v15418_v44 = vld [vmem:[%s21850_s29 + $0x220] ss:$8 sps:$4 sm:$0xff]  }
 0x964   :  { %v20222_v36 = vmax.f32 %v9109_v42, %v9248_v6  ;;  %v9114_v59 = vmax.f32 %v19935_v31, %v9069_v23  ;;  %v9258_v8 = vsel %vm21875_vm4, %v9249_v1, %v9257_v58  ;;  %9142 = vst [vmem:[#allocation5 + $0xb0] sm:$0x3f] %v9118_v46  ;;  %v15417_v31 = vld [vmem:[%s21850_s29 + $0x214] ss:$8 sps:$4 sm:$0xff]   ;;  %v9117_v1 = vmax.f32 %v8977_v9, %v9066_v56  ;;  %vm21876_vm5 = vmmov %vm21863_vm0 }
 0x965   :  { %9140 = vst [vmem:[#allocation5 + $0xa0] sm:$0x3f] %v9116_v2  ;;  %10141 = vmatprep.subr.bf16.mxu1 %v15417_v31  ;;  %v9103_v41 = vmax.f32 %v8963_v55, %v9047_v47  ;;  %v9063_v32 = vsel %vm21876_vm5, %v9054_v12, %v9062_v38  ;;  %vm21877_vm1 = vmmov %vm21863_vm0  ;;  %v8979_v42 = vld [vmem:[#allocation5 + $0xb8] sm:$0x3f]  ;;  %v9253_v23 = vrot.slane %v20079_v14, 4  ;;  %v9070_v28 = vrot.slane %v20035_v50, 2 }
 0x966   :  { %v20235_v40 = vmax.f32 %v9114_v59, %v9258_v8  ;;  %9141 = vst [vmem:[#allocation5 + $0xa8] sm:$0x3f] %v9117_v1  ;;  %9532 = vrot.lane.b32.xlu1 %v20100_v45, %s15603_s4  ;;  %v9055_v63 = vsel %vm21877_vm1, %v9046_v43, %v9054_v12  ;;  %v9111_v61 = vmax.f32 %v8971_v19, %v9063_v32  ;;  %v15423_v6 = vld [vmem:[%s21850_s29 + $0x234] ss:$8 sps:$4 sm:$0xff]   ;;  %vm21878_vm2 = vmmov %vm21863_vm0  ;;  %v9255_v8 = vrot.slane %v20123_v30, 4 }
 0x967   :  { %9391 = vrot.lane.b32.xlu0 %v20177_v49, %s15602_s10  ;;  %10142 = vmatpush1.bf16.msra.mxu1 %v15415_v39  ;;  %9127 = vst.msk [vmem:[#allocation5 + $0x38] sm:$0xff] %vm7939_vm9, %v9103_v41  ;;  %v9107_v27 = vmax.f32 %v8967_v29, %v9055_v63  ;;  %v9039_v46 = vsel %vm21878_vm2, %v9037_v52, %v9038_v37  ;;  %v8975_v59 = vld [vmem:[#allocation5 + $0x98] sm:$0xff]  ;;  %v9227_v2 = vrot.slane %v20010_v7, 4  ;;  %v9235_v31 = vrot.slane %v20012_v20, 4  ;;  %vm21879_vm11 = vmmov %vm21863_vm0  ;;  %v15426_v19 = vld [vmem:[%s21850_s29 + $0x244] ss:$8 sps:$4 sm:$0xff]  }
 0x968   :  { %10143 = vmatprep.subr.bf16.mxu1 %v15420_v21  ;;  %9135 = vst.msk [vmem:[#allocation5 + $0x78] sm:$0xff] %vm7939_vm9, %v9111_v61  ;;  %v9119_v1 = vmax.f32 %v8979_v42, %v9070_v28  ;;  %v9071_v55 = vsel %vm21879_vm11, %v9062_v38, %v9070_v28  ;;  %v15421_v7 = vld [vmem:[%s21850_s29 + $0x230] ss:$8 sps:$4 sm:$0xff]   ;;  %v9172_v39 = vld [vmem:[#allocation4 + $0x18] sm:$0xf0]  ;;  %v9243_v20 = vrot.slane %v20018_v25, 4  ;;  %vm21880_vm12 = vmmov %vm21858_vm3 }
 0x969   :  { %9131 = vst.msk [vmem:[#allocation5 + $0x58] sm:$0xff] %vm7939_vm9, %v9107_v27  ;;  %v9115_v53 = vmax.f32 %v8975_v59, %v9071_v55  ;;  %v9251_v47 = vrot.slane %v20020_v16, 4  ;;  %v9236_v25 = vsel %vm21880_vm12, %v9227_v2, %v9235_v31  ;;  %v9226_v38 = vrot.slane %v9172_v39, 4  ;;  %v15424_v16 = vld [vmem:[%s21850_s29 + $0x240] ss:$8 sps:$4 sm:$0xff]   ;;  %vm21881_vm13 = vmmov %vm21858_vm3 }
 0x96a   :  { %9540 = vrot.lane.b32.xlu1 %v20107_v18, %s15603_s4  ;;  %9144 = vst.msk [vmem:[#allocation5 + $0xb8] sm:$0x3f] %vm9143_vm10, %v9119_v1  ;;  %v15429_v41 = vld [vmem:[%s21850_s29 + $0x254] ss:$8 sps:$4 sm:$0xff]   ;;  %vm21882_vm7 = vmmov %vm21858_vm3  ;;  %v15433_v55 = vld [vmem:[%s21850_s29 + $0x270] ss:$8 sps:$4 sm:$0xff]  }
 0x96b   :  { %v9167_v10 = vld [vmem:[#allocation5 + $0xb0] sm:$0xf]  ;;  %9399 = vrot.lane.b32.xlu0 %v20206_v35, %s15602_s10  ;;  %10144 = vmatpush1.bf16.msra.mxu1 %v15418_v44  ;;  %9139 = vst.msk [vmem:[#allocation5 + $0x98] sm:$0xff] %vm7939_vm9, %v9115_v53  ;;  %v9244_v63 = vsel %vm21882_vm7, %v9235_v31, %v9243_v20  ;;  %v9259_v44 = vrot.slane %v20035_v50, 4  ;;  %v9228_v42 = vsel %vm21858_vm3, %v9226_v38, %v9227_v2  ;;  %vm21883_vm6 = vmmov %vm21858_vm3  ;;  %v15442_v14 = vld [vmem:[%s21850_s29 + $0x2a0] ss:$8 sps:$4 sm:$0xff]  }
 0x96c   :  { %v9307_v60 = vmax.f32 %v9167_v10, %v9257_v58  ;;  %v9165_v9 = vld [vmem:[#allocation5 + $0xa0] sm:$0xf]  ;;  %v9099_v58 = vmax.f32 %v8959_v0, %v9039_v46  ;;  %10145 = vmatprep.subr.bf16.mxu1 %v15423_v6  ;;  %v9252_v0 = vsel %vm21881_vm13, %v9243_v20, %v9251_v47  ;;  %v15427_v6 = vld [vmem:[%s21850_s29 + $0x250] ss:$8 sps:$4 sm:$0xff]   ;;  %vm21885_vm15 = vmmov %vm21863_vm0  ;;  %vm9429_vm12 = vcmask 654336  }
 0x96d   :  { %v9305_v37 = vmax.f32 %v9165_v9, %v9253_v23  ;;  %v9166_v43 = vld [vmem:[#allocation5 + $0xa8] sm:$0xf]  ;;  %v9260_v59 = vsel %vm21883_vm6, %v9251_v47, %v9259_v44  ;;  %v15432_v9 = vld [vmem:[%s21850_s29 + $0x264] ss:$8 sps:$4 sm:$0xff]   ;;  %vm21886_vm8 = vmmov %vm21858_vm3  ;;  %vm9568_vm13 = vcmask 261120  }
 0x96e   :  { %9331 = vst [vmem:[#allocation5 + $0xb0] sm:$0xf] %v9307_v60  ;;  %9123 = vst.msk [vmem:[#allocation5 + $0x18] sm:$0xff] %vm7939_vm9, %v9099_v58  ;;  %v9306_v21 = vmax.f32 %v9166_v43, %v9255_v8  ;;  %9389 = vrot.lane.b32.xlu1 %v20173_v22, %s15602_s10  ;;  %v9152_v12 = vld [vmem:[#allocation5 + $0x38] sm:$0xff]  ;;  %v15430_v58 = vld [vmem:[%s21850_s29 + $0x260] ss:$8 sps:$4 sm:$0xff]  }
 0x96f   :  { %9329 = vst [vmem:[#allocation5 + $0xa0] sm:$0xf] %v9305_v37  ;;  %9407 = vrot.lane.b32.xlu0 %v20222_v36, %s15602_s10  ;;  %10146 = vmatpush1.bf16.msra.mxu1 %v15421_v7  ;;  %v9292_v29 = vmax.f32 %v9152_v12, %v9236_v25  ;;  %v9160_v32 = vld [vmem:[#allocation5 + $0x78] sm:$0xff]  ;;  %v15438_v7 = vld [vmem:[%s21850_s29 + $0x284] ss:$8 sps:$4 sm:$0xff]   ;;  %v9254_v12 = vsel %vm21886_vm8, %v9245_v51, %v9253_v23  ;;  %vm21887_vm4 = vmmov %vm21858_vm3 }
 0x970   :  { %9330 = vst [vmem:[#allocation5 + $0xa8] sm:$0xf] %v9306_v21  ;;  %10147 = vmatprep.subr.bf16.mxu1 %v15426_v19  ;;  %v9156_v52 = vld [vmem:[#allocation5 + $0x58] sm:$0xff]  ;;  %v9300_v10 = vmax.f32 %v9160_v32, %v9252_v0  ;;  %v15436_v20 = vld [vmem:[%s21850_s29 + $0x280] ss:$8 sps:$4 sm:$0xff]   ;;  %v9067_v19 = vsel %vm21885_vm15, %v9058_v3, %v9066_v56  ;;  %v21888_v0 = vmov 0  }
 0x971   :  { %9316 = vst.msk [vmem:[#allocation5 + $0x38] sm:$0xff] %vm7939_vm9, %v9292_v29  ;;  %v9296_v61 = vmax.f32 %v9156_v52, %v9244_v63  ;;  %v9168_v60 = vld [vmem:[#allocation5 + $0xb8] sm:$0xf]  ;;  %v15435_v37 = vld [vmem:[%s21850_s29 + $0x274] ss:$8 sps:$4 sm:$0xff]   ;;  %v9113_v3 = vmax.f32 %v20068_v62, %v9067_v19  ;;  %v12860_v32 = vld [vmem:[%s21624_s16 + $0x60] sm:$0xff] }
 0x972   :  { %9405 = vrot.lane.b32.xlu1 %v20213_v11, %s15602_s10  ;;  %9324 = vst.msk [vmem:[#allocation5 + $0x78] sm:$0xff] %vm7939_vm9, %v9300_v10  ;;  %v9308_v46 = vmax.f32 %v9168_v60, %v9259_v44  ;;  %v9164_v28 = vld [vmem:[#allocation5 + $0x98] sm:$0xff]  ;;  %v15444_v56 = vld [vmem:[%s21850_s29 + $0x2a4] ss:$8 sps:$4 sm:$0xff]   ;;  %vm10660_vm1 = vcmp.gt.f32.partialorder %v12860_v32, 0.0  ;;  %v12862_v44 = vld [vmem:[%s21624_s16 + $0x70] sm:$0xff] }
 0x973   :  { %9522 = vrot.lane.b32.xlu0 %v20171_v26, %s15603_s4  ;;  %10148 = vmatpush1.bf16.msra.mxu1 %v15424_v16  ;;  %9320 = vst.msk [vmem:[#allocation5 + $0x58] sm:$0xff] %vm7939_vm9, %v9296_v61  ;;  %v9304_v2 = vmax.f32 %v9164_v28, %v9260_v59  ;;  %v15439_v25 = vld [vmem:[%s21850_s29 + $0x290] ss:$8 sps:$4 sm:$0xff]   ;;  %v15447_v23 = vld [vmem:[%s21850_s29 + $0x2b4] ss:$8 sps:$4 sm:$0xff]   ;;  %v12865_v63 = vld [vmem:[%s21624_s16 + $0x88] sm:$0xff] }
 0x974   :  { %10149 = vmatprep.subr.bf16.mxu1 %v15429_v41  ;;  %9332 = vst.msk [vmem:[#allocation5 + $0xb8] sm:$0xf] %vm7949_vm14, %v9308_v46  ;;  %vm21884_vm14 = vmmov %vm21863_vm0  ;;  %v12863_v41 = vld [vmem:[%s21624_s16 + $0x78] sm:$0xff]  ;;  %v10666_v61 = vsel %vm10660_vm1, 1, %v21888_v0  ;;  %vm10665_vm2 = vcmp.gt.f32.partialorder %v12865_v63, 0.0  ;;  %vm10662_vm10 = vcmp.gt.f32.partialorder %v12862_v44, 0.0 }
 0x975   :  { %v9148_v27 = vld [vmem:[#allocation5 + $0x18] sm:$0xff]  ;;  %9328 = vst.msk [vmem:[#allocation5 + $0x98] sm:$0xff] %vm7939_vm9, %v9304_v2  ;;  %v9065_v39 = vsel %vm21884_vm14, %v9056_v5, %v9064_v4  ;;  %v20393_v16 = vld [vmem:[#allocation5 + $0xb0] sm:$0xff]  ;;  %vm10663_vm5 = vcmp.gt.f32.partialorder %v12863_v41, 0.0  ;;  %vm21889_vm7 = vmmov %vm21884_vm14  ;;  %vm10720_vm1 = vcmask 523264  }
 0x976   :  { %v9288_v50 = vmax.f32 %v9148_v27, %v9228_v42  ;;  %9548 = vrot.lane.b32.xlu1 %v20143_v34, %s15603_s4  ;;  %v9112_v47 = vmax.f32 %v20002_v54, %v9065_v39  ;;  %v15441_v5 = vld [vmem:[%s21850_s29 + $0x294] ss:$8 sps:$4 sm:$0xff]   ;;  %v9256_v54 = vsel %vm21887_vm4, %v9247_v17, %v9255_v8  ;;  %v20412_v29 = vld [vmem:[#allocation5 + $0xa0] sm:$0xff]  ;;  %v12861_v8 = vld [vmem:[%s21624_s16 + $0x68] sm:$0xff]  ;;  %v10669_v10 = vsel %vm10663_vm5, 1, %v21888_v0 }
 0x977   :  { %9530 = vrot.lane.b32.xlu0 %v20177_v49, %s15603_s4  ;;  %10150 = vmatpush1.bf16.msra.mxu1 %v15427_v6  ;;  %v20407_v51 = vmax.f32 %v9113_v3, %v9256_v54  ;;  %v20418_v62 = vld [vmem:[#allocation5 + $0xa8] sm:$0xff]  ;;  %vm10661_vm0 = vcmp.gt.f32.partialorder %v12861_v8, 0.0  ;;  %v12864_v27 = vld [vmem:[%s21624_s16 + $0x80] sm:$0xff]  ;;  %v10671_v42 = vsel %vm10665_vm2, 1, %v21888_v0  ;;  %v10668_v6 = vsel %vm10662_vm10, 1, %v21888_v0  ;;  %vm21890_vm3 = vmmov %vm21889_vm7 }
 0x978   :  { %9312 = vst.msk [vmem:[#allocation5 + $0x18] sm:$0xff] %vm7939_vm9, %v9288_v50  ;;  %10151 = vmatprep.subr.bf16.mxu1 %v15432_v9  ;;  %v20387_v38 = vmax.f32 %v9112_v47, %v9254_v12  ;;  %v20432_v30 = vld [vmem:[#allocation5 + $0x38] sm:$0xff]  ;;  %v10667_v52 = vsel %vm10661_vm0, 1, %v21888_v0  ;;  %vm10664_vm11 = vcmp.gt.f32.partialorder %v12864_v27, 0.0  ;;  %vm21891_vm6 = vmmov %vm21890_vm3 }
 0x979   :  { %v9348_v31 = vld [vmem:[#allocation5 + $0x78] sm:$0xff]  ;;  %v10670_v50 = vsel %vm10664_vm11, 1, %v21888_v0  ;;  %vm21892_vm14 = vmmov %vm21890_vm3 }
 0x97a   :  { %9528 = vrot.lane.b32.xlu1 %v20173_v22, %s15603_s4  ;;  %v9344_v1 = vld [vmem:[#allocation5 + $0x58] sm:$0xff]  ;;  %vm21893_vm15 = vmmov %vm21890_vm3 }
 0x97b   :  { %9538 = vrot.lane.b32.xlu0 %v20206_v35, %s15603_s4  ;;  %10152 = vmatpush1.bf16.msra.mxu1 %v15430_v58  ;;  %v20346_v43 = vpack.c.bf16 %v9348_v31, %v9344_v1  ;;  %v20357_v53 = vld [vmem:[#allocation5 + $0xb8] sm:$0xff]  ;;  %vm21894_vm8 = vmmov %vm21890_vm3 }
 0x97c   :  { %10153 = vmatprep.subr.bf16.mxu1 %v15435_v37  ;;  %v20359_v21 = vld [vmem:[#allocation5 + $0x98] sm:$0xff]  ;;  %vm21895_vm4 = vmmov %vm21890_vm3 }
 0x97d   :  { %v9753_v4 = vpack.c.bf16 %v20357_v53, %v20359_v21  ;;  %vm21896_vm0 = vmmov %vm21890_vm3 }
 0x97e   :  { %9544 = vrot.lane.b32.xlu1 %v20213_v11, %s15603_s4 }
 0x97f   :  { %9546 = vrot.lane.b32.xlu0 %v20222_v36, %s15603_s4  ;;  %10154 = vmatpush1.bf16.msra.mxu1 %v15433_v55  ;;  %v9336_v17 = vld [vmem:[#allocation5 + $0x18] sm:$0xff] }
 0x980   :  { %10155 = vmatprep.subr.bf16.mxu1 %v15438_v7 }
 0x982   :  { %9417 = vrot.lane.b32.xlu1 %v20235_v40, %s15602_s10 }
 0x983   :  { %9536 = vrot.lane.b32.xlu0 %v20155_v33, %s15603_s4  ;;  %10156 = vmatpush1.bf16.msra.mxu1 %v15436_v20 }
 0x984   :  { %10157 = vmatprep.subr.bf16.mxu1 %v15441_v5 }
 0x986   :  { %9425 = vrot.lane.b32.xlu1 %v20393_v16, %s15602_s10 }
 0x987   :  { %9413 = vrot.lane.b32.xlu0 %v20387_v38, %s15602_s10  ;;  %10158 = vmatpush1.bf16.msra.mxu1 %v15439_v25 }
 0x988   :  { %10159 = vmatprep.subr.bf16.mxu1 %v15444_v56 }
 0x98a   :  { %9421 = vrot.lane.b32.xlu1 %v20412_v29, %s15602_s10 }
 0x98b   :  { %9415 = vrot.lane.b32.xlu0 %v20407_v51, %s15602_s10  ;;  %10160 = vmatpush1.bf16.msra.mxu1 %v15442_v14 }
 0x98c   :  { %10192 = vmatprep.subr.bf16.mxu1 %v15447_v23 }
 0x98e   :  { %9556 = vrot.lane.b32.xlu1 %v20235_v40, %s15603_s4 }
 0x98f   :  { %9423 = vrot.lane.b32.xlu0 %v20418_v62, %s15602_s10 }
 0x992   :  { %9564 = vrot.lane.b32.xlu1 %v20393_v16, %s15603_s4 }
 0x993   :  { %9552 = vrot.lane.b32.xlu0 %v20387_v38, %s15603_s4 }
 0x996   :  { %9560 = vrot.lane.b32.xlu1 %v20412_v29, %s15603_s4 }
 0x997   :  { %9554 = vrot.lane.b32.xlu0 %v20407_v51, %s15603_s4 }
 0x99a   :  { %9395 = vrot.lane.b32.xlu1 %v20432_v30, %s15602_s10 }
 0x99b   :  { %9562 = vrot.lane.b32.xlu0 %v20418_v62, %s15603_s4 }
 0x99e   :  { %9411 = vrot.lane.b32.xlu1 %v9348_v31, %s15602_s10 }
 0x99f   :  { %9387 = vrot.lane.b32.xlu0 %v9336_v17, %s15602_s10 }
 0x9a2   :  { %9534 = vrot.lane.b32.xlu1 %v20432_v30, %s15603_s4 }
 0x9a3   :  { %9403 = vrot.lane.b32.xlu0 %v9344_v1, %s15602_s10 }
 0x9a6   :  { %9550 = vrot.lane.b32.xlu1 %v9348_v31, %s15603_s4 }
 0x9a7   :  { %9526 = vrot.lane.b32.xlu0 %v9336_v17, %s15603_s4 }
 0x9aa   :  { %9427 = vrot.lane.b32.xlu1 %v20357_v53, %s15602_s10 }
 0x9ab   :  { %9542 = vrot.lane.b32.xlu0 %v9344_v1, %s15603_s4 }
 0x9ae   :  { %9566 = vrot.lane.b32.xlu1 %v20357_v53, %s15603_s4  ;;  %v15478_v53 = vld [vmem:[%s21850_s29] ss:$8 sps:$4 sm:$0xff]  }
 0x9af   :  { %9419 = vrot.lane.b32.xlu0 %v20359_v21, %s15602_s10 }
 0x9b2   :  { %10676 = vperm.xlu1 %14601, %v10667_v52  }
 0x9b3   :  { %9558 = vrot.lane.b32.xlu0 %v20359_v21, %s15603_s4 }
 0x9b6   :  { %10682 = vperm.xlu1 %14601, %v10669_v10  }
 0x9b7   :  { %10673 = vperm.xlu0 %14600, %v10666_v61  }
 0x9ba   :  { %10688 = vperm.xlu1 %14601, %v10671_v42  }
 0x9bb   :  { %10679 = vperm.xlu0 %14600, %v10668_v6  }
 0x9bf   :  { %10685 = vperm.xlu0 %14600, %v10670_v50  }
 0x9c4   :  { %v20478_v60 = vpop.permute.xlu1 %9385 }
 0x9c8   :  { %v20480_v46 = vpop.permute.xlu1 %9393 }
 0x9c9   :  { %v9382_v28 = vpop.permute.xlu0 %9381 }
 0x9cc   :  { %v20482_v59 = vpop.permute.xlu1 %9401 }
 0x9cd   :  { %v9398_v9 = vpop.permute.xlu0 %9397 }
 0x9d0   :  { %v20484_v2 = vpop.permute.xlu1 %9409 }
 0x9d1   :  { %v9521_v58 = vpop.permute.xlu0 %9520 }
 0x9d4   :  { %v20486_v37 = vpop.permute.xlu1 %9524 }
 0x9d5   :  { %v9384_v31 = vpop.permute.xlu0 %9383 }
 0x9d6   :  { %v9430_v5 = vsel %vm9429_vm12, %v9382_v28, %v9384_v31  ;;  %v9431_v19 = vsel %vm9429_vm12, %v9384_v31, %v20478_v60 }
 0x9d7   :  { %v9466_v12 = vmax.f32 %v20128_v24, %v9430_v5  ;;  %v9467_v25 = vmax.f32 %v20171_v26, %v9431_v19 }
 0x9d8   :  { %v20488_v1 = vpop.permute.xlu1 %9532 }
 0x9d9   :  { %v9392_v55 = vpop.permute.xlu0 %9391 }
 0x9da   :  { %v9434_v54 = vsel %vm9429_vm12, %v9392_v55, %v20480_v46 }
 0x9db   :  { %v9470_v41 = vmax.f32 %v20177_v49, %v9434_v54 }
 0x9dc   :  { %v20490_v7 = vpop.permute.xlu1 %9540 }
 0x9dd   :  { %v9400_v39 = vpop.permute.xlu0 %9399 }
 0x9de   :  { %v9437_v0 = vsel %vm9429_vm12, %v9400_v39, %v20482_v59 }
 0x9df   :  { %v9473_v49 = vmax.f32 %v20206_v35, %v9437_v0 }
 0x9e0   :  { %v9390_v20 = vpop.permute.xlu1 %9389 }
 0x9e1   :  { %v9408_v47 = vpop.permute.xlu0 %9407  ;;  %v9433_v26 = vsel %vm9429_vm12, %v9390_v20, %v9392_v55 }
 0x9e2   :  { %v9469_v44 = vmax.f32 %v20173_v22, %v9433_v26  ;;  %v9440_v6 = vsel %vm9429_vm12, %v9408_v47, %v20484_v2 }
 0x9e3   :  { %v9476_v55 = vmax.f32 %v20222_v36, %v9440_v6  ;;  %v15450_v6 = vld [vmem:[%s21850_s29 + $0x2c4] ss:$8 sps:$4 sm:$0xff]  }
 0x9e4   :  { %v9406_v3 = vpop.permute.xlu1 %9405 }
 0x9e5   :  { %v9523_v56 = vpop.permute.xlu0 %9522  ;;  %v9439_v42 = vsel %vm9429_vm12, %v9406_v3, %v9408_v47  ;;  %v9436_v47 = vsel %vm9429_vm12, %v9398_v9, %v9400_v39 }
 0x9e6   :  { %v9569_v14 = vsel %vm9568_vm13, %v9521_v58, %v9523_v56  ;;  %v9570_v23 = vsel %vm9568_vm13, %v9523_v56, %v20486_v37  ;;  %v9475_v35 = vmax.f32 %v20213_v11, %v9439_v42  ;;  %v9472_v11 = vmax.f32 %v20155_v33, %v9436_v47  ;;  %v15456_v47 = vld [vmem:[%s21850_s29 + $0x2e4] ss:$8 sps:$4 sm:$0xff]  }
 0x9e7   :  { %v20502_v17 = vmax.f32 %v9466_v12, %v9569_v14  ;;  %v20504_v8 = vmax.f32 %v9467_v25, %v9570_v23 }
 0x9e8   :  { %v20507_v32 = vpop.permute.xlu1 %9548 }
 0x9e9   :  { %9623 = vst [vmem:[#allocation5] sm:$0xff] %v20502_v17  ;;  %9624 = vst [vmem:[#allocation5 + $0x8] sm:$0xff] %v20504_v8  ;;  %v9531_v24 = vpop.permute.xlu0 %9530 }
 0x9ea   :  { %v9573_v52 = vsel %vm9568_vm13, %v9531_v24, %v20488_v1 }
 0x9eb   :  { %v20516_v63 = vmax.f32 %v9470_v41, %v9573_v52 }
 0x9ec   :  { %v9529_v10 = vpop.permute.xlu1 %9528 }
 0x9ed   :  { %v9539_v61 = vpop.permute.xlu0 %9538  ;;  %v9673_v27 = vpack.c.bf16 %v20516_v63, %v20504_v8  ;;  %v9572_v50 = vsel %vm9568_vm13, %v9529_v10, %v9531_v24  ;;  %v15445_v10 = vld [vmem:[%s21850_s29 + $0x2b0] ss:$8 sps:$4 sm:$0xff]  }
 0x9ee   :  { %v9576_v28 = vsel %vm9568_vm13, %v9539_v61, %v20490_v7  ;;  %v20528_v58 = vmax.f32 %v9469_v44, %v9572_v50  ;;  %v15499_v8 = vld [vmem:[%s21850_s29 + $0x70] ss:$8 sps:$4 sm:$0xff]  }
 0x9ef   :  { %v9612_v22 = vmax.f32 %v9473_v49, %v9576_v28 }
 0x9f0   :  { %v9739_v31 = vld [vmem:[#allocation5 + $0x8] sm:$0xf0]  ;;  %v9545_v20 = vpop.permute.xlu1 %9544  ;;  %v9672_v19 = vpack.c.bf16 %v20528_v58, %v20502_v17  ;;  %v9738_v14 = vld [vmem:[#allocation5] sm:$0xf0]  ;;  %v15537_v17 = vld [vmem:[%s21850_s29 + $0x134] ss:$8 sps:$4 sm:$0xff]  }
 0x9f1   :  { %v9547_v5 = vpop.permute.xlu0 %9546  ;;  %v9747_v54 = vpack.c.bf16 %v20516_v63, %v9739_v31  ;;  %v9746_v0 = vpack.c.bf16 %v20528_v58, %v9738_v14  ;;  %v15448_v31 = vld [vmem:[%s21850_s29 + $0x2c0] ss:$8 sps:$4 sm:$0xff]   ;;  %v15459_v14 = vld [vmem:[%s21850_s29 + $0x2f4] ss:$8 sps:$4 sm:$0xff]   ;;  %v15504_v63 = vld [vmem:[%s21850_s29 + $0x84] ss:$8 sps:$4 sm:$0xff]  }
 0x9f2   :  { %v9578_v12 = vsel %vm9568_vm13, %v9545_v20, %v9547_v5  ;;  %v9579_v25 = vsel %vm9568_vm13, %v9547_v5, %v20507_v32  ;;  %v15451_v5 = vld [vmem:[%s21850_s29 + $0x2d0] ss:$8 sps:$4 sm:$0xff]  }
 0x9f3   :  { %v9614_v3 = vmax.f32 %v9475_v35, %v9578_v12  ;;  %v9615_v56 = vmax.f32 %v9476_v55, %v9579_v25  ;;  %v9824_v39 = vrot.slane %v9747_v54, 2  ;;  %v15453_v35 = vld [vmem:[%s21850_s29 + $0x2d4] ss:$8 sps:$4 sm:$0xff]   ;;  %v15454_v54 = vld [vmem:[%s21850_s29 + $0x2e0] ss:$8 sps:$4 sm:$0xff]  }
 0x9f4   :  { %v20540_v36 = vpop.permute.xlu1 %9417 }
 0x9f5   :  { %v9537_v23 = vpop.permute.xlu0 %9536  ;;  %v20542_v41 = vpack.c.bf16 %v9615_v56, %v9612_v22 }
 0x9f6   :  { %v9575_v24 = vsel %vm9568_vm13, %v9537_v23, %v9539_v61  ;;  %v9821_v61 = vrot.slane %v9746_v0, 2 }
 0x9f7   :  { %v9611_v9 = vmax.f32 %v9472_v11, %v9575_v24  ;;  %v9825_v26 = vrot.slane %v20542_v41, 2 }
 0x9f8   :  { %v20547_v52 = vpop.permute.xlu1 %9425 }
 0x9f9   :  { %v9414_v44 = vpop.permute.xlu0 %9413  ;;  %v9826_v33 = vsel %vm21889_vm7, %v9824_v39, %v9825_v26  ;;  %v20552_v49 = vpack.c.bf16 %v9614_v3, %v9611_v9  ;;  %vm21897_vm7 = vcmask 1043456  }
 0x9fa   :  { %10161 = vmatprep.mubr.bf16.mxu1 %v9826_v33 }
 0x9fb   :  { %v9822_v42 = vrot.slane %v20552_v49, 2 }
 0x9fc   :  { %v9422_v50 = vpop.permute.xlu1 %9421 }
 0x9fd   :  { %v9416_v28 = vpop.permute.xlu0 %9415  ;;  %v9823_v22 = vsel %vm21890_vm3, %v9821_v61, %v9822_v42  ;;  %vm21898_vm3 = vmmov %vm21897_vm7 }
 0x9fe   :  { %10162 = vmatmul.mubr.bf16.vlgmr.msra.gmra.mrb[48].mxu1 %v9823_v22  ;;  %v9442_v3 = vsel %vm9429_vm12, %v9414_v44, %v9416_v28  ;;  %v9443_v56 = vsel %vm9429_vm12, %v9416_v28, %v20540_v36 }
 0x9ff   :  { %10193 = vmatpush1.bf16.msra.mxu1 %v15445_v10  ;;  %v9478_v11 = vmax.f32 %v20387_v38, %v9442_v3  ;;  %v9479_v23 = vmax.f32 %v20407_v51, %v9443_v56  ;;  %v15457_v38 = vld [vmem:[%s21850_s29 + $0x2f0] ss:$8 sps:$4 sm:$0xff]   ;;  %v15462_v51 = vld [vmem:[%s21850_s29 + $0x304] ss:$8 sps:$4 sm:$0xff]  }
 0xa00   :  { %10194 = vmatprep.subr.bf16.mxu1 %v15450_v6  ;;  %v20570_v55 = vpop.permute.xlu1 %9556 }
 0xa01   :  { %v9424_v20 = vpop.permute.xlu0 %9423 }
 0xa02   :  { %v9445_v39 = vsel %vm9429_vm12, %v9422_v50, %v9424_v20  ;;  %v9446_v0 = vsel %vm9429_vm12, %v9424_v20, %v20547_v52 }
 0xa03   :  { %10195 = vmatpush1.bf16.msra.mxu1 %v15448_v31  ;;  %v9481_v6 = vmax.f32 %v20412_v29, %v9445_v39  ;;  %v9482_v50 = vmax.f32 %v20418_v62, %v9446_v0  ;;  %v15460_v29 = vld [vmem:[%s21850_s29 + $0x300] ss:$8 sps:$4 sm:$0xff]   ;;  %v15465_v62 = vld [vmem:[%s21850_s29 + $0x314] ss:$8 sps:$4 sm:$0xff]   ;;  %v15468_v0 = vld [vmem:[%s21850_s29 + $0x324] ss:$8 sps:$4 sm:$0xff]  }
 0xa04   :  { %10196 = vmatprep.subr.bf16.mxu1 %v15453_v35  ;;  %v20578_v12 = vpop.permute.xlu1 %9564 }
 0xa05   :  { %v9553_v25 = vpop.permute.xlu0 %9552 }
 0xa07   :  { %10197 = vmatpush1.bf16.msra.mxu1 %v15451_v5 }
 0xa08   :  { %10198 = vmatprep.subr.bf16.mxu1 %v15456_v47  ;;  %v9561_v24 = vpop.permute.xlu1 %9560 }
 0xa09   :  { %v9555_v9 = vpop.permute.xlu0 %9554 }
 0xa0a   :  { %v9581_v44 = vsel %vm9568_vm13, %v9553_v25, %v9555_v9  ;;  %v9582_v33 = vsel %vm9568_vm13, %v9555_v9, %v20570_v55 }
 0xa0b   :  { %v20597_v10 = vmax.f32 %v9478_v11, %v9581_v44  ;;  %v20599_v61 = vmax.f32 %v9479_v23, %v9582_v33  ;;  %10199 = vmatpush1.bf16.msra.mxu1 %v15454_v54  ;;  %v9741_v44 = vld [vmem:[#allocation5 + $0x18] sm:$0xf0] }
 0xa0c   :  { %10200 = vmatprep.subr.bf16.mxu1 %v15459_v14  ;;  %v9396_v28 = vpop.permute.xlu1 %9395 }
 0xa0d   :  { %v9563_v22 = vpop.permute.xlu0 %9562  ;;  %v9435_v31 = vsel %vm9429_vm12, %v20480_v46, %v9396_v28 }
 0xa0e   :  { %v9584_v35 = vsel %vm9568_vm13, %v9561_v24, %v9563_v22  ;;  %v9585_v20 = vsel %vm9568_vm13, %v9563_v22, %v20578_v12  ;;  %v9471_v5 = vmax.f32 %v20100_v45, %v9435_v31  ;;  %v15463_v24 = vld [vmem:[%s21850_s29 + $0x310] ss:$8 sps:$4 sm:$0xff]  }
 0xa0f   :  { %v9620_v47 = vmax.f32 %v9481_v6, %v9584_v35  ;;  %v9621_v25 = vmax.f32 %v9482_v50, %v9585_v20  ;;  %10201 = vmatpush1.bf16.msra.mxu1 %v15457_v38  ;;  %v15469_v35 = vld [vmem:[%s21850_s29 + $0x330] ss:$8 sps:$4 sm:$0xff]  }
 0xa10   :  { %10202 = vmatprep.subr.bf16.mxu1 %v15462_v51  ;;  %9489 = vst [vmem:[#allocation5 + $0x30] sm:$0xff] %v9471_v5  ;;  %v9412_v46 = vpop.permute.xlu1 %9411 }
 0xa11   :  { %9638 = vst [vmem:[#allocation5 + $0xa0] sm:$0xff] %v9620_v47  ;;  %9639 = vst [vmem:[#allocation5 + $0xa8] sm:$0xff] %v9621_v25  ;;  %v9388_v3 = vpop.permute.xlu0 %9387  ;;  %v9751_v56 = vpack.c.bf16 %v9621_v25, %v20599_v61  ;;  %v9750_v45 = vpack.c.bf16 %v9620_v47, %v20597_v10  ;;  %v9441_v54 = vsel %vm9429_vm12, %v20484_v2, %v9412_v46  ;;  %v15474_v47 = vld [vmem:[%s21850_s29 + $0x344] ss:$8 sps:$4 sm:$0xff]  }
 0xa12   :  { %v9432_v14 = vsel %vm9429_vm12, %v20478_v60, %v9388_v3  ;;  %v9477_v11 = vmax.f32 %v20143_v34, %v9441_v54  ;;  %v15472_v3 = vld [vmem:[%s21850_s29 + $0x340] ss:$8 sps:$4 sm:$0xff]  }
 0xa13   :  { %v9468_v23 = vmax.f32 %v20093_v57, %v9432_v14  ;;  %10203 = vmatpush1.bf16.msra.mxu1 %v15460_v29  ;;  %v9835_v9 = vrot.slane %v9751_v56, 2  ;;  %v9833_v39 = vrot.slane %v9750_v45, 2  ;;  %v15477_v45 = vld [vmem:[%s21850_s29 + $0x354] ss:$8 sps:$4 sm:$0xff]  }
 0xa14   :  { %10204 = vmatprep.subr.bf16.mxu1 %v15465_v62  ;;  %9495 = vst [vmem:[#allocation5 + $0x70] sm:$0xff] %v9477_v11  ;;  %v9535_v2 = vpop.permute.xlu1 %9534 }
 0xa15   :  { %9486 = vst [vmem:[#allocation5 + $0x10] sm:$0xff] %v9468_v23  ;;  %v9404_v60 = vpop.permute.xlu0 %9403  ;;  %v9836_v57 = vsel %vm21891_vm6, %v9825_v26, %v9835_v9  ;;  %v9834_v34 = vsel %vm21892_vm14, %v9822_v42, %v9833_v39  ;;  %v9574_v33 = vsel %vm9568_vm13, %v20488_v1, %v9535_v2  ;;  %v15466_v26 = vld [vmem:[%s21850_s29 + $0x320] ss:$8 sps:$4 sm:$0xff]   ;;  %v15471_v42 = vld [vmem:[%s21850_s29 + $0x334] ss:$8 sps:$4 sm:$0xff]   ;;  %v9749_v1 = vpack.c.bf16 %v20432_v30, %v9741_v44 }
 0xa16   :  { %v9438_v38 = vsel %vm9429_vm12, %v20482_v59, %v9404_v60  ;;  %10171 = vmatprep.mubr.bf16.mxu1 %v9836_v57  ;;  %v9610_v51 = vmax.f32 %v9471_v5, %v9574_v33  ;;  %v9831_v5 = vrot.slane %v20346_v43, 2  ;;  %v10781_v44 = vld [vmem:[%s21616_s8 + $0x8] sm:$0xff]  ;;  %v10782_v33 = vld [vmem:[%s21616_s8 + $0x10] sm:$0xff] }
 0xa17   :  { %v9474_v6 = vmax.f32 %v20107_v18, %v9438_v38  ;;  %10205 = vmatpush1.bf16.msra.mxu1 %v15463_v24  ;;  %v9830_v20 = vrot.slane %v9749_v1, 2 }
 0xa18   :  { %10172 = vmatmul.mubr.bf16.gmra.mrb[52].mxu1 %v9834_v34  ;;  %10206 = vmatprep.subr.bf16.mxu1 %v15468_v0  ;;  %9628 = vst.msk [vmem:[#allocation5 + $0x30] sm:$0xff] %vm9429_vm12, %v9610_v51  ;;  %v9551_v59 = vpop.permute.xlu1 %9550  ;;  %v9839_v34 = vrot.slane %v9753_v4, 2 }
 0xa19   :  { %9492 = vst [vmem:[#allocation5 + $0x50] sm:$0xff] %v9474_v6  ;;  %v9527_v50 = vpop.permute.xlu0 %9526  ;;  %10181 = vmatprep.mubr.bf16.mxu1 %v9835_v9  ;;  %v9580_v18 = vsel %vm9568_vm13, %v20507_v32, %v9551_v59  ;;  %v9832_v56 = vsel %vm21893_vm15, %v9830_v20, %v9831_v5  ;;  %v15480_v9 = vld [vmem:[%s21850_s29 + $0x4] ss:$8 sps:$4 sm:$0xff]  }
 0xa1a   :  { %v9571_v28 = vsel %vm9568_vm13, %v20486_v37, %v9527_v50  ;;  %v9616_v22 = vmax.f32 %v9477_v11, %v9580_v18  ;;  %v9840_v59 = vsel %vm21895_vm4, %v9831_v5, %v9839_v34  ;;  %v10784_v50 = vld [vmem:[%s21616_s8 + $0x20] sm:$0xff]  ;;  %v10785_v18 = vld [vmem:[%s21616_s8 + $0x28] sm:$0xff] }
 0xa1b   :  { %v9607_v31 = vmax.f32 %v9468_v23, %v9571_v28  ;;  %10207 = vmatpush1.bf16.msra.mxu1 %v15466_v26  ;;  %v15475_v23 = vld [vmem:[%s21850_s29 + $0x350] ss:$8 sps:$4 sm:$0xff]   ;;  %v15483_v26 = vld [vmem:[%s21850_s29 + $0x14] ss:$8 sps:$4 sm:$0xff]   ;;  %v20748_v5 = vpack.c.bf16 %v10785_v18, %v10784_v50 }
 0xa1c   :  { %10208 = vmatprep.subr.bf16.mxu1 %v15471_v42  ;;  %9634 = vst.msk [vmem:[#allocation5 + $0x70] sm:$0xff] %vm9429_vm12, %v9616_v22  ;;  %v9428_v32 = vpop.permute.xlu1 %9427  ;;  %v15481_v28 = vld [vmem:[%s21850_s29 + $0x10] ss:$8 sps:$4 sm:$0xff]   ;;  %v15486_v22 = vld [vmem:[%s21850_s29 + $0x24] ss:$8 sps:$4 sm:$0xff]  }
 0xa1d   :  { %9625 = vst.msk [vmem:[#allocation5 + $0x10] sm:$0xff] %vm9429_vm12, %v9607_v31  ;;  %v9543_v37 = vpop.permute.xlu0 %9542  ;;  %v9447_v25 = vsel %vm9429_vm12, %v20547_v52, %v9428_v32  ;;  %v15541_v18 = vld [vmem:[%s21850_s29 + $0x150] ss:$8 sps:$4 sm:$0xff]  }
 0xa1e   :  { %v9577_v29 = vsel %vm9568_vm13, %v20490_v7, %v9543_v37  ;;  %v9483_v62 = vmax.f32 %v20393_v16, %v9447_v25  ;;  %v15489_v37 = vld [vmem:[%s21850_s29 + $0x34] ss:$8 sps:$4 sm:$0xff]  }
 0xa1f   :  { %v9613_v46 = vmax.f32 %v9474_v6, %v9577_v29  ;;  %10209 = vmatpush1.bf16.msra.mxu1 %v15469_v35  ;;  %v10783_v6 = vld [vmem:[%s21616_s8 + $0x18] sm:$0xff] }
 0xa20   :  { %10182 = vmatmul.mubr.bf16.gmra.mrb[56].mxu1 %v9833_v39  ;;  %10210 = vmatprep.subr.bf16.mxu1 %v15474_v47  ;;  %9501 = vst [vmem:[#allocation5 + $0xb0] sm:$0xff] %v9483_v62  ;;  %v9567_v52 = vpop.permute.xlu1 %9566  ;;  %v20695_v39 = vld [vmem:[#allocation5 + $0x30] sm:$0xff]  ;;  %v20727_v1 = vpack.c.bf16 %v10783_v6, %v10782_v33  ;;  %v15484_v47 = vld [vmem:[%s21850_s29 + $0x20] ss:$8 sps:$4 sm:$0xff]  }
 0xa21   :  { %9631 = vst.msk [vmem:[#allocation5 + $0x50] sm:$0xff] %vm9429_vm12, %v9613_v46  ;;  %v9420_v7 = vpop.permute.xlu0 %9419  ;;  %12974 = vmatprep.mubr.msk.bf16.mxu1 %vm7939_vm9, %v9832_v56  ;;  %v9586_v16 = vsel %vm9568_vm13, %v20578_v12, %v9567_v52  ;;  %v15487_v29 = vld [vmem:[%s21850_s29 + $0x30] ss:$8 sps:$4 sm:$0xff]   ;;  %v15490_v46 = vld [vmem:[%s21850_s29 + $0x40] ss:$8 sps:$4 sm:$0xff]  }
 0xa22   :  { %v9444_v54 = vsel %vm9429_vm12, %v20540_v36, %v9420_v7  ;;  %v9622_v14 = vmax.f32 %v9483_v62, %v9586_v16  ;;  %v15492_v62 = vld [vmem:[%s21850_s29 + $0x44] ss:$8 sps:$4 sm:$0xff]   ;;  %v15493_v56 = vld [vmem:[%s21850_s29 + $0x50] ss:$8 sps:$4 sm:$0xff]   ;;  %v15496_v52 = vld [vmem:[%s21850_s29 + $0x60] ss:$8 sps:$4 sm:$0xff]  }
 0xa23   :  { %v9480_v11 = vmax.f32 %v20235_v40, %v9444_v54  ;;  %10211 = vmatpush1.bf16.msra.mxu1 %v15472_v3  ;;  %v9662_v60 = vld [vmem:[#allocation5 + $0x70] sm:$0xff]  ;;  %v15532_v6 = vld [vmem:[%s21850_s29 + $0x120] ss:$8 sps:$4 sm:$0xff]  }
 0xa24   :  { %10212 = vmatprep.subr.bf16.mxu1 %v15477_v45  ;;  %v9740_v24 = vld [vmem:[#allocation5 + $0x10] sm:$0xf0]  ;;  %9640 = vst.msk [vmem:[#allocation5 + $0xb0] sm:$0xff] %vm9429_vm12, %v9622_v14  ;;  %v15498_v45 = vld [vmem:[%s21850_s29 + $0x64] ss:$8 sps:$4 sm:$0xff]  }
 0xa25   :  { %9498 = vst [vmem:[#allocation5 + $0x90] sm:$0xff] %v9480_v11  ;;  %v9559_v12 = vpop.permute.xlu0 %9558  ;;  %v9748_v0 = vpack.c.bf16 %v20695_v39, %v9740_v24  ;;  %v15495_v3 = vld [vmem:[%s21850_s29 + $0x54] ss:$8 sps:$4 sm:$0xff]   ;;  %v15505_v54 = vld [vmem:[%s21850_s29 + $0x90] ss:$8 sps:$4 sm:$0xff]  }
 0xa26   :  { %v9583_v36 = vsel %vm9568_vm13, %v20570_v55, %v9559_v12  ;;  %v10780_v55 = vld [vmem:[%s21616_s8] sm:$0xff]  ;;  %v15501_v7 = vld [vmem:[%s21850_s29 + $0x74] ss:$8 sps:$4 sm:$0xff]   ;;  %v15511_v24 = vld [vmem:[%s21850_s29 + $0xb0] ss:$8 sps:$4 sm:$0xff]   ;;  %vm10730_vm13 = vcmask 519168  }
 0xa27   :  { %v9619_v40 = vmax.f32 %v9480_v11, %v9583_v36  ;;  %10213 = vmatpush1.bf16.msra.mxu1 %v15475_v23  ;;  %v9827_v38 = vrot.slane %v9748_v0, 2  ;;  %v20717_v4 = vpack.c.bf16 %v10781_v44, %v10780_v55  ;;  %v15507_v16 = vld [vmem:[%s21850_s29 + $0x94] ss:$8 sps:$4 sm:$0xff]   ;;  %v15510_v14 = vld [vmem:[%s21850_s29 + $0xa4] ss:$8 sps:$4 sm:$0xff]  }
 0xa28   :  { %v9658_v2 = vld [vmem:[#allocation5 + $0x50] sm:$0xff]  ;;  %10534 = vmatprep.subr.bf16.mxu1 %v15480_v9  ;;  %v15508_v11 = vld [vmem:[%s21850_s29 + $0xa0] ss:$8 sps:$4 sm:$0xff]   ;;  %v15516_v9 = vld [vmem:[%s21850_s29 + $0xc4] ss:$8 sps:$4 sm:$0xff]  }
 0xa29   :  { %9637 = vst.msk [vmem:[#allocation5 + $0x90] sm:$0xff] %vm9429_vm12, %v9619_v40  ;;  %v20699_v57 = vpack.c.bf16 %v9662_v60, %v9658_v2  ;;  %14001 = vmatpush1.bf16.msra.mxu0 %v20717_v4  ;;  %v15513_v23 = vld [vmem:[%s21850_s29 + $0xb4] ss:$8 sps:$4 sm:$0xff]   ;;  %v15514_v12 = vld [vmem:[%s21850_s29 + $0xc0] ss:$8 sps:$4 sm:$0xff]  }
 0xa2a   :  { %14002 = vmatprep.subr.bf16.mxu0 %v21725_v48  ;;  %v15519_v36 = vld [vmem:[%s21850_s29 + $0xd4] ss:$8 sps:$4 sm:$0xff]   ;;  %v15517_v40 = vld [vmem:[%s21850_s29 + $0xd0] ss:$8 sps:$4 sm:$0xff]   ;;  %v15522_v0 = vld [vmem:[%s21850_s29 + $0xe4] ss:$8 sps:$4 sm:$0xff]  }
 0xa2b   :  { %v9828_v51 = vrot.slane %v20699_v57, 2  ;;  %v9744_v35 = vld [vmem:[#allocation5 + $0xb0] sm:$0xff]  ;;  %v15520_v2 = vld [vmem:[%s21850_s29 + $0xe0] ss:$8 sps:$4 sm:$0xff]   ;;  %v15528_v55 = vld [vmem:[%s21850_s29 + $0x104] ss:$8 sps:$4 sm:$0xff]  }
 0xa2c   :  { %v15525_v60 = vld [vmem:[%s21850_s29 + $0xf4] ss:$8 sps:$4 sm:$0xff]   ;;  %v15526_v44 = vld [vmem:[%s21850_s29 + $0x100] ss:$8 sps:$4 sm:$0xff]  }
 0xa2d   :  { %v9829_v42 = vsel %vm21894_vm8, %v9827_v38, %v9828_v51  ;;  %14004 = vmatpush1.bf16.msra.mxu0 %v20727_v1  ;;  %v15531_v33 = vld [vmem:[%s21850_s29 + $0x114] ss:$8 sps:$4 sm:$0xff]   ;;  %v15529_v38 = vld [vmem:[%s21850_s29 + $0x110] ss:$8 sps:$4 sm:$0xff]  }
 0xa2e   :  { %10225 = vmatmul.mubr.bf16.vlgmr.msra.gmra.mrb[48].mxu1 %v9829_v42  ;;  %14005 = vmatprep.subr.bf16.mxu0 %v21725_v48  ;;  %v9651_v42 = vld [vmem:[#allocation5 + $0x18] sm:$0xff] }
 0xa2f   :  { %12975 = vmatprep.mubr.msk.bf16.mxu1 %vm7939_vm9, %v9840_v59  ;;  %10535 = vmatpush1.bf16.msra.mxu1 %v15478_v53  ;;  %v9669_v53 = vld [vmem:[#allocation5 + $0xa8] sm:$0xf]  ;;  %v15543_v59 = vld [vmem:[%s21850_s29 + $0x154] ss:$8 sps:$4 sm:$0xff]   ;;  %v9675_v50 = vpack.c.bf16 %v20432_v30, %v9651_v42 }
 0xa30   :  { %10536 = vmatprep.subr.bf16.mxu1 %v15483_v26  ;;  %v20744_v31 = vld [vmem:[#allocation5 + $0x90] sm:$0xff]  ;;  %v9681_v58 = vpack.c.bf16 %v9669_v53, %v20599_v61  ;;  %v9668_v26 = vld [vmem:[#allocation5 + $0xa0] sm:$0xf] }
 0xa31   :  { %v9752_v20 = vpack.c.bf16 %v9744_v35, %v20744_v31  ;;  %14007 = vmatpush1.bf16.msra.mxu0 %v20748_v5  ;;  %v15538_v61 = vld [vmem:[%s21850_s29 + $0x140] ss:$8 sps:$4 sm:$0xff]   ;;  %v15549_v30 = vld [vmem:[%s21850_s29 + $0x174] ss:$8 sps:$4 sm:$0xff]   ;;  %v15552_v35 = vld [vmem:[%s21850_s29 + $0x184] ss:$8 sps:$4 sm:$0xff]  }
 0xa32   :  { %14008 = vmatprep.subr.bf16.mxu0 %v21725_v48 }
 0xa33   :  { %10537 = vmatpush1.bf16.msra.mxu1 %v15481_v28  ;;  %v9837_v32 = vrot.slane %v9752_v20, 2  ;;  %v15544_v28 = vld [vmem:[%s21850_s29 + $0x160] ss:$8 sps:$4 sm:$0xff]  }
 0xa34   :  { %10538 = vmatprep.subr.bf16.mxu1 %v15486_v22  ;;  %v15547_v22 = vld [vmem:[%s21850_s29 + $0x170] ss:$8 sps:$4 sm:$0xff]   ;;  %v15550_v20 = vld [vmem:[%s21850_s29 + $0x180] ss:$8 sps:$4 sm:$0xff]  }
 0xa35   :  { %v9838_v25 = vsel %vm21896_vm0, %v9828_v51, %v9837_v32  ;;  %v15534_v51 = vld [vmem:[%s21850_s29 + $0x124] ss:$8 sps:$4 sm:$0xff]  }
 0xa36   :  { %10235 = vmatmul.mubr.bf16.gmra.mrb[52].mxu1 %v9838_v25  ;;  %v15556_v25 = vld [vmem:[%s21850_s29 + $0x1a0] ss:$8 sps:$4 sm:$0xff]  }
 0xa37   :  { %10539 = vmatpush1.bf16.msra.mxu1 %v15484_v47  ;;  %12976 = vmatprep.mubr.msk.bf16.mxu1 %vm7939_vm9, %v9839_v34  ;;  %v15523_v34 = vld [vmem:[%s21850_s29 + $0xf0] ss:$8 sps:$4 sm:$0xff]   ;;  %v15555_v47 = vld [vmem:[%s21850_s29 + $0x194] ss:$8 sps:$4 sm:$0xff]  }
 0xa38   :  { %10540 = vmatprep.subr.bf16.mxu1 %v15489_v37  ;;  %v15558_v37 = vld [vmem:[%s21850_s29 + $0x1a4] ss:$8 sps:$4 sm:$0xff]  }
 0xa3b   :  { %10541 = vmatpush1.bf16.msra.mxu1 %v15487_v29  ;;  %v9650_v29 = vld [vmem:[#allocation5 + $0x10] sm:$0xff] }
 0xa3c   :  { %10542 = vmatprep.subr.bf16.mxu1 %v15492_v62  ;;  %v9674_v62 = vpack.c.bf16 %v20695_v39, %v9650_v29  ;;  %v10786_v39 = vld [vmem:[%s21616_s8 + $0x30] sm:$0xff] }
 0xa3e   :  { %10245 = vmatmul.mubr.bf16.gmra.mrb[56].mxu1 %v9837_v32  ;;  %v15553_v32 = vld [vmem:[%s21850_s29 + $0x190] ss:$8 sps:$4 sm:$0xff]  }
 0xa3f   :  { %10543 = vmatpush1.bf16.msra.mxu1 %v15490_v46  ;;  %10566 = vmatprep.mubr.bf16.mxu1 %v9673_v27  ;;  %v15502_v27 = vld [vmem:[%s21850_s29 + $0x80] ss:$8 sps:$4 sm:$0xff]   ;;  %v9671_v46 = vld [vmem:[#allocation5 + $0xb8] sm:$0xf] }
 0xa40   :  { %10544 = vmatprep.subr.bf16.mxu1 %v15495_v3  ;;  %v9683_v3 = vpack.c.bf16 %v9671_v46, %v20359_v21  ;;  %v10788_v21 = vld [vmem:[%s21616_s8 + $0x40] sm:$0xff] }
 0xa43   :  { %10545 = vmatpush1.bf16.msra.mxu1 %v15493_v56  ;;  %v9670_v56 = vld [vmem:[#allocation5 + $0xb0] sm:$0xf] }
 0xa44   :  { %10546 = vmatprep.subr.bf16.mxu1 %v15498_v45  ;;  %v9682_v45 = vpack.c.bf16 %v9670_v56, %v20744_v31 }
 0xa47   :  { %10547 = vmatpush1.bf16.msra.mxu1 %v15496_v52 }
 0xa48   :  { %10548 = vmatprep.subr.bf16.mxu1 %v15501_v7  ;;  %v10790_v7 = vld [vmem:[%s21616_s8 + $0x50] sm:$0xff] }
 0xa4b   :  { %10549 = vmatpush1.bf16.msra.mxu1 %v15499_v8  ;;  %v10791_v8 = vld [vmem:[%s21616_s8 + $0x58] sm:$0xff] }
 0xa4c   :  { %10550 = vmatprep.subr.bf16.mxu1 %v15504_v63  ;;  %v20948_v63 = vpack.c.bf16 %v10791_v8, %v10790_v7 }
 0xa4f   :  { %10551 = vmatpush1.bf16.msra.mxu1 %v15502_v27  ;;  %v10792_v27 = vld [vmem:[%s21616_s8 + $0x60] sm:$0xff] }
 0xa50   :  { %10552 = vmatprep.subr.bf16.mxu1 %v15507_v16  ;;  %v10793_v16 = vld [vmem:[%s21616_s8 + $0x68] sm:$0xff] }
 0xa53   :  { %10553 = vmatpush1.bf16.msra.mxu1 %v15505_v54  ;;  %v20958_v54 = vpack.c.bf16 %v10793_v16, %v10792_v27 }
 0xa54   :  { %10554 = vmatprep.subr.bf16.mxu1 %v15510_v14  ;;  %v10794_v14 = vld [vmem:[%s21616_s8 + $0x70] sm:$0xff] }
 0xa57   :  { %10555 = vmatpush1.bf16.msra.mxu1 %v15508_v11  ;;  %v10795_v11 = vld [vmem:[%s21616_s8 + $0x78] sm:$0xff] }
 0xa58   :  { %10556 = vmatprep.subr.bf16.mxu1 %v15513_v23  ;;  %v20968_v23 = vpack.c.bf16 %v10795_v11, %v10794_v14 }
 0xa5b   :  { %10557 = vmatpush1.bf16.msra.mxu1 %v15511_v24  ;;  %v10796_v24 = vld [vmem:[%s21616_s8 + $0x80] sm:$0xff] }
 0xa5c   :  { %10558 = vmatprep.subr.bf16.mxu1 %v15516_v9  ;;  %v10797_v9 = vld [vmem:[%s21616_s8 + $0x88] sm:$0xff] }
 0xa5f   :  { %10559 = vmatpush1.bf16.msra.mxu1 %v15514_v12  ;;  %v10798_v12 = vld [vmem:[%s21616_s8 + $0x90] sm:$0xff] }
 0xa60   :  { %10560 = vmatprep.subr.bf16.mxu1 %v15519_v36  ;;  %v20981_v36 = vpack.c.bf16 %v10797_v9, %v10796_v24 }
 0xa63   :  { %10561 = vmatpush1.bf16.msra.mxu1 %v15517_v40  ;;  %v10799_v40 = vld [vmem:[%s21616_s8 + $0x98] sm:$0xff] }
 0xa64   :  { %10562 = vmatprep.subr.bf16.mxu1 %v15522_v0  ;;  %v20987_v0 = vpack.c.bf16 %v10799_v40, %v10798_v12 }
 0xa67   :  { %10563 = vmatpush1.bf16.msra.mxu1 %v15520_v2  ;;  %v10800_v2 = vld [vmem:[%s21616_s8 + $0xa0] sm:$0xff] }
 0xa68   :  { %10564 = vmatprep.subr.bf16.mxu1 %v15525_v60  ;;  %v10801_v60 = vld [vmem:[%s21616_s8 + $0xa8] sm:$0xff] }
 0xa6b   :  { %10565 = vmatpush1.bf16.msra.mxu1 %v15523_v34  ;;  %v20997_v34 = vpack.c.bf16 %v10801_v60, %v10800_v2 }
 0xa6c   :  { %10597 = vmatprep.subr.bf16.mxu1 %v15528_v55  ;;  %v10802_v55 = vld [vmem:[%s21616_s8 + $0xb0] sm:$0xff] }
 0xa6e   :  { %10567 = vmatmul.mubr.bf16.vlgmr.msra.gmra.mrb[48].mxu1 %v9672_v19  ;;  %v15535_v19 = vld [vmem:[%s21850_s29 + $0x130] ss:$8 sps:$4 sm:$0xff]  }
 0xa6f   :  { %10576 = vmatprep.mubr.bf16.mxu1 %v20542_v41  ;;  %10598 = vmatpush1.bf16.msra.mxu1 %v15526_v44  ;;  %v15540_v41 = vld [vmem:[%s21850_s29 + $0x144] ss:$8 sps:$4 sm:$0xff]   ;;  %v10803_v44 = vld [vmem:[%s21616_s8 + $0xb8] sm:$0xff] }
 0xa70   :  { %10599 = vmatprep.subr.bf16.mxu1 %v15531_v33  ;;  %v21007_v33 = vpack.c.bf16 %v10803_v44, %v10802_v55 }
 0xa73   :  { %10600 = vmatpush1.bf16.msra.mxu1 %v15529_v38  ;;  %v21012_v38 = vpop.permute.xlu0 %10673 }
 0xa74   :  { %10601 = vmatprep.subr.bf16.mxu1 %v15534_v51  ;;  %v21014_v51 = vpop.permute.xlu1 %10676 }
 0xa75   :  { %vm10691_vm5 = vcmp.eq.s32.totalorder %v21014_v51, 1 }
 0xa76   :  { %10577 = vmatmul.mubr.bf16.gmra.mrb[52].mxu1 %v20552_v49  ;;  %v9680_v49 = vpack.c.bf16 %v9668_v26, %v20597_v10  ;;  %v15546_v10 = vld [vmem:[%s21850_s29 + $0x164] ss:$8 sps:$4 sm:$0xff]  }
 0xa77   :  { %10586 = vmatprep.mubr.bf16.mxu1 %v9681_v58  ;;  %10602 = vmatpush1.bf16.msra.mxu1 %v15532_v6 }
 0xa78   :  { %10603 = vmatprep.subr.bf16.mxu1 %v15537_v17 }
 0xa7b   :  { %10604 = vmatpush1.bf16.msra.mxu1 %v15535_v19 }
 0xa7c   :  { %10605 = vmatprep.subr.bf16.mxu1 %v15540_v41 }
 0xa7e   :  { %10587 = vmatmul.mubr.bf16.gmra.mrb[56].mxu1 %v9680_v49 }
 0xa7f   :  { %10606 = vmatpush1.bf16.msra.mxu1 %v15538_v61  ;;  %13031 = vmatprep.mubr.msk.bf16.mxu1 %vm7939_vm9, %v9675_v50 }
 0xa80   :  { %10607 = vmatprep.subr.bf16.mxu1 %v15543_v59 }
 0xa83   :  { %10608 = vmatpush1.bf16.msra.mxu1 %v15541_v18  ;;  %v21038_v18 = vpop.permute.xlu0 %10679 }
 0xa84   :  { %10609 = vmatprep.subr.bf16.mxu1 %v15546_v10  ;;  %vm10692_vm2 = vcmp.eq.s32.totalorder %v21038_v18, 1 }
 0xa87   :  { %10610 = vmatpush1.bf16.msra.mxu1 %v15544_v28  ;;  %v21066_v14 = vpop.permute.xlu0 %10685 }
 0xa88   :  { %10611 = vmatprep.subr.bf16.mxu1 %v15549_v30  ;;  %vm10694_vm11 = vcmp.eq.s32.totalorder %v21066_v14, 1  ;;  %v11216_v14 = vld [vmem:[%s21625_s17] sm:$0x3] }
 0xa8b   :  { %10612 = vmatpush1.bf16.msra.mxu1 %v15547_v22 }
 0xa8c   :  { %10613 = vmatprep.subr.bf16.mxu1 %v15552_v35 }
 0xa8f   :  { %10614 = vmatpush1.bf16.msra.mxu1 %v15550_v20  ;;  %v21042_v20 = vpop.permute.xlu1 %10682 }
 0xa90   :  { %10615 = vmatprep.subr.bf16.mxu1 %v15555_v47  ;;  %vm10693_vm10 = vcmp.eq.s32.totalorder %v21042_v20, 1 }
 0xa93   :  { %10616 = vmatpush1.bf16.msra.mxu1 %v15553_v32  ;;  %v21073_v60 = vpop.permute.xlu1 %10688 }
 0xa94   :  { %10617 = vmatprep.subr.bf16.mxu1 %v15558_v37  ;;  %vm10695_vm12 = vcmp.eq.s32.totalorder %v21073_v60, 1  ;;  %v13065_v60 = vld [vmem:[%s21626_s18 + $0xc0] sm:$0xff] }
 0xa97   :  { %10618 = vmatpush1.bf16.msra.mxu1 %v15556_v25 }
 0xa9a   :  { %10630 = vmatmul.mubr.bf16.vlgmr.msra.gmra.mrb[48].mxu1 %v9674_v62 }
 0xa9b   :  { %13032 = vmatprep.mubr.msk.bf16.mxu1 %vm7939_vm9, %v20346_v43  ;;  %v10787_v43 = vld [vmem:[%s21616_s8 + $0x38] sm:$0xff] }
 0xa9c   :  { %v20928_v52 = vpack.c.bf16 %v10787_v43, %v10786_v39 }
 0xa9e   :  { %14010 = vmatpush1.bf16.msra.mxu0 %v20928_v52 }
 0xa9f   :  { %14011 = vmatprep.subr.bf16.mxu0 %v21725_v48 }
 0xaa2   :  { %10640 = vmatmul.mubr.bf16.gmra.mrb[52].mxu1 %v20699_v57  ;;  %v10789_v57 = vld [vmem:[%s21616_s8 + $0x48] sm:$0xff] }
 0xaa3   :  { %13033 = vmatprep.mubr.msk.bf16.mxu1 %vm7939_vm9, %v9683_v3  ;;  %v20938_v31 = vpack.c.bf16 %v10789_v57, %v10788_v21  ;;  %vm10690_vm9 = vcmp.eq.s32.totalorder %v21012_v38, 1 }
 0xaa5   :  { %14013 = vmatpush1.bf16.msra.mxu0 %v20938_v31 }
 0xaa6   :  { %14014 = vmatprep.subr.bf16.mxu0 %v21725_v48 }
 0xaa9   :  { %14016 = vmatpush1.bf16.msra.mxu0 %v20948_v63 }
 0xaaa   :  { %10650 = vmatmul.mubr.bf16.gmra.mrb[56].mxu1 %v9682_v45  ;;  %14017 = vmatprep.subr.bf16.mxu0 %v21725_v48 }
 0xaab   :  { %11638 = vmatprep.mubr.f32.mxu1 %v21723_v13 }
 0xaad   :  { %14019 = vmatpush1.bf16.msra.mxu0 %v20958_v54 }
 0xaae   :  { %14020 = vmatprep.subr.bf16.mxu0 %v21725_v48 }
 0xab1   :  { %14022 = vmatpush1.bf16.msra.mxu0 %v20968_v23 }
 0xab2   :  { %14023 = vmatprep.subr.bf16.mxu0 %v21725_v48 }
 0xab5   :  { %14025 = vmatpush1.bf16.msra.mxu0 %v20981_v36 }
 0xab6   :  { %14026 = vmatprep.subr.bf16.mxu0 %v21725_v48 }
 0xab9   :  { %14028 = vmatpush1.bf16.msra.mxu0 %v20987_v0 }
 0xaba   :  { %14029 = vmatprep.subr.bf16.mxu0 %v21725_v48 }
 0xabd   :  { %14031 = vmatpush1.bf16.msra.mxu0 %v20997_v34 }
 0xabe   :  { %14032 = vmatprep.subr.bf16.mxu0 %v21725_v48 }
 0xac1   :  { %14034 = vmatpush1.bf16.msra.mxu0 %v21007_v33 }
 0xac2   :  { %14035 = vmatprep.subr.bf16.mxu0 %v21725_v48 }
 0xb6d   :  { %v21017_v53 = vpop.f32.mrb[48].mxu1 }
 0xb6e   :  { %v10696_v6 = vsel %vm10690_vm9, %v21017_v53, 0.0  ;;  %v21022_v17 = vpop.f32.mrb[49].mxu1 }
 0xb6f   :  { %v10697_v58 = vsel %vm10690_vm9, %v21022_v17, 0.0  ;;  %v21028_v19 = vpop.f32.mrb[50].mxu1  ;;  %v10739_v61 = vmul.f32 %v10696_v6, %v10696_v6 }
 0xb70   :  { %v10740_v41 = vmul.f32 %v10697_v58, %v10697_v58  ;;  %v10698_v26 = vsel %vm10691_vm5, %v21028_v19, 0.0  ;;  %v21033_v42 = vpop.f32.mrb[51].mxu1  ;;  %v10721_v10 = vsel %vm10720_vm1, %v10697_v58, 0.0 }
 0xb71   :  { %v10708_v49 = vadd.f32 %v10698_v26, %v10696_v6  ;;  %v10741_v59 = vmul.f32 %v10698_v26, %v10698_v26  ;;  %v10699_v50 = vsel %vm10691_vm5, %v21033_v42, 0.0 }
 0xb72   :  { %v10722_v28 = vsel %vm10720_vm1, %v10699_v50, 0.0  ;;  %v10742_v30 = vmul.f32 %v10699_v50, %v10699_v50  ;;  %v10763_v47 = vsel %vm10720_vm1, %v10740_v41, 0.0 }
 0xb73   :  { %v10751_v22 = vadd.f32 %v10741_v59, %v10739_v61  ;;  %v10723_v35 = vadd.f32 %v10722_v28, %v10721_v10 }
 0xb74   :  { %v10764_v32 = vsel %vm10720_vm1, %v10742_v30, 0.0 }
 0xb75   :  { %v10765_v37 = vadd.f32 %v10764_v32, %v10763_v47  ;;  %v21047_v25 = vpop.f32.mrb[52].mxu1 }
 0xb76   :  { %v10700_v29 = vsel %vm10692_vm2, %v21047_v25, 0.0  ;;  %v21052_v62 = vpop.f32.mrb[53].mxu1 }
 0xb77   :  { %v10709_v46 = vadd.f32 %v10708_v49, %v10700_v29  ;;  %v10743_v3 = vmul.f32 %v10700_v29, %v10700_v29  ;;  %v10701_v56 = vsel %vm10692_vm2, %v21052_v62, 0.0  ;;  %v21058_v45 = vpop.f32.mrb[54].mxu1 }
 0xb78   :  { %v10724_v39 = vsel %vm10720_vm1, %v10701_v56, 0.0  ;;  %v10744_v43 = vmul.f32 %v10701_v56, %v10701_v56  ;;  %v10702_v21 = vsel %vm10693_vm10, %v21058_v45, 0.0  ;;  %v21064_v57 = vpop.f32.mrb[55].mxu1 }
 0xb79   :  { %v10752_v7 = vadd.f32 %v10751_v22, %v10743_v3  ;;  %v10725_v8 = vadd.f32 %v10724_v39, %v10723_v35  ;;  %v10710_v27 = vadd.f32 %v10709_v46, %v10702_v21  ;;  %v10745_v16 = vmul.f32 %v10702_v21, %v10702_v21 }
 0xb7a   :  { %v10766_v11 = vsel %vm10720_vm1, %v10744_v43, 0.0  ;;  %v10703_v24 = vsel %vm10693_vm10, %v21064_v57, 0.0 }
 0xb7b   :  { %v10767_v9 = vadd.f32 %v10766_v11, %v10765_v37  ;;  %v10753_v12 = vadd.f32 %v10752_v7, %v10745_v16  ;;  %v10726_v40 = vsel %vm10720_vm1, %v10703_v24, 0.0  ;;  %v10746_v2 = vmul.f32 %v10703_v24, %v10703_v24 }
 0xb7c   :  { %v10727_v55 = vadd.f32 %v10726_v40, %v10725_v8 }
 0xb7d   :  { %v10768_v44 = vsel %vm10720_vm1, %v10746_v2, 0.0  ;;  %v21077_v6 = vpop.f32.mrb[56].mxu1 }
 0xb7e   :  { %v10769_v58 = vadd.f32 %v10768_v44, %v10767_v9  ;;  %v10704_v41 = vsel %vm10694_vm11, %v21077_v6, 0.0  ;;  %v21082_v26 = vpop.f32.mrb[57].mxu1 }
 0xb7f   :  { %v10711_v61 = vadd.f32 %v10710_v27, %v10704_v41  ;;  %v10747_v49 = vmul.f32 %v10704_v41, %v10704_v41  ;;  %v10705_v59 = vsel %vm10694_vm11, %v21082_v26, 0.0  ;;  %v21088_v50 = vpop.f32.mrb[58].mxu1 }
 0xb80   :  { %v10728_v10 = vsel %vm10720_vm1, %v10705_v59, 0.0  ;;  %v10748_v28 = vmul.f32 %v10705_v59, %v10705_v59  ;;  %v10706_v30 = vsel %vm10695_vm12, %v21088_v50, 0.0  ;;  %v21094_v22 = vpop.f32.mrb[59].mxu1 }
 0xb81   :  { %v10754_v35 = vadd.f32 %v10753_v12, %v10747_v49  ;;  %v10729_v47 = vadd.f32 %v10728_v10, %v10727_v55  ;;  %v10712_v32 = vsel %vm21897_vm7, %v10706_v30, 0.0  ;;  %v10749_v37 = vmul.f32 %v10706_v30, %v10706_v30 }
 0xb82   :  { %v10770_v29 = vsel %vm10720_vm1, %v10748_v28, 0.0  ;;  %v10713_v46 = vadd.f32 %v10712_v32, %v10711_v61  ;;  %v10707_v3 = vsel %vm10695_vm12, %v21094_v22, 0.0 }
 0xb83   :  { %v10771_v56 = vadd.f32 %v10770_v29, %v10769_v58  ;;  %v10755_v39 = vsel %vm21898_vm3, %v10749_v37, 0.0  ;;  %v10731_v43 = vsel %vm10730_vm13, %v10707_v3, 0.0  ;;  %v10750_v21 = vmul.f32 %v10707_v3, %v10707_v3  ;;  %v10969_v3 = vld [vmem:[%s21617_s9 + $0x30] sm:$0xff]  ;;  %vm21208_vm3 = vmpackc.low %vm10691_vm5, %vm10690_vm9 }
 0xb84   :  { %v10714_v7 = vrot.slane %v10713_v46, 4  ;;  %v10756_v8 = vadd.f32 %v10755_v39, %v10754_v35  ;;  %v10732_v27 = vadd.f32 %v10731_v43, %v10729_v47  ;;  %v10970_v47 = vld [vmem:[%s21617_s9 + $0x38] sm:$0xff]  ;;  %vm21225_vm5 = vmpackc.low %vm10693_vm10, %vm10692_vm2  ;;  %vm21903_vm10 = vcmask 1043456  }
 0xb85   :  { %v10772_v16 = vsel %vm10730_vm13, %v10750_v21, 0.0  ;;  %v10974_v39 = vld [vmem:[%s21617_s9 + $0x58] sm:$0xff] }
 0xb86   :  { %v10715_v11 = vadd.f32 %v10714_v7, %v10713_v46  ;;  %v10733_v24 = vrot.slane %v10732_v27, 4  ;;  %v10773_v9 = vadd.f32 %v10772_v16, %v10771_v56  ;;  %v10967_v46 = vld [vmem:[%s21617_s9 + $0x20] sm:$0xff]  ;;  %v10972_v56 = vld [vmem:[%s21617_s9 + $0x48] sm:$0xff]  ;;  %v10978_v16 = vld [vmem:[%s21617_s9 + $0x78] sm:$0xff] }
 0xb87   :  { %v14077_v43 = vpack.c.bf16 %v10969_v3, %v10967_v46  ;;  %v14079_v21 = vpack.c.bf16 %v10974_v39, %v10972_v56  ;;  %v10971_v7 = vld [vmem:[%s21617_s9 + $0x40] sm:$0xff] }
 0xb88   :  { %v10716_v12 = vrot.slane %v10715_v11, 2  ;;  %v10734_v40 = vadd.f32 %v10733_v24, %v10732_v27  ;;  %v10774_v2 = vrot.slane %v10773_v9, 4  ;;  %v10976_v27 = vld [vmem:[%s21617_s9 + $0x68] sm:$0xff] }
 0xb89   :  { %v14083_v24 = vpack.c.bf16 %v10978_v16, %v10976_v27 }
 0xb8a   :  { %v10717_v55 = vadd.f32 %v10716_v12, %v10715_v11  ;;  %v10735_v44 = vrot.slane %v10734_v40, 2  ;;  %v10775_v41 = vadd.f32 %v10774_v2, %v10773_v9  ;;  %v10975_v9 = vld [vmem:[%s21617_s9 + $0x60] sm:$0xff]  ;;  %v10977_v12 = vld [vmem:[%s21617_s9 + $0x70] sm:$0xff] }
 0xb8c   :  { %v10736_v61 = vadd.f32 %v10735_v44, %v10734_v40  ;;  %v10776_v49 = vrot.slane %v10775_v41, 2  ;;  %v10718_v58 = vrot.slane %v10717_v55, 1  ;;  %v14085_v40 = vpack.c.bf16 %v10977_v12, %v10975_v9 }
 0xb8e   :  { %v10737_v59 = vrot.slane %v10736_v61, 1  ;;  %v10777_v10 = vadd.f32 %v10776_v49, %v10775_v41  ;;  %v10719_v32 = vadd.f32 %v10718_v58, %v10717_v55 }
 0xb90   :  { %v10738_v28 = vadd.f32 %v10737_v59, %v10736_v61  ;;  %v10778_v30 = vrot.slane %v10777_v10, 1 }
 0xb92   :  { %13034 = vmatprep.mubr.msk.f32.mxu0 %vm10720_vm1, %v10738_v28  ;;  %v10779_v35 = vadd.f32 %v10778_v30, %v10777_v10  ;;  %v10956_v30 = vld [vmem:[%s21622_s14] sm:$0x1]  ;;  %s11866_s14 = sld [smem:[#allocation6 + $0x2]] }
 0xb93   :  { %10872 = vmatmul.mubr.f32.vlgmr.msra.gmra.mrb[52].mxu0 %v10719_v32 }
 0xb94   :  { %14037 = vmatpush1.bf16.msra.mxu0 %v20717_v4  ;;  %13035 = vmatprep.mubr.msk.f32.mxu0 %vm10720_vm1, %v10779_v35  ;;  %v10757_v4 = vrot.slane %v10756_v8, 4 }
 0xb95   :  { %14038 = vmatprep.subr.bf16.mxu0 %v21725_v48 }
 0xb98   :  { %14040 = vmatpush1.bf16.msra.mxu0 %v20727_v1  ;;  %v10758_v1 = vadd.f32 %v10757_v4, %v10756_v8  ;;  %v10973_v8 = vld [vmem:[%s21617_s9 + $0x50] sm:$0xff]  ;;  %v11179_v56 = vstv %s11866_s14 }
 0xb99   :  { %14041 = vmatprep.subr.bf16.mxu0 %v21725_v48  ;;  %v14081_v11 = vpack.c.bf16 %v10973_v8, %v10971_v7 }
 0xb9c   :  { %14043 = vmatpush1.bf16.msra.mxu0 %v20748_v5  ;;  %v10759_v5 = vrot.slane %v10758_v1, 2 }
 0xb9d   :  { %14044 = vmatprep.subr.bf16.mxu0 %v21725_v48 }
 0xba0   :  { %14046 = vmatpush1.bf16.msra.mxu0 %v20928_v52  ;;  %v10760_v52 = vadd.f32 %v10759_v5, %v10758_v1  ;;  %v10960_v1 = vld [vmem:[%s21623_s15] sm:$0x1] }
 0xba1   :  { %14047 = vmatprep.subr.bf16.mxu0 %v21725_v48 }
 0xba4   :  { %14049 = vmatpush1.bf16.msra.mxu0 %v20938_v31  ;;  %v10761_v31 = vrot.slane %v10760_v52, 1 }
 0xba5   :  { %14050 = vmatprep.subr.bf16.mxu0 %v21725_v48 }
 0xba8   :  { %14052 = vmatpush1.bf16.msra.mxu0 %v20948_v63  ;;  %v10762_v63 = vadd.f32 %v10761_v31, %v10760_v52 }
 0xba9   :  { %14053 = vmatprep.subr.bf16.mxu0 %v21725_v48 }
 0xbac   :  { %14055 = vmatpush1.bf16.msra.mxu0 %v20958_v54  ;;  %v10964_v54 = vld [vmem:[%s21617_s9 + $0x8] sm:$0xff] }
 0xbad   :  { %14056 = vmatprep.subr.bf16.mxu0 %v21725_v48 }
 0xbb0   :  { %14058 = vmatpush1.bf16.msra.mxu0 %v20968_v23  ;;  %v10966_v23 = vld [vmem:[%s21617_s9 + $0x18] sm:$0xff] }
 0xbb1   :  { %14059 = vmatprep.subr.bf16.mxu0 %v21725_v48 }
 0xbb4   :  { %14061 = vmatpush1.bf16.msra.mxu0 %v20981_v36  ;;  %v10963_v36 = vld [vmem:[%s21617_s9] sm:$0xff] }
 0xbb5   :  { %14062 = vmatprep.subr.bf16.mxu0 %v21725_v48 }
 0xbb8   :  { %14064 = vmatpush1.bf16.msra.mxu0 %v20987_v0  ;;  %v14071_v0 = vpack.c.bf16 %v10966_v23, %v10964_v54 }
 0xbb9   :  { %14065 = vmatprep.subr.bf16.mxu0 %v21725_v48 }
 0xbbc   :  { %14067 = vmatpush1.bf16.msra.mxu0 %v20997_v34  ;;  %v10965_v34 = vld [vmem:[%s21617_s9 + $0x10] sm:$0xff] }
 0xbbd   :  { %14068 = vmatprep.subr.bf16.mxu0 %v21725_v48  ;;  %v14073_v37 = vpack.c.bf16 %v10965_v34, %v10963_v36 }
 0xbc0   :  { %14070 = vmatpush1.bf16.msra.mxu0 %v21007_v33  ;;  %v10968_v33 = vld [vmem:[%s21617_s9 + $0x28] sm:$0xff] }
 0xbc1   :  { %v14075_v29 = vpack.c.bf16 %v10970_v47, %v10968_v33  ;;  %14072 = vmatprep.subr.bf16.mxu0 %v14071_v0 }
 0xbc3   :  { %10947 = vmatmul.mubr.f32.vlgmr.msra.gmra.mrb[54].mxu0 %v10762_v63 }
 0xbc4   :  { %11046 = vmatprep.mubr.f32.mxu0 %v21723_v13  ;;  %14074 = vmatpush1.bf16.msra.mxu0 %v14073_v37 }
 0xbc5   :  { %14076 = vmatprep.subr.bf16.mxu0 %v14075_v29 }
 0xbc8   :  { %14078 = vmatpush1.bf16.msra.mxu0 %v14077_v43 }
 0xbc9   :  { %14080 = vmatprep.subr.bf16.mxu0 %v14079_v21 }
 0xbcc   :  { %14082 = vmatpush1.bf16.msra.mxu0 %v14081_v11 }
 0xbcd   :  { %14084 = vmatprep.subr.bf16.mxu0 %v14083_v24 }
 0xbd0   :  { %14086 = vmatpush1.bf16.msra.mxu0 %v14085_v40 }
 0xbd1   :  { %14088 = vmatprep.subr.bf16.mxu0 %v14071_v0 }
 0xc66   :  { %v10873_v2 = vpop.f32.mrb[52].mxu0 }
 0xc67   :  { %v10875_v55 = vpop.f32.mrb[53].mxu0  ;;  %v10878_v44 = vmul.f32 0.055555556, %v10873_v2 }
 0xc69   :  { %v10953_v61 = vmul.f32 %v10878_v44, %v10878_v44 }
 0xc96   :  { %v10948_v41 = vpop.f32.mrb[54].mxu0 }
 0xc97   :  { %v10952_v49 = vmul.f32 0.055555556, %v10948_v41  ;;  %v10950_v58 = vpop.f32.mrb[55].mxu0 }
 0xc99   :  { %v10954_v59 = vsub.f32 %v10952_v49, %v10953_v61 }
 0xc9b   :  { %v10955_v10 = vmax.f32 %v10954_v59, 0.0 }
 0xc9d   :  { %v10957_v28 = vadd.f32 1e-05, %v10955_v10 }
 0xc9f   :  { %15563 = vrsqrt.f32 %v10957_v28 }
 0xca9   :  { %v15564_v32 = vpop.eup %15563 }
 0xcaa   :  { %v10959_v35 = vmul.f32 %v15564_v32, %v10956_v30  ;;  %v13110_v30 = vld [vmem:[%s21626_s18 + $0x1a8] sm:$0xff] }
 0xcac   :  { %13036 = vmatmul.mubr.msk.f32.vlgmr.msra.gmra.mrb[56].mxu0 %vm10720_vm1, %v10959_v35  ;;  %v10961_v4 = vmul.f32 %v10959_v35, %v10878_v44 }
 0xcad   :  { %14090 = vmatpush1.bf16.msra.mxu0 %v14073_v37  ;;  %11120 = vmatprep.mubr.f32.mxu0 %v21723_v13 }
 0xcae   :  { %14092 = vmatprep.subr.bf16.mxu0 %v14075_v29  ;;  %v10962_v5 = vsub.f32 %v10960_v1, %v10961_v4 }
 0xcb1   :  { %14094 = vmatpush1.bf16.msra.mxu0 %v14077_v43 }
 0xcb2   :  { %14096 = vmatprep.subr.bf16.mxu0 %v14079_v21 }
 0xcb5   :  { %14098 = vmatpush1.bf16.msra.mxu0 %v14081_v11 }
 0xcb6   :  { %14100 = vmatprep.subr.bf16.mxu0 %v14083_v24 }
 0xcb9   :  { %14102 = vmatpush1.bf16.msra.mxu0 %v14085_v40 }
 0xcbc   :  { %13037 = vmatmul.mubr.msk.f32.vlgmr.msra.gmra.mrb[58].mxu0 %vm10720_vm1, %v10962_v5 }
 0xcbd   :  { %11291 = vmatprep.mubr.f32.mxu0 %v21723_v13 }
 0xd7f   :  { %v11048_v52 = vpop.f32.mrb[56].mxu0 }
 0xd80   :  { %v11130_v31 = vrot.slane %v11048_v52, %v16816_v15  ;;  %v11050_v63 = vpop.f32.mrb[57].mxu0 }
 0xd81   :  { %v11134_v54 = vrot.slane %v11050_v63, %v16816_v15 }
 0xd82   :  { %v11135_v23 = vmul.f32 %v11130_v31, %v21017_v53  ;;  %v11137_v36 = vmul.f32 %v11130_v31, %v21028_v19  ;;  %v11139_v0 = vmul.f32 %v11130_v31, %v21047_v25  ;;  %v11141_v34 = vmul.f32 %v11130_v31, %v21058_v45 }
 0xd83   :  { %v11143_v33 = vmul.f32 %v11130_v31, %v21077_v6  ;;  %v21194_v47 = vmul.f32 %v11130_v31, %v21088_v50  ;;  %v11136_v37 = vmul.f32 %v11134_v54, %v21022_v17  ;;  %v11138_v29 = vmul.f32 %v11134_v54, %v21033_v42 }
 0xd84   :  { %v11140_v46 = vmul.f32 %v11134_v54, %v21052_v62  ;;  %v11142_v3 = vmul.f32 %v11134_v54, %v21064_v57  ;;  %v11144_v53 = vmul.f32 %v11134_v54, %v21082_v26  ;;  %v11146_v19 = vmul.f32 %v11134_v54, %v21094_v22 }
 0xd8f   :  { %v11122_v25 = vpop.f32.mrb[58].mxu0 }
 0xd90   :  { %v11150_v45 = vrot.slane %v11122_v25, %v16816_v15  ;;  %v11124_v6 = vpop.f32.mrb[59].mxu0  ;;  %v13070_v25 = vld [vmem:[%s21626_s18 + $0xe8] sm:$0xff] }
 0xd91   :  { %v11154_v50 = vrot.slane %v11124_v6, %v16816_v15  ;;  %v13071_v6 = vld [vmem:[%s21626_s18 + $0xf0] sm:$0xff] }
 0xd92   :  { %v11155_v39 = vadd.f32 %v11150_v45, %v11135_v23  ;;  %v11157_v17 = vadd.f32 %v11150_v45, %v11137_v36  ;;  %v11159_v43 = vadd.f32 %v11150_v45, %v11139_v0  ;;  %v11161_v42 = vadd.f32 %v11150_v45, %v11141_v34  ;;  %v13118_v23 = vld [vmem:[%s21626_s18 + $0x1e8] sm:$0xff] }
 0xd93   :  { %v11156_v21 = vadd.f32 %v11154_v50, %v11136_v37  ;;  %v11158_v62 = vadd.f32 %v11154_v50, %v11138_v29  ;;  %v11160_v7 = vadd.f32 %v11154_v50, %v11140_v46  ;;  %v11162_v57 = vadd.f32 %v11154_v50, %v11142_v3  ;;  %v13051_v37 = vld [vmem:[%s21625_s17 + $0x2] sm:$0x3]  ;;  %v13067_v46 = vld [vmem:[%s21626_s18 + $0xd0] sm:$0xff]  ;;  %v13068_v3 = vld [vmem:[%s21626_s18 + $0xd8] sm:$0xff] }
 0xd94   :  { %vm11167_vm6 = vcmp.gt.f32.partialorder %v11155_v39, 0.0  ;;  %vm11169_vm14 = vcmp.gt.f32.partialorder %v11157_v17, 0.0  ;;  %v11180_v26 = vmul.f32 %v11179_v56, %v11155_v39  ;;  %v11182_v22 = vmul.f32 %v11179_v56, %v11157_v17 }
 0xd95   :  { %vm11168_vm15 = vcmp.gt.f32.partialorder %v11156_v21, 0.0  ;;  %vm11170_vm8 = vcmp.gt.f32.partialorder %v11158_v62, 0.0  ;;  %v11181_v8 = vmul.f32 %v11179_v56, %v11156_v21  ;;  %v11183_v27 = vmul.f32 %v11179_v56, %v11158_v62 }
 0xd96   :  { %v11192_v16 = vsel %vm11167_vm6, %v11155_v39, %v11180_v26  ;;  %v11194_v11 = vsel %vm11169_vm14, %v11157_v17, %v11182_v22  ;;  %vm11172_vm4 = vcmp.gt.f32.partialorder %v11160_v7, 0.0  ;;  %vm11174_vm0 = vcmp.gt.f32.partialorder %v11162_v57, 0.0  ;;  %v13073_v39 = vld [vmem:[%s21626_s18 + $0x100] sm:$0xff]  ;;  %v13074_v17 = vld [vmem:[%s21626_s18 + $0x108] sm:$0xff]  ;;  %v13079_v22 = vld [vmem:[%s21626_s18 + $0x130] sm:$0xff] }
 0xd97   :  { %v11193_v15 = vsel %vm11168_vm15, %v11156_v21, %v11181_v8  ;;  %v11195_v24 = vsel %vm11170_vm8, %v11158_v62, %v11183_v27  ;;  %v14106_v9 = vpack.c.bf16 %v11194_v11, %v11192_v16  ;;  %v11185_v12 = vmul.f32 %v11179_v56, %v11160_v7  ;;  %vm21243_vm15 = vmpackc.low %vm21903_vm10, %vm10694_vm11  ;;  %v13076_v21 = vld [vmem:[%s21626_s18 + $0x118] sm:$0xff]  ;;  %v13081_v16 = vld [vmem:[%s21626_s18 + $0x140] sm:$0xff] }
 0xd98   :  { %v14103_v40 = vpack.c.bf16 %v11195_v24, %v11193_v15  ;;  %v11187_v2 = vmul.f32 %v11179_v56, %v11162_v57  ;;  %vm11171_vm13 = vcmp.gt.f32.partialorder %v11159_v43, 0.0  ;;  %vm11173_vm7 = vcmp.gt.f32.partialorder %v11161_v42, 0.0  ;;  %v13080_v8 = vld [vmem:[%s21626_s18 + $0x138] sm:$0xff]  ;;  %v13082_v11 = vld [vmem:[%s21626_s18 + $0x148] sm:$0xff]  ;;  %v13083_v24 = vld [vmem:[%s21626_s18 + $0x150] sm:$0xff] }
 0xd99   :  { %v11197_v44 = vsel %vm11172_vm4, %v11160_v7, %v11185_v12  ;;  %v11184_v41 = vmul.f32 %v11179_v56, %v11159_v43  ;;  %v11186_v61 = vmul.f32 %v11179_v56, %v11161_v42  ;;  %v11164_v49 = vadd.f32 %v11154_v50, %v11144_v53  ;;  %v13077_v7 = vld [vmem:[%s21626_s18 + $0x120] sm:$0xff] }
 0xd9a   :  { %14105 = vmatprep.subr.msk.bf16.mxu0 %vm21208_vm3, %v14103_v40  ;;  %14213 = vmatprep.subr.msk.bf16.mxu1 %vm21208_vm3, %v14103_v40  ;;  %v11199_v58 = vsel %vm11174_vm0, %v11162_v57, %v11187_v2  ;;  %v11166_v59 = vadd.f32 %v11154_v50, %v11146_v19  ;;  %v11163_v38 = vadd.f32 %v11150_v45, %v11143_v33  ;;  %vm11217_vm11 = vcmask 359424   ;;  %v13091_v33 = vld [vmem:[%s21625_s17 + $0x4] sm:$0x3]  ;;  %v13072_v50 = vld [vmem:[%s21626_s18 + $0xf8] sm:$0xff]  ;;  %v13078_v57 = vld [vmem:[%s21626_s18 + $0x128] sm:$0xff] }
 0xd9b   :  { %14108 = vmatpush1.bf16.msk.msra.mxu0 %vm21208_vm3, %v14106_v9  ;;  %14216 = vmatpush1.bf16.msk.msra.mxu1 %vm21208_vm3, %v14106_v9  ;;  %v14109_v51 = vpack.c.bf16 %v11199_v58, %v11197_v44  ;;  %v11196_v10 = vsel %vm11171_vm13, %v11159_v43, %v11184_v41  ;;  %v11198_v28 = vsel %vm11173_vm7, %v11161_v42, %v11186_v61  ;;  %vm11176_vm9 = vcmp.gt.f32.partialorder %v11164_v49, 0.0  ;;  %v13069_v19 = vld [vmem:[%s21626_s18 + $0xe0] sm:$0xff]  ;;  %v13075_v42 = vld [vmem:[%s21626_s18 + $0x110] sm:$0xff]  ;;  %v13086_v2 = vld [vmem:[%s21626_s18 + $0x168] sm:$0xff] }
 0xd9c   :  { %v14112_v32 = vpack.c.bf16 %v11198_v28, %v11196_v10  ;;  %vm11178_vm6 = vcmp.gt.f32.partialorder %v11166_v59, 0.0  ;;  %v11189_v35 = vmul.f32 %v11179_v56, %v11164_v49  ;;  %v11191_v4 = vmul.f32 %v11179_v56, %v11166_v59  ;;  %v13085_v12 = vld [vmem:[%s21626_s18 + $0x160] sm:$0xff]  ;;  %v13087_v44 = vld [vmem:[%s21626_s18 + $0x170] sm:$0xff]  ;;  %v13088_v41 = vld [vmem:[%s21626_s18 + $0x178] sm:$0xff] }
 0xd9d   :  { %14111 = vmatprep.subr.msk.bf16.mxu0 %vm21225_vm5, %v14109_v51  ;;  %14219 = vmatprep.subr.msk.bf16.mxu1 %vm21225_vm5, %v14109_v51  ;;  %v11165_v1 = vadd.f32 %v11150_v45, %v21194_v47  ;;  %vm11175_vm14 = vcmp.gt.f32.partialorder %v11163_v38, 0.0  ;;  %v11188_v18 = vmul.f32 %v11179_v56, %v11163_v38  ;;  %v13066_v47 = vld [vmem:[%s21626_s18 + $0xc8] sm:$0xff]  ;;  %v14143_v53 = vpack.c.bf16 %v13068_v3, %v13067_v46  ;;  %v13109_v28 = vld [vmem:[%s21626_s18 + $0x1a0] sm:$0xff] }
 0xd9e   :  { %v11201_v5 = vsel %vm11176_vm9, %v11164_v49, %v11189_v35  ;;  %v11203_v20 = vsel %vm11178_vm6, %v11166_v59, %v11191_v4  ;;  %v14140_v29 = vpack.c.bf16 %v13066_v47, %v13065_v60  ;;  %v14146_v45 = vpack.c.bf16 %v13070_v25, %v13069_v19  ;;  %v13105_v49 = vld [vmem:[%s21626_s18 + $0x180] sm:$0xff]  ;;  %v13106_v58 = vld [vmem:[%s21626_s18 + $0x188] sm:$0xff]  ;;  %v13111_v35 = vld [vmem:[%s21626_s18 + $0x1b0] sm:$0xff] }
 0xd9f   :  { %14114 = vmatpush1.bf16.msk.msra.mxu0 %vm21225_vm5, %v14112_v32  ;;  %14222 = vmatpush1.bf16.msk.msra.mxu1 %vm21225_vm5, %v14112_v32  ;;  %v11215_v52 = vsel %vm10695_vm12, %v11203_v20, 0.0  ;;  %vm11177_vm2 = vcmp.gt.f32.partialorder %v11165_v1, 0.0  ;;  %v11190_v31 = vmul.f32 %v11179_v56, %v11165_v1  ;;  %v11200_v54 = vsel %vm11175_vm14, %v11163_v38, %v11188_v18  ;;  %v13107_v38 = vld [vmem:[%s21626_s18 + $0x190] sm:$0xff]  ;;  %v13112_v4 = vld [vmem:[%s21626_s18 + $0x1b8] sm:$0xff]  ;;  %v13113_v18 = vld [vmem:[%s21626_s18 + $0x1c0] sm:$0xff] }
 0xda0   :  { %v14115_v63 = vpack.c.bf16 %v11215_v52, %v11201_v5  ;;  %v14149_v56 = vpack.c.bf16 %v13072_v50, %v13071_v6  ;;  %v14152_v43 = vpack.c.bf16 %v13074_v17, %v13073_v39  ;;  %v14155_v62 = vpack.c.bf16 %v13076_v21, %v13075_v42  ;;  %v13114_v5 = vld [vmem:[%s21626_s18 + $0x1c8] sm:$0xff]  ;;  %v13115_v52 = vld [vmem:[%s21626_s18 + $0x1d0] sm:$0xff]  ;;  %v13125_v3 = vld [vmem:[%s21626_s18 + $0x220] sm:$0xff] }
 0xda1   :  { %v11202_v36 = vsel %vm11177_vm2, %v11165_v1, %v11190_v31  ;;  %v14158_v26 = vpack.c.bf16 %v13078_v57, %v13077_v7  ;;  %v14161_v27 = vpack.c.bf16 %v13080_v8, %v13079_v22  ;;  %v14164_v15 = vpack.c.bf16 %v13082_v11, %v13081_v16  ;;  %v13116_v31 = vld [vmem:[%s21626_s18 + $0x1d8] sm:$0xff]  ;;  %v13122_v60 = vld [vmem:[%s21626_s18 + $0x208] sm:$0xff]  ;;  %v13127_v25 = vld [vmem:[%s21626_s18 + $0x230] sm:$0xff] }
 0xda2   :  { %14117 = vmatprep.subr.msk.bf16.mxu0 %vm21243_vm15, %v14115_v63  ;;  %14225 = vmatprep.subr.msk.bf16.mxu1 %vm21243_vm15, %v14115_v63  ;;  %v11214_v0 = vsel %vm10695_vm12, %v11202_v36, 0.0  ;;  %v14170_v55 = vpack.c.bf16 %v13086_v2, %v13085_v12  ;;  %v14173_v61 = vpack.c.bf16 %v13088_v41, %v13087_v44  ;;  %v14230_v59 = vpack.c.bf16 %v13106_v58, %v13105_v49  ;;  %v11299_v42 = vld [vmem:[%s21626_s18 + $0x8] sm:$0xff]  ;;  %v11300_v57 = vld [vmem:[%s21626_s18 + $0x10] sm:$0xff]  ;;  %v11302_v8 = vld [vmem:[%s21626_s18 + $0x20] sm:$0xff] }
 0xda3   :  { %v14118_v34 = vpack.c.bf16 %v11214_v0, %v11200_v54  ;;  %v14239_v1 = vpack.c.bf16 %v13112_v4, %v13111_v35  ;;  %v14242_v20 = vpack.c.bf16 %v13114_v5, %v13113_v18  ;;  %v13117_v54 = vld [vmem:[%s21626_s18 + $0x1e0] sm:$0xff]  ;;  %v13119_v0 = vld [vmem:[%s21626_s18 + $0x1f0] sm:$0xff]  ;;  %v11307_v12 = vld [vmem:[%s21626_s18 + $0x48] sm:$0xff] }
 0xda4   :  { %v14248_v36 = vpack.c.bf16 %v13118_v23, %v13117_v54  ;;  %v11304_v11 = vld [vmem:[%s21626_s18 + $0x30] sm:$0xff]  ;;  %v11310_v41 = vld [vmem:[%s21626_s18 + $0x60] sm:$0xff] }
 0xda5   :  { %14120 = vmatpush1.bf16.msk.msra.mxu0 %vm21243_vm15, %v14118_v34  ;;  %14228 = vmatpush1.bf16.msk.msra.mxu1 %vm21243_vm15, %v14118_v34  ;;  %v11308_v2 = vld [vmem:[%s21626_s18 + $0x50] sm:$0xff]  ;;  %v11318_v4 = vld [vmem:[%s21626_s18 + $0xa0] sm:$0xff] }
 0xda6   :  { %14123 = vmatprep.subr.msk.bf16.mxu0 %vm21208_vm3, %v14103_v40  ;;  %14229 = vmatprep.subr.bf16.mxu1 %v21725_v48  ;;  %v11312_v58 = vld [vmem:[%s21626_s18 + $0x70] sm:$0xff] }
 0xda7   :  { %v11320_v5 = vld [vmem:[%s21626_s18 + $0xb0] sm:$0xff] }
 0xda8   :  { %13050 = vmatmul.mubr.msk.f32.vlgmr.msra.gmra.mrb[60].mxu0 %vm11217_vm11, %v11216_v14  ;;  %13104 = vmatmul.mubr.msk.f32.vlgmr.msra.gmra.mrb[60].mxu1 %vm11217_vm11, %v13091_v33  ;;  %v13121_v33 = vld [vmem:[%s21626_s18 + $0x200] sm:$0xff]  ;;  %v11758_v54 = vld [vmem:[%s21628_s20 + $0x10] sm:$0xff] }
 0xda9   :  { %14126 = vmatpush1.bf16.msk.msra.mxu0 %vm21208_vm3, %v14106_v9  ;;  %11391 = vmatprep.mubr.f32.mxu0 %v21723_v13  ;;  %v13084_v9 = vld [vmem:[%s21626_s18 + $0x158] sm:$0xff]  ;;  %v14254_v47 = vpack.c.bf16 %v13122_v60, %v13121_v33  ;;  %v11762_v33 = vld [vmem:[%s21628_s20 + $0x30] sm:$0xff] }
 0xdaa   :  { %14129 = vmatprep.subr.msk.bf16.mxu0 %vm21225_vm5, %v14109_v51  ;;  %v14167_v40 = vpack.c.bf16 %v13084_v9, %v13083_v24  ;;  %14231 = vmatpush1.bf16.msra.mxu1 %v14230_v59  ;;  %v13108_v51 = vld [vmem:[%s21626_s18 + $0x198] sm:$0xff]  ;;  %v11306_v9 = vld [vmem:[%s21626_s18 + $0x40] sm:$0xff] }
 0xdab   :  { %14232 = vmatprep.subr.bf16.mxu1 %v21725_v48  ;;  %v14233_v10 = vpack.c.bf16 %v13108_v51, %v13107_v38  ;;  %v11313_v59 = vld [vmem:[%s21626_s18 + $0x78] sm:$0xff]  ;;  %v11314_v51 = vld [vmem:[%s21626_s18 + $0x80] sm:$0xff] }
 0xdac   :  { %v14197_v38 = vpack.c.bf16 %v11313_v59, %v11312_v58  ;;  %v11763_v60 = vld [vmem:[%s21628_s20 + $0x38] sm:$0xff] }
 0xdad   :  { %14132 = vmatpush1.bf16.msk.msra.mxu0 %vm21225_vm5, %v14112_v32  ;;  %v14236_v32 = vpack.c.bf16 %v13110_v30, %v13109_v28  ;;  %v11316_v30 = vld [vmem:[%s21626_s18 + $0x90] sm:$0xff] }
 0xdae   :  { %14135 = vmatprep.subr.msk.bf16.mxu0 %vm21243_vm15, %v14115_v63  ;;  %14234 = vmatpush1.bf16.msra.mxu1 %v14233_v10  ;;  %v14245_v63 = vpack.c.bf16 %v13116_v31, %v13115_v52  ;;  %v11315_v10 = vld [vmem:[%s21626_s18 + $0x88] sm:$0xff]  ;;  %v11756_v31 = vld [vmem:[%s21628_s20] sm:$0xff] }
 0xdaf   :  { %14235 = vmatprep.subr.bf16.mxu1 %v21725_v48  ;;  %v14200_v28 = vpack.c.bf16 %v11315_v10, %v11314_v51 }
 0xdb1   :  { %14138 = vmatpush1.bf16.msk.msra.mxu0 %vm21243_vm15, %v14118_v34  ;;  %v13120_v34 = vld [vmem:[%s21626_s18 + $0x1f8] sm:$0xff] }
 0xdb2   :  { %14139 = vmatprep.subr.bf16.mxu0 %v21725_v48  ;;  %14237 = vmatpush1.bf16.msra.mxu1 %v14236_v32  ;;  %v14251_v14 = vpack.c.bf16 %v13120_v34, %v13119_v0  ;;  %v11317_v32 = vld [vmem:[%s21626_s18 + $0x98] sm:$0xff]  ;;  %v11761_v34 = vld [vmem:[%s21628_s20 + $0x28] sm:$0xff] }
 0xdb3   :  { %14238 = vmatprep.subr.bf16.mxu1 %v21725_v48  ;;  %v14203_v35 = vpack.c.bf16 %v11317_v32, %v11316_v30 }
 0xdb4   :  { %13064 = vmatmul.mubr.msk.f32.vlgmr.msra.gmra.mrb[62].mxu0 %vm11217_vm11, %v13051_v37  ;;  %v13123_v37 = vld [vmem:[%s21626_s18 + $0x210] sm:$0xff] }
 0xdb5   :  { %14141 = vmatpush1.bf16.msra.mxu0 %v14140_v29  ;;  %v13124_v29 = vld [vmem:[%s21626_s18 + $0x218] sm:$0xff] }
 0xdb6   :  { %14142 = vmatprep.subr.bf16.mxu0 %v21725_v48  ;;  %14240 = vmatpush1.bf16.msra.mxu1 %v14239_v1  ;;  %v14257_v46 = vpack.c.bf16 %v13124_v29, %v13123_v37  ;;  %v11319_v1 = vld [vmem:[%s21626_s18 + $0xa8] sm:$0xff]  ;;  %v11764_v37 = vld [vmem:[%s21628_s20 + $0x40] sm:$0xff] }
 0xdb7   :  { %14241 = vmatprep.subr.bf16.mxu1 %v21725_v48  ;;  %v14206_v18 = vpack.c.bf16 %v11319_v1, %v11318_v4  ;;  %v11765_v29 = vld [vmem:[%s21628_s20 + $0x48] sm:$0xff] }
 0xdb9   :  { %14144 = vmatpush1.bf16.msra.mxu0 %v14143_v53  ;;  %v13126_v53 = vld [vmem:[%s21626_s18 + $0x228] sm:$0xff] }
 0xdba   :  { %14145 = vmatprep.subr.bf16.mxu0 %v21725_v48  ;;  %14243 = vmatpush1.bf16.msra.mxu1 %v14242_v20  ;;  %v14260_v19 = vpack.c.bf16 %v13126_v53, %v13125_v3  ;;  %v11321_v20 = vld [vmem:[%s21626_s18 + $0xb8] sm:$0xff]  ;;  %v11766_v3 = vld [vmem:[%s21628_s20 + $0x50] sm:$0xff] }
 0xdbb   :  { %14244 = vmatprep.subr.bf16.mxu1 %v21725_v48  ;;  %v14209_v52 = vpack.c.bf16 %v11321_v20, %v11320_v5  ;;  %v11767_v53 = vld [vmem:[%s21628_s20 + $0x58] sm:$0xff] }
 0xdbd   :  { %14147 = vmatpush1.bf16.msra.mxu0 %v14146_v45  ;;  %v13128_v45 = vld [vmem:[%s21626_s18 + $0x238] sm:$0xff] }
 0xdbe   :  { %14148 = vmatprep.subr.bf16.mxu0 %v21725_v48  ;;  %14246 = vmatpush1.bf16.msra.mxu1 %v14245_v63  ;;  %v14263_v6 = vpack.c.bf16 %v13128_v45, %v13127_v25  ;;  %v11757_v63 = vld [vmem:[%s21628_s20 + $0x8] sm:$0xff]  ;;  %v11768_v25 = vld [vmem:[%s21628_s20 + $0x60] sm:$0xff] }
 0xdbf   :  { %14247 = vmatprep.subr.bf16.mxu1 %v21725_v48  ;;  %v14266_v23 = vpack.c.bf16 %v11757_v63, %v11756_v31  ;;  %v11769_v45 = vld [vmem:[%s21628_s20 + $0x68] sm:$0xff] }
 0xdc1   :  { %14150 = vmatpush1.bf16.msra.mxu0 %v14149_v56 }
 0xdc2   :  { %14151 = vmatprep.subr.bf16.mxu0 %v21725_v48  ;;  %14249 = vmatpush1.bf16.msra.mxu1 %v14248_v36  ;;  %v11759_v36 = vld [vmem:[%s21628_s20 + $0x18] sm:$0xff] }
 0xdc3   :  { %14250 = vmatprep.subr.bf16.mxu1 %v21725_v48  ;;  %v14269_v0 = vpack.c.bf16 %v11759_v36, %v11758_v54 }
 0xdc5   :  { %14153 = vmatpush1.bf16.msra.mxu0 %v14152_v43  ;;  %v11298_v43 = vld [vmem:[%s21626_s18] sm:$0xff] }
 0xdc6   :  { %14154 = vmatprep.subr.bf16.mxu0 %v21725_v48  ;;  %14252 = vmatpush1.bf16.msra.mxu1 %v14251_v14 }
 0xdc7   :  { %14253 = vmatprep.subr.bf16.mxu1 %v21725_v48 }
 0xdc9   :  { %14156 = vmatpush1.bf16.msra.mxu0 %v14155_v62  ;;  %v14176_v62 = vpack.c.bf16 %v11299_v42, %v11298_v43 }
 0xdca   :  { %14157 = vmatprep.subr.bf16.mxu0 %v21725_v48  ;;  %14255 = vmatpush1.bf16.msra.mxu1 %v14254_v47  ;;  %v14275_v47 = vpack.c.bf16 %v11763_v60, %v11762_v33 }
 0xdcb   :  { %14256 = vmatprep.subr.bf16.mxu1 %v21725_v48 }
 0xdcd   :  { %14159 = vmatpush1.bf16.msra.mxu0 %v14158_v26  ;;  %v11301_v26 = vld [vmem:[%s21626_s18 + $0x18] sm:$0xff] }
 0xdce   :  { %14160 = vmatprep.subr.bf16.mxu0 %v21725_v48  ;;  %14258 = vmatpush1.bf16.msra.mxu1 %v14257_v46  ;;  %v14179_v22 = vpack.c.bf16 %v11301_v26, %v11300_v57  ;;  %v14278_v46 = vpack.c.bf16 %v11765_v29, %v11764_v37  ;;  %v13130_v26 = vld [vmem:[%s21627_s19] ss:$0 sm:$0xff] }
 0xdcf   :  { %14259 = vmatprep.subr.bf16.mxu1 %v21725_v48 }
 0xdd1   :  { %14162 = vmatpush1.bf16.msra.mxu0 %v14161_v27  ;;  %v11303_v27 = vld [vmem:[%s21626_s18 + $0x28] sm:$0xff] }
 0xdd2   :  { %14163 = vmatprep.subr.bf16.mxu0 %v21725_v48  ;;  %14261 = vmatpush1.bf16.msra.mxu1 %v14260_v19  ;;  %v14182_v16 = vpack.c.bf16 %v11303_v27, %v11302_v8  ;;  %v14281_v19 = vpack.c.bf16 %v11767_v53, %v11766_v3  ;;  %v11753_v8 = vstv %s11867_s1 }
 0xdd3   :  { %14262 = vmatprep.subr.bf16.mxu1 %v21725_v48 }
 0xdd5   :  { %14165 = vmatpush1.bf16.msra.mxu0 %v14164_v15  ;;  %v11305_v15 = vld [vmem:[%s21626_s18 + $0x38] sm:$0xff] }
 0xdd6   :  { %14166 = vmatprep.subr.bf16.mxu0 %v21725_v48  ;;  %14264 = vmatpush1.bf16.msra.mxu1 %v14263_v6  ;;  %v14185_v24 = vpack.c.bf16 %v11305_v15, %v11304_v11  ;;  %v11770_v6 = vld [vmem:[%s21628_s20 + $0x70] sm:$0xff] }
 0xdd9   :  { %14168 = vmatpush1.bf16.msra.mxu0 %v14167_v40  ;;  %v14188_v40 = vpack.c.bf16 %v11307_v12, %v11306_v9 }
 0xdda   :  { %14169 = vmatprep.subr.bf16.mxu0 %v21725_v48 }
 0xddd   :  { %14171 = vmatpush1.bf16.msra.mxu0 %v14170_v55  ;;  %v11309_v55 = vld [vmem:[%s21626_s18 + $0x58] sm:$0xff] }
 0xdde   :  { %14172 = vmatprep.subr.bf16.mxu0 %v21725_v48  ;;  %v14191_v44 = vpack.c.bf16 %v11309_v55, %v11308_v2  ;;  %v21907_v55 = vlaneseq }
 0xde1   :  { %14174 = vmatpush1.bf16.msra.mxu0 %v14173_v61  ;;  %v11311_v61 = vld [vmem:[%s21626_s18 + $0x68] sm:$0xff] }
 0xde2   :  { %14175 = vmatprep.subr.bf16.mxu0 %v21725_v48  ;;  %v14194_v49 = vpack.c.bf16 %v11311_v61, %v11310_v41 }
 0xe7b   :  { %v21451_v50 = vpop.f32.mrb[60].mxu0  ;;  %v11640_v56 = vpop.f32.mrb[60].mxu1 }
 0xe7c   :  { %v11295_v39 = vpop.f32.mrb[61].mxu0  ;;  %v11642_v17 = vpop.f32.mrb[61].mxu1 }
 0xe7d   :  { %13129 = vmatprep.mubr.msk.f32.mxu1 %vm10720_vm1, %v11642_v17 }
 0xe7e   :  { %11738 = vmatmul.mubr.f32.vlgmr.msra.gmra.mrb[62].mxu1 %v11640_v56  ;;  %v11771_v56 = vld [vmem:[%s21628_s20 + $0x78] sm:$0xff] }
 0xe87   :  { %v11393_v21 = vpop.f32.mrb[62].mxu0 }
 0xe88   :  { %v11395_v7 = vpop.f32.mrb[63].mxu0 }
 0xe89   :  { %13089 = vmatprep.mubr.msk.f32.mxu0 %vm10720_vm1, %v11395_v7 }
 0xe8a   :  { %11491 = vmatmul.mubr.f32.vlgmr.msra.gmra.mrb[64].mxu0 %v11393_v21 }
 0xe8b   :  { %14177 = vmatpush1.bf16.msra.mxu0 %v14176_v62  ;;  %13090 = vmatprep.mubr.msk.f32.mxu0 %vm10720_vm1, %v11295_v39  ;;  %vm21906_vm1 = vmmov 0   ;;  %v14287_v39 = vpack.c.bf16 %v11771_v56, %v11770_v6 }
 0xe8c   :  { %14178 = vmatprep.subr.bf16.mxu0 %v21725_v48 }
 0xe8f   :  { %14180 = vmatpush1.bf16.msra.mxu0 %v14179_v22 }
 0xe90   :  { %14181 = vmatprep.subr.bf16.mxu0 %v21725_v48 }
 0xe93   :  { %14183 = vmatpush1.bf16.msra.mxu0 %v14182_v16 }
 0xe94   :  { %14184 = vmatprep.subr.bf16.mxu0 %v21725_v48 }
 0xe97   :  { %14186 = vmatpush1.bf16.msra.mxu0 %v14185_v24 }
 0xe98   :  { %14187 = vmatprep.subr.bf16.mxu0 %v21725_v48 }
 0xe9b   :  { %14189 = vmatpush1.bf16.msra.mxu0 %v14188_v40 }
 0xe9c   :  { %14190 = vmatprep.subr.bf16.mxu0 %v21725_v48 }
 0xe9f   :  { %14192 = vmatpush1.bf16.msra.mxu0 %v14191_v44  ;;  %v11850_v44 = vand.u32 127, %v21907_v55 }
 0xea0   :  { %14193 = vmatprep.subr.bf16.mxu0 %v21725_v48 }
 0xea1   :  { %vm11851_vm8 = vcmp.eq.s32.totalorder %v11850_v44, 0 }
 0xea3   :  { %14195 = vmatpush1.bf16.msra.mxu0 %v14194_v49 }
 0xea4   :  { %14196 = vmatprep.subr.bf16.mxu0 %v21725_v48 }
 0xea7   :  { %14198 = vmatpush1.bf16.msra.mxu0 %v14197_v38 }
 0xea8   :  { %14199 = vmatprep.subr.bf16.mxu0 %v21725_v48 }
 0xeab   :  { %14201 = vmatpush1.bf16.msra.mxu0 %v14200_v28 }
 0xeac   :  { %14202 = vmatprep.subr.bf16.mxu0 %v21725_v48 }
 0xeaf   :  { %14204 = vmatpush1.bf16.msra.mxu0 %v14203_v35 }
 0xeb0   :  { %14205 = vmatprep.subr.bf16.mxu0 %v21725_v48 }
 0xeb3   :  { %14207 = vmatpush1.bf16.msra.mxu0 %v14206_v18 }
 0xeb4   :  { %14208 = vmatprep.subr.bf16.mxu0 %v21725_v48 }
 0xeb7   :  { %14210 = vmatpush1.bf16.msra.mxu0 %v14209_v52 }
 0xeb8   :  { %14265 = vmatprep.subr.bf16.mxu0 %v21725_v48 }
 0xeba   :  { %11564 = vmatmul.mubr.f32.vlgmr.msra.gmra.mrb[66].mxu0 %v21451_v50  ;;  %v14284_v50 = vpack.c.bf16 %v11769_v45, %v11768_v25 }
 0xebb   :  { %13600 = vmatprep.mubr.msk.f32.mxu0 %vm21906_vm1, %v21723_v13  ;;  %14267 = vmatpush3.bf16.msra.mxu0 %v14266_v23  ;;  %v11760_v13 = vld [vmem:[%s21628_s20 + $0x20] sm:$0xff] }
 0xebc   :  { %14268 = vmatprep.subr.bf16.mxu0 %v21725_v48  ;;  %v14272_v14 = vpack.c.bf16 %v11761_v34, %v11760_v13 }
 0xebf   :  { %14270 = vmatpush3.bf16.msra.mxu0 %v14269_v0 }
 0xec0   :  { %14271 = vmatprep.subr.bf16.mxu0 %v21725_v48 }
 0xec3   :  { %14273 = vmatpush3.bf16.msra.mxu0 %v14272_v14 }
 0xec4   :  { %14274 = vmatprep.subr.bf16.mxu0 %v21725_v48 }
 0xec7   :  { %14276 = vmatpush3.bf16.msra.mxu0 %v14275_v47 }
 0xec8   :  { %14277 = vmatprep.subr.bf16.mxu0 %v21725_v48 }
 0xecb   :  { %14279 = vmatpush3.bf16.msra.mxu0 %v14278_v46 }
 0xecc   :  { %14280 = vmatprep.subr.bf16.mxu0 %v21725_v48 }
 0xecf   :  { %14282 = vmatpush3.bf16.msra.mxu0 %v14281_v19 }
 0xed0   :  { %14283 = vmatprep.subr.bf16.mxu0 %v21725_v48 }
 0xed3   :  { %14285 = vmatpush3.bf16.msra.mxu0 %v14284_v50 }
 0xed4   :  { %14286 = vmatprep.subr.bf16.mxu0 %v21725_v48  ;;  %v13131_v48 = vld [vmem:[%s21629_s21] ss:$0 sm:$0xff] }
 0xed7   :  { %14288 = vmatpush3.bf16.msra.mxu0 %v14287_v39 }
 0xf51   :  { %v11739_v17 = vpop.f32.mrb[62].mxu1 }
 0xf52   :  { %v11741_v43 = vpop.f32.mrb[63].mxu1 }
 0xf5d   :  { %v11492_v42 = vpop.f32.mrb[64].mxu0 }
 0xf5e   :  { %v11494_v21 = vpop.f32.mrb[65].mxu0 }
 0xf8d   :  { %v11565_v62 = vpop.f32.mrb[66].mxu0 }
 0xf8e   :  { %v11566_v7 = vadd.f32 %v11565_v62, %v11492_v42  ;;  %v11567_v57 = vpop.f32.mrb[67].mxu0 }
 0xf90   :  { %v11743_v22 = vadd.f32 %v11739_v17, %v11566_v7 }
 0xf92   :  { %v11751_v27 = vadd.f32 %v13130_v26, %v11743_v22 }
 0xf94   :  { %v11754_v16 = vmul.f32 %v11753_v8, %v11751_v27  ;;  %vm11752_vm12 = vcmp.gt.f32.partialorder %v11751_v27, 0.0 }
 0xf96   :  { %v11755_v11 = vsel %vm11752_vm12, %v11751_v27, %v11754_v16 }
 0xf97   :  { %13601 = vmatmul.mubr.f32.vlgmr.msra.gmra.mrb[68].mxu0 %v11755_v11 }
0x106a   :  { %v11845_v15 = vpop.f32.mrb[68].mxu0 }
0x106b   :  { %v11846_v24 = vadd.f32 %v13131_v48, %v11845_v15  ;;  %v13602_v9 = vpop.f32.mrb[69].mxu0 }
0x106d   :  { %v13132_v12 = vmul.f32 -1.442695, %v11846_v24 }
0x106f   :  { %15565 = vpow2.f32 %v13132_v12 }
0x1079   :  { %v15566_v40 = vpop.eup %15565 }
0x107a   :  { %v11855_v2 = vadd.f32 1.0, %v15566_v40 }
0x107c   :  { %15567 = vrcp.f32 %v11855_v2 }
0x1086   :  { %v15568_v41 = vpop.eup %15567 }
0x1087   :  { %v11858_v61 = vsel %vm11851_vm8, %v15568_v41, %v11846_v24 }
0x1088   :  { %11859 = vst [vmem:[%s21631_s23] sm:$0x3] %v11858_v61 }
0x1089   :  { %11864 = vsyncpa [#allocation7], 1 }

</bundles_post_ra>
